<compile_context>
chip_gen: v7x
topology: tpu7x:2x2x1
jax: 0.10.0
libtpu: 0.0.40
codegen_flags: <defaults>
</compile_context>

<pallas_src>
import functools

import jax
import jax.numpy as jnp
from jax import lax
from jax.experimental import pallas as pl
from jax.experimental.pallas import tpu as pltpu


def _round_up(x, m):
    return (x + m - 1) // m * m


# -----------------------------------------------------------------------------
# pltpu.roll convention probe.  We need  out[:, q, :] = a[:, q+k, :]  for small
# static k.  jnp.roll expresses that as shift = Q - k; the hardware rotate
# direction is probed once to be safe, with a slice-based fallback if roll
# cannot be lowered at all.
# -----------------------------------------------------------------------------
@functools.lru_cache(maxsize=None)
def _roll_mode():
    def probe_kernel(x_ref, o_ref):
        o_ref[...] = pltpu.roll(x_ref[...], 1, 1)

    try:
        x = lax.broadcasted_iota(jnp.float32, (1, 16, 128), 1)
        y = pl.pallas_call(
            probe_kernel,
            out_shape=jax.ShapeDtypeStruct((1, 16, 128), jnp.float32),
        )(x)
        y = jax.device_get(jax.block_until_ready(y))
        if float(y[0, 1, 0]) == 0.0 and float(y[0, 0, 0]) == 15.0:
            return "jnp"     # out[i] = in[(i - shift) mod N]  (np.roll-like)
        if float(y[0, 0, 0]) == 1.0:
            return "neg"     # out[i] = in[(i + shift) mod N]
    except Exception:
        pass
    return "none"


def _shift_cols(a, k, mode):
    """Return s with s[:, q, :] = a[:, q + k, :] for q < Q - k.

    Columns q >= Q - k of the result are unspecified (callers mask / discard
    them).  Uses an XLU rotate when available (no vld/vst relayout copy)."""
    if k == 0:
        return a
    q = a.shape[1]
    if mode == "jnp":
        return pltpu.roll(a, shift=q - k, axis=1)
    if mode == "neg":
        return pltpu.roll(a, shift=k, axis=1)
    # Fallback: shifted slice + zero tail (one relayout copy, always correct).
    tail = jnp.zeros(a.shape[:1] + (k,) + a.shape[2:], a.dtype)
    return jnp.concatenate([a[:, k:, :], tail], axis=1)


def _conv3x3(src, w_ref, b_row, roll_mode):
    """3x3 conv of row-haloed `src` (R+2, Q, Cp) -> (R, Q, Cp) float32.

    Only columns q <= Q-3 of the result are valid (the last two wrap); the
    callers mask / slice them away.  `w_ref` holds (3, 3*Cp, Cp) laid out as
    [kw, kh*Cp + c_in, c_out]; `b_row` is (1, Cp) f32 bias.
    """
    rp2, q, c = src.shape
    r = rp2 - 2
    # kh-fused LHS: lane-dim concat of the three row-shifted views (cheap,
    # tile-aligned), then a layout-preserving collapse to 2-D (q % 16 == 0).
    lhs = jnp.concatenate([src[0:r], src[1:r + 1], src[2:r + 2]], axis=-1)
    lhs2d = lhs.reshape(r * q, 3 * c)
    out = None
    for kw in range(3):
        acc = jnp.dot(lhs2d, w_ref[kw],
                      preferred_element_type=jnp.float32).reshape(r, q, c)
        acc = _shift_cols(acc, kw, roll_mode)     # XLU rotate, not vld/vst
        out = acc if out is None else out + acc
    return out + b_row


def _make_kernel(TH, H, W, Qp, Cp, roll_mode, out_dtype):
    def kernel(x_hbm, w1_ref, b1_ref, w2_ref, b2_ref, o_ref, x_buf, dma_sem):
        # x_hbm : (B, Hp+4, Qp, Cp) bf16, left in HBM (memory_space=pl.ANY)
        # w*_ref: (3, 3*Cp, Cp) bf16;  b*_ref: (1, Cp) f32
        # o_ref : (1, TH, W, Cp) out_dtype
        # x_buf : (TH+4, Qp, Cp) bf16 VMEM scratch
        b = pl.program_id(0)
        t = pl.program_id(1)

        # Fetch the (TH+4)-row haloed window straight from HBM -- no
        # wrapper-side window replication / concatenate.
        copy = pltpu.make_async_copy(
            x_hbm.at[b, pl.ds(t * TH, TH + 4)], x_buf, dma_sem)
        copy.start()
        copy.wait()
        # TODO(synk): a chained double-buffered prefetch of the next window
        # would hide this DMA but conflicts with megacore grid sharding.

        x = x_buf[...]                         # (TH+4, Qp, Cp) bf16
        xr = jnp.maximum(x, 0)                 # pre-activation ReLU

        # ---- conv1 over the extended window -> intermediate with 1-row halo
        mid = _conv3x3(xr, w1_ref, b1_ref[...], roll_mode)    # (TH+2, Qp, Cp)
        mid = jnp.maximum(mid, 0.0).astype(jnp.bfloat16)

        # conv2's zero padding: zero everything outside the real image
        # (also kills the rotate-wrapped junk columns).  Select runs in bf16.
        row_g = lax.broadcasted_iota(jnp.int32, (TH + 2, Qp, Cp), 0) + (t * TH - 1)
        col = lax.broadcasted_iota(jnp.int32, (TH + 2, Qp, Cp), 1)
        valid = (row_g >= 0) & (row_g < H) & (col >= 1) & (col <= W)
        mid = jnp.where(valid, mid, jnp.zeros_like(mid))

        # ---- conv2
        out = _conv3x3(mid, w2_ref, b2_ref[...], roll_mode)   # (TH, Qp, Cp)

        # ---- residual add with the original (un-activated) input tile
        res = x[2:TH + 2, 2:W + 2, :]
        o_ref[0] = (out[:, :W, :] + res).astype(out_dtype)

    return kernel


def _vmem_capacity_bytes():
    try:
        return int(pltpu.get_tpu_info().vmem_capacity_bytes)
    except Exception:
        return 64 * 1024 * 1024          # conservative (v7x per-core VMEM)


def preact_residual_conv_unit(x_nchw, w1, b1, w2, b2, *, tile_h=None,
                              out_dtype=jnp.float32):
    """Fused PreActResidualConvUnit forward (bn=False).

    x_nchw : (B, C, H, W) input.
    w1, w2 : (3, 3, C, C) HWIO weights (PyTorch OIHW -> .transpose(2, 3, 1, 0)).
    b1, b2 : (C,) biases.
    Returns (B, C, H, W) in `out_dtype` (default f32, matching the module).
    """
    B, C, H, W = x_nchw.shape
    Cp = _round_up(C, 128)     # lane-dense channels, MXU-friendly K/N
    Qp = _round_up(W + 4, 16)  # working width: multiple of the bf16 sublane
                               # tile so (R,Qp,C)<->(R*Qp,C) collapses are free

    vmem_cap = _vmem_capacity_bytes()
    roll_mode = _roll_mode()

    # ---- tile height against the real VMEM working set ----------------------
    if tile_h is None:
        # conservative per-produced-row live bytes: bf16 window + 3*Cp bf16
        # LHS + f32 accumulators + bf16 mid + int32 masks + double-buffered out
        bytes_per_row = 56 * Qp * Cp
        fixed = 72 * Cp * Cp + 72 * Qp * Cp   # double-buffered weights + halo rows
        budget = int(0.35 * vmem_cap)
        tile_h = max(1, min(H, (budget - fixed) // bytes_per_row))
        # keep >= 2 grid steps so both v7x TensorCores get work
        if B == 1 and tile_h >= H and H > 1:
            tile_h = -(-H // 2)
    TH = max(1, min(int(tile_h), H))
    nT = -(-H // TH)
    Hp = nT * TH

    # ---- operand preparation (bf16 activations/weights, f32 accumulation) ---
    x_nhwc = jnp.transpose(x_nchw, (0, 2, 3, 1)).astype(jnp.bfloat16)
    # 2-px zero border (conv1 halo around conv2's halo), rows padded to Hp,
    # width padded to Qp, channels padded to Cp.
    xpad = jnp.pad(x_nhwc,
                   ((0, 0), (2, 2 + Hp - H), (2, Qp - W - 2), (0, Cp - C)))
    # TODO(synk): an NHWC-native (and bf16-output) entry point would skip the
    # two NCHW<->NHWC transposes when neighboring DPT ops allow it.

    def prep_w(w):   # (3,3,C,C) HWIO -> (kw, kh*Cp + c_in, c_out) = (3, 3Cp, Cp)
        wp = jnp.pad(w.astype(jnp.bfloat16),
                     ((0, 0), (0, 0), (0, Cp - C), (0, Cp - C)))
        return jnp.transpose(wp, (1, 0, 2, 3)).reshape(3, 3 * Cp, Cp)

    def prep_b(b):
        return jnp.pad(b.astype(jnp.float32), (0, Cp - C)).reshape(1, Cp)

    kernel = _make_kernel(TH, H, W, Qp, Cp, roll_mode, out_dtype)

    vmem_limit = max(32 * 1024 * 1024,
                     min(int(0.75 * vmem_cap), 96 * 1024 * 1024))

    out = pl.pallas_call(
        kernel,
        out_shape=jax.ShapeDtypeStruct((B, Hp, W, Cp), out_dtype),
        grid_spec=pltpu.PrefetchScalarGridSpec(
            num_scalar_prefetch=0,
            grid=(B, nT),
            in_specs=[
                pl.BlockSpec(memory_space=pl.ANY),             # activation (HBM)
                pl.BlockSpec((3, 3 * Cp, Cp), lambda b, t: (0, 0, 0)),
                pl.BlockSpec((1, Cp), lambda b, t: (0, 0)),
                pl.BlockSpec((3, 3 * Cp, Cp), lambda b, t: (0, 0, 0)),
                pl.BlockSpec((1, Cp), lambda b, t: (0, 0)),
            ],
            out_specs=pl.BlockSpec((1, TH, W, Cp), lambda b, t: (b, t, 0, 0)),
            scratch_shapes=[
                pltpu.VMEM((TH + 4, Qp, Cp), jnp.bfloat16),
                pltpu.SemaphoreType.DMA(()),
            ],
        ),
        compiler_params=pltpu.CompilerParams(
            dimension_semantics=("parallel", "parallel"),
            vmem_limit_bytes=vmem_limit),
    )(xpad, prep_w(w1), prep_b(b1), prep_w(w2), prep_b(b2))

    out = out[:, :H, :, :C]
    return jnp.transpose(out, (0, 3, 1, 2))       # back to NCHW


def _reference(x_nchw, w1, b1, w2, b2):
    """Pure-JAX f32 reference (matches the PyTorch module with bn=False)."""
    def conv(x, w, b):
        y = lax.conv_general_dilated(
            x, w, window_strides=(1, 1), padding=((1, 1), (1, 1)),
            dimension_numbers=("NCHW", "HWIO", "NCHW"))
        return y + b.reshape(1, -1, 1, 1)
    x0 = x_nchw
    x = jnp.maximum(x0, 0.0)
    x = conv(x, w1, b1)
    x = jnp.maximum(x, 0.0)
    x = conv(x, w2, b2)
    return x + x0


if __name__ == "__main__":
    B, C, H, W = 2, 8, 16, 16
    key = jax.random.PRNGKey(0)
    k_x, k_w1, k_b1, k_w2, k_b2 = jax.random.split(key, 5)

    x = jax.random.normal(k_x, (B, C, H, W), dtype=jnp.float32)
    # Deterministic synthetic params (Conv2d(C, C, 3) -> HWIO (3,3,C,C) + bias)
    fan_in = C * 3 * 3
    bound = 1.0 / (fan_in ** 0.5)
    w1 = jax.random.uniform(k_w1, (3, 3, C, C), jnp.float32, -bound, bound)
    b1 = jax.random.uniform(k_b1, (C,), jnp.float32, -bound, bound)
    w2 = jax.random.uniform(k_w2, (3, 3, C, C), jnp.float32, -bound, bound)
    b2 = jax.random.uniform(k_b2, (C,), jnp.float32, -bound, bound)

    out = preact_residual_conv_unit(x, w1, b1, w2, b2)
    out = jax.block_until_ready(out)

    # Reference computed on the same bf16-rounded activations/weights the
    # kernel consumes (f32 conv math); the tolerance covers the extra bf16
    # rounding of the conv1->conv2 intermediate inside the kernel.
    rd = lambda a: a.astype(jnp.bfloat16).astype(jnp.float32)
    ref = _reference(rd(x), rd(w1), b1, rd(w2), b2)

    assert out.shape == (B, C, H, W)
    err = float(jnp.max(jnp.abs(out - ref)))
    assert jnp.allclose(out, ref, atol=2e-2, rtol=2e-2), f"max err {err}"

    print("KERNEL_OK")
</pallas_src>

<mosaic_0001>
module attributes {stable_mosaic.version = 11 : i64} {
  func.func @probe_kernel(%arg0: memref<1x16x128xf32, #tpu.memory_space<vmem>>, %arg1: memref<1x16x128xf32, #tpu.memory_space<vmem>>) attributes {dimension_semantics = [], scalar_prefetch = 0 : i64, scratch_operands = 0 : i64, tpu.core_type = #tpu.core_type<tc>} {
    %c0 = arith.constant 0 : index
    %c0_0 = arith.constant 0 : index
    %c0_1 = arith.constant 0 : index
    %0 = vector.load %arg0[%c0, %c0_0, %c0_1] : memref<1x16x128xf32, #tpu.memory_space<vmem>>, vector<1x16x128xf32>
    %c1_i32 = arith.constant 1 : i32
    %1 = tpu.dynamic_rotate %0 by %c1_i32 dim 1 : vector<1x16x128xf32>, i32 -> vector<1x16x128xf32>
    %c0_2 = arith.constant 0 : index
    %c0_3 = arith.constant 0 : index
    %c0_4 = arith.constant 0 : index
    %2 = vector.load %arg1[%c0_2, %c0_3, %c0_4] : memref<1x16x128xf32, #tpu.memory_space<vmem>>, vector<1x16x128xf32>
    tpu.vector_store %arg1[%c0_2, %c0_3, %c0_4], %1 {strides = array<i32>} : memref<1x16x128xf32, #tpu.memory_space<vmem>>, vector<1x16x128xf32>,
    return
  }
}

module attributes {stable_mosaic.version = 11 : i64} {
  func.func @kernel(%arg0: i32, %arg1: i32, %arg2: memref<2x20x32x128xbf16, #tpu.memory_space<any>>, %arg3: memref<3x384x128xbf16, #tpu.memory_space<vmem>>, %arg4: memref<1x128xf32, #tpu.memory_space<vmem>>, %arg5: memref<3x384x128xbf16, #tpu.memory_space<vmem>>, %arg6: memref<1x128xf32, #tpu.memory_space<vmem>>, %arg7: memref<1x16x16x128xf32, #tpu.memory_space<vmem>>, %arg8: memref<20x32x128xbf16, #tpu.memory_space<vmem>>, %arg9: memref<!tpu.dma_semaphore, #tpu.memory_space<semaphore_mem>>) attributes {dimension_semantics = [#tpu.dimension_semantics<parallel>, #tpu.dimension_semantics<parallel>], iteration_bounds = array<i64: 2, 1>, scalar_prefetch = 0 : i64, scratch_operands = 2 : i64, tpu.core_type = #tpu.core_type<tc>, window_params = [{}, {pipeline_mode = #tpu.pipeline_mode<synchronous>, transform_indices = @transform_1, window_bounds = array<i64: 3, 384, 128>}, {pipeline_mode = #tpu.pipeline_mode<synchronous>, transform_indices = @transform_2, window_bounds = array<i64: 1, 128>}, {pipeline_mode = #tpu.pipeline_mode<synchronous>, transform_indices = @transform_3, window_bounds = array<i64: 3, 384, 128>}, {pipeline_mode = #tpu.pipeline_mode<synchronous>, transform_indices = @transform_4, window_bounds = array<i64: 1, 128>}, {transform_indices = @transform_5, window_bounds = array<i64: 1, 16, 16, 128>}]} {
    %c16_i32 = arith.constant 16 : i32
    %0 = arith.muli %arg1, %c16_i32 : i32
    %c0_i32 = arith.constant 0 : i32
    %c0_i32_0 = arith.constant 0 : i32
    %1 = tpu.memref_slice %arg2[%arg0, %0, %c0_i32, %c0_i32_0] : memref<2x20x32x128xbf16, #tpu.memory_space<any>> -> memref<1x20x32x128xbf16, #tpu.memory_space<any>>
    %2 = tpu.memref_squeeze %1 : memref<1x20x32x128xbf16, #tpu.memory_space<any>> -> memref<20x32x128xbf16, #tpu.memory_space<any>>
    tpu.enqueue_dma source(%2 : memref<20x32x128xbf16, #tpu.memory_space<any>>) target(%arg8 : memref<20x32x128xbf16, #tpu.memory_space<vmem>>) target_semaphore(%arg9 : memref<!tpu.dma_semaphore, #tpu.memory_space<semaphore_mem>>)
    %c0_i32_1 = arith.constant 0 : i32
    %c0_i32_2 = arith.constant 0 : i32
    %3 = tpu.memref_slice %arg2[%arg0, %0, %c0_i32_1, %c0_i32_2] : memref<2x20x32x128xbf16, #tpu.memory_space<any>> -> memref<1x20x32x128xbf16, #tpu.memory_space<any>>
    %4 = tpu.memref_squeeze %3 : memref<1x20x32x128xbf16, #tpu.memory_space<any>> -> memref<20x32x128xbf16, #tpu.memory_space<any>>
    tpu.wait_dma2 semaphore(%arg9 : memref<!tpu.dma_semaphore, #tpu.memory_space<semaphore_mem>>) src(%4 : memref<20x32x128xbf16, #tpu.memory_space<any>>) dst(%arg8 : memref<20x32x128xbf16, #tpu.memory_space<vmem>>)
    %c0 = arith.constant 0 : index
    %c0_3 = arith.constant 0 : index
    %c0_4 = arith.constant 0 : index
    %5 = vector.load %arg8[%c0, %c0_3, %c0_4] : memref<20x32x128xbf16, #tpu.memory_space<vmem>>, vector<20x32x128xbf16>
    %cst = arith.constant 0.000000e+00 : bf16
    %6 = vector.broadcast %cst : bf16 to vector<20x32x128xbf16>
    %7 = arith.maximumf %5, %6 : vector<20x32x128xbf16>
    %c0_5 = arith.constant 0 : index
    %c0_6 = arith.constant 0 : index
    %8 = vector.load %arg4[%c0_5, %c0_6] : memref<1x128xf32, #tpu.memory_space<vmem>>, vector<1x128xf32>
    %9 = vector.extract_strided_slice %7 {offsets = [0, 0, 0], sizes = [18, 32, 128], strides = [1, 1, 1]} : vector<20x32x128xbf16> to vector<18x32x128xbf16>
    %10 = vector.extract_strided_slice %7 {offsets = [1, 0, 0], sizes = [18, 32, 128], strides = [1, 1, 1]} : vector<20x32x128xbf16> to vector<18x32x128xbf16>
    %11 = vector.extract_strided_slice %7 {offsets = [2, 0, 0], sizes = [18, 32, 128], strides = [1, 1, 1]} : vector<20x32x128xbf16> to vector<18x32x128xbf16>
    %12 = tpu.concatenate %9, %10, %11 in 2 : vector<18x32x128xbf16>, vector<18x32x128xbf16>, vector<18x32x128xbf16> -> vector<18x32x384xbf16>
    %13 = vector.shape_cast %12 : vector<18x32x384xbf16> to vector<576x384xbf16>
    %c0_7 = arith.constant 0 : index
    %c0_8 = arith.constant 0 : index
    %c0_9 = arith.constant 0 : index
    %14 = vector.load %arg3[%c0_7, %c0_8, %c0_9] : memref<3x384x128xbf16, #tpu.memory_space<vmem>>, vector<1x384x128xbf16>
    %15 = vector.shape_cast %14 : vector<1x384x128xbf16> to vector<384x128xbf16>
    %cst_10 = arith.constant dense<0.000000e+00> : vector<576x128xf32>
    %16 = tpu.matmul %13, %15, %cst_10 {dimension_numbers = #tpu.dot_dimension_numbers<[1], [0], [0], [1], [0, 0, 1, 1], [], []>} : vector<576x384xbf16>, vector<384x128xbf16>, vector<576x128xf32> -> vector<576x128xf32>
    %17 = vector.shape_cast %16 : vector<576x128xf32> to vector<18x32x128xf32>
    %c1 = arith.constant 1 : index
    %c0_11 = arith.constant 0 : index
    %c0_12 = arith.constant 0 : index
    %18 = vector.load %arg3[%c1, %c0_11, %c0_12] : memref<3x384x128xbf16, #tpu.memory_space<vmem>>, vector<1x384x128xbf16>
    %19 = vector.shape_cast %18 : vector<1x384x128xbf16> to vector<384x128xbf16>
    %cst_13 = arith.constant dense<0.000000e+00> : vector<576x128xf32>
    %20 = tpu.matmul %13, %19, %cst_13 {dimension_numbers = #tpu.dot_dimension_numbers<[1], [0], [0], [1], [0, 0, 1, 1], [], []>} : vector<576x384xbf16>, vector<384x128xbf16>, vector<576x128xf32> -> vector<576x128xf32>
    %21 = vector.shape_cast %20 : vector<576x128xf32> to vector<18x32x128xf32>
    %cst_14 = arith.constant 0.000000e+00 : f32
    %22 = vector.broadcast %cst_14 : f32 to vector<18x1x128xf32>
    %23 = vector.extract_strided_slice %21 {offsets = [0, 1, 0], sizes = [18, 31, 128], strides = [1, 1, 1]} : vector<18x32x128xf32> to vector<18x31x128xf32>
    %24 = tpu.concatenate %23, %22 in 1 : vector<18x31x128xf32>, vector<18x1x128xf32> -> vector<18x32x128xf32>
    %25 = arith.addf %17, %24 : vector<18x32x128xf32>
    %c2 = arith.constant 2 : index
    %c0_15 = arith.constant 0 : index
    %c0_16 = arith.constant 0 : index
    %26 = vector.load %arg3[%c2, %c0_15, %c0_16] : memref<3x384x128xbf16, #tpu.memory_space<vmem>>, vector<1x384x128xbf16>
    %27 = vector.shape_cast %26 : vector<1x384x128xbf16> to vector<384x128xbf16>
    %cst_17 = arith.constant dense<0.000000e+00> : vector<576x128xf32>
    %28 = tpu.matmul %13, %27, %cst_17 {dimension_numbers = #tpu.dot_dimension_numbers<[1], [0], [0], [1], [0, 0, 1, 1], [], []>} : vector<576x384xbf16>, vector<384x128xbf16>, vector<576x128xf32> -> vector<576x128xf32>
    %29 = vector.shape_cast %28 : vector<576x128xf32> to vector<18x32x128xf32>
    %cst_18 = arith.constant 0.000000e+00 : f32
    %30 = vector.broadcast %cst_18 : f32 to vector<18x2x128xf32>
    %31 = vector.extract_strided_slice %29 {offsets = [0, 2, 0], sizes = [18, 30, 128], strides = [1, 1, 1]} : vector<18x32x128xf32> to vector<18x30x128xf32>
    %32 = tpu.concatenate %31, %30 in 1 : vector<18x30x128xf32>, vector<18x2x128xf32> -> vector<18x32x128xf32>
    %33 = arith.addf %25, %32 : vector<18x32x128xf32>
    %34 = vector.shape_cast %8 : vector<1x128xf32> to vector<1x1x128xf32>
    %35 = vector.broadcast %34 : vector<1x1x128xf32> to vector<18x32x128xf32>
    %36 = arith.addf %33, %35 : vector<18x32x128xf32>
    %cst_19 = arith.constant 0.000000e+00 : f32
    %37 = vector.broadcast %cst_19 : f32 to vector<18x32x128xf32>
    %38 = arith.maximumf %36, %37 : vector<18x32x128xf32>
    %39 = arith.truncf %38 : vector<18x32x128xf32> to vector<18x32x128xbf16>
    %40 = tpu.iota {dimensions = array<i32: 0>} : vector<18x32x128xi32>
    %c16_i32_20 = arith.constant 16 : i32
    %41 = arith.muli %arg1, %c16_i32_20 : i32
    %c1_i32 = arith.constant 1 : i32
    %42 = arith.subi %41, %c1_i32 : i32
    %43 = vector.broadcast %42 : i32 to vector<18x32x128xi32>
    %44 = arith.addi %40, %43 : vector<18x32x128xi32>
    %45 = tpu.iota {dimensions = array<i32: 1>} : vector<18x32x128xi32>
    %c0_i32_21 = arith.constant 0 : i32
    %46 = vector.broadcast %c0_i32_21 : i32 to vector<18x32x128xi32>
    %47 = arith.cmpi sge, %44, %46 : vector<18x32x128xi32>
    %c16_i32_22 = arith.constant 16 : i32
    %48 = vector.broadcast %c16_i32_22 : i32 to vector<18x32x128xi32>
    %49 = arith.cmpi slt, %44, %48 : vector<18x32x128xi32>
    %50 = arith.andi %47, %49 : vector<18x32x128xi1>
    %c1_i32_23 = arith.constant 1 : i32
    %51 = vector.broadcast %c1_i32_23 : i32 to vector<18x32x128xi32>
    %52 = arith.cmpi sge, %45, %51 : vector<18x32x128xi32>
    %53 = arith.andi %50, %52 : vector<18x32x128xi1>
    %c16_i32_24 = arith.constant 16 : i32
    %54 = vector.broadcast %c16_i32_24 : i32 to vector<18x32x128xi32>
    %55 = arith.cmpi sle, %45, %54 : vector<18x32x128xi32>
    %56 = arith.andi %53, %55 : vector<18x32x128xi1>
    %cst_25 = arith.constant 0.000000e+00 : bf16
    %57 = vector.broadcast %cst_25 : bf16 to vector<18x32x128xbf16>
    %58 = arith.select %56, %39, %57 : vector<18x32x128xi1>, vector<18x32x128xbf16>
    %c0_26 = arith.constant 0 : index
    %c0_27 = arith.constant 0 : index
    %59 = vector.load %arg6[%c0_26, %c0_27] : memref<1x128xf32, #tpu.memory_space<vmem>>, vector<1x128xf32>
    %60 = vector.extract_strided_slice %58 {offsets = [0, 0, 0], sizes = [16, 32, 128], strides = [1, 1, 1]} : vector<18x32x128xbf16> to vector<16x32x128xbf16>
    %61 = vector.extract_strided_slice %58 {offsets = [1, 0, 0], sizes = [16, 32, 128], strides = [1, 1, 1]} : vector<18x32x128xbf16> to vector<16x32x128xbf16>
    %62 = vector.extract_strided_slice %58 {offsets = [2, 0, 0], sizes = [16, 32, 128], strides = [1, 1, 1]} : vector<18x32x128xbf16> to vector<16x32x128xbf16>
    %63 = tpu.concatenate %60, %61, %62 in 2 : vector<16x32x128xbf16>, vector<16x32x128xbf16>, vector<16x32x128xbf16> -> vector<16x32x384xbf16>
    %64 = vector.shape_cast %63 : vector<16x32x384xbf16> to vector<512x384xbf16>
    %c0_28 = arith.constant 0 : index
    %c0_29 = arith.constant 0 : index
    %c0_30 = arith.constant 0 : index
    %65 = vector.load %arg5[%c0_28, %c0_29, %c0_30] : memref<3x384x128xbf16, #tpu.memory_space<vmem>>, vector<1x384x128xbf16>
    %66 = vector.shape_cast %65 : vector<1x384x128xbf16> to vector<384x128xbf16>
    %cst_31 = arith.constant dense<0.000000e+00> : vector<512x128xf32>
    %67 = tpu.matmul %64, %66, %cst_31 {dimension_numbers = #tpu.dot_dimension_numbers<[1], [0], [0], [1], [0, 0, 1, 1], [], []>} : vector<512x384xbf16>, vector<384x128xbf16>, vector<512x128xf32> -> vector<512x128xf32>
    %68 = vector.shape_cast %67 : vector<512x128xf32> to vector<16x32x128xf32>
    %c1_32 = arith.constant 1 : index
    %c0_33 = arith.constant 0 : index
    %c0_34 = arith.constant 0 : index
    %69 = vector.load %arg5[%c1_32, %c0_33, %c0_34] : memref<3x384x128xbf16, #tpu.memory_space<vmem>>, vector<1x384x128xbf16>
    %70 = vector.shape_cast %69 : vector<1x384x128xbf16> to vector<384x128xbf16>
    %cst_35 = arith.constant dense<0.000000e+00> : vector<512x128xf32>
    %71 = tpu.matmul %64, %70, %cst_35 {dimension_numbers = #tpu.dot_dimension_numbers<[1], [0], [0], [1], [0, 0, 1, 1], [], []>} : vector<512x384xbf16>, vector<384x128xbf16>, vector<512x128xf32> -> vector<512x128xf32>
    %72 = vector.shape_cast %71 : vector<512x128xf32> to vector<16x32x128xf32>
    %cst_36 = arith.constant 0.000000e+00 : f32
    %73 = vector.broadcast %cst_36 : f32 to vector<16x1x128xf32>
    %74 = vector.extract_strided_slice %72 {offsets = [0, 1, 0], sizes = [16, 31, 128], strides = [1, 1, 1]} : vector<16x32x128xf32> to vector<16x31x128xf32>
    %75 = tpu.concatenate %74, %73 in 1 : vector<16x31x128xf32>, vector<16x1x128xf32> -> vector<16x32x128xf32>
    %76 = arith.addf %68, %75 : vector<16x32x128xf32>
    %c2_37 = arith.constant 2 : index
    %c0_38 = arith.constant 0 : index
    %c0_39 = arith.constant 0 : index
    %77 = vector.load %arg5[%c2_37, %c0_38, %c0_39] : memref<3x384x128xbf16, #tpu.memory_space<vmem>>, vector<1x384x128xbf16>
    %78 = vector.shape_cast %77 : vector<1x384x128xbf16> to vector<384x128xbf16>
    %cst_40 = arith.constant dense<0.000000e+00> : vector<512x128xf32>
    %79 = tpu.matmul %64, %78, %cst_40 {dimension_numbers = #tpu.dot_dimension_numbers<[1], [0], [0], [1], [0, 0, 1, 1], [], []>} : vector<512x384xbf16>, vector<384x128xbf16>, vector<512x128xf32> -> vector<512x128xf32>
    %80 = vector.shape_cast %79 : vector<512x128xf32> to vector<16x32x128xf32>
    %cst_41 = arith.constant 0.000000e+00 : f32
    %81 = vector.broadcast %cst_41 : f32 to vector<16x2x128xf32>
    %82 = vector.extract_strided_slice %80 {offsets = [0, 2, 0], sizes = [16, 30, 128], strides = [1, 1, 1]} : vector<16x32x128xf32> to vector<16x30x128xf32>
    %83 = tpu.concatenate %82, %81 in 1 : vector<16x30x128xf32>, vector<16x2x128xf32> -> vector<16x32x128xf32>
    %84 = arith.addf %76, %83 : vector<16x32x128xf32>
    %85 = vector.shape_cast %59 : vector<1x128xf32> to vector<1x1x128xf32>
    %86 = vector.broadcast %85 : vector<1x1x128xf32> to vector<16x32x128xf32>
    %87 = arith.addf %84, %86 : vector<16x32x128xf32>
    %88 = vector.extract_strided_slice %5 {offsets = [2, 2, 0], sizes = [16, 16, 128], strides = [1, 1, 1]} : vector<20x32x128xbf16> to vector<16x16x128xbf16>
    %89 = vector.extract_strided_slice %87 {offsets = [0, 0, 0], sizes = [16, 16, 128], strides = [1, 1, 1]} : vector<16x32x128xf32> to vector<16x16x128xf32>
    %90 = arith.extf %88 : vector<16x16x128xbf16> to vector<16x16x128xf32>
    %91 = arith.addf %89, %90 : vector<16x16x128xf32>
    %c0_42 = arith.constant 0 : index
    %c0_43 = arith.constant 0 : index
    %c0_44 = arith.constant 0 : index
    %c0_45 = arith.constant 0 : index
    %92 = vector.load %arg7[%c0_42, %c0_43, %c0_44, %c0_45] : memref<1x16x16x128xf32, #tpu.memory_space<vmem>>, vector<1x16x16x128xf32>
    %93 = vector.shape_cast %92 : vector<1x16x16x128xf32> to vector<16x16x128xf32>
    %94 = vector.shape_cast %91 : vector<16x16x128xf32> to vector<1x16x16x128xf32>
    tpu.vector_store %arg7[%c0_42, %c0_43, %c0_44, %c0_45], %94 {strides = array<i32>} : memref<1x16x16x128xf32, #tpu.memory_space<vmem>>, vector<1x16x16x128xf32>,
    return
  }
  func.func @transform_1(%arg0: i32, %arg1: i32) -> (i32, i32, i32) {
    %c0_i32 = arith.constant 0 : i32
    %c0_i32_0 = arith.constant 0 : i32
    %c0_i32_1 = arith.constant 0 : i32
    %c0_i32_2 = arith.constant 0 : i32
    return %c0_i32, %c0_i32_0, %c0_i32_1 : i32, i32, i32
  }
  func.func @transform_2(%arg0: i32, %arg1: i32) -> (i32, i32) {
    %c0_i32 = arith.constant 0 : i32
    %c0_i32_0 = arith.constant 0 : i32
    %c0_i32_1 = arith.constant 0 : i32
    return %c0_i32, %c0_i32_0 : i32, i32
  }
  func.func @transform_3(%arg0: i32, %arg1: i32) -> (i32, i32, i32) {
    %c0_i32 = arith.constant 0 : i32
    %c0_i32_0 = arith.constant 0 : i32
    %c0_i32_1 = arith.constant 0 : i32
    %c0_i32_2 = arith.constant 0 : i32
    return %c0_i32, %c0_i32_0, %c0_i32_1 : i32, i32, i32
  }
  func.func @transform_4(%arg0: i32, %arg1: i32) -> (i32, i32) {
    %c0_i32 = arith.constant 0 : i32
    %c0_i32_0 = arith.constant 0 : i32
    %c0_i32_1 = arith.constant 0 : i32
    return %c0_i32, %c0_i32_0 : i32, i32
  }
  func.func @transform_5(%arg0: i32, %arg1: i32) -> (i32, i32, i32, i32) {
    %c0_i32 = arith.constant 0 : i32
    %c0_i32_0 = arith.constant 0 : i32
    %c0_i32_1 = arith.constant 0 : i32
    return %arg0, %arg1, %c0_i32, %c0_i32_0 : i32, i32, i32, i32
  }
}

</mosaic_0001>

<bundles_post_ra>
// kernel: tpu_custom_call.1
= control target key start
LH: loop header
LB: loop body
LE: loop exit
PB: predicated region body
PF: predicated region fallthrough
CT: control target
= control target key end

     0   :  { %6 = vsyncpa [#allocation3], 0  ;;  %s147_s0 = inlined_call_operand.hbm [shape: f32[1,16,128], index: 0, kind: input, shape index: {}]   ;;  %s148_s1 = inlined_call_operand.hbm [shape: f32[1,16,128], index: 1, kind: output, shape index: {}]  }
   0x1   :  { %7 = vsyncpa [#allocation4], 0  ;;  %s103_s6 = smov [#allocation2]   ;;  %s55_s10 = scalar_lea.hbm %s147_s0, 256 }
   0x2   :  { %s13_s7 = sshll.u32 %s103_s6, 4  ;;  %p56_p0 = scmp.ne.s32.totalorder %s147_s0, %s55_s10  ;;  %s14_s7 = int_to_ptr.vmem [resolvable:$true] %s13_s7 }
   0x3   :  { %p59_p1 = scmp.lt.u32.totalorder %s55_s10, %s147_s0 }
   0x5   :  { %p61_p2 = pnand %p59_p1, %p56_p0 }
   0x7   :  { %64 = shalt.err (!%p61_p2)
}
   0x8   :  { %s65_s15 = scalar_lea.vmem %s14_s7, 256  ;;  %p70_p4 = scmp.lt.s32.totalorder %s14_s7, %s14_s7 }
   0x9   :  { %p66_p3 = scmp.ne.s32.totalorder %s14_s7, %s65_s15  ;;  %p71_p5 = scmp.lt.s32.totalorder %s65_s15, %s65_s15 }
   0xb   :  { %p72_p6 = por %p71_p5, %p70_p4 }
   0xd   :  { %p73_p7 = pnand %p72_p6, %p66_p3 }
   0xf   :  { %76 = shalt.err (!%p73_p7)
}
  0x10   :  { %s104_s16 = smov 128   ;;  %s105_s17 = smov 8  }
  0x11   :  { %19 = dma.hbm_to_vmem [thread:$0]  %s147_s0, 256, %s14_s7, [#allocation3], %s104_s16, %s104_s16, %s105_s17  }
  0x12   :  { %99 = dma.done.wait [#allocation3], 256  }
  0x13   :  { %100 = vsyncadd [#allocation3], 4294967040  ;;  %v27_v0 = vlaneseq  ;;  %s106_s20 = smov [#allocation5]   ;;  %v23_v2 = vld [vmem:[#allocation2] sm:$0xff]  ;;  %v24_v3 = vld [vmem:[#allocation2 + $0x8] sm:$0xff] }
  0x14   :  { %s39_s21 = sshll.u32 %s106_s20, 4  ;;  %v25_v4 = vrot.slane %v23_v2, 7  ;;  %v26_v5 = vrot.slane %v24_v3, 7  ;;  %s40_s21 = int_to_ptr.vmem [resolvable:$true] %s39_s21 }
  0x15   :  { %v28_v1 = vshrl.u32 %v27_v0, 7  ;;  %s77_s22 = scalar_lea.vmem %s40_s21, 256  ;;  %p82_p9 = scmp.lt.s32.totalorder %s40_s21, %s40_s21 }
  0x16   :  { %p78_p8 = scmp.ne.s32.totalorder %s40_s21, %s77_s22  ;;  %p83_p10 = scmp.lt.s32.totalorder %s77_s22, %s77_s22 }
  0x17   :  { %vm29_vm0 = vcmp.lt.s32.totalorder %v28_v1, 1 }
  0x18   :  { %v31_v6 = vsel %vm29_vm0, %v26_v5, %v25_v4  ;;  %v30_v7 = vsel %vm29_vm0, %v25_v4, %v26_v5  ;;  %p84_p11 = por %p83_p10, %p82_p9 }
  0x19   :  { %32 = vst [vmem:[#allocation5] sm:$0xff] %v31_v6  ;;  %33 = vst [vmem:[#allocation5 + $0x8] sm:$0xff] %v30_v7 }
  0x1a   :  { %p85_p12 = pnand %p84_p11, %p78_p8 }
  0x1c   :  { %88 = shalt.err (!%p85_p12)
}
  0x1d   :  { %s89_s24 = scalar_lea.hbm %s148_s1, 256 }
  0x1e   :  { %p90_p13 = scmp.ne.s32.totalorder %s148_s1, %s89_s24  ;;  %p93_p0 = scmp.lt.u32.totalorder %s89_s24, %s148_s1 }
  0x20   :  { %p95_p1 = pnand %p93_p0, %p90_p13 }
  0x22   :  { %98 = shalt.err (!%p95_p1)
}
  0x23   :  { %45 = dma.vmem_to_hbm [thread:$0]  %s40_s21, 256, %s148_s1, [#allocation4], %s104_s16, %s104_s16, %s105_s17  }
  0x24   :  { %101 = dma.done.wait [#allocation4], 256  }
  0x25   :  { %102 = vsyncadd [#allocation4], 4294967040 }
  0x26   :  { %49 = vsyncpa [#allocation3], 1 }
  0x27   :  { %50 = vsyncpa [#allocation4], 1 }

// kernel: tpu_custom_call.1
= control target key start
LH: loop header
LB: loop body
LE: loop exit
PB: predicated region body
PF: predicated region fallthrough
CT: control target
= control target key end

     0   :  { %10 = vsyncpa [#allocation5], 0  ;;  %s12557_s0 = inlined_call_operand.hbm [shape: bf16[2,20,32,128], index: 0, kind: input, shape index: {}]   ;;  %s12558_s1 = inlined_call_operand.hbm [shape: bf16[3,384,128], index: 1, kind: input, shape index: {}]   ;;  %s12559_s2 = inlined_call_operand.vmem [shape: f32[1,128], index: 2, kind: input, shape index: {}]   ;;  %s12560_s3 = inlined_call_operand.hbm [shape: bf16[3,384,128], index: 3, kind: input, shape index: {}]   ;;  %s12561_s4 = inlined_call_operand.vmem [shape: f32[1,128], index: 4, kind: input, shape index: {}]   ;;  %s12562_s5 = inlined_call_operand.hbm [shape: f32[2,16,16,128], index: 5, kind: output, shape index: {}]  }
   0x1   :  { %11 = vsyncpa [#allocation8], 0 }
   0x2   :  { %12 = vsyncpa [#allocation6], 0 }
   0x3   :  { %14 = vsyncpa [#allocation6 + $0x1], 0  ;;  %s9000_s18 = smov 0   ;;  %s9002_s19 = smov 0  }
   0x4   :  { %s9004_s20 = smov 0   ;;  %s9006_s21 = smov 0  }
   0x5   :  { %s9008_s22 = smov 0   ;;  %s9010_s23 = smov 0  }
   0x6 LB: > { %s7284_s24 = sadd.s32 4294967295, %s8957_s23   ;;  %s7285_s25 = sadd.s32 4294967294, %s8957_s23   ;;  %s8957_s23 = sphi %s9010_s23, %s20_s23   ;;  %s8953_s22 = sphi %s9008_s22, %s13130_s22   ;;  %s8949_s21 = sphi %s9006_s21, %s13129_s21   ;;  %s8945_s20 = sphi %s9004_s20, %s13128_s20   ;;  %s8941_s19 = sphi %s9002_s19, %s13127_s19   ;;  %s8937_s18 = sphi %s9000_s18, %s13126_s18  }
   0x7   : > { %s32_s26 = sadd.s32 1, %s8953_s22  ;;  %s125_s27 = sadd.s32 1, %s8945_s20 }
   0x8   : > { %p34_p0 = scmp.ge.s32.totalorder %s32_s26, 2  ;;  %p135_p1 = scmp.ne.s32.totalorder %s8945_s20, %s8941_s19 }
   0x9   : > { %p136_p2 = scmp.eq.s32.totalorder %s7284_s24, 1  ;;  %p141_p3 = scmp.ne.s32.totalorder %s8941_s19, %s8937_s18 }
   0xa   : > { %s13132_s26 = smov (%p34_p0, %s32_s26), 0  ;;  %p142_p5 = scmp.eq.s32.totalorder %s7285_s25, 1 }
   0xb   : > { %12639 = sst [smem:[#allocation18_spill]] %s13132_s26  ;;  %p9040_p4 = por %p136_p2, %p135_p1 }
   0xc   : > { %s120_s29 = ssub.s32 %s8953_s22, %s13132_s26  ;;  %p7286_p6 = scmp.ge.s32.totalorder %s8957_s23, 1 }
   0xd   : > { %s12640_s28 = scalar_select %p9040_p4, 1, 0 }
   0xe   : > { %p123_p7 = scmp.eq.s32.totalorder %s120_s29, 0  ;;  %p9047_p8 = por %p142_p5, %p141_p3 }
   0xf   : > { %p149_p9 = scmp.lt.s32.totalorder %s8957_s23, 3  ;;  %p9059_p11 = scmp.eq.s32.totalorder %s7284_s24, 0 }
  0x10   : > { %s12641_s30 = scalar_select %p9047_p8, 1, 0 }
  0x11   : > { %s9053_s6 = scalar_select %p123_p7, %s8945_s20, %s125_s27  }
  0x12   : > { %p9055_p10 = pnand %p7286_p6, %p149_p9  ;;  %s8959_s9 = smov [#allocation4]  }
  0x13   : > { %s12643_s8 = scalar_select %p9059_p11, 1, 0 }
  0x14   : > { %s12642_s7 = scalar_select %p9055_p10, 1, 0 }
  0x15   : > { %p8538_p12 = pneg %p9055_p10  ;;  %s161_s10 = sshll.u32 %s8959_s9, 4  ;;  %s162_s10 = int_to_ptr.vmem [resolvable:$true] %s161_s10 }
  0x16   : > { %s8960_s12 = smov [#allocation7]   ;;  %s8789_s16 = scalar_lea.hbm %s12558_s1, 9216 }
  0x17   : > { %p9067_p13 = pnand %p9059_p11, %p8538_p12  ;;  %s177_s13 = sshll.u32 %s8960_s12, 4  ;;  %s9071_s13 = int_to_ptr.vmem [resolvable:$true] %s177_s13 }
  0x18   : > { %p8790_p0 = scmp.ne.s32.totalorder %s12558_s1, %s8789_s16  ;;  %p8796_p5 = scmp.lt.u32.totalorder %s8789_s16, %s12558_s1 }
  0x19   : > { %p8791_p1 = pneg %p9067_p13 }
  0x1b   : > { %p8792_p2 = pnand %p8791_p1, %p8790_p0 }
  0x1d   : > { %p8793_p3 = pneg %p8792_p2 }
  0x1f   : > { %p8798_p6 = pnand %p8796_p5, %p8793_p3 }
  0x21   : > { %8801 = shalt.err (!%p8798_p6)
}
  0x22   : > { %s8802_s29 = scalar_lea.vmem %s162_s10, 9216  ;;  %p8810_p8 = scmp.lt.s32.totalorder %s162_s10, %s162_s10 }
  0x23   : > { %p8803_p7 = scmp.ne.s32.totalorder %s162_s10, %s8802_s29  ;;  %p8811_p4 = scmp.lt.s32.totalorder %s8802_s29, %s8802_s29 }
  0x25   : > { %p8805_p9 = pnand %p8803_p7, %p8791_p1  ;;  %p8812_p11 = por %p8811_p4, %p8810_p8 }
  0x27   : > { %p8806_p12 = pneg %p8805_p9 }
  0x29   : > { %p8813_p10 = pnand %p8812_p11, %p8806_p12 }
  0x2b   : > { %8816 = shalt.err (!%p8813_p10)
}
  0x2c   : > { %s8961_s9 = smov 64   ;;  %s8962_s12 = smov 4  }
  0x2d   : > { %8541 = dma.hbm_to_vmem [thread:$0]  (!%p9067_p13), %s12558_s1, 9216, %s162_s10, [#allocation5], %s8961_s9, %s8961_s9, %s8962_s12  }
  0x2e   : > { %s8817_s24 = scalar_lea.hbm %s12560_s3, 9216 }
  0x2f   : > { %p8818_p0 = scmp.ne.s32.totalorder %s12560_s3, %s8817_s24  ;;  %p8824_p10 = scmp.lt.u32.totalorder %s8817_s24, %s12560_s3 }
  0x31   : > { %p8820_p4 = pnand %p8818_p0, %p8791_p1 }
  0x33   : > { %p8821_p8 = pneg %p8820_p4 }
  0x35   : > { %p8826_p11 = pnand %p8824_p10, %p8821_p8 }
  0x37   : > { %8829 = shalt.err (!%p8826_p11)
}
  0x38   : > { %s8830_s10 = scalar_lea.vmem %s9071_s13, 9216  ;;  %p8838_p6 = scmp.lt.s32.totalorder %s9071_s13, %s9071_s13 }
  0x39   : > { %p8831_p2 = scmp.ne.s32.totalorder %s9071_s13, %s8830_s10  ;;  %p8839_p7 = scmp.lt.s32.totalorder %s8830_s10, %s8830_s10 }
  0x3b   : > { %p8833_p3 = pnand %p8831_p2, %p8791_p1  ;;  %p8840_p9 = por %p8839_p7, %p8838_p6 }
  0x3d   : > { %p8834_p5 = pneg %p8833_p3 }
  0x3f   : > { %p8841_p12 = pnand %p8840_p9, %p8834_p5 }
  0x41   : > { %8844 = shalt.err (!%p8841_p12)
}
  0x42   : > { %8544 = dma.hbm_to_vmem [thread:$0]  (!%p9067_p13), %s12560_s3, 9216, %s9071_s13, [#allocation8], %s8961_s9, %s8961_s9, %s8962_s12  }
  0x43   : > { %p12645_p0 = scmp.ne.s32.totalorder %s12642_s7, 0 }
  0x45   : > { %196 = sbr.rel (%p12645_p0) target bundleno = 1710 (0x6ae), region = 36 }
  0x4c   : > { %p12646_p4 = scmp.ne.s32.totalorder %s12643_s8, 0 }
  0x4e   : > { %8922 = dma.done.wait (%p12646_p4), [#allocation5], 9216  }
  0x4f   : > { %8924 = vsyncadd (%p12646_p4), [#allocation5], 4294958080 }
  0x50   : > { %8926 = dma.done.wait (%p12646_p4), [#allocation8], 9216  }
  0x51   : > { %8928 = vsyncadd (%p12646_p4), [#allocation8], 4294958080  ;;  %s218_s11 = sand.u32 1, %s8941_s19   ;;  %s7770_s13 = smul.u32 5120, %s8949_s21 }
  0x52   : > { %s7292_s7 = sshll.u32 %s218_s11, 8  ;;  %s8963_s16 = smov [#allocation2]  }
  0x53   : > { %s230_s15 = scalar_lea.hbm %s12557_s0, %s7770_s13  ;;  %s238_s17 = sshll.u32 %s8963_s16, 4  ;;  %s239_s17 = int_to_ptr.vmem [resolvable:$true] %s238_s17 }
  0x54   : > { %s8845_s24 = scalar_lea.hbm %s230_s15, 5120  ;;  %s8847_s8 = scalar_lea.hbm %s12557_s0, 10240 }
  0x55   : > { %p8846_p13 = scmp.ne.s32.totalorder %s230_s15, %s8845_s24  ;;  %p8848_p1 = scmp.lt.u32.totalorder %s230_s15, %s12557_s0 }
  0x56   : > { %p8849_p8 = scmp.lt.u32.totalorder %s8847_s8, %s8845_s24  ;;  %p8851_p11 = scmp.lt.u32.totalorder %s8845_s24, %s230_s15 }
  0x58   : > { %p8850_p10 = por %p8849_p8, %p8848_p1 }
  0x5a   : > { %p8852_p2 = por %p8851_p11, %p8850_p10 }
  0x5c   : > { %p8853_p3 = pnand %p8852_p2, %p8846_p13 }
  0x5e   : > { %8856 = shalt.err (!%p8853_p3)  }
  0x5f   : > { %s8857_s26 = scalar_lea.vmem %s239_s17, 5120  ;;  %p8862_p6 = scmp.lt.s32.totalorder %s239_s17, %s239_s17 }
  0x60   : > { %p8858_p5 = scmp.ne.s32.totalorder %s239_s17, %s8857_s26  ;;  %p8863_p7 = scmp.lt.s32.totalorder %s8857_s26, %s8857_s26 }
  0x62   : > { %p8864_p9 = por %p8863_p7, %p8862_p6 }
  0x64   : > { %p8865_p12 = pnand %p8864_p9, %p8858_p5 }
  0x66   : > { %8868 = shalt.err (!%p8865_p12)  }
  0x67   : > { %241 = dma.hbm_to_vmem [thread:$0]  %s230_s15, 5120, %s239_s17, [#allocation3] }
  0x68   : > { %s9143_s14 = scalar_lea.vmem [#allocation9], %s7292_s7 }
  0x69   : > { %8929 = dma.done.wait [#allocation3], 5120 }
  0x6a   : > { %8930 = vsyncadd [#allocation3], 4294962176  ;;  %v12576_v0 = vmov 0   ;;  %v8612_v1 = vld [vmem:[#allocation4] sm:$0xff]   ;;  %v8614_v3 = vld [vmem:[#allocation4 + $0x8] sm:$0xff]   ;;  %vm2069_vm0 = vcmask 1046528  }
  0x6b   : > { %520 = vmatprep.subr.bf16.mxu0 %v12576_v0  ;;  %v8613_v2 = vld [vmem:[#allocation4 + $0x80] sm:$0xff]   ;;  %v8615_v4 = vld [vmem:[#allocation4 + $0x88] sm:$0xff]   ;;  %v8617_v5 = vld [vmem:[#allocation4 + $0x90] sm:$0xff]   ;;  %vm8965_vm2 = vmmov 1   ;;  %vm3265_vm4 = vcmask 1045504   ;;  %vm8966_vm7 = vmmov 0  }
  0x6c   : > { %521 = vmatpush1.bf16.msra.mxu0 %v8612_v1  ;;  %8024 = vmatprep.subr.bf16.mxu1 %v8613_v2  ;;  %v8616_v6 = vld [vmem:[#allocation4 + $0x10] sm:$0xff]   ;;  %v8619_v7 = vld [vmem:[#allocation4 + $0x98] sm:$0xff]   ;;  %v8621_v9 = vld [vmem:[#allocation4 + $0xa0] sm:$0xff]   ;;  %s7771_s17 = sshll.u32 %s8949_s21, 12  ;;  %s7190_s24 = sshll.u32 %s9143_s14, 4  ;;  %s12506_s24 = int_to_ptr.vmem [resolvable:$true] %s7190_s24 }
  0x6d   : > { %522 = vmatprep.subr.bf16.mxu0 %v12576_v0  ;;  %8025 = vmatpush3.bf16.msra.mxu1 %v8613_v2  ;;  %v8618_v8 = vld [vmem:[#allocation4 + $0x18] sm:$0xff]   ;;  %v8620_v10 = vld [vmem:[#allocation4 + $0x20] sm:$0xff]   ;;  %v8623_v12 = vld [vmem:[#allocation4 + $0xa8] sm:$0xff]   ;;  %s12504_s8 = scalar_lea.hbm %s12562_s5, %s7771_s17  ;;  %s12511_s21 = scalar_lea.sflag [#allocation6], %s218_s11 }
  0x6e   : > { %8026 = vmatprep.subr.bf16.mxu1 %v8615_v4  ;;  %v251_v11 = vld [vmem:[#allocation2 + $0x20] sm:$0xff]  ;;  %v8622_v14 = vld [vmem:[#allocation4 + $0x28] sm:$0xff]   ;;  %v8625_v15 = vld [vmem:[#allocation4 + $0xb0] sm:$0xff]   ;;  %s8869_s29 = scalar_lea.vmem %s12506_s24, 4096  ;;  %p13123_p4 = scmp.ne.s32.totalorder %s12640_s28, 0 }
  0x6f   : > { %v9151_v13 = vmax.bf16 %v12576_v0, %v251_v11  ;;  %v8624_v16 = vld [vmem:[#allocation4 + $0x30] sm:$0xff]   ;;  %v8627_v17 = vld [vmem:[#allocation4 + $0xb8] sm:$0xff]   ;;  %v252_v19 = vld [vmem:[#allocation2 + $0x28] sm:$0xff]  ;;  %p8870_p0 = scmp.ne.s32.totalorder %s12506_s24, %s8869_s29  ;;  %s8967_s10 = smov [#allocation9]  }
  0x70   : > { %523 = vmatpush1.bf16.msra.mxu0 %v8614_v3  ;;  %v8626_v18 = vld [vmem:[#allocation4 + $0x38] sm:$0xff]   ;;  %v253_v20 = vld [vmem:[#allocation2 + $0x30] sm:$0xff]  ;;  %v8628_v22 = vld [vmem:[#allocation4 + $0x40] sm:$0xff]   ;;  %v9162_v24 = vmax.bf16 %v12576_v0, %v252_v19  ;;  %s8873_s26 = sshll.u32 %s8967_s10, 4  ;;  %s8874_s26 = int_to_ptr.vmem [resolvable:$false] %s8873_s26 }
  0x71   : > { %524 = vmatprep.subr.bf16.mxu0 %v12576_v0  ;;  %8027 = vmatpush3.bf16.msra.mxu1 %v8615_v4  ;;  %12647 = vst [vmem:[#allocation19_spill] sm:$0xff] %v9151_v13  ;;  %v249_v21 = vld [vmem:[#allocation2 + $0x10] sm:$0xff]  ;;  %v9165_v25 = vmax.bf16 %v12576_v0, %v253_v20  ;;  %v8630_v26 = vld [vmem:[#allocation4 + $0xc0] sm:$0xff]   ;;  %v8629_v27 = vld [vmem:[#allocation4 + $0x48] sm:$0xff]   ;;  %p8871_p13 = pnand %p8870_p0, %p13123_p4  ;;  %s8875_s13 = scalar_lea.vmem %s8874_s26, 8192 }
  0x72   : > { %8028 = vmatprep.subr.bf16.mxu1 %v8617_v5  ;;  %8040 = vmatprep.mubr.bf16.mxu1 %v9151_v13  ;;  %v9158_v23 = vmax.bf16 %v12576_v0, %v249_v21  ;;  %v254_v28 = vld [vmem:[#allocation2 + $0x38] sm:$0xff]  ;;  %v8634_v29 = vld [vmem:[#allocation4 + $0xc8] sm:$0xff]   ;;  %v255_v30 = vld [vmem:[#allocation2 + $0x40] sm:$0xff]  ;;  %p8876_p8 = scmp.lt.s32.totalorder %s12506_s24, %s8874_s26  ;;  %p8877_p10 = scmp.lt.s32.totalorder %s8875_s13, %s8869_s29 }
  0x73   : > { %12649 = vst [vmem:[#allocation21_spill] sm:$0xff] %v9165_v25  ;;  %v8631_v31 = vld [vmem:[#allocation4 + $0x50] sm:$0xff]   ;;  %v9175_v32 = vmax.bf16 %v12576_v0, %v254_v28  ;;  %v9178_v33 = vmax.bf16 %v12576_v0, %v255_v30  ;;  %v8632_v35 = vld [vmem:[#allocation4 + $0x58] sm:$0xff]   ;;  %v256_v36 = vld [vmem:[#allocation2 + $0x48] sm:$0xff]  ;;  %p8872_p1 = pneg %p8871_p13 }
  0x74   : > { %525 = vmatpush1.bf16.msra.mxu0 %v8616_v6  ;;  %12648 = vst [vmem:[#allocation20_spill] sm:$0xff] %v9158_v23  ;;  %552 = vmatprep.mubr.bf16.mxu0 %v9158_v23  ;;  %v8637_v34 = vld [vmem:[#allocation4 + $0xd0] sm:$0xff]   ;;  %v8640_v37 = vld [vmem:[#allocation4 + $0xd8] sm:$0xff]   ;;  %v8633_v39 = vld [vmem:[#allocation4 + $0x60] sm:$0xff]   ;;  %v9187_v40 = vmax.bf16 %v12576_v0, %v256_v36  ;;  %p8878_p11 = por %p8877_p10, %p8876_p8 }
  0x75   : > { %526 = vmatprep.subr.bf16.mxu0 %v12576_v0  ;;  %8029 = vmatpush3.bf16.msra.mxu1 %v8617_v5  ;;  %v257_v38 = vld [vmem:[#allocation2 + $0x50] sm:$0xff]  ;;  %v8641_v42 = vld [vmem:[#allocation4 + $0xe0] sm:$0xff]   ;;  %v8635_v43 = vld [vmem:[#allocation4 + $0x68] sm:$0xff]  }
  0x76   : > { %8030 = vmatprep.subr.bf16.mxu1 %v8619_v7  ;;  %v9190_v41 = vmax.bf16 %v12576_v0, %v257_v38  ;;  %v258_v44 = vld [vmem:[#allocation2 + $0x58] sm:$0xff]  ;;  %v8642_v45 = vld [vmem:[#allocation4 + $0xe8] sm:$0xff]   ;;  %v259_v46 = vld [vmem:[#allocation2 + $0x60] sm:$0xff]  ;;  %p8879_p2 = pnand %p8878_p11, %p8872_p1 }
  0x77   : > { %v8636_v47 = vld [vmem:[#allocation4 + $0x70] sm:$0xff]   ;;  %v9199_v48 = vmax.bf16 %v12576_v0, %v258_v44  ;;  %v8638_v49 = vld [vmem:[#allocation4 + $0x78] sm:$0xff]   ;;  %v247_v50 = vld [vmem:[#allocation2] sm:$0xff]  ;;  %v9202_v51 = vmax.bf16 %v12576_v0, %v259_v46 }
  0x78   : > { %527 = vmatpush1.bf16.msra.mxu0 %v8618_v8  ;;  %v8643_v52 = vld [vmem:[#allocation4 + $0xf0] sm:$0xff]   ;;  %v8639_v53 = vld [vmem:[#allocation4 + $0x140] sm:$0xff]   ;;  %v250_v54 = vld [vmem:[#allocation2 + $0x18] sm:$0xff]  ;;  %v9209_v58 = vmax.bf16 %v12576_v0, %v247_v50 }
  0x79   : > { %528 = vmatprep.subr.bf16.mxu0 %v12576_v0  ;;  %8031 = vmatpush3.bf16.msra.mxu1 %v8619_v7  ;;  %v260_v55 = vld [vmem:[#allocation2 + $0x68] sm:$0xff]  ;;  %v8645_v56 = vld [vmem:[#allocation4 + $0xf8] sm:$0xff]   ;;  %v261_v57 = vld [vmem:[#allocation2 + $0x70] sm:$0xff]  ;;  %v9213_v60 = vmax.bf16 %v12576_v0, %v250_v54 }
  0x7a   : > { %8032 = vmatprep.subr.bf16.mxu1 %v8621_v9  ;;  %12650 = vst [vmem:[#allocation22_spill] sm:$0xff] %v9209_v58  ;;  %v8644_v59 = vld [vmem:[#allocation4 + $0x148] sm:$0xff]   ;;  %v8646_v61 = vld [vmem:[#allocation4 + $0x100] sm:$0xff]   ;;  %v9216_v62 = vmax.bf16 %v12576_v0, %v260_v55  ;;  %v9219_v1 = vmax.bf16 %v12576_v0, %v261_v57  ;;  %v8649_v2 = vld [vmem:[#allocation4 + $0x150] sm:$0xff]  }
  0x7b   : > { %12651 = vst [vmem:[#allocation23_spill] sm:$0xff] %v9213_v60  ;;  %v248_v63 = vld [vmem:[#allocation2 + $0x8] sm:$0xff]  ;;  %v262_v3 = vld [vmem:[#allocation2 + $0x78] sm:$0xff]  ;;  %v263_v5 = vld [vmem:[#allocation2 + $0x80] sm:$0xff] }
  0x7c   : > { %529 = vmatpush1.bf16.msra.mxu0 %v8620_v10  ;;  %12652 = vst [vmem:[#allocation24_spill] sm:$0xff] %v9216_v62  ;;  %12653 = vst [vmem:[#allocation25_spill] sm:$0xff] %v9219_v1  ;;  %v8647_v4 = vld [vmem:[#allocation4 + $0x108] sm:$0xff]   ;;  %v9227_v6 = vmax.bf16 %v12576_v0, %v248_v63  ;;  %v8654_v7 = vld [vmem:[#allocation4 + $0x158] sm:$0xff]   ;;  %v9234_v10 = vmax.bf16 %v12576_v0, %v263_v5 }
  0x7d   : > { %530 = vmatprep.subr.bf16.mxu0 %v12576_v0  ;;  %8033 = vmatpush3.bf16.msra.mxu1 %v8621_v9  ;;  %v8648_v8 = vld [vmem:[#allocation4 + $0x110] sm:$0xff]   ;;  %v9231_v9 = vmax.bf16 %v12576_v0, %v262_v3  ;;  %v264_v11 = vld [vmem:[#allocation2 + $0x88] sm:$0xff]  ;;  %v266_v19 = vld [vmem:[#allocation2 + $0x98] sm:$0xff] }
  0x7e   : > { %8034 = vmatprep.subr.bf16.mxu1 %v8623_v12  ;;  %12654 = vst [vmem:[#allocation26_spill] sm:$0xff] %v9227_v6  ;;  %v8652_v20 = vld [vmem:[#allocation4 + $0x128] sm:$0xff]   ;;  %v267_v21 = vld [vmem:[#allocation2 + $0xa0] sm:$0xff]  ;;  %v8655_v30 = vld [vmem:[#allocation4 + $0x138] sm:$0xff]  }
  0x7f   : > { %12655 = vst [vmem:[#allocation27_spill] sm:$0xff] %v9231_v9  ;;  %v268_v28 = vld [vmem:[#allocation2 + $0xa8] sm:$0xff]  ;;  %v271_v36 = vld [vmem:[#allocation2 + $0xc0] sm:$0xff]  ;;  %v282_v5 = vld [vmem:[#allocation2 + $0x118] sm:$0xff] }
  0x80   : > { %531 = vmatpush1.bf16.msra.mxu0 %v8622_v14  ;;  %v8650_v14 = vld [vmem:[#allocation4 + $0x118] sm:$0xff]   ;;  %v9281_v38 = vmax.bf16 %v12576_v0, %v271_v36  ;;  %v275_v46 = vld [vmem:[#allocation2 + $0xe0] sm:$0xff]  ;;  %v280_v63 = vld [vmem:[#allocation2 + $0x108] sm:$0xff] }
  0x81   : > { %532 = vmatprep.subr.bf16.mxu0 %v12576_v0  ;;  %8035 = vmatpush3.bf16.msra.mxu1 %v8623_v12  ;;  %v265_v12 = vld [vmem:[#allocation2 + $0x90] sm:$0xff]  ;;  %v9301_v50 = vmax.bf16 %v12576_v0, %v275_v46  ;;  %v279_v57 = vld [vmem:[#allocation2 + $0x100] sm:$0xff]  ;;  %v9328_v3 = vmax.bf16 %v12576_v0, %v280_v63  ;;  %vm10517_vm3 = vmpackc.low %vm8965_vm2, %vm8965_vm2 }
  0x82   : > { %8036 = vmatprep.subr.bf16.mxu1 %v8625_v15  ;;  %v8662_v36 = vld [vmem:[#allocation4 + $0x1a0] sm:$0xff]   ;;  %vm3970_vm8 = vmpackc.low %vm8966_vm7, %vm8966_vm7 }
  0x83   : > { %12656 = vst [vmem:[#allocation28_spill] sm:$0xff] %v9301_v50  ;;  %v8668_v46 = vld [vmem:[#allocation4 + $0x1c0] sm:$0xff]  }
  0x84   : > { %533 = vmatpush1.bf16.msra.mxu0 %v8624_v16  ;;  %v9243_v16 = vmax.bf16 %v12576_v0, %v264_v11 }
  0x85   : > { %534 = vmatprep.subr.bf16.mxu0 %v12576_v0  ;;  %8037 = vmatpush3.bf16.msra.mxu1 %v8625_v15  ;;  %v8651_v15 = vld [vmem:[#allocation4 + $0x120] sm:$0xff]  }
  0x86   : > { %8038 = vmatprep.subr.bf16.mxu1 %v8627_v17 }
  0x88   : > { %535 = vmatpush1.bf16.msra.mxu0 %v8626_v18  ;;  %v8658_v18 = vld [vmem:[#allocation4 + $0x160] sm:$0xff]  }
  0x89   : > { %536 = vmatprep.subr.bf16.mxu0 %v12576_v0  ;;  %8039 = vmatpush3.bf16.msra.mxu1 %v8627_v17  ;;  %v9246_v17 = vmax.bf16 %v12576_v0, %v265_v12  ;;  %v8664_v12 = vld [vmem:[#allocation4 + $0x170] sm:$0xff]  }
  0x8a   : > { %1355 = vmatprep.subr.bf16.mxu1 %v12576_v0 }
  0x8c   : > { %537 = vmatpush1.bf16.msra.mxu0 %v8628_v22  ;;  %8041 = vmatmul.mubr.bf16.vlgmr.msra.gmra.mrb[0].mxu1 %v9162_v24  ;;  %v8653_v22 = vld [vmem:[#allocation4 + $0x130] sm:$0xff]  }
  0x8d   : > { %538 = vmatprep.subr.bf16.mxu0 %v12576_v0  ;;  %8044 = vmatprep.mubr.bf16.mxu1 %v9165_v25 }
  0x8e   : > { %1356 = vmatpush1.bf16.msra.mxu1 %v8630_v26  ;;  %v9255_v26 = vmax.bf16 %v12576_v0, %v266_v19 }
  0x8f   : > { %1357 = vmatprep.subr.bf16.mxu1 %v12576_v0 }
  0x90   : > { %539 = vmatpush1.bf16.msra.mxu0 %v8629_v27  ;;  %v9258_v27 = vmax.bf16 %v12576_v0, %v267_v21 }
  0x91   : > { %540 = vmatprep.subr.bf16.mxu0 %v12576_v0 }
  0x92   : > { %1358 = vmatpush1.bf16.msra.mxu1 %v8634_v29  ;;  %v269_v29 = vld [vmem:[#allocation2 + $0xb0] sm:$0xff] }
  0x93   : > { %1359 = vmatprep.subr.bf16.mxu1 %v12576_v0 }
  0x94   : > { %541 = vmatpush1.bf16.msra.mxu0 %v8631_v31  ;;  %8045 = vmatmul.mubr.bf16.gmra.mrb[4].mxu1 %v9175_v32  ;;  %v9267_v31 = vmax.bf16 %v12576_v0, %v268_v28  ;;  %v8657_v28 = vld [vmem:[#allocation4 + $0x188] sm:$0xff]  }
  0x95   : > { %542 = vmatprep.subr.bf16.mxu0 %v12576_v0  ;;  %8048 = vmatprep.mubr.bf16.mxu1 %v9178_v33 }
  0x96   : > { %1360 = vmatpush1.bf16.msra.mxu1 %v8637_v34  ;;  %v9270_v34 = vmax.bf16 %v12576_v0, %v269_v29  ;;  %v8659_v29 = vld [vmem:[#allocation4 + $0x190] sm:$0xff]  }
  0x97   : > { %1361 = vmatprep.subr.bf16.mxu1 %v12576_v0 }
  0x98   : > { %543 = vmatpush1.bf16.msra.mxu0 %v8632_v35  ;;  %v270_v35 = vld [vmem:[#allocation2 + $0xb8] sm:$0xff] }
  0x99   : > { %544 = vmatprep.subr.bf16.mxu0 %v12576_v0 }
  0x9a   : > { %1362 = vmatpush1.bf16.msra.mxu1 %v8640_v37  ;;  %v9278_v37 = vmax.bf16 %v12576_v0, %v270_v35  ;;  %v8667_v35 = vld [vmem:[#allocation4 + $0x178] sm:$0xff]  }
  0x9b   : > { %1363 = vmatprep.subr.bf16.mxu1 %v12576_v0 }
  0x9c   : > { %545 = vmatpush1.bf16.msra.mxu0 %v8633_v39  ;;  %8049 = vmatmul.mubr.bf16.gmra.mrb[8].mxu1 %v9187_v40  ;;  %v272_v39 = vld [vmem:[#allocation2 + $0xc8] sm:$0xff] }
  0x9d   : > { %546 = vmatprep.subr.bf16.mxu0 %v12576_v0  ;;  %8052 = vmatprep.mubr.bf16.mxu1 %v9190_v41 }
  0x9e   : > { %1364 = vmatpush1.bf16.msra.mxu1 %v8641_v42  ;;  %v273_v42 = vld [vmem:[#allocation2 + $0xd0] sm:$0xff] }
  0x9f   : > { %1365 = vmatprep.subr.bf16.mxu1 %v12576_v0  ;;  %v9291_v44 = vmax.bf16 %v12576_v0, %v273_v42  ;;  %v8665_v42 = vld [vmem:[#allocation4 + $0x1b0] sm:$0xff]  }
  0xa0   : > { %547 = vmatpush1.bf16.msra.mxu0 %v8635_v43  ;;  %v9288_v43 = vmax.bf16 %v12576_v0, %v272_v39  ;;  %v8663_v39 = vld [vmem:[#allocation4 + $0x1a8] sm:$0xff]  }
  0xa1   : > { %548 = vmatprep.subr.bf16.mxu0 %v12576_v0 }
  0xa2   : > { %1366 = vmatpush1.bf16.msra.mxu1 %v8642_v45  ;;  %v274_v45 = vld [vmem:[#allocation2 + $0xd8] sm:$0xff] }
  0xa3   : > { %1367 = vmatprep.subr.bf16.mxu1 %v12576_v0 }
  0xa4   : > { %549 = vmatpush1.bf16.msra.mxu0 %v8636_v47  ;;  %8053 = vmatmul.mubr.bf16.gmra.mrb[12].mxu1 %v9199_v48  ;;  %v8661_v47 = vld [vmem:[#allocation4 + $0x168] sm:$0xff]  }
  0xa5   : > { %550 = vmatprep.subr.bf16.mxu0 %v12576_v0  ;;  %8056 = vmatprep.mubr.bf16.mxu1 %v9202_v51 }
  0xa6   : > { %1368 = vmatpush1.bf16.msra.mxu1 %v8643_v52  ;;  %v276_v52 = vld [vmem:[#allocation2 + $0xe8] sm:$0xff] }
  0xa7   : > { %1369 = vmatprep.subr.bf16.mxu1 %v12576_v0  ;;  %v9308_v54 = vmax.bf16 %v12576_v0, %v276_v52  ;;  %v9399_v52 = vld [vmem:[#allocation4 + $0x200] sm:$0xff]  }
  0xa8   : > { %551 = vmatpush1.bf16.msra.mxu0 %v8638_v49  ;;  %v9298_v49 = vmax.bf16 %v12576_v0, %v274_v45  ;;  %v8666_v45 = vld [vmem:[#allocation4 + $0x1b8] sm:$0xff]  }
  0xa9   : > { %8112 = vmatprep.subr.bf16.mxu0 %v8639_v53 }
  0xaa   : > { %1370 = vmatpush1.bf16.msra.mxu1 %v8645_v56  ;;  %v278_v56 = vld [vmem:[#allocation2 + $0xf8] sm:$0xff] }
  0xab   : > { %553 = vmatmul.mubr.bf16.vlgmr.msra.gmra.mrb[0].mxu0 %v9209_v58  ;;  %1371 = vmatprep.subr.bf16.mxu1 %v12576_v0 }
  0xac   : > { %8113 = vmatpush3.bf16.msra.mxu0 %v8639_v53  ;;  %560 = vmatprep.mubr.bf16.mxu0 %v9213_v60  ;;  %v277_v53 = vld [vmem:[#allocation2 + $0xf0] sm:$0xff] }
  0xad   : > { %8057 = vmatmul.mubr.bf16.gmra.mrb[16].mxu1 %v9216_v62  ;;  %8114 = vmatprep.subr.bf16.mxu0 %v8644_v59  ;;  %v9311_v55 = vmax.bf16 %v12576_v0, %v277_v53  ;;  %v8671_v53 = vld [vmem:[#allocation4 + $0x1d0] sm:$0xff]  }
  0xae   : > { %8060 = vmatprep.mubr.bf16.mxu1 %v9219_v1  ;;  %1372 = vmatpush1.bf16.msra.mxu1 %v8646_v61  ;;  %v9321_v61 = vmax.bf16 %v12576_v0, %v279_v57 }
  0xaf   : > { %1373 = vmatprep.subr.bf16.mxu1 %v12576_v0 }
  0xb0   : > { %8115 = vmatpush3.bf16.msra.mxu0 %v8644_v59  ;;  %v9318_v59 = vmax.bf16 %v12576_v0, %v278_v56  ;;  %12658 = vst [vmem:[#allocation30_spill] sm:$0xff] %v9321_v61 }
  0xb1   : > { %8116 = vmatprep.subr.bf16.mxu0 %v8649_v2 }
  0xb2   : > { %1374 = vmatpush1.bf16.msra.mxu1 %v8647_v4  ;;  %12657 = vst [vmem:[#allocation29_spill] sm:$0xff] %v9318_v59 }
  0xb3   : > { %561 = vmatmul.mubr.bf16.gmra.mrb[4].mxu0 %v9227_v6  ;;  %1375 = vmatprep.subr.bf16.mxu1 %v12576_v0 }
  0xb4   : > { %568 = vmatprep.mubr.bf16.mxu0 %v9151_v13  ;;  %8117 = vmatpush3.bf16.msra.mxu0 %v8649_v2  ;;  %v281_v2 = vld [vmem:[#allocation2 + $0x110] sm:$0xff] }
  0xb5   : > { %8061 = vmatmul.mubr.bf16.gmra.mrb[20].mxu1 %v9231_v9  ;;  %8118 = vmatprep.subr.bf16.mxu0 %v8654_v7  ;;  %v9331_v4 = vmax.bf16 %v12576_v0, %v281_v2 }
  0xb6   : > { %8064 = vmatprep.mubr.bf16.mxu1 %v9234_v10  ;;  %1376 = vmatpush1.bf16.msra.mxu1 %v8648_v8  ;;  %v9338_v8 = vmax.bf16 %v12576_v0, %v282_v5 }
  0xb7   : > { %1377 = vmatprep.subr.bf16.mxu1 %v12576_v0  ;;  %12659 = vst [vmem:[#allocation31_spill] sm:$0xff] %v9331_v4 }
  0xb8   : > { %8119 = vmatpush3.bf16.msra.mxu0 %v8654_v7  ;;  %v283_v7 = vld [vmem:[#allocation2 + $0x120] sm:$0xff]  ;;  %12660 = vst [vmem:[#allocation32_spill] sm:$0xff] %v9338_v8 }
  0xb9   : > { %8120 = vmatprep.subr.bf16.mxu0 %v8658_v18  ;;  %v9341_v11 = vmax.bf16 %v12576_v0, %v283_v7 }
  0xba   : > { %1378 = vmatpush1.bf16.msra.mxu1 %v8650_v14  ;;  %v284_v14 = vld [vmem:[#allocation2 + $0x128] sm:$0xff] }
  0xbb   : > { %569 = vmatmul.mubr.bf16.gmra.mrb[8].mxu0 %v9158_v23  ;;  %1379 = vmatprep.subr.bf16.mxu1 %v12576_v0  ;;  %12661 = vst [vmem:[#allocation33_spill] sm:$0xff] %v9341_v11 }
  0xbc   : > { %576 = vmatprep.mubr.bf16.mxu0 %v9162_v24  ;;  %8121 = vmatpush3.bf16.msra.mxu0 %v8658_v18  ;;  %v9348_v18 = vmax.bf16 %v12576_v0, %v284_v14 }
  0xbd   : > { %8065 = vmatmul.mubr.bf16.gmra.mrb[24].mxu1 %v9243_v16  ;;  %8122 = vmatprep.subr.bf16.mxu0 %v8661_v47 }
  0xbe   : > { %8068 = vmatprep.mubr.bf16.mxu1 %v9246_v17  ;;  %1380 = vmatpush1.bf16.msra.mxu1 %v8651_v15  ;;  %v285_v15 = vld [vmem:[#allocation2 + $0x130] sm:$0xff]  ;;  %12662 = vst [vmem:[#allocation34_spill] sm:$0xff] %v9348_v18 }
  0xbf   : > { %1381 = vmatprep.subr.bf16.mxu1 %v12576_v0  ;;  %v9351_v19 = vmax.bf16 %v12576_v0, %v285_v15 }
  0xc0   : > { %8123 = vmatpush3.bf16.msra.mxu0 %v8661_v47  ;;  %v8669_v47 = vld [vmem:[#allocation4 + $0x1c8] sm:$0xff]  }
  0xc1   : > { %8124 = vmatprep.subr.bf16.mxu0 %v8664_v12  ;;  %12663 = vst [vmem:[#allocation35_spill] sm:$0xff] %v9351_v19 }
  0xc2   : > { %1382 = vmatpush1.bf16.msra.mxu1 %v8652_v20  ;;  %v286_v20 = vld [vmem:[#allocation2 + $0x138] sm:$0xff] }
  0xc3   : > { %577 = vmatmul.mubr.bf16.gmra.mrb[12].mxu0 %v9213_v60  ;;  %1383 = vmatprep.subr.bf16.mxu1 %v12576_v0  ;;  %v9358_v21 = vmax.bf16 %v12576_v0, %v286_v20 }
  0xc4   : > { %584 = vmatprep.mubr.bf16.mxu0 %v9165_v25  ;;  %8125 = vmatpush3.bf16.msra.mxu0 %v8664_v12  ;;  %v8673_v12 = vld [vmem:[#allocation4 + $0x1d8] sm:$0xff]  }
  0xc5   : > { %8069 = vmatmul.mubr.bf16.gmra.mrb[28].mxu1 %v9255_v26  ;;  %12664 = vst [vmem:[#allocation36_spill] sm:$0xff] %v9358_v21  ;;  %8126 = vmatprep.subr.bf16.mxu0 %v8667_v35 }
  0xc6   : > { %8072 = vmatprep.mubr.bf16.mxu1 %v9258_v27  ;;  %1384 = vmatpush1.bf16.msra.mxu1 %v8653_v22  ;;  %v8656_v22 = vld [vmem:[#allocation4 + $0x180] sm:$0xff]  }
  0xc7   : > { %1385 = vmatprep.subr.bf16.mxu1 %v12576_v0 }
  0xc8   : > { %8127 = vmatpush3.bf16.msra.mxu0 %v8667_v35 }
  0xc9   : > { %8200 = vmatprep.subr.bf16.mxu0 %v9399_v52 }
  0xca   : > { %1386 = vmatpush1.bf16.msra.mxu1 %v8655_v30  ;;  %v8660_v30 = vld [vmem:[#allocation4 + $0x198] sm:$0xff]  }
  0xcb   : > { %585 = vmatmul.mubr.bf16.gmra.mrb[16].mxu0 %v9151_v13  ;;  %2551 = vmatprep.subr.bf16.mxu1 %v12576_v0 }
  0xcc   : > { %592 = vmatprep.mubr.bf16.mxu0 %v9175_v32 }
  0xcd   : > { %8073 = vmatmul.mubr.bf16.gmra.mrb[32].mxu1 %v9267_v31 }
  0xce   : > { %8076 = vmatprep.mubr.bf16.mxu1 %v9270_v34 }
  0xd3   : > { %593 = vmatmul.mubr.bf16.gmra.mrb[20].mxu0 %v9162_v24 }
  0xd4   : > { %600 = vmatprep.mubr.bf16.mxu0 %v9178_v33 }
  0xd5   : > { %8077 = vmatmul.mubr.bf16.gmra.mrb[36].mxu1 %v9278_v37 }
  0xd6   : > { %8080 = vmatprep.mubr.bf16.mxu1 %v9281_v38 }
  0xdb   : > { %601 = vmatmul.mubr.bf16.gmra.mrb[24].mxu0 %v9165_v25 }
  0xdc   : > { %608 = vmatprep.mubr.bf16.mxu0 %v9187_v40 }
  0xdd   : > { %8081 = vmatmul.mubr.bf16.gmra.mrb[40].mxu1 %v9288_v43 }
  0xde   : > { %8084 = vmatprep.mubr.bf16.mxu1 %v9291_v44 }
  0xe3   : > { %609 = vmatmul.mubr.bf16.gmra.mrb[28].mxu0 %v9175_v32 }
  0xe4   : > { %616 = vmatprep.mubr.bf16.mxu0 %v9190_v41 }
  0xe5   : > { %8085 = vmatmul.mubr.bf16.gmra.mrb[44].mxu1 %v9298_v49 }
  0xe6   : > { %8088 = vmatprep.mubr.bf16.mxu1 %v9301_v50 }
  0xeb   : > { %617 = vmatmul.mubr.bf16.gmra.mrb[32].mxu0 %v9178_v33 }
  0xec   : > { %624 = vmatprep.mubr.bf16.mxu0 %v9199_v48 }
  0xed   : > { %8089 = vmatmul.mubr.bf16.gmra.mrb[48].mxu1 %v9308_v54 }
  0xee   : > { %8092 = vmatprep.mubr.bf16.mxu1 %v9311_v55 }
  0xf3   : > { %625 = vmatmul.mubr.bf16.gmra.mrb[36].mxu0 %v9187_v40 }
  0xf4   : > { %632 = vmatprep.mubr.bf16.mxu0 %v9202_v51 }
  0xf5   : > { %8093 = vmatmul.mubr.bf16.gmra.mrb[52].mxu1 %v9318_v59 }
  0xf6   : > { %8096 = vmatprep.mubr.bf16.mxu1 %v9321_v61 }
  0xfb   : > { %633 = vmatmul.mubr.bf16.gmra.mrb[40].mxu0 %v9190_v41 }
  0xfc   : > { %640 = vmatprep.mubr.bf16.mxu0 %v9216_v62 }
  0xfd   : > { %8097 = vmatmul.mubr.bf16.gmra.mrb[56].mxu1 %v9328_v3 }
  0xfe   : > { %8100 = vmatprep.mubr.bf16.mxu1 %v9331_v4 }
 0x103   : > { %641 = vmatmul.mubr.bf16.gmra.mrb[44].mxu0 %v9199_v48 }
 0x104   : > { %648 = vmatprep.mubr.bf16.mxu0 %v9219_v1 }
 0x105   : > { %8101 = vmatmul.mubr.bf16.gmra.mrb[60].mxu1 %v9338_v8 }
 0x106   : > { %8104 = vmatprep.mubr.bf16.mxu1 %v9341_v11 }
 0x10b   : > { %649 = vmatmul.mubr.bf16.gmra.mrb[48].mxu0 %v9202_v51 }
 0x10c   : > { %656 = vmatprep.mubr.bf16.mxu0 %v9231_v9 }
 0x10d   : > { %8105 = vmatmul.mubr.bf16.gmra.mrb[64].mxu1 %v9348_v18 }
 0x10e   : > { %8108 = vmatprep.mubr.bf16.mxu1 %v9351_v19 }
 0x113   : > { %657 = vmatmul.mubr.bf16.gmra.mrb[52].mxu0 %v9216_v62 }
 0x114   : > { %664 = vmatprep.mubr.bf16.mxu0 %v9234_v10 }
 0x115   : > { %8109 = vmatmul.mubr.bf16.gmra.mrb[68].mxu1 %v9358_v21 }
 0x116   : > { %1387 = vmatprep.mubr.bf16.mxu1 %v9158_v23 }
 0x11b   : > { %665 = vmatmul.mubr.bf16.gmra.mrb[56].mxu0 %v9219_v1 }
 0x11c   : > { %672 = vmatprep.mubr.bf16.mxu0 %v9243_v16 }
 0x11d   : > { %1388 = vmatmul.mubr.bf16.vlgmr.msra.gmra.mrb[72].mxu1 %v9209_v58 }
 0x11e   : > { %1395 = vmatprep.mubr.bf16.mxu1 %v9213_v60  ;;  %2552 = vmatpush1.bf16.msra.mxu1 %v8656_v22 }
 0x11f   : > { %2553 = vmatprep.subr.bf16.mxu1 %v12576_v0 }
 0x122   : > { %2554 = vmatpush1.bf16.msra.mxu1 %v8657_v28 }
 0x123   : > { %673 = vmatmul.mubr.bf16.gmra.mrb[60].mxu0 %v9231_v9  ;;  %2555 = vmatprep.subr.bf16.mxu1 %v12576_v0 }
 0x124   : > { %680 = vmatprep.mubr.bf16.mxu0 %v9246_v17 }
 0x125   : > { %1396 = vmatmul.mubr.bf16.gmra.mrb[76].mxu1 %v9227_v6 }
 0x126   : > { %1403 = vmatprep.mubr.bf16.mxu1 %v9151_v13  ;;  %2556 = vmatpush1.bf16.msra.mxu1 %v8659_v29 }
 0x127   : > { %2557 = vmatprep.subr.bf16.mxu1 %v12576_v0 }
 0x12a   : > { %2558 = vmatpush1.bf16.msra.mxu1 %v8660_v30 }
 0x12b   : > { %681 = vmatmul.mubr.bf16.gmra.mrb[64].mxu0 %v9234_v10  ;;  %2559 = vmatprep.subr.bf16.mxu1 %v12576_v0 }
 0x12c   : > { %688 = vmatprep.mubr.bf16.mxu0 %v9255_v26 }
 0x12d   : > { %1404 = vmatmul.mubr.bf16.gmra.mrb[80].mxu1 %v9158_v23 }
 0x12e   : > { %1411 = vmatprep.mubr.bf16.mxu1 %v9162_v24  ;;  %2560 = vmatpush1.bf16.msra.mxu1 %v8662_v36 }
 0x12f   : > { %2561 = vmatprep.subr.bf16.mxu1 %v12576_v0 }
 0x132   : > { %2562 = vmatpush1.bf16.msra.mxu1 %v8663_v39 }
 0x133   : > { %689 = vmatmul.mubr.bf16.gmra.mrb[68].mxu0 %v9243_v16  ;;  %2563 = vmatprep.subr.bf16.mxu1 %v12576_v0 }
 0x134   : > { %696 = vmatprep.mubr.bf16.mxu0 %v9258_v27 }
 0x135   : > { %1412 = vmatmul.mubr.bf16.gmra.mrb[84].mxu1 %v9213_v60 }
 0x136   : > { %1419 = vmatprep.mubr.bf16.mxu1 %v9165_v25  ;;  %2564 = vmatpush1.bf16.msra.mxu1 %v8665_v42  ;;  %v8675_v42 = vld [vmem:[#allocation4 + $0x1e0] sm:$0xff]  }
 0x137   : > { %2565 = vmatprep.subr.bf16.mxu1 %v12576_v0 }
 0x13a   : > { %2566 = vmatpush1.bf16.msra.mxu1 %v8666_v45 }
 0x13b   : > { %697 = vmatmul.mubr.bf16.gmra.mrb[72].mxu0 %v9246_v17  ;;  %2567 = vmatprep.subr.bf16.mxu1 %v12576_v0 }
 0x13c   : > { %704 = vmatprep.mubr.bf16.mxu0 %v9267_v31 }
 0x13d   : > { %1420 = vmatmul.mubr.bf16.gmra.mrb[88].mxu1 %v9151_v13 }
 0x13e   : > { %1427 = vmatprep.mubr.bf16.mxu1 %v9175_v32  ;;  %2568 = vmatpush1.bf16.msra.mxu1 %v8668_v46 }
 0x13f   : > { %2569 = vmatprep.subr.bf16.mxu1 %v12576_v0 }
 0x142   : > { %2570 = vmatpush1.bf16.msra.mxu1 %v8669_v47 }
 0x143   : > { %705 = vmatmul.mubr.bf16.gmra.mrb[76].mxu0 %v9255_v26  ;;  %2571 = vmatprep.subr.bf16.mxu1 %v12576_v0 }
 0x144   : > { %712 = vmatprep.mubr.bf16.mxu0 %v9270_v34 }
 0x145   : > { %1428 = vmatmul.mubr.bf16.gmra.mrb[92].mxu1 %v9162_v24 }
 0x146   : > { %1435 = vmatprep.mubr.bf16.mxu1 %v9178_v33  ;;  %2572 = vmatpush1.bf16.msra.mxu1 %v8671_v53 }
 0x147   : > { %2573 = vmatprep.subr.bf16.mxu1 %v12576_v0 }
 0x14a   : > { %2574 = vmatpush1.bf16.msra.mxu1 %v8673_v12 }
 0x14b   : > { %713 = vmatmul.mubr.bf16.gmra.mrb[80].mxu0 %v9258_v27  ;;  %2575 = vmatprep.subr.bf16.mxu1 %v12576_v0 }
 0x14c   : > { %720 = vmatprep.mubr.bf16.mxu0 %v9278_v37 }
 0x14d   : > { %1436 = vmatmul.mubr.bf16.gmra.mrb[96].mxu1 %v9165_v25 }
 0x14e   : > { %1443 = vmatprep.mubr.bf16.mxu1 %v9187_v40  ;;  %2576 = vmatpush1.bf16.msra.mxu1 %v8675_v42 }
 0x14f   : > { %2577 = vmatprep.subr.bf16.mxu1 %v12576_v0 }
 0x153   : > { %721 = vmatmul.mubr.bf16.gmra.mrb[84].mxu0 %v9267_v31 }
 0x154   : > { %728 = vmatprep.mubr.bf16.mxu0 %v9281_v38 }
 0x155   : > { %1444 = vmatmul.mubr.bf16.gmra.mrb[100].mxu1 %v9175_v32 }
 0x156   : > { %1451 = vmatprep.mubr.bf16.mxu1 %v9190_v41 }
 0x15b   : > { %729 = vmatmul.mubr.bf16.gmra.mrb[88].mxu0 %v9270_v34 }
 0x15c   : > { %736 = vmatprep.mubr.bf16.mxu0 %v9288_v43 }
 0x15d   : > { %1452 = vmatmul.mubr.bf16.gmra.mrb[104].mxu1 %v9178_v33 }
 0x15e   : > { %1459 = vmatprep.mubr.bf16.mxu1 %v9199_v48 }
 0x15f   : > { %v8042_v56 = vpop.f32.mrb[0].mxu1 }
 0x160   : > { %v875_v57 = vpop.f32.mrb[1].mxu1 }
 0x161   : > { %v8043_v63 = vpop.f32.mrb[2].mxu1 }
 0x162   : > { %v878_v2 = vpop.f32.mrb[3].mxu1 }
 0x163   : > { %737 = vmatmul.mubr.bf16.gmra.mrb[92].mxu0 %v9278_v37 }
 0x164   : > { %744 = vmatprep.mubr.bf16.mxu0 %v9291_v44 }
 0x165   : > { %1460 = vmatmul.mubr.bf16.gmra.mrb[108].mxu1 %v9187_v40 }
 0x166   : > { %1467 = vmatprep.mubr.bf16.mxu1 %v9202_v51 }
 0x167   : > { %v9418_v5 = vpop.f32.mrb[4].mxu1 }
 0x168   : > { %v891_v7 = vpop.f32.mrb[5].mxu1 }
 0x169   : > { %v9420_v14 = vpop.f32.mrb[6].mxu1 }
 0x16a   : > { %v894_v15 = vpop.f32.mrb[7].mxu1 }
 0x16b   : > { %745 = vmatmul.mubr.bf16.gmra.mrb[96].mxu0 %v9281_v38 }
 0x16c   : > { %752 = vmatprep.mubr.bf16.mxu0 %v9298_v49 }
 0x16d   : > { %1468 = vmatmul.mubr.bf16.gmra.mrb[112].mxu1 %v9190_v41 }
 0x16e   : > { %1475 = vmatprep.mubr.bf16.mxu1 %v9216_v62 }
 0x16f   : > { %v9427_v20 = vpop.f32.mrb[8].mxu1 }
 0x170   : > { %v9429_v22 = vpop.f32.mrb[9].mxu1 }
 0x171   : > { %v9431_v28 = vpop.f32.mrb[10].mxu1 }
 0x172   : > { %v9434_v29 = vpop.f32.mrb[11].mxu1 }
 0x173   : > { %753 = vmatmul.mubr.bf16.gmra.mrb[100].mxu0 %v9288_v43 }
 0x174   : > { %760 = vmatprep.mubr.bf16.mxu0 %v9301_v50 }
 0x175   : > { %1476 = vmatmul.mubr.bf16.gmra.mrb[116].mxu1 %v9199_v48 }
 0x176   : > { %1483 = vmatprep.mubr.bf16.mxu1 %v9219_v1 }
 0x177   : > { %v9439_v30 = vpop.f32.mrb[12].mxu1 }
 0x178   : > { %v9441_v35 = vpop.f32.mrb[13].mxu1 }
 0x179   : > { %v9443_v36 = vpop.f32.mrb[14].mxu1 }
 0x17a   : > { %v9446_v39 = vpop.f32.mrb[15].mxu1 }
 0x17b   : > { %761 = vmatmul.mubr.bf16.gmra.mrb[104].mxu0 %v9291_v44 }
 0x17c   : > { %768 = vmatprep.mubr.bf16.mxu0 %v9308_v54 }
 0x17d   : > { %1484 = vmatmul.mubr.bf16.gmra.mrb[120].mxu1 %v9202_v51 }
 0x17e   : > { %v554_v45 = vpop.f32.mrb[0].mxu0  ;;  %1491 = vmatprep.mubr.bf16.mxu1 %v9231_v9 }
 0x17f   : > { %v9451_v46 = vadd.f32 %v875_v57, %v554_v45  ;;  %v556_v47 = vpop.f32.mrb[1].mxu0 }
 0x180   : > { %v557_v53 = vpop.f32.mrb[2].mxu0  ;;  %v9454_v12 = vpop.f32.mrb[16].mxu1 }
 0x181   : > { %12665 = vst [vmem:[#allocation37_spill] sm:$0xff] %v9451_v46  ;;  %v9456_v21 = vadd.f32 %v878_v2, %v557_v53  ;;  %v559_v19 = vpop.f32.mrb[3].mxu0  ;;  %v9458_v6 = vpop.f32.mrb[17].mxu1 }
 0x182   : > { %v9460_v60 = vpop.f32.mrb[18].mxu1 }
 0x183   : > { %12666 = vst [vmem:[#allocation38_spill] sm:$0xff] %v9456_v21  ;;  %769 = vmatmul.mubr.bf16.gmra.mrb[108].mxu0 %v9298_v49  ;;  %v9463_v58 = vpop.f32.mrb[19].mxu1 }
 0x184   : > { %776 = vmatprep.mubr.bf16.mxu0 %v9311_v55 }
 0x185   : > { %1492 = vmatmul.mubr.bf16.gmra.mrb[124].mxu1 %v9216_v62 }
 0x186   : > { %v562_v57 = vpop.f32.mrb[4].mxu0  ;;  %1499 = vmatprep.mubr.bf16.mxu1 %v9234_v10 }
 0x187   : > { %v9468_v42 = vadd.f32 %v8042_v56, %v562_v57  ;;  %v564_v2 = vpop.f32.mrb[5].mxu0  ;;  %v8677_v56 = vld [vmem:[#allocation4 + $0x1e8] sm:$0xff]  }
 0x188   : > { %v565_v45 = vpop.f32.mrb[6].mxu0  ;;  %v9470_v19 = vpop.f32.mrb[20].mxu1  ;;  %2578 = vmatpush1.bf16.msra.mxu1 %v8677_v56 }
 0x189   : > { %12667 = vst [vmem:[#allocation39_spill] sm:$0xff] %v9468_v42  ;;  %v9472_v47 = vadd.f32 %v8043_v63, %v565_v45  ;;  %v567_v53 = vpop.f32.mrb[7].mxu0  ;;  %v9474_v0 = vpop.f32.mrb[21].mxu1 }
 0x18a   : > { %v9476_v21 = vpop.f32.mrb[22].mxu1 }
 0x18b   : > { %12668 = vst [vmem:[#allocation40_spill] sm:$0xff] %v9472_v47  ;;  %777 = vmatmul.mubr.bf16.gmra.mrb[112].mxu0 %v9301_v50  ;;  %v9479_v46 = vpop.f32.mrb[23].mxu1  ;;  %v12670_v47 = vmov 0  }
 0x18c   : > { %784 = vmatprep.mubr.bf16.mxu0 %v9318_v59  ;;  %2579 = vmatprep.subr.bf16.mxu1 %v12670_v47 }
 0x18d   : > { %1500 = vmatmul.mubr.bf16.gmra.mrb[128].mxu1 %v9219_v1 }
 0x18e   : > { %v570_v57 = vpop.f32.mrb[8].mxu0  ;;  %1507 = vmatprep.mubr.bf16.mxu1 %v9243_v16 }
 0x18f   : > { %v9484_v2 = vadd.f32 %v891_v7, %v570_v57  ;;  %v572_v63 = vpop.f32.mrb[9].mxu0 }
 0x190   : > { %v573_v45 = vpop.f32.mrb[10].mxu0  ;;  %v9486_v53 = vpop.f32.mrb[24].mxu1 }
 0x191   : > { %12669 = vst [vmem:[#allocation41_spill] sm:$0xff] %v9484_v2  ;;  %v9489_v42 = vadd.f32 %v894_v15, %v573_v45  ;;  %v575_v23 = vpop.f32.mrb[11].mxu0  ;;  %v9491_v62 = vpop.f32.mrb[25].mxu1 }
 0x192   : > { %v9493_v50 = vpop.f32.mrb[26].mxu1 }
 0x193   : > { %12671 = vst [vmem:[#allocation42_spill] sm:$0xff] %v9489_v42  ;;  %785 = vmatmul.mubr.bf16.gmra.mrb[116].mxu0 %v9308_v54  ;;  %v9496_v1 = vpop.f32.mrb[27].mxu1 }
 0x194   : > { %792 = vmatprep.mubr.bf16.mxu0 %v9321_v61 }
 0x195   : > { %1508 = vmatmul.mubr.bf16.gmra.mrb[132].mxu1 %v9231_v9 }
 0x196   : > { %v578_v7 = vpop.f32.mrb[12].mxu0  ;;  %1515 = vmatprep.mubr.bf16.mxu1 %v9246_v17 }
 0x197   : > { %v9502_v56 = vadd.f32 %v9418_v5, %v578_v7  ;;  %v580_v15 = vpop.f32.mrb[13].mxu0 }
 0x198   : > { %v581_v23 = vpop.f32.mrb[14].mxu0  ;;  %v9504_v57 = vpop.f32.mrb[28].mxu1  ;;  %v8679_v15 = vld [vmem:[#allocation4 + $0x1f0] sm:$0xff]  }
 0x199   : > { %12672 = vst [vmem:[#allocation43_spill] sm:$0xff] %v9502_v56  ;;  %12673 = vst [vmem:[#allocation44_spill] sm:$0xff] %v9504_v57  ;;  %v9507_v63 = vadd.f32 %v9420_v14, %v581_v23  ;;  %v583_v45 = vpop.f32.mrb[15].mxu0  ;;  %v9509_v42 = vpop.f32.mrb[29].mxu1  ;;  %2580 = vmatpush1.bf16.msra.mxu1 %v8679_v15 }
 0x19a   : > { %v9511_v2 = vpop.f32.mrb[30].mxu1  ;;  %2581 = vmatprep.subr.bf16.mxu1 %v12670_v47 }
 0x19b   : > { %12674 = vst [vmem:[#allocation45_spill] sm:$0xff] %v9507_v63  ;;  %12675 = vst [vmem:[#allocation46_spill] sm:$0xff] %v9511_v2  ;;  %793 = vmatmul.mubr.bf16.gmra.mrb[120].mxu0 %v9311_v55  ;;  %v9514_v9 = vpop.f32.mrb[31].mxu1 }
 0x19c   : > { %800 = vmatprep.mubr.bf16.mxu0 %v9328_v3 }
 0x19d   : > { %1516 = vmatmul.mubr.bf16.gmra.mrb[136].mxu1 %v9234_v10 }
 0x19e   : > { %v586_v5 = vpop.f32.mrb[16].mxu0  ;;  %1523 = vmatprep.mubr.bf16.mxu1 %v9255_v26 }
 0x19f   : > { %v9520_v7 = vadd.f32 %v9429_v22, %v586_v5  ;;  %v588_v14 = vpop.f32.mrb[17].mxu0 }
 0x1a0   : > { %v589_v23 = vpop.f32.mrb[18].mxu0  ;;  %v9522_v45 = vpop.f32.mrb[32].mxu1 }
 0x1a1   : > { %12676 = vst [vmem:[#allocation47_spill] sm:$0xff] %v9520_v7  ;;  %12677 = vst [vmem:[#allocation48_spill] sm:$0xff] %v9522_v45  ;;  %v9525_v63 = vadd.f32 %v9434_v29, %v589_v23  ;;  %v591_v56 = vpop.f32.mrb[19].mxu0  ;;  %v9527_v2 = vpop.f32.mrb[33].mxu1 }
 0x1a2   : > { %v9529_v57 = vpop.f32.mrb[34].mxu1 }
 0x1a3   : > { %12678 = vst [vmem:[#allocation49_spill] sm:$0xff] %v9525_v63  ;;  %12679 = vst [vmem:[#allocation50_spill] sm:$0xff] %v9529_v57  ;;  %801 = vmatmul.mubr.bf16.gmra.mrb[124].mxu0 %v9318_v59  ;;  %v9533_v22 = vpop.f32.mrb[35].mxu1 }
 0x1a4   : > { %808 = vmatprep.mubr.bf16.mxu0 %v9331_v4 }
 0x1a5   : > { %1524 = vmatmul.mubr.bf16.gmra.mrb[140].mxu1 %v9243_v16 }
 0x1a6   : > { %v594_v5 = vpop.f32.mrb[20].mxu0  ;;  %1531 = vmatprep.mubr.bf16.mxu1 %v9258_v27 }
 0x1a7   : > { %v9539_v29 = vadd.f32 %v9427_v20, %v594_v5  ;;  %v596_v56 = vpop.f32.mrb[21].mxu0 }
 0x1a8   : > { %v597_v14 = vpop.f32.mrb[22].mxu0  ;;  %v9541_v15 = vpop.f32.mrb[36].mxu1 }
 0x1a9   : > { %12680 = vst [vmem:[#allocation51_spill] sm:$0xff] %v9539_v29  ;;  %12681 = vst [vmem:[#allocation52_spill] sm:$0xff] %v9541_v15  ;;  %v9544_v23 = vadd.f32 %v9431_v28, %v597_v14  ;;  %v599_v63 = vpop.f32.mrb[23].mxu0  ;;  %v9546_v7 = vpop.f32.mrb[37].mxu1 }
 0x1aa   : > { %v9548_v57 = vpop.f32.mrb[38].mxu1 }
 0x1ab   : > { %12682 = vst [vmem:[#allocation53_spill] sm:$0xff] %v9544_v23  ;;  %12683 = vst [vmem:[#allocation54_spill] sm:$0xff] %v9548_v57  ;;  %809 = vmatmul.mubr.bf16.gmra.mrb[128].mxu0 %v9321_v61  ;;  %v9551_v45 = vpop.f32.mrb[39].mxu1  ;;  %v8681_v57 = vld [vmem:[#allocation4 + $0x1f8] sm:$0xff]  }
 0x1ac   : > { %12684 = vst [vmem:[#allocation55_spill] sm:$0xff] %v9551_v45  ;;  %816 = vmatprep.mubr.bf16.mxu0 %v9338_v8  ;;  %2582 = vmatpush1.bf16.msra.mxu1 %v8681_v57 }
 0x1ad   : > { %1532 = vmatmul.mubr.bf16.gmra.mrb[144].mxu1 %v9246_v17 }
 0x1ae   : > { %v602_v20 = vpop.f32.mrb[24].mxu0  ;;  %1539 = vmatprep.mubr.bf16.mxu1 %v9267_v31 }
 0x1af   : > { %v9557_v5 = vadd.f32 %v9441_v35, %v602_v20  ;;  %v604_v28 = vpop.f32.mrb[25].mxu0 }
 0x1b0   : > { %v605_v63 = vpop.f32.mrb[26].mxu0  ;;  %v9559_v56 = vpop.f32.mrb[40].mxu1 }
 0x1b1   : > { %12685 = vst [vmem:[#allocation56_spill] sm:$0xff] %v9557_v5  ;;  %v9562_v14 = vadd.f32 %v9446_v39, %v605_v63  ;;  %v607_v23 = vpop.f32.mrb[27].mxu0  ;;  %v9564_v29 = vpop.f32.mrb[41].mxu1 }
 0x1b2   : > { %v9566_v15 = vpop.f32.mrb[42].mxu1 }
 0x1b3   : > { %12686 = vst [vmem:[#allocation57_spill] sm:$0xff] %v9562_v14  ;;  %12687 = vst [vmem:[#allocation58_spill] sm:$0xff] %v9566_v15  ;;  %817 = vmatmul.mubr.bf16.gmra.mrb[132].mxu0 %v9328_v3  ;;  %v9569_v45 = vpop.f32.mrb[43].mxu1 }
 0x1b4   : > { %824 = vmatprep.mubr.bf16.mxu0 %v9341_v11 }
 0x1b5   : > { %1540 = vmatmul.mubr.bf16.gmra.mrb[148].mxu1 %v9255_v26 }
 0x1b6   : > { %v610_v35 = vpop.f32.mrb[28].mxu0  ;;  %1547 = vmatprep.mubr.bf16.mxu1 %v9270_v34 }
 0x1b7   : > { %v9575_v39 = vadd.f32 %v9439_v30, %v610_v35  ;;  %v612_v23 = vpop.f32.mrb[29].mxu0 }
 0x1b8   : > { %v613_v20 = vpop.f32.mrb[30].mxu0  ;;  %v9577_v28 = vpop.f32.mrb[44].mxu1 }
 0x1b9   : > { %12688 = vst [vmem:[#allocation59_spill] sm:$0xff] %v9575_v39  ;;  %12689 = vst [vmem:[#allocation60_spill] sm:$0xff] %v9577_v28  ;;  %v9580_v63 = vadd.f32 %v9443_v36, %v613_v20  ;;  %v615_v14 = vpop.f32.mrb[31].mxu0  ;;  %v9582_v5 = vpop.f32.mrb[45].mxu1 }
 0x1ba   : > { %v9584_v57 = vpop.f32.mrb[46].mxu1 }
 0x1bb   : > { %12690 = vst [vmem:[#allocation61_spill] sm:$0xff] %v9580_v63  ;;  %12691 = vst [vmem:[#allocation62_spill] sm:$0xff] %v9584_v57  ;;  %825 = vmatmul.mubr.bf16.gmra.mrb[136].mxu0 %v9331_v4  ;;  %v9587_v15 = vpop.f32.mrb[47].mxu1 }
 0x1bc   : > { %832 = vmatprep.mubr.bf16.mxu0 %v9348_v18 }
 0x1bd   : > { %1548 = vmatmul.mubr.bf16.gmra.mrb[152].mxu1 %v9258_v27 }
 0x1be   : > { %v618_v30 = vpop.f32.mrb[32].mxu0  ;;  %1555 = vmatprep.mubr.bf16.mxu1 %v9278_v37 }
 0x1bf   : > { %v9593_v35 = vadd.f32 %v9458_v6, %v618_v30  ;;  %v620_v36 = vpop.f32.mrb[33].mxu0 }
 0x1c0   : > { %v621_v14 = vpop.f32.mrb[34].mxu0  ;;  %v9595_v23 = vpop.f32.mrb[48].mxu1 }
 0x1c1   : > { %12692 = vst [vmem:[#allocation63_spill] sm:$0xff] %v9593_v35  ;;  %12693 = vst [vmem:[#allocation64_spill] sm:$0xff] %v9595_v23  ;;  %v9598_v20 = vadd.f32 %v9463_v58, %v621_v14  ;;  %v623_v63 = vpop.f32.mrb[35].mxu0  ;;  %v9600_v39 = vpop.f32.mrb[49].mxu1 }
 0x1c2   : > { %v9602_v57 = vpop.f32.mrb[50].mxu1 }
 0x1c3   : > { %12694 = vst [vmem:[#allocation65_spill] sm:$0xff] %v9598_v20  ;;  %12695 = vst [vmem:[#allocation66_spill] sm:$0xff] %v9602_v57  ;;  %833 = vmatmul.mubr.bf16.gmra.mrb[140].mxu0 %v9338_v8  ;;  %v9605_v28 = vpop.f32.mrb[51].mxu1  ;;  %v8672_v57 = vld [vmem:[#allocation4 + $0x208] sm:$0xff]  }
 0x1c4   : > { %8128 = vmatprep.mubr.bf16.mxu0 %v9151_v13 }
 0x1c5   : > { %1556 = vmatmul.mubr.bf16.gmra.mrb[156].mxu1 %v9267_v31 }
 0x1c6   : > { %v626_v6 = vpop.f32.mrb[36].mxu0  ;;  %1563 = vmatprep.mubr.bf16.mxu1 %v9281_v38 }
 0x1c7   : > { %v9611_v30 = vadd.f32 %v9454_v12, %v626_v6  ;;  %v628_v58 = vpop.f32.mrb[37].mxu0  ;;  %v8674_v12 = vld [vmem:[#allocation4 + $0x210] sm:$0xff]  }
 0x1c8   : > { %v629_v63 = vpop.f32.mrb[38].mxu0  ;;  %v9613_v36 = vpop.f32.mrb[52].mxu1 }
 0x1c9   : > { %12696 = vst [vmem:[#allocation67_spill] sm:$0xff] %v9611_v30  ;;  %12697 = vst [vmem:[#allocation68_spill] sm:$0xff] %v9613_v36  ;;  %v9616_v14 = vadd.f32 %v9460_v60, %v629_v63  ;;  %v631_v20 = vpop.f32.mrb[39].mxu0  ;;  %v9618_v35 = vpop.f32.mrb[53].mxu1 }
 0x1ca   : > { %v9620_v23 = vpop.f32.mrb[54].mxu1 }
 0x1cb   : > { %12698 = vst [vmem:[#allocation69_spill] sm:$0xff] %v9616_v14  ;;  %12699 = vst [vmem:[#allocation70_spill] sm:$0xff] %v9620_v23  ;;  %8129 = vmatmul.mubr.bf16.vlgmr.msra.gmra.mrb[144].mxu0 %v9162_v24  ;;  %v9623_v13 = vpop.f32.mrb[55].mxu1  ;;  %v8676_v23 = vld [vmem:[#allocation4 + $0x218] sm:$0xff]  }
 0x1cc   : > { %8201 = vmatpush3.bf16.msra.mxu0 %v9399_v52  ;;  %8132 = vmatprep.mubr.bf16.mxu0 %v9165_v25 }
 0x1cd   : > { %1564 = vmatmul.mubr.bf16.gmra.mrb[160].mxu1 %v9270_v34  ;;  %8202 = vmatprep.subr.bf16.mxu0 %v8672_v57 }
 0x1ce   : > { %v634_v60 = vpop.f32.mrb[40].mxu0  ;;  %1571 = vmatprep.mubr.bf16.mxu1 %v9288_v43 }
 0x1cf   : > { %v9630_v20 = vadd.f32 %v9474_v0, %v634_v60  ;;  %v636_v6 = vpop.f32.mrb[41].mxu0  ;;  %v8678_v0 = vld [vmem:[#allocation4 + $0x220] sm:$0xff]  }
 0x1d0   : > { %v637_v58 = vpop.f32.mrb[42].mxu0  ;;  %v9632_v63 = vpop.f32.mrb[56].mxu1  ;;  %8203 = vmatpush3.bf16.msra.mxu0 %v8672_v57 }
 0x1d1   : > { %12700 = vst [vmem:[#allocation71_spill] sm:$0xff] %v9630_v20  ;;  %12701 = vst [vmem:[#allocation72_spill] sm:$0xff] %v9632_v63  ;;  %v9635_v14 = vadd.f32 %v9479_v46, %v637_v58  ;;  %v639_v52 = vpop.f32.mrb[43].mxu0  ;;  %v9637_v30 = vpop.f32.mrb[57].mxu1  ;;  %8204 = vmatprep.subr.bf16.mxu0 %v8674_v12  ;;  %v8680_v20 = vld [vmem:[#allocation4 + $0x228] sm:$0xff]  }
 0x1d2   : > { %v9639_v36 = vpop.f32.mrb[58].mxu1 }
 0x1d3   : > { %12702 = vst [vmem:[#allocation73_spill] sm:$0xff] %v9635_v14  ;;  %12703 = vst [vmem:[#allocation74_spill] sm:$0xff] %v9639_v36  ;;  %8133 = vmatmul.mubr.bf16.gmra.mrb[148].mxu0 %v9175_v32  ;;  %v9642_v25 = vpop.f32.mrb[59].mxu1 }
 0x1d4   : > { %8136 = vmatprep.mubr.bf16.mxu0 %v9178_v33  ;;  %8205 = vmatpush3.bf16.msra.mxu0 %v8674_v12 }
 0x1d5   : > { %1572 = vmatmul.mubr.bf16.gmra.mrb[164].mxu1 %v9278_v37  ;;  %8206 = vmatprep.subr.bf16.mxu0 %v8676_v23 }
 0x1d6   : > { %v642_v46 = vpop.f32.mrb[44].mxu0  ;;  %1579 = vmatprep.mubr.bf16.mxu1 %v9291_v44 }
 0x1d7   : > { %v9648_v57 = vadd.f32 %v9470_v19, %v642_v46  ;;  %v644_v60 = vpop.f32.mrb[45].mxu0  ;;  %v8682_v19 = vld [vmem:[#allocation4 + $0x230] sm:$0xff]  }
 0x1d8   : > { %v645_v6 = vpop.f32.mrb[46].mxu0  ;;  %v9650_v58 = vpop.f32.mrb[60].mxu1  ;;  %8207 = vmatpush3.bf16.msra.mxu0 %v8676_v23 }
 0x1d9   : > { %12704 = vst [vmem:[#allocation75_spill] sm:$0xff] %v9648_v57  ;;  %12705 = vst [vmem:[#allocation76_spill] sm:$0xff] %v9650_v58  ;;  %v9653_v52 = vadd.f32 %v9476_v21, %v645_v6  ;;  %v647_v14 = vpop.f32.mrb[47].mxu0  ;;  %v9655_v12 = vpop.f32.mrb[61].mxu1  ;;  %8208 = vmatprep.subr.bf16.mxu0 %v8678_v0  ;;  %v8683_v57 = vld [vmem:[#allocation4 + $0x238] sm:$0xff]  }
 0x1da   : > { %v9657_v36 = vpop.f32.mrb[62].mxu1 }
 0x1db   : > { %12706 = vst [vmem:[#allocation77_spill] sm:$0xff] %v9653_v52  ;;  %12707 = vst [vmem:[#allocation78_spill] sm:$0xff] %v9657_v36  ;;  %8137 = vmatmul.mubr.bf16.gmra.mrb[152].mxu0 %v9187_v40  ;;  %v9660_v63 = vpop.f32.mrb[63].mxu1 }
 0x1dc   : > { %8140 = vmatprep.mubr.bf16.mxu0 %v9190_v41  ;;  %8209 = vmatpush3.bf16.msra.mxu0 %v8678_v0 }
 0x1dd   : > { %1580 = vmatmul.mubr.bf16.gmra.mrb[168].mxu1 %v9281_v38  ;;  %8210 = vmatprep.subr.bf16.mxu0 %v8680_v20 }
 0x1de   : > { %v650_v21 = vpop.f32.mrb[48].mxu0  ;;  %1587 = vmatprep.mubr.bf16.mxu1 %v9298_v49 }
 0x1df   : > { %v9666_v23 = vadd.f32 %v9491_v62, %v650_v21  ;;  %v652_v14 = vpop.f32.mrb[49].mxu0 }
 0x1e0   : > { %v653_v46 = vpop.f32.mrb[50].mxu0  ;;  %v9668_v60 = vpop.f32.mrb[64].mxu1  ;;  %8211 = vmatpush3.bf16.msra.mxu0 %v8680_v20 }
 0x1e1   : > { %12708 = vst [vmem:[#allocation79_spill] sm:$0xff] %v9666_v23  ;;  %12709 = vst [vmem:[#allocation80_spill] sm:$0xff] %v9668_v60  ;;  %v9671_v6 = vadd.f32 %v9496_v1, %v653_v46  ;;  %v655_v52 = vpop.f32.mrb[51].mxu0  ;;  %v9673_v0 = vpop.f32.mrb[65].mxu1  ;;  %8212 = vmatprep.subr.bf16.mxu0 %v8682_v19  ;;  %v12712_v1 = vld [vmem:[#allocation28_spill] sm:$0xff] }
 0x1e2   : > { %v9675_v36 = vpop.f32.mrb[66].mxu1 }
 0x1e3   : > { %12710 = vst [vmem:[#allocation81_spill] sm:$0xff] %v9671_v6  ;;  %12711 = vst [vmem:[#allocation82_spill] sm:$0xff] %v9675_v36  ;;  %8141 = vmatmul.mubr.bf16.gmra.mrb[156].mxu0 %v9199_v48  ;;  %v9678_v58 = vpop.f32.mrb[67].mxu1  ;;  %v12717_v36 = vld [vmem:[#allocation24_spill] sm:$0xff] }
 0x1e4   : > { %8144 = vmatprep.mubr.bf16.mxu0 %v9202_v51  ;;  %8213 = vmatpush3.bf16.msra.mxu0 %v8682_v19 }
 0x1e5   : > { %1588 = vmatmul.mubr.bf16.gmra.mrb[172].mxu1 %v9288_v43  ;;  %8214 = vmatprep.subr.bf16.mxu0 %v8683_v57 }
 0x1e6   : > { %v658_v62 = vpop.f32.mrb[52].mxu0  ;;  %1595 = vmatprep.mubr.bf16.mxu1 %v12712_v1 }
 0x1e7   : > { %v9684_v20 = vadd.f32 %v9486_v53, %v658_v62  ;;  %v660_v52 = vpop.f32.mrb[53].mxu0  ;;  %v12719_v53 = vld [vmem:[#allocation25_spill] sm:$0xff] }
 0x1e8   : > { %v661_v21 = vpop.f32.mrb[54].mxu0  ;;  %v9686_v14 = vpop.f32.mrb[68].mxu1  ;;  %8215 = vmatpush3.bf16.msra.mxu0 %v8683_v57 }
 0x1e9   : > { %12713 = vst [vmem:[#allocation28_spill] sm:$0xff] %v9684_v20  ;;  %12714 = vst [vmem:[#allocation83_spill] sm:$0xff] %v9686_v14  ;;  %v9689_v46 = vadd.f32 %v9493_v50, %v661_v21  ;;  %v663_v6 = vpop.f32.mrb[55].mxu0  ;;  %v9691_v23 = vpop.f32.mrb[69].mxu1  ;;  %4487 = vmatprep.subr.bf16.mxu0 %v12670_v47  ;;  %v12724_v14 = vld [vmem:[#allocation27_spill] sm:$0xff] }
 0x1ea   : > { %v9694_v19 = vpop.f32.mrb[70].mxu1 }
 0x1eb   : > { %12715 = vst [vmem:[#allocation84_spill] sm:$0xff] %v9689_v46  ;;  %12716 = vst [vmem:[#allocation85_spill] sm:$0xff] %v9694_v19  ;;  %8145 = vmatmul.mubr.bf16.gmra.mrb[160].mxu0 %v12717_v36  ;;  %v9697_v60 = vpop.f32.mrb[71].mxu1 }
 0x1ec   : > { %12718 = vst [vmem:[#allocation24_spill] sm:$0xff] %v9697_v60  ;;  %8148 = vmatprep.mubr.bf16.mxu0 %v12719_v53 }
 0x1ed   : > { %1596 = vmatmul.mubr.bf16.gmra.mrb[176].mxu1 %v9291_v44 }
 0x1ee   : > { %v666_v62 = vpop.f32.mrb[56].mxu0  ;;  %1603 = vmatprep.mubr.bf16.mxu1 %v9308_v54 }
 0x1ef   : > { %v9703_v50 = vadd.f32 %v9509_v42, %v666_v62  ;;  %v668_v57 = vpop.f32.mrb[57].mxu0  ;;  %v12725_v62 = vld [vmem:[#allocation44_spill] sm:$0xff] }
 0x1f0   : > { %v669_v6 = vpop.f32.mrb[58].mxu0  ;;  %v9705_v52 = vpop.f32.mrb[72].mxu1 }
 0x1f1   : > { %12720 = vst [vmem:[#allocation25_spill] sm:$0xff] %v9703_v50  ;;  %12721 = vst [vmem:[#allocation86_spill] sm:$0xff] %v9705_v52  ;;  %v9708_v21 = vadd.f32 %v9514_v9, %v669_v6  ;;  %v671_v46 = vpop.f32.mrb[59].mxu0  ;;  %v1391_v20 = vpop.f32.mrb[73].mxu1 }
 0x1f2   : > { %v9710_v19 = vpop.f32.mrb[74].mxu1  ;;  %v12727_v20 = vld [vmem:[#allocation46_spill] sm:$0xff] }
 0x1f3   : > { %12722 = vst [vmem:[#allocation87_spill] sm:$0xff] %v9708_v21  ;;  %12723 = vst [vmem:[#allocation88_spill] sm:$0xff] %v9710_v19  ;;  %8149 = vmatmul.mubr.bf16.gmra.mrb[164].mxu0 %v12724_v14  ;;  %v1394_v60 = vpop.f32.mrb[75].mxu1 }
 0x1f4   : > { %8152 = vmatprep.mubr.bf16.mxu0 %v9234_v10 }
 0x1f5   : > { %1604 = vmatmul.mubr.bf16.gmra.mrb[180].mxu1 %v9298_v49 }
 0x1f6   : > { %v674_v42 = vpop.f32.mrb[60].mxu0  ;;  %1611 = vmatprep.mubr.bf16.mxu1 %v9311_v55 }
 0x1f7   : > { %v9717_v57 = vadd.f32 %v12725_v62, %v674_v42  ;;  %v676_v50 = vpop.f32.mrb[61].mxu0 }
 0x1f8   : > { %v677_v9 = vpop.f32.mrb[62].mxu0  ;;  %v9719_v6 = vpop.f32.mrb[76].mxu1 }
 0x1f9   : > { %12726 = vst [vmem:[#allocation27_spill] sm:$0xff] %v9717_v57  ;;  %v9722_v46 = vadd.f32 %v12727_v20, %v677_v9  ;;  %v679_v21 = vpop.f32.mrb[63].mxu0  ;;  %v1399_v19 = vpop.f32.mrb[77].mxu1 }
 0x1fa   : > { %v9724_v60 = vpop.f32.mrb[78].mxu1 }
 0x1fb   : > { %12728 = vst [vmem:[#allocation44_spill] sm:$0xff] %v9722_v46  ;;  %8153 = vmatmul.mubr.bf16.gmra.mrb[168].mxu0 %v9243_v16  ;;  %v1402_v52 = vpop.f32.mrb[79].mxu1 }
 0x1fc   : > { %8156 = vmatprep.mubr.bf16.mxu0 %v9246_v17 }
 0x1fd   : > { %1612 = vmatmul.mubr.bf16.gmra.mrb[184].mxu1 %v12712_v1 }
 0x1fe   : > { %v682_v42 = vpop.f32.mrb[64].mxu0  ;;  %1619 = vmatprep.mubr.bf16.mxu1 %v9318_v59 }
 0x1ff   : > { %v9731_v50 = vadd.f32 %v9527_v2, %v682_v42  ;;  %v684_v62 = vpop.f32.mrb[65].mxu0  ;;  %v12733_v42 = vld [vmem:[#allocation48_spill] sm:$0xff] }
 0x200   : > { %v685_v9 = vpop.f32.mrb[66].mxu0  ;;  %v9733_v20 = vpop.f32.mrb[80].mxu1 }
 0x201   : > { %12729 = vst [vmem:[#allocation46_spill] sm:$0xff] %v9731_v50  ;;  %12730 = vst [vmem:[#allocation89_spill] sm:$0xff] %v9733_v20  ;;  %v9736_v19 = vadd.f32 %v9533_v22, %v685_v9  ;;  %v687_v21 = vpop.f32.mrb[67].mxu0  ;;  %v1407_v46 = vpop.f32.mrb[81].mxu1 }
 0x202   : > { %v9738_v52 = vpop.f32.mrb[82].mxu1  ;;  %v12735_v46 = vld [vmem:[#allocation50_spill] sm:$0xff] }
 0x203   : > { %12731 = vst [vmem:[#allocation90_spill] sm:$0xff] %v9736_v19  ;;  %12732 = vst [vmem:[#allocation91_spill] sm:$0xff] %v9738_v52  ;;  %8157 = vmatmul.mubr.bf16.gmra.mrb[172].mxu0 %v9255_v26  ;;  %v1410_v57 = vpop.f32.mrb[83].mxu1 }
 0x204   : > { %8160 = vmatprep.mubr.bf16.mxu0 %v9258_v27 }
 0x205   : > { %1620 = vmatmul.mubr.bf16.gmra.mrb[188].mxu1 %v9308_v54 }
 0x206   : > { %v690_v2 = vpop.f32.mrb[68].mxu0  ;;  %1627 = vmatprep.mubr.bf16.mxu1 %v9321_v61 }
 0x207   : > { %v9745_v62 = vadd.f32 %v12733_v42, %v690_v2  ;;  %v692_v50 = vpop.f32.mrb[69].mxu0 }
 0x208   : > { %v693_v22 = vpop.f32.mrb[70].mxu0  ;;  %v9747_v9 = vpop.f32.mrb[84].mxu1 }
 0x209   : > { %12734 = vst [vmem:[#allocation48_spill] sm:$0xff] %v9745_v62  ;;  %v9750_v21 = vadd.f32 %v12735_v46, %v693_v22  ;;  %v695_v19 = vpop.f32.mrb[71].mxu0  ;;  %v1415_v52 = vpop.f32.mrb[85].mxu1 }
 0x20a   : > { %v9752_v57 = vpop.f32.mrb[86].mxu1  ;;  %v12740_v19 = vld [vmem:[#allocation55_spill] sm:$0xff] }
 0x20b   : > { %12736 = vst [vmem:[#allocation50_spill] sm:$0xff] %v9750_v21  ;;  %12737 = vst [vmem:[#allocation92_spill] sm:$0xff] %v9752_v57  ;;  %8161 = vmatmul.mubr.bf16.gmra.mrb[176].mxu0 %v9267_v31  ;;  %v1418_v20 = vpop.f32.mrb[87].mxu1 }
 0x20c   : > { %8164 = vmatprep.mubr.bf16.mxu0 %v9270_v34 }
 0x20d   : > { %1628 = vmatmul.mubr.bf16.gmra.mrb[192].mxu1 %v9311_v55 }
 0x20e   : > { %v698_v2 = vpop.f32.mrb[72].mxu0  ;;  %1635 = vmatprep.mubr.bf16.mxu1 %v9328_v3 }
 0x20f   : > { %v9759_v50 = vadd.f32 %v9546_v7, %v698_v2  ;;  %v700_v42 = vpop.f32.mrb[73].mxu0  ;;  %v12743_v2 = vld [vmem:[#allocation52_spill] sm:$0xff] }
 0x210   : > { %v701_v22 = vpop.f32.mrb[74].mxu0  ;;  %v9761_v46 = vpop.f32.mrb[88].mxu1 }
 0x211   : > { %12738 = vst [vmem:[#allocation93_spill] sm:$0xff] %v9759_v50  ;;  %12739 = vst [vmem:[#allocation94_spill] sm:$0xff] %v9761_v46  ;;  %v9764_v52 = vadd.f32 %v12740_v19, %v701_v22  ;;  %v703_v21 = vpop.f32.mrb[75].mxu0  ;;  %v1423_v62 = vpop.f32.mrb[89].mxu1 }
 0x212   : > { %v9766_v20 = vpop.f32.mrb[90].mxu1  ;;  %v12745_v62 = vld [vmem:[#allocation54_spill] sm:$0xff] }
 0x213   : > { %12741 = vst [vmem:[#allocation55_spill] sm:$0xff] %v9764_v52  ;;  %12742 = vst [vmem:[#allocation95_spill] sm:$0xff] %v9766_v20  ;;  %8165 = vmatmul.mubr.bf16.gmra.mrb[180].mxu0 %v9278_v37  ;;  %v1426_v57 = vpop.f32.mrb[91].mxu1 }
 0x214   : > { %8168 = vmatprep.mubr.bf16.mxu0 %v9281_v38 }
 0x215   : > { %1636 = vmatmul.mubr.bf16.gmra.mrb[196].mxu1 %v9318_v59 }
 0x216   : > { %v706_v7 = vpop.f32.mrb[76].mxu0  ;;  %1643 = vmatprep.mubr.bf16.mxu1 %v9331_v4 }
 0x217   : > { %v9773_v42 = vadd.f32 %v12743_v2, %v706_v7  ;;  %v708_v50 = vpop.f32.mrb[77].mxu0 }
 0x218   : > { %v709_v22 = vpop.f32.mrb[78].mxu0  ;;  %v9775_v19 = vpop.f32.mrb[92].mxu1 }
 0x219   : > { %12744 = vst [vmem:[#allocation52_spill] sm:$0xff] %v9773_v42  ;;  %v9778_v21 = vadd.f32 %v12745_v62, %v709_v22  ;;  %v711_v52 = vpop.f32.mrb[79].mxu0  ;;  %v1431_v20 = vpop.f32.mrb[93].mxu1 }
 0x21a   : > { %v9780_v57 = vpop.f32.mrb[94].mxu1 }
 0x21b   : > { %12746 = vst [vmem:[#allocation54_spill] sm:$0xff] %v9778_v21  ;;  %8169 = vmatmul.mubr.bf16.gmra.mrb[184].mxu0 %v9288_v43  ;;  %v1434_v46 = vpop.f32.mrb[95].mxu1 }
 0x21c   : > { %8172 = vmatprep.mubr.bf16.mxu0 %v9291_v44 }
 0x21d   : > { %1644 = vmatmul.mubr.bf16.gmra.mrb[200].mxu1 %v9321_v61 }
 0x21e   : > { %v714_v7 = vpop.f32.mrb[80].mxu0  ;;  %1651 = vmatprep.mubr.bf16.mxu1 %v9338_v8 }
 0x21f   : > { %v9787_v50 = vadd.f32 %v9564_v29, %v714_v7  ;;  %v716_v2 = vpop.f32.mrb[81].mxu0 }
 0x220   : > { %v717_v22 = vpop.f32.mrb[82].mxu0  ;;  %v9789_v62 = vpop.f32.mrb[96].mxu1 }
 0x221   : > { %12747 = vst [vmem:[#allocation96_spill] sm:$0xff] %v9787_v50  ;;  %12748 = vst [vmem:[#allocation97_spill] sm:$0xff] %v9789_v62  ;;  %v9792_v52 = vadd.f32 %v9569_v45, %v717_v22  ;;  %v719_v20 = vpop.f32.mrb[83].mxu0  ;;  %v1439_v21 = vpop.f32.mrb[97].mxu1  ;;  %v8684_v45 = vld [vmem:[#allocation7 + $0x80] sm:$0xff]  }
 0x222   : > { %v9794_v46 = vpop.f32.mrb[98].mxu1  ;;  %v12752_v21 = vld [vmem:[#allocation58_spill] sm:$0xff]  ;;  %8288 = vmatprep.subr.bf16.mxu1 %v8684_v45 }
 0x223   : > { %12749 = vst [vmem:[#allocation98_spill] sm:$0xff] %v9792_v52  ;;  %12750 = vst [vmem:[#allocation99_spill] sm:$0xff] %v9794_v46  ;;  %8173 = vmatmul.mubr.bf16.gmra.mrb[188].mxu0 %v9298_v49  ;;  %v1442_v42 = vpop.f32.mrb[99].mxu1 }
 0x224   : > { %8176 = vmatprep.mubr.bf16.mxu0 %v12712_v1 }
 0x225   : > { %1652 = vmatmul.mubr.bf16.gmra.mrb[204].mxu1 %v9328_v3 }
 0x226   : > { %v722_v29 = vpop.f32.mrb[84].mxu0  ;;  %1659 = vmatprep.mubr.bf16.mxu1 %v9341_v11 }
 0x227   : > { %v9801_v7 = vadd.f32 %v9559_v56, %v722_v29  ;;  %v724_v2 = vpop.f32.mrb[85].mxu0 }
 0x228   : > { %v725_v22 = vpop.f32.mrb[86].mxu0  ;;  %v9803_v20 = vpop.f32.mrb[100].mxu1 }
 0x229   : > { %12751 = vst [vmem:[#allocation100_spill] sm:$0xff] %v9801_v7  ;;  %v9806_v52 = vadd.f32 %v12752_v21, %v725_v22  ;;  %v727_v50 = vpop.f32.mrb[87].mxu0  ;;  %v1447_v42 = vpop.f32.mrb[101].mxu1 }
 0x22a   : > { %v9808_v46 = vpop.f32.mrb[102].mxu1 }
 0x22b   : > { %12753 = vst [vmem:[#allocation58_spill] sm:$0xff] %v9806_v52  ;;  %8177 = vmatmul.mubr.bf16.gmra.mrb[192].mxu0 %v9308_v54  ;;  %v1450_v62 = vpop.f32.mrb[103].mxu1 }
 0x22c   : > { %8180 = vmatprep.mubr.bf16.mxu0 %v9311_v55 }
 0x22d   : > { %1660 = vmatmul.mubr.bf16.gmra.mrb[208].mxu1 %v9331_v4 }
 0x22e   : > { %v730_v56 = vpop.f32.mrb[88].mxu0  ;;  %1667 = vmatprep.mubr.bf16.mxu1 %v9348_v18 }
 0x22f   : > { %v9815_v29 = vadd.f32 %v9582_v5, %v730_v56  ;;  %v732_v2 = vpop.f32.mrb[89].mxu0  ;;  %v12758_v56 = vld [vmem:[#allocation20_spill] sm:$0xff] }
 0x230   : > { %v733_v22 = vpop.f32.mrb[90].mxu0  ;;  %v9817_v50 = vpop.f32.mrb[104].mxu1  ;;  %v12759_v2 = vld [vmem:[#allocation60_spill] sm:$0xff] }
 0x231   : > { %12754 = vst [vmem:[#allocation101_spill] sm:$0xff] %v9815_v29  ;;  %12755 = vst [vmem:[#allocation102_spill] sm:$0xff] %v9817_v50  ;;  %v9820_v21 = vadd.f32 %v9587_v15, %v733_v22  ;;  %v735_v42 = vpop.f32.mrb[91].mxu0  ;;  %v1455_v52 = vpop.f32.mrb[105].mxu1 }
 0x232   : > { %v9822_v62 = vpop.f32.mrb[106].mxu1  ;;  %v12761_v52 = vld [vmem:[#allocation62_spill] sm:$0xff] }
 0x233   : > { %12756 = vst [vmem:[#allocation103_spill] sm:$0xff] %v9820_v21  ;;  %12757 = vst [vmem:[#allocation104_spill] sm:$0xff] %v9822_v62  ;;  %8181 = vmatmul.mubr.bf16.gmra.mrb[196].mxu0 %v9318_v59  ;;  %v1458_v7 = vpop.f32.mrb[107].mxu1  ;;  %v12763_v62 = vld [vmem:[#allocation22_spill] sm:$0xff] }
 0x234   : > { %8184 = vmatprep.mubr.bf16.mxu0 %v9321_v61 }
 0x235   : > { %1668 = vmatmul.mubr.bf16.gmra.mrb[212].mxu1 %v9338_v8 }
 0x236   : > { %v738_v5 = vpop.f32.mrb[92].mxu0  ;;  %2583 = vmatprep.mubr.bf16.mxu1 %v12758_v56 }
 0x237   : > { %v9829_v29 = vadd.f32 %v12759_v2, %v738_v5  ;;  %v740_v50 = vpop.f32.mrb[93].mxu0  ;;  %v12764_v2 = vld [vmem:[#allocation23_spill] sm:$0xff] }
 0x238   : > { %v741_v15 = vpop.f32.mrb[94].mxu0  ;;  %v9831_v22 = vpop.f32.mrb[108].mxu1 }
 0x239   : > { %12760 = vst [vmem:[#allocation20_spill] sm:$0xff] %v9829_v29  ;;  %v9834_v42 = vadd.f32 %v12761_v52, %v741_v15  ;;  %v743_v21 = vpop.f32.mrb[95].mxu0  ;;  %v1463_v59 = vpop.f32.mrb[109].mxu1 }
 0x23a   : > { %v9836_v7 = vpop.f32.mrb[110].mxu1 }
 0x23b   : > { %12762 = vst [vmem:[#allocation60_spill] sm:$0xff] %v9834_v42  ;;  %8185 = vmatmul.mubr.bf16.gmra.mrb[200].mxu0 %v9328_v3  ;;  %v1466_v61 = vpop.f32.mrb[111].mxu1 }
 0x23c   : > { %8188 = vmatprep.mubr.bf16.mxu0 %v9331_v4 }
 0x23d   : > { %2584 = vmatmul.mubr.bf16.vlgmr.msra.gmra.mrb[216].mxu1 %v12763_v62 }
 0x23e   : > { %v746_v5 = vpop.f32.mrb[96].mxu0  ;;  %2591 = vmatprep.mubr.bf16.mxu1 %v12764_v2  ;;  %8289 = vmatpush3.bf16.msra.mxu1 %v8684_v45  ;;  %v12767_v45 = vld [vmem:[#allocation26_spill] sm:$0xff] }
 0x23f   : > { %v9843_v50 = vadd.f32 %v9600_v39, %v746_v5  ;;  %v748_v15 = vpop.f32.mrb[97].mxu0  ;;  %v12768_v5 = vld [vmem:[#allocation19_spill] sm:$0xff] }
 0x240   : > { %v749_v52 = vpop.f32.mrb[98].mxu0  ;;  %v9845_v21 = vpop.f32.mrb[112].mxu1  ;;  %v12769_v15 = vld [vmem:[#allocation64_spill] sm:$0xff] }
 0x241   : > { %12765 = vst [vmem:[#allocation62_spill] sm:$0xff] %v9843_v50  ;;  %v9848_v59 = vadd.f32 %v9605_v28, %v749_v52  ;;  %v751_v42 = vpop.f32.mrb[99].mxu0  ;;  %v1471_v61 = vpop.f32.mrb[113].mxu1 }
 0x242   : > { %v9850_v29 = vpop.f32.mrb[114].mxu1  ;;  %v12771_v42 = vld [vmem:[#allocation66_spill] sm:$0xff] }
 0x243   : > { %12766 = vst [vmem:[#allocation22_spill] sm:$0xff] %v9848_v59  ;;  %8189 = vmatmul.mubr.bf16.gmra.mrb[204].mxu0 %v9338_v8  ;;  %v1474_v62 = vpop.f32.mrb[115].mxu1 }
 0x244   : > { %8192 = vmatprep.mubr.bf16.mxu0 %v9341_v11  ;;  %v12773_v11 = vld [vmem:[#allocation35_spill] sm:$0xff] }
 0x245   : > { %2592 = vmatmul.mubr.bf16.gmra.mrb[220].mxu1 %v12767_v45 }
 0x246   : > { %v754_v39 = vpop.f32.mrb[100].mxu0  ;;  %2599 = vmatprep.mubr.bf16.mxu1 %v12768_v5 }
 0x247   : > { %v9857_v50 = vadd.f32 %v12769_v15, %v754_v39  ;;  %v756_v4 = vpop.f32.mrb[101].mxu0 }
 0x248   : > { %v757_v28 = vpop.f32.mrb[102].mxu0  ;;  %v9859_v52 = vpop.f32.mrb[116].mxu1 }
 0x249   : > { %12770 = vst [vmem:[#allocation23_spill] sm:$0xff] %v9857_v50  ;;  %v9862_v61 = vadd.f32 %v12771_v42, %v757_v28  ;;  %v759_v59 = vpop.f32.mrb[103].mxu0  ;;  %v1479_v8 = vpop.f32.mrb[117].mxu1  ;;  %v8687_v28 = vld [vmem:[#allocation7 + $0x88] sm:$0xff]  }
 0x24a   : > { %v9864_v62 = vpop.f32.mrb[118].mxu1  ;;  %8290 = vmatprep.subr.bf16.mxu1 %v8687_v28 }
 0x24b   : > { %12772 = vst [vmem:[#allocation26_spill] sm:$0xff] %v9862_v61  ;;  %8193 = vmatmul.mubr.bf16.gmra.mrb[208].mxu0 %v9348_v18  ;;  %v1482_v45 = vpop.f32.mrb[119].mxu1  ;;  %8291 = vmatpush3.bf16.msra.mxu1 %v8687_v28 }
 0x24c   : > { %8196 = vmatprep.mubr.bf16.mxu0 %v12773_v11 }
 0x24d   : > { %2600 = vmatmul.mubr.bf16.gmra.mrb[224].mxu1 %v12758_v56  ;;  %v12776_v56 = vld [vmem:[#allocation36_spill] sm:$0xff] }
 0x24e   : > { %v762_v39 = vpop.f32.mrb[104].mxu0  ;;  %2607 = vmatprep.mubr.bf16.mxu1 %v9162_v24 }
 0x24f   : > { %v9871_v4 = vadd.f32 %v9618_v35, %v762_v39  ;;  %v764_v15 = vpop.f32.mrb[105].mxu0  ;;  %v12777_v39 = vld [vmem:[#allocation21_spill] sm:$0xff] }
 0x250   : > { %v765_v42 = vpop.f32.mrb[106].mxu0  ;;  %v9873_v59 = vpop.f32.mrb[120].mxu1  ;;  %v12778_v15 = vld [vmem:[#allocation68_spill] sm:$0xff] }
 0x251   : > { %12774 = vst [vmem:[#allocation19_spill] sm:$0xff] %v9871_v4  ;;  %v9876_v8 = vadd.f32 %v9623_v13, %v765_v42  ;;  %v767_v61 = vpop.f32.mrb[107].mxu0  ;;  %v1487_v45 = vpop.f32.mrb[121].mxu1 }
 0x252   : > { %v9878_v50 = vpop.f32.mrb[122].mxu1  ;;  %v8685_v45 = vld [vmem:[#allocation7] sm:$0xff]  }
 0x253   : > { %12775 = vst [vmem:[#allocation64_spill] sm:$0xff] %v9876_v8  ;;  %8197 = vmatmul.mubr.bf16.gmra.mrb[212].mxu0 %v12776_v56  ;;  %v1490_v11 = vpop.f32.mrb[123].mxu1  ;;  %v12780_v8 = vld [vmem:[#allocation70_spill] sm:$0xff] }
 0x254   : > { %8216 = vmatprep.mubr.bf16.mxu0 %v12768_v5 }
 0x255   : > { %2608 = vmatmul.mubr.bf16.gmra.mrb[228].mxu1 %v12764_v2 }
 0x256   : > { %v770_v35 = vpop.f32.mrb[108].mxu0  ;;  %2615 = vmatprep.mubr.bf16.mxu1 %v12777_v39 }
 0x257   : > { %v9885_v4 = vadd.f32 %v12778_v15, %v770_v35  ;;  %v772_v13 = vpop.f32.mrb[109].mxu0  ;;  %v8686_v35 = vld [vmem:[#allocation7 + $0x8] sm:$0xff]  }
 0x258   : > { %v773_v61 = vpop.f32.mrb[110].mxu0  ;;  %v9887_v42 = vpop.f32.mrb[124].mxu1 }
 0x259   : > { %12779 = vst [vmem:[#allocation66_spill] sm:$0xff] %v9885_v4  ;;  %v9890_v28 = vadd.f32 %v12780_v8, %v773_v61  ;;  %v775_v56 = vpop.f32.mrb[111].mxu0  ;;  %v1495_v11 = vpop.f32.mrb[125].mxu1 }
 0x25a   : > { %v9892_v18 = vpop.f32.mrb[126].mxu1  ;;  %v8688_v11 = vld [vmem:[#allocation7 + $0x10] sm:$0xff]  }
 0x25b   : > { %12781 = vst [vmem:[#allocation21_spill] sm:$0xff] %v9890_v28  ;;  %8217 = vmatmul.mubr.bf16.vlgmr.msra.gmra.mrb[216].mxu0 %v9162_v24  ;;  %v1498_v2 = vpop.f32.mrb[127].mxu1 }
 0x25c   : > { %8220 = vmatprep.mubr.bf16.mxu0 %v12777_v39  ;;  %4488 = vmatpush1.bf16.msra.mxu0 %v8685_v45 }
 0x25d   : > { %2616 = vmatmul.mubr.bf16.gmra.mrb[232].mxu1 %v12768_v5  ;;  %4489 = vmatprep.subr.bf16.mxu0 %v12670_v47 }
 0x25e   : > { %v778_v15 = vpop.f32.mrb[112].mxu0  ;;  %2623 = vmatprep.mubr.bf16.mxu1 %v9175_v32 }
 0x25f   : > { %v9900_v8 = vadd.f32 %v9637_v30, %v778_v15  ;;  %v780_v56 = vpop.f32.mrb[113].mxu0  ;;  %v8689_v30 = vld [vmem:[#allocation7 + $0x18] sm:$0xff]  }
 0x260   : > { %v781_v13 = vpop.f32.mrb[114].mxu0  ;;  %v9902_v61 = vpop.f32.mrb[128].mxu1  ;;  %4490 = vmatpush1.bf16.msra.mxu0 %v8686_v35 }
 0x261   : > { %12782 = vst [vmem:[#allocation68_spill] sm:$0xff] %v9900_v8  ;;  %v9905_v2 = vadd.f32 %v9642_v25, %v781_v13  ;;  %v783_v45 = vpop.f32.mrb[115].mxu0  ;;  %v1503_v28 = vpop.f32.mrb[129].mxu1  ;;  %4491 = vmatprep.subr.bf16.mxu0 %v12670_v47  ;;  %v12785_v25 = vld [vmem:[#allocation72_spill] sm:$0xff] }
 0x262   : > { %v9908_v5 = vpop.f32.mrb[130].mxu1  ;;  %v12787_v45 = vld [vmem:[#allocation74_spill] sm:$0xff] }
 0x263   : > { %12783 = vst [vmem:[#allocation70_spill] sm:$0xff] %v9905_v2  ;;  %12784 = vst [vmem:[#allocation105_spill] sm:$0xff] %v9908_v5  ;;  %8221 = vmatmul.mubr.bf16.gmra.mrb[220].mxu0 %v9175_v32  ;;  %v1506_v4 = vpop.f32.mrb[131].mxu1 }
 0x264   : > { %8224 = vmatprep.mubr.bf16.mxu0 %v9178_v33  ;;  %4492 = vmatpush1.bf16.msra.mxu0 %v8688_v11  ;;  %v8690_v4 = vld [vmem:[#allocation7 + $0x20] sm:$0xff]  }
 0x265   : > { %2624 = vmatmul.mubr.bf16.gmra.mrb[236].mxu1 %v9162_v24  ;;  %4493 = vmatprep.subr.bf16.mxu0 %v12670_v47 }
 0x266   : > { %v786_v35 = vpop.f32.mrb[116].mxu0  ;;  %2631 = vmatprep.mubr.bf16.mxu1 %v9178_v33 }
 0x267   : > { %v9916_v28 = vadd.f32 %v12785_v25, %v786_v35  ;;  %v788_v15 = vpop.f32.mrb[117].mxu0  ;;  %v8691_v35 = vld [vmem:[#allocation7 + $0x28] sm:$0xff]  }
 0x268   : > { %v789_v56 = vpop.f32.mrb[118].mxu0  ;;  %v9918_v13 = vpop.f32.mrb[132].mxu1  ;;  %4494 = vmatpush1.bf16.msra.mxu0 %v8689_v30  ;;  %v8692_v15 = vld [vmem:[#allocation7 + $0x90] sm:$0xff]  }
 0x269   : > { %12786 = vst [vmem:[#allocation72_spill] sm:$0xff] %v9916_v28  ;;  %v9921_v2 = vadd.f32 %v12787_v45, %v789_v56  ;;  %v791_v11 = vpop.f32.mrb[119].mxu0  ;;  %v1511_v8 = vpop.f32.mrb[133].mxu1  ;;  %4495 = vmatprep.subr.bf16.mxu0 %v12670_v47  ;;  %8292 = vmatprep.subr.bf16.mxu1 %v8692_v15 }
 0x26a   : > { %v9924_v24 = vpop.f32.mrb[134].mxu1  ;;  %8293 = vmatpush3.bf16.msra.mxu1 %v8692_v15 }
 0x26b   : > { %12788 = vst [vmem:[#allocation74_spill] sm:$0xff] %v9921_v2  ;;  %8225 = vmatmul.mubr.bf16.gmra.mrb[224].mxu0 %v9187_v40  ;;  %v1514_v5 = vpop.f32.mrb[135].mxu1  ;;  %v8693_v2 = vld [vmem:[#allocation7 + $0x30] sm:$0xff]  }
 0x26c   : > { %8228 = vmatprep.mubr.bf16.mxu0 %v9190_v41  ;;  %4496 = vmatpush1.bf16.msra.mxu0 %v8690_v4 }
 0x26d   : > { %2632 = vmatmul.mubr.bf16.gmra.mrb[240].mxu1 %v12777_v39  ;;  %4497 = vmatprep.subr.bf16.mxu0 %v12670_v47 }
 0x26e   : > { %v794_v30 = vpop.f32.mrb[120].mxu0  ;;  %2639 = vmatprep.mubr.bf16.mxu1 %v9187_v40 }
 0x26f   : > { %v9932_v8 = vadd.f32 %v9655_v12, %v794_v30  ;;  %v796_v25 = vpop.f32.mrb[121].mxu0 }
 0x270   : > { %v797_v56 = vpop.f32.mrb[122].mxu0  ;;  %v9934_v45 = vpop.f32.mrb[136].mxu1  ;;  %4498 = vmatpush1.bf16.msra.mxu0 %v8691_v35  ;;  %v12791_v35 = vld [vmem:[#allocation76_spill] sm:$0xff] }
 0x271   : > { %12789 = vst [vmem:[#allocation106_spill] sm:$0xff] %v9932_v8  ;;  %v9937_v5 = vadd.f32 %v9660_v63, %v797_v56  ;;  %v799_v4 = vpop.f32.mrb[123].mxu0  ;;  %v1519_v11 = vpop.f32.mrb[137].mxu1  ;;  %4499 = vmatprep.subr.bf16.mxu0 %v12670_v47 }
 0x272   : > { %v9940_v39 = vpop.f32.mrb[138].mxu1  ;;  %v12793_v4 = vld [vmem:[#allocation78_spill] sm:$0xff] }
 0x273   : > { %12790 = vst [vmem:[#allocation107_spill] sm:$0xff] %v9937_v5  ;;  %8229 = vmatmul.mubr.bf16.gmra.mrb[228].mxu0 %v9199_v48  ;;  %v1522_v12 = vpop.f32.mrb[139].mxu1 }
 0x274   : > { %8232 = vmatprep.mubr.bf16.mxu0 %v9202_v51  ;;  %4500 = vmatpush1.bf16.msra.mxu0 %v8693_v2 }
 0x275   : > { %2640 = vmatmul.mubr.bf16.gmra.mrb[244].mxu1 %v9175_v32  ;;  %4501 = vmatprep.subr.bf16.mxu0 %v12670_v47 }
 0x276   : > { %v802_v63 = vpop.f32.mrb[124].mxu0  ;;  %2647 = vmatprep.mubr.bf16.mxu1 %v9190_v41 }
 0x277   : > { %v9948_v30 = vadd.f32 %v12791_v35, %v802_v63  ;;  %v804_v25 = vpop.f32.mrb[125].mxu0  ;;  %v8694_v35 = vld [vmem:[#allocation7 + $0x38] sm:$0xff]  }
 0x278   : > { %v805_v56 = vpop.f32.mrb[126].mxu0  ;;  %v9950_v15 = vpop.f32.mrb[140].mxu1  ;;  %4502 = vmatpush1.bf16.msra.mxu0 %v8694_v35 }
 0x279   : > { %12792 = vst [vmem:[#allocation76_spill] sm:$0xff] %v9948_v30  ;;  %v9953_v11 = vadd.f32 %v12793_v4, %v805_v56  ;;  %v807_v12 = vpop.f32.mrb[127].mxu0  ;;  %v1527_v5 = vpop.f32.mrb[141].mxu1  ;;  %4503 = vmatprep.subr.bf16.mxu0 %v12670_v47 }
 0x27a   : > { %v9955_v2 = vpop.f32.mrb[142].mxu1 }
 0x27b   : > { %12794 = vst [vmem:[#allocation78_spill] sm:$0xff] %v9953_v11  ;;  %8233 = vmatmul.mubr.bf16.gmra.mrb[232].mxu0 %v12717_v36  ;;  %v1530_v32 = vpop.f32.mrb[143].mxu1 }
 0x27c   : > { %8236 = vmatprep.mubr.bf16.mxu0 %v12719_v53 }
 0x27d   : > { %2648 = vmatmul.mubr.bf16.gmra.mrb[248].mxu1 %v9178_v33 }
 0x27e   : > { %v810_v63 = vpop.f32.mrb[128].mxu0  ;;  %2655 = vmatprep.mubr.bf16.mxu1 %v9199_v48 }
 0x27f   : > { %v9962_v25 = vadd.f32 %v9673_v0, %v810_v63  ;;  %v812_v56 = vpop.f32.mrb[129].mxu0  ;;  %v12797_v63 = vld [vmem:[#allocation80_spill] sm:$0xff] }
 0x280   : > { %v813_v4 = vpop.f32.mrb[130].mxu0  ;;  %v9964_v12 = vpop.f32.mrb[144].mxu1  ;;  %v8695_v56 = vld [vmem:[#allocation7 + $0x40] sm:$0xff]  }
 0x281   : > { %12795 = vst [vmem:[#allocation108_spill] sm:$0xff] %v9962_v25  ;;  %v9967_v5 = vadd.f32 %v9678_v58, %v813_v4  ;;  %v815_v32 = vpop.f32.mrb[131].mxu0  ;;  %v1535_v8 = vpop.f32.mrb[145].mxu1  ;;  %4504 = vmatpush1.bf16.msra.mxu0 %v8695_v56 }
 0x282   : > { %v9970_v33 = vpop.f32.mrb[146].mxu1  ;;  %v12799_v32 = vld [vmem:[#allocation82_spill] sm:$0xff]  ;;  %4505 = vmatprep.subr.bf16.mxu0 %v12670_v47 }
 0x283   : > { %12796 = vst [vmem:[#allocation109_spill] sm:$0xff] %v9967_v5  ;;  %v1538_v11 = vpop.f32.mrb[147].mxu1  ;;  %8237 = vmatmul.mubr.bf16.gmra.mrb[236].mxu0 %v12724_v14 }
 0x284   : > { %8240 = vmatprep.mubr.bf16.mxu0 %v9234_v10 }
 0x285   : > { %2656 = vmatmul.mubr.bf16.gmra.mrb[252].mxu1 %v9187_v40 }
 0x286   : > { %v818_v0 = vpop.f32.mrb[132].mxu0  ;;  %2663 = vmatprep.mubr.bf16.mxu1 %v9202_v51 }
 0x287   : > { %v9977_v35 = vadd.f32 %v12797_v63, %v818_v0  ;;  %v820_v58 = vpop.f32.mrb[133].mxu0 }
 0x288   : > { %v821_v8 = vpop.f32.mrb[134].mxu0  ;;  %v9979_v4 = vpop.f32.mrb[148].mxu1 }
 0x289   : > { %12798 = vst [vmem:[#allocation80_spill] sm:$0xff] %v9977_v35  ;;  %v9982_v5 = vadd.f32 %v12799_v32, %v821_v8  ;;  %v823_v11 = vpop.f32.mrb[135].mxu0  ;;  %v1543_v25 = vpop.f32.mrb[149].mxu1  ;;  %v12803_v32 = vld [vmem:[#allocation24_spill] sm:$0xff] }
 0x28a   : > { %v9984_v30 = vpop.f32.mrb[150].mxu1  ;;  %v8696_v25 = vld [vmem:[#allocation7 + $0x48] sm:$0xff]  }
 0x28b   : > { %12800 = vst [vmem:[#allocation82_spill] sm:$0xff] %v9982_v5  ;;  %v1546_v40 = vpop.f32.mrb[151].mxu1  ;;  %8241 = vmatmul.mubr.bf16.gmra.mrb[240].mxu0 %v9243_v16 }
 0x28c   : > { %8244 = vmatprep.mubr.bf16.mxu0 %v9246_v17  ;;  %4506 = vmatpush1.bf16.msra.mxu0 %v8696_v25  ;;  %v8698_v25 = vld [vmem:[#allocation7 + $0x50] sm:$0xff]  }
 0x28d   : > { %2664 = vmatmul.mubr.bf16.gmra.mrb[0].mxu1 %v9190_v41  ;;  %4507 = vmatprep.subr.bf16.mxu0 %v12670_v47 }
 0x28e   : > { %v826_v0 = vpop.f32.mrb[136].mxu0  ;;  %2671 = vmatprep.mubr.bf16.mxu1 %v12717_v36 }
 0x28f   : > { %v9992_v63 = vadd.f32 %v9691_v23, %v826_v0  ;;  %v828_v58 = vpop.f32.mrb[137].mxu0  ;;  %v12806_v0 = vld [vmem:[#allocation83_spill] sm:$0xff] }
 0x290   : > { %v829_v56 = vpop.f32.mrb[138].mxu0  ;;  %v9994_v8 = vpop.f32.mrb[152].mxu1  ;;  %4508 = vmatpush1.bf16.msra.mxu0 %v8698_v25 }
 0x291   : > { %12801 = vst [vmem:[#allocation110_spill] sm:$0xff] %v9992_v63  ;;  %12802 = vst [vmem:[#allocation111_spill] sm:$0xff] %v9994_v8  ;;  %v9997_v11 = vadd.f32 %v12803_v32, %v829_v56  ;;  %v831_v40 = vpop.f32.mrb[139].mxu0  ;;  %v1551_v5 = vpop.f32.mrb[153].mxu1  ;;  %4509 = vmatprep.subr.bf16.mxu0 %v12670_v47 }
 0x292   : > { %v9999_v35 = vpop.f32.mrb[154].mxu1  ;;  %v8697_v5 = vld [vmem:[#allocation7 + $0x98] sm:$0xff]  }
 0x293   : > { %12804 = vst [vmem:[#allocation24_spill] sm:$0xff] %v9997_v11  ;;  %12805 = vst [vmem:[#allocation112_spill] sm:$0xff] %v9999_v35  ;;  %v1554_v41 = vpop.f32.mrb[155].mxu1  ;;  %8245 = vmatmul.mubr.bf16.gmra.mrb[244].mxu0 %v9255_v26  ;;  %v12809_v11 = vld [vmem:[#allocation85_spill] sm:$0xff]  ;;  %8294 = vmatprep.subr.bf16.mxu1 %v8697_v5  ;;  %v12814_v35 = vld [vmem:[#allocation88_spill] sm:$0xff] }
 0x294   : > { %8248 = vmatprep.mubr.bf16.mxu0 %v9258_v27  ;;  %8295 = vmatpush3.bf16.msra.mxu1 %v8697_v5 }
 0x295   : > { %2672 = vmatmul.mubr.bf16.gmra.mrb[4].mxu1 %v9199_v48 }
 0x296   : > { %v834_v23 = vpop.f32.mrb[140].mxu0  ;;  %2679 = vmatprep.mubr.bf16.mxu1 %v12719_v53 }
 0x297   : > { %v10007_v58 = vadd.f32 %v12806_v0, %v834_v23  ;;  %v836_v56 = vpop.f32.mrb[141].mxu0 }
 0x298   : > { %v837_v32 = vpop.f32.mrb[142].mxu0  ;;  %v10009_v40 = vpop.f32.mrb[156].mxu1  ;;  %v12812_v56 = vld [vmem:[#allocation86_spill] sm:$0xff] }
 0x299   : > { %12807 = vst [vmem:[#allocation83_spill] sm:$0xff] %v10007_v58  ;;  %12808 = vst [vmem:[#allocation113_spill] sm:$0xff] %v10009_v40  ;;  %v10012_v41 = vadd.f32 %v12809_v11, %v837_v32  ;;  %v839_v63 = vpop.f32.mrb[143].mxu0  ;;  %v1559_v28 = vpop.f32.mrb[157].mxu1  ;;  %v8699_v11 = vld [vmem:[#allocation7 + $0x58] sm:$0xff]   ;;  %v12826_v40 = vld [vmem:[#allocation91_spill] sm:$0xff] }
 0x29a   : > { %v10014_v48 = vpop.f32.mrb[158].mxu1  ;;  %4510 = vmatpush1.bf16.msra.mxu0 %v8699_v11  ;;  %v12818_v11 = vld [vmem:[#allocation40_spill] sm:$0xff] }
 0x29b   : > { %12810 = vst [vmem:[#allocation85_spill] sm:$0xff] %v10012_v41  ;;  %12811 = vst [vmem:[#allocation114_spill] sm:$0xff] %v10014_v48  ;;  %v1562_v23 = vpop.f32.mrb[159].mxu1  ;;  %8249 = vmatmul.mubr.bf16.gmra.mrb[248].mxu0 %v9267_v31  ;;  %4511 = vmatprep.subr.bf16.mxu0 %v12670_v47 }
 0x29c   : > { %8252 = vmatprep.mubr.bf16.mxu0 %v9270_v34 }
 0x29d   : > { %2680 = vmatmul.mubr.bf16.gmra.mrb[8].mxu1 %v9202_v51 }
 0x29e   : > { %v8130_v0 = vpop.f32.mrb[144].mxu0  ;;  %2687 = vmatprep.mubr.bf16.mxu1 %v12724_v14 }
 0x29f   : > { %v1719_v63 = vadd.f32 %v8130_v0, %v9719_v6  ;;  %v1710_v28 = vpop.f32.mrb[145].mxu0 }
 0x2a0   : > { %v1711_v25 = vadd.f32 %v1710_v28, %v12812_v56  ;;  %v8131_v32 = vpop.f32.mrb[146].mxu0  ;;  %v10023_v5 = vpop.f32.mrb[160].mxu1 }
 0x2a1   : > { %12813 = vst [vmem:[#allocation86_spill] sm:$0xff] %v10023_v5  ;;  %v1722_v23 = vadd.f32 %v8131_v32, %v9724_v60  ;;  %v1713_v41 = vpop.f32.mrb[147].mxu0  ;;  %v1567_v58 = vpop.f32.mrb[161].mxu1  ;;  %v2073_v6 = vrot.slane %v1719_v63, 1 }
 0x2a2   : > { %v1714_v51 = vadd.f32 %v1713_v41, %v12814_v35  ;;  %v10027_v48 = vpop.f32.mrb[162].mxu1  ;;  %v2070_v28 = vrot.slane %v1711_v25, 1  ;;  %v12816_v35 = vld [vmem:[#allocation39_spill] sm:$0xff] }
 0x2a3   : > { %12815 = vst [vmem:[#allocation88_spill] sm:$0xff] %v10027_v48  ;;  %v2075_v0 = vrot.slane %v1722_v23, 1  ;;  %v1570_v8 = vpop.f32.mrb[163].mxu1  ;;  %8253 = vmatmul.mubr.bf16.gmra.mrb[252].mxu0 %v9278_v37  ;;  %v12820_v23 = vld [vmem:[#allocation37_spill] sm:$0xff]  ;;  %v12822_v48 = vld [vmem:[#allocation38_spill] sm:$0xff] }
 0x2a4   : > { %v2071_v56 = vrot.slane %v1714_v51, 1  ;;  %8256 = vmatprep.mubr.bf16.mxu0 %v9281_v38 }
 0x2a5   : > { %v2076_v60 = vsel %vm2069_vm0, %v2073_v6, %v2075_v0  ;;  %v2268_v58 = vsel %vm2069_vm0, %v2075_v0, 0.0  ;;  %2688 = vmatmul.mubr.bf16.gmra.mrb[12].mxu1 %v12717_v36 }
 0x2a6   : > { %v10036_v41 = vadd.f32 %v2076_v60, %v12816_v35  ;;  %v10039_v32 = vadd.f32 %v2268_v58, %v12818_v11  ;;  %v2072_v8 = vsel %vm2069_vm0, %v2070_v28, %v2071_v56  ;;  %v2074_v63 = vsel %vm2069_vm0, %v2071_v56, %v2073_v6  ;;  %v8134_v25 = vpop.f32.mrb[148].mxu0  ;;  %2695 = vmatprep.mubr.bf16.mxu1 %v9234_v10  ;;  %v8700_v35 = vld [vmem:[#allocation7 + $0x60] sm:$0xff]   ;;  %v12825_v28 = vld [vmem:[#allocation92_spill] sm:$0xff] }
 0x2a7   : > { %v10045_v51 = vadd.f32 %v2072_v8, %v12820_v23  ;;  %v10048_v0 = vadd.f32 %v2074_v63, %v12822_v48  ;;  %v1735_v36 = vadd.f32 %v8134_v25, %v9747_v9  ;;  %v1726_v60 = vpop.f32.mrb[149].mxu0  ;;  %4512 = vmatpush1.bf16.msra.mxu0 %v8700_v35 }
 0x2a8   : > { %12817 = vst [vmem:[#allocation39_spill] sm:$0xff] %v10036_v41  ;;  %12819 = vst [vmem:[#allocation40_spill] sm:$0xff] %v10039_v32  ;;  %v12824_v41 = vld [vmem:[#allocation89_spill] sm:$0xff]  ;;  %v8135_v11 = vpop.f32.mrb[150].mxu0  ;;  %v10052_v32 = vpop.f32.mrb[164].mxu1  ;;  %4513 = vmatprep.subr.bf16.mxu0 %v12670_v47 }
 0x2a9   : > { %12821 = vst [vmem:[#allocation37_spill] sm:$0xff] %v10045_v51  ;;  %12823 = vst [vmem:[#allocation38_spill] sm:$0xff] %v10048_v0  ;;  %v1727_v58 = vadd.f32 %v1726_v60, %v12824_v41  ;;  %v1738_v6 = vadd.f32 %v8135_v11, %v12825_v28  ;;  %v1729_v56 = vpop.f32.mrb[151].mxu0  ;;  %v1575_v5 = vpop.f32.mrb[165].mxu1  ;;  %v2080_v48 = vrot.slane %v1735_v36, 1  ;;  %v12829_v11 = vld [vmem:[#allocation45_spill] sm:$0xff] }
 0x2aa   : > { %v1730_v8 = vadd.f32 %v1729_v56, %v12826_v40  ;;  %v10056_v23 = vpop.f32.mrb[166].mxu1  ;;  %v12827_v40 = vld [vmem:[#allocation43_spill] sm:$0xff]  ;;  %v12831_v56 = vld [vmem:[#allocation41_spill] sm:$0xff] }
 0x2ab   : > { %v2082_v9 = vrot.slane %v1738_v6, 1  ;;  %v1578_v63 = vpop.f32.mrb[167].mxu1  ;;  %8257 = vmatmul.mubr.bf16.gmra.mrb[0].mxu0 %v9288_v43  ;;  %v2077_v41 = vrot.slane %v1727_v58, 1  ;;  %v12835_v0 = vld [vmem:[#allocation95_spill] sm:$0xff] }
 0x2ac   : > { %v2078_v25 = vrot.slane %v1730_v8, 1  ;;  %8260 = vmatprep.mubr.bf16.mxu0 %v9291_v44  ;;  %v12832_v63 = vld [vmem:[#allocation42_spill] sm:$0xff] }
 0x2ad   : > { %v2083_v60 = vsel %vm2069_vm0, %v2080_v48, %v2082_v9  ;;  %v2269_v5 = vsel %vm2069_vm0, %v2082_v9, 0.0  ;;  %2696 = vmatmul.mubr.bf16.gmra.mrb[16].mxu1 %v12719_v53 }
 0x2ae   : > { %v10065_v35 = vadd.f32 %v2083_v60, %v12827_v40  ;;  %v10068_v28 = vadd.f32 %v2269_v5, %v12829_v11  ;;  %v2079_v36 = vsel %vm2069_vm0, %v2077_v41, %v2078_v25  ;;  %v2081_v6 = vsel %vm2069_vm0, %v2078_v25, %v2080_v48  ;;  %v8138_v58 = vpop.f32.mrb[152].mxu0  ;;  %2703 = vmatprep.mubr.bf16.mxu1 %v9243_v16  ;;  %v12834_v40 = vld [vmem:[#allocation94_spill] sm:$0xff] }
 0x2af   : > { %v10074_v8 = vadd.f32 %v2079_v36, %v12831_v56  ;;  %v10077_v9 = vadd.f32 %v2081_v6, %v12832_v63  ;;  %v1751_v53 = vadd.f32 %v8138_v58, %v9775_v19  ;;  %v1742_v60 = vpop.f32.mrb[153].mxu0 }
 0x2b0   : > { %12828 = vst [vmem:[#allocation89_spill] sm:$0xff] %v10065_v35  ;;  %12830 = vst [vmem:[#allocation92_spill] sm:$0xff] %v10068_v28  ;;  %v1743_v35 = vadd.f32 %v1742_v60, %v12834_v40  ;;  %v8139_v5 = vpop.f32.mrb[154].mxu0  ;;  %v10081_v11 = vpop.f32.mrb[168].mxu1  ;;  %v8701_v28 = vld [vmem:[#allocation7 + $0x68] sm:$0xff]  }
 0x2b1   : > { %12833 = vst [vmem:[#allocation91_spill] sm:$0xff] %v10077_v9  ;;  %v1754_v41 = vadd.f32 %v8139_v5, %v9780_v57  ;;  %v1745_v48 = vpop.f32.mrb[155].mxu0  ;;  %v1583_v25 = vpop.f32.mrb[169].mxu1  ;;  %v2087_v56 = vrot.slane %v1751_v53, 1  ;;  %4514 = vmatpush1.bf16.msra.mxu0 %v8701_v28  ;;  %v12838_v53 = vld [vmem:[#allocation53_spill] sm:$0xff]  ;;  %v12840_v28 = vld [vmem:[#allocation47_spill] sm:$0xff] }
 0x2b2   : > { %v1746_v51 = vadd.f32 %v1745_v48, %v12835_v0  ;;  %v10085_v36 = vpop.f32.mrb[170].mxu1  ;;  %v2084_v19 = vrot.slane %v1743_v35, 1  ;;  %4515 = vmatprep.subr.bf16.mxu0 %v12670_v47  ;;  %v12836_v0 = vld [vmem:[#allocation51_spill] sm:$0xff]  ;;  %v12841_v25 = vld [vmem:[#allocation49_spill] sm:$0xff] }
 0x2b3   : > { %v2089_v6 = vrot.slane %v1754_v41, 1  ;;  %v1586_v63 = vpop.f32.mrb[171].mxu1  ;;  %8261 = vmatmul.mubr.bf16.gmra.mrb[4].mxu0 %v9298_v49 }
 0x2b4   : > { %v2085_v58 = vrot.slane %v1746_v51, 1  ;;  %8264 = vmatprep.mubr.bf16.mxu0 %v12712_v1 }
 0x2b5   : > { %v2090_v60 = vsel %vm2069_vm0, %v2087_v56, %v2089_v6  ;;  %v2270_v57 = vsel %vm2069_vm0, %v2089_v6, 0.0  ;;  %2704 = vmatmul.mubr.bf16.gmra.mrb[20].mxu1 %v12724_v14 }
 0x2b6   : > { %v10094_v40 = vadd.f32 %v2090_v60, %v12836_v0  ;;  %v10097_v5 = vadd.f32 %v2270_v57, %v12838_v53  ;;  %v2086_v35 = vsel %vm2069_vm0, %v2084_v19, %v2085_v58  ;;  %v2088_v51 = vsel %vm2069_vm0, %v2085_v58, %v2087_v56  ;;  %v8142_v41 = vpop.f32.mrb[156].mxu0  ;;  %2711 = vmatprep.mubr.bf16.mxu1 %v9246_v17  ;;  %v12843_v60 = vld [vmem:[#allocation97_spill] sm:$0xff] }
 0x2b7   : > { %v10103_v48 = vadd.f32 %v2086_v35, %v12840_v28  ;;  %v10106_v14 = vadd.f32 %v2088_v51, %v12841_v25  ;;  %v1767_v6 = vadd.f32 %v8142_v41, %v9803_v20  ;;  %v1758_v63 = vpop.f32.mrb[157].mxu0 }
 0x2b8   : > { %12837 = vst [vmem:[#allocation43_spill] sm:$0xff] %v10094_v40  ;;  %12839 = vst [vmem:[#allocation45_spill] sm:$0xff] %v10097_v5  ;;  %v1759_v0 = vadd.f32 %v1758_v63, %v12843_v60  ;;  %v8143_v57 = vpop.f32.mrb[158].mxu0  ;;  %v10110_v53 = vpop.f32.mrb[172].mxu1  ;;  %v12844_v5 = vld [vmem:[#allocation99_spill] sm:$0xff]  ;;  %v8703_v60 = vld [vmem:[#allocation7 + $0x70] sm:$0xff]  }
 0x2b9   : > { %12842 = vst [vmem:[#allocation41_spill] sm:$0xff] %v10106_v14  ;;  %v1770_v19 = vadd.f32 %v8143_v57, %v9808_v46  ;;  %v1761_v56 = vpop.f32.mrb[159].mxu0  ;;  %v1591_v58 = vpop.f32.mrb[173].mxu1  ;;  %v2094_v35 = vrot.slane %v1767_v6, 1  ;;  %v8702_v46 = vld [vmem:[#allocation7 + $0xa0] sm:$0xff]   ;;  %v12847_v6 = vld [vmem:[#allocation61_spill] sm:$0xff]  ;;  %4516 = vmatpush1.bf16.msra.mxu0 %v8703_v60 }
 0x2ba   : > { %v1762_v40 = vadd.f32 %v1761_v56, %v12844_v5  ;;  %v10114_v9 = vpop.f32.mrb[174].mxu1  ;;  %v2091_v20 = vrot.slane %v1759_v0, 1  ;;  %v12845_v5 = vld [vmem:[#allocation59_spill] sm:$0xff]  ;;  %v12849_v58 = vld [vmem:[#allocation56_spill] sm:$0xff]  ;;  %8296 = vmatprep.subr.bf16.mxu1 %v8702_v46  ;;  %4517 = vmatprep.subr.bf16.mxu0 %v12670_v47  ;;  %v12855_v60 = vld [vmem:[#allocation29_spill] sm:$0xff] }
 0x2bb   : > { %v2096_v28 = vrot.slane %v1770_v19, 1  ;;  %v1594_v51 = vpop.f32.mrb[175].mxu1  ;;  %8265 = vmatmul.mubr.bf16.gmra.mrb[8].mxu0 %v9308_v54  ;;  %8297 = vmatpush3.bf16.msra.mxu1 %v8702_v46  ;;  %v8704_v46 = vld [vmem:[#allocation7 + $0x78] sm:$0xff]  }
 0x2bc   : > { %v2092_v41 = vrot.slane %v1762_v40, 1  ;;  %8268 = vmatprep.mubr.bf16.mxu0 %v9311_v55 }
 0x2bd   : > { %v2097_v25 = vsel %vm2069_vm0, %v2094_v35, %v2096_v28  ;;  %v2271_v63 = vsel %vm2069_vm0, %v2096_v28, 0.0  ;;  %2712 = vmatmul.mubr.bf16.gmra.mrb[24].mxu1 %v9234_v10  ;;  %v12851_v28 = vld [vmem:[#allocation57_spill] sm:$0xff]  ;;  %4518 = vmatpush1.bf16.msra.mxu0 %v8704_v46 }
 0x2be   : > { %v10122_v57 = vadd.f32 %v2097_v25, %v12845_v5  ;;  %v10125_v19 = vadd.f32 %v2271_v63, %v12847_v6  ;;  %v2093_v56 = vsel %vm2069_vm0, %v2091_v20, %v2092_v41  ;;  %v2095_v40 = vsel %vm2069_vm0, %v2092_v41, %v2094_v35  ;;  %v8146_v0 = vpop.f32.mrb[160].mxu0  ;;  %2719 = vmatprep.mubr.bf16.mxu1 %v9255_v26  ;;  %v12853_v63 = vld [vmem:[#allocation102_spill] sm:$0xff] }
 0x2bf   : > { %v10131_v51 = vadd.f32 %v2093_v56, %v12849_v58  ;;  %v10134_v10 = vadd.f32 %v2095_v40, %v12851_v28  ;;  %v1783_v14 = vadd.f32 %v8146_v0, %v9831_v22  ;;  %v1774_v25 = vpop.f32.mrb[161].mxu0  ;;  %v12854_v58 = vld [vmem:[#allocation104_spill] sm:$0xff] }
 0x2c0   : > { %12846 = vst [vmem:[#allocation42_spill] sm:$0xff] %v10122_v57  ;;  %12848 = vst [vmem:[#allocation94_spill] sm:$0xff] %v10125_v19  ;;  %v1775_v5 = vadd.f32 %v1774_v25, %v12853_v63  ;;  %v8147_v6 = vpop.f32.mrb[162].mxu0  ;;  %v10138_v20 = vpop.f32.mrb[176].mxu1  ;;  %v12856_v57 = vld [vmem:[#allocation30_spill] sm:$0xff] }
 0x2c1   : > { %12850 = vst [vmem:[#allocation95_spill] sm:$0xff] %v10131_v51  ;;  %12852 = vst [vmem:[#allocation51_spill] sm:$0xff] %v10134_v10  ;;  %v1786_v35 = vadd.f32 %v8147_v6, %v9836_v7  ;;  %v1777_v41 = vpop.f32.mrb[163].mxu0  ;;  %v1599_v56 = vpop.f32.mrb[177].mxu1  ;;  %v2101_v22 = vrot.slane %v1783_v14, 1  ;;  %v12857_v6 = vld [vmem:[#allocation67_spill] sm:$0xff] }
 0x2c2   : > { %v1778_v40 = vadd.f32 %v1777_v41, %v12854_v58  ;;  %v10143_v28 = vpop.f32.mrb[178].mxu1  ;;  %v2098_v25 = vrot.slane %v1775_v5, 1  ;;  %v12859_v56 = vld [vmem:[#allocation69_spill] sm:$0xff]  ;;  %v12861_v58 = vld [vmem:[#allocation63_spill] sm:$0xff] }
 0x2c3   : > { %v2103_v0 = vrot.slane %v1786_v35, 1  ;;  %v1602_v19 = vpop.f32.mrb[179].mxu1  ;;  %8269 = vmatmul.mubr.bf16.gmra.mrb[12].mxu0 %v12855_v60  ;;  %v12862_v51 = vld [vmem:[#allocation65_spill] sm:$0xff] }
 0x2c4   : > { %v2099_v63 = vrot.slane %v1778_v40, 1  ;;  %8272 = vmatprep.mubr.bf16.mxu0 %v12856_v57 }
 0x2c5   : > { %v2104_v10 = vsel %vm2069_vm0, %v2101_v22, %v2103_v0  ;;  %v2272_v7 = vsel %vm2069_vm0, %v2103_v0, 0.0  ;;  %2720 = vmatmul.mubr.bf16.gmra.mrb[28].mxu1 %v9243_v16 }
 0x2c6   : > { %v10151_v41 = vadd.f32 %v2104_v10, %v12857_v6  ;;  %v10154_v14 = vadd.f32 %v2272_v7, %v12859_v56  ;;  %v2100_v19 = vsel %vm2069_vm0, %v2098_v25, %v2099_v63  ;;  %v2102_v5 = vsel %vm2069_vm0, %v2099_v63, %v2101_v22  ;;  %v8150_v35 = vpop.f32.mrb[164].mxu0  ;;  %2727 = vmatprep.mubr.bf16.mxu1 %v9258_v27 }
 0x2c7   : > { %v10160_v40 = vadd.f32 %v2100_v19, %v12861_v58  ;;  %v10163_v0 = vadd.f32 %v2102_v5, %v12862_v51  ;;  %v1799_v16 = vadd.f32 %v8150_v35, %v9859_v52  ;;  %v1790_v10 = vpop.f32.mrb[165].mxu0  ;;  %v12863_v35 = vld [vmem:[#allocation31_spill] sm:$0xff] }
 0x2c8   : > { %12858 = vst [vmem:[#allocation53_spill] sm:$0xff] %v10151_v41  ;;  %12860 = vst [vmem:[#allocation47_spill] sm:$0xff] %v10154_v14  ;;  %v1791_v7 = vadd.f32 %v1790_v10, %v9845_v21  ;;  %v8151_v6 = vpop.f32.mrb[166].mxu0  ;;  %v10167_v56 = vpop.f32.mrb[180].mxu1 }
 0x2c9   : > { %v1802_v22 = vadd.f32 %v8151_v6, %v9864_v62  ;;  %v1793_v25 = vpop.f32.mrb[167].mxu0  ;;  %v1607_v63 = vpop.f32.mrb[181].mxu1  ;;  %v2108_v58 = vrot.slane %v1799_v16, 1  ;;  %v10178_v62 = vld [vmem:[#allocation7 + $0x140] sm:$0xff]   ;;  %v12866_v16 = vld [vmem:[#allocation77_spill] sm:$0xff] }
 0x2ca   : > { %v1794_v14 = vadd.f32 %v1793_v25, %v9850_v29  ;;  %v10171_v19 = vpop.f32.mrb[182].mxu1  ;;  %v2105_v52 = vrot.slane %v1791_v7, 1  ;;  %v12864_v29 = vld [vmem:[#allocation75_spill] sm:$0xff]  ;;  %8368 = vmatprep.subr.bf16.mxu0 %v10178_v62 }
 0x2cb   : > { %v2110_v51 = vrot.slane %v1802_v22, 1  ;;  %v1610_v5 = vpop.f32.mrb[183].mxu1  ;;  %8273 = vmatmul.mubr.bf16.gmra.mrb[16].mxu0 %v9328_v3  ;;  %v12868_v63 = vld [vmem:[#allocation71_spill] sm:$0xff] }
 0x2cc   : > { %v2106_v46 = vrot.slane %v1794_v14, 1  ;;  %8276 = vmatprep.mubr.bf16.mxu0 %v12863_v35 }
 0x2cd   : > { %v2111_v21 = vsel %vm2069_vm0, %v2108_v58, %v2110_v51  ;;  %v2273_v10 = vsel %vm2069_vm0, %v2110_v51, 0.0  ;;  %2728 = vmatmul.mubr.bf16.gmra.mrb[32].mxu1 %v9246_v17  ;;  %v12870_v51 = vld [vmem:[#allocation73_spill] sm:$0xff] }
 0x2ce   : > { %v10181_v6 = vadd.f32 %v2111_v21, %v12864_v29  ;;  %v10184_v22 = vadd.f32 %v2273_v10, %v12866_v16  ;;  %v2107_v25 = vsel %vm2069_vm0, %v2105_v52, %v2106_v46  ;;  %v2109_v14 = vsel %vm2069_vm0, %v2106_v46, %v2108_v58  ;;  %v8154_v7 = vpop.f32.mrb[168].mxu0  ;;  %2735 = vmatprep.mubr.bf16.mxu1 %v9267_v31  ;;  %v8706_v10 = vld [vmem:[#allocation7 + $0xa8] sm:$0xff]  }
 0x2cf   : > { %v10190_v5 = vadd.f32 %v2107_v25, %v12868_v63  ;;  %v10193_v17 = vadd.f32 %v2109_v14, %v12870_v51  ;;  %v1815_v41 = vadd.f32 %v8154_v7, %v9887_v42  ;;  %v1806_v21 = vpop.f32.mrb[169].mxu0  ;;  %8298 = vmatprep.subr.bf16.mxu1 %v8706_v10  ;;  %v12872_v51 = vld [vmem:[#allocation32_spill] sm:$0xff] }
 0x2d0   : > { %12865 = vst [vmem:[#allocation49_spill] sm:$0xff] %v10181_v6  ;;  %12867 = vst [vmem:[#allocation97_spill] sm:$0xff] %v10184_v22  ;;  %v1807_v29 = vadd.f32 %v1806_v21, %v9873_v59  ;;  %v8155_v52 = vpop.f32.mrb[170].mxu0  ;;  %v10198_v16 = vpop.f32.mrb[184].mxu1  ;;  %8299 = vmatpush3.bf16.msra.mxu1 %v8706_v10  ;;  %v8707_v6 = vld [vmem:[#allocation7 + $0xb0] sm:$0xff]  }
 0x2d1   : > { %12869 = vst [vmem:[#allocation99_spill] sm:$0xff] %v10190_v5  ;;  %12871 = vst [vmem:[#allocation59_spill] sm:$0xff] %v10193_v17  ;;  %v1818_v58 = vadd.f32 %v8155_v52, %v9892_v18  ;;  %v1809_v46 = vpop.f32.mrb[171].mxu0  ;;  %v1615_v22 = vpop.f32.mrb[185].mxu1  ;;  %v2115_v42 = vrot.slane %v1815_v41, 1  ;;  %v12873_v17 = vld [vmem:[#allocation33_spill] sm:$0xff]  ;;  %8300 = vmatprep.subr.bf16.mxu1 %v8707_v6 }
 0x2d2   : > { %v1810_v25 = vadd.f32 %v1809_v46, %v9878_v50  ;;  %v10202_v14 = vpop.f32.mrb[186].mxu1  ;;  %v2112_v59 = vrot.slane %v1807_v29, 1  ;;  %v12874_v50 = vld [vmem:[#allocation28_spill] sm:$0xff] }
 0x2d3   : > { %v2117_v7 = vrot.slane %v1818_v58, 1  ;;  %v1618_v63 = vpop.f32.mrb[187].mxu1  ;;  %8277 = vmatmul.mubr.bf16.gmra.mrb[20].mxu0 %v12872_v51  ;;  %v12876_v41 = vld [vmem:[#allocation84_spill] sm:$0xff] }
 0x2d4   : > { %v2113_v21 = vrot.slane %v1810_v25, 1  ;;  %8280 = vmatprep.mubr.bf16.mxu0 %v12873_v17  ;;  %v12878_v25 = vld [vmem:[#allocation79_spill] sm:$0xff]  ;;  %8301 = vmatpush3.bf16.msra.mxu1 %v8707_v6 }
 0x2d5   : > { %v2118_v18 = vsel %vm2069_vm0, %v2115_v42, %v2117_v7  ;;  %v2274_v22 = vsel %vm2069_vm0, %v2117_v7, 0.0  ;;  %2736 = vmatmul.mubr.bf16.gmra.mrb[36].mxu1 %v9255_v26  ;;  %v12879_v7 = vld [vmem:[#allocation81_spill] sm:$0xff] }
 0x2d6   : > { %v10210_v52 = vadd.f32 %v2118_v18, %v12874_v50  ;;  %v10213_v10 = vadd.f32 %v2274_v22, %v12876_v41  ;;  %v2114_v58 = vsel %vm2069_vm0, %v2112_v59, %v2113_v21  ;;  %v2116_v29 = vsel %vm2069_vm0, %v2113_v21, %v2115_v42  ;;  %v8158_v46 = vpop.f32.mrb[172].mxu0  ;;  %2743 = vmatprep.mubr.bf16.mxu1 %v9270_v34  ;;  %v8708_v50 = vld [vmem:[#allocation7 + $0xb8] sm:$0xff]  }
 0x2d7   : > { %v10219_v63 = vadd.f32 %v2114_v58, %v12878_v25  ;;  %v10222_v5 = vadd.f32 %v2116_v29, %v12879_v7  ;;  %v1831_v26 = vadd.f32 %v8158_v46, %v9918_v13  ;;  %v1822_v18 = vpop.f32.mrb[173].mxu0  ;;  %8302 = vmatprep.subr.bf16.mxu1 %v8708_v50  ;;  %v12880_v58 = vld [vmem:[#allocation105_spill] sm:$0xff]  ;;  %v12881_v46 = vld [vmem:[#allocation34_spill] sm:$0xff] }
 0x2d8   : > { %12875 = vst [vmem:[#allocation61_spill] sm:$0xff] %v10210_v52  ;;  %12877 = vst [vmem:[#allocation56_spill] sm:$0xff] %v10213_v10  ;;  %v1823_v22 = vadd.f32 %v1822_v18, %v9902_v61  ;;  %v8159_v41 = vpop.f32.mrb[174].mxu0  ;;  %v10226_v59 = vpop.f32.mrb[188].mxu1  ;;  %8303 = vmatpush3.bf16.msra.mxu1 %v8708_v50  ;;  %v12882_v18 = vld [vmem:[#allocation35_spill] sm:$0xff] }
 0x2d9   : > { %v1834_v42 = vadd.f32 %v8159_v41, %v9924_v24  ;;  %v1825_v21 = vpop.f32.mrb[175].mxu0  ;;  %v1623_v10 = vpop.f32.mrb[189].mxu1  ;;  %v2122_v29 = vrot.slane %v1831_v26, 1  ;;  %5194 = vmatprep.subr.bf16.mxu1 %v12670_v47  ;;  %v12883_v41 = vld [vmem:[#allocation27_spill] sm:$0xff]  ;;  %v12885_v26 = vld [vmem:[#allocation44_spill] sm:$0xff] }
 0x2da   : > { %v1826_v25 = vadd.f32 %v1825_v21, %v12880_v58  ;;  %v10230_v52 = vpop.f32.mrb[190].mxu1  ;;  %v2119_v6 = vrot.slane %v1823_v22, 1 }
 0x2db   : > { %v2124_v7 = vrot.slane %v1834_v42, 1  ;;  %v1626_v13 = vpop.f32.mrb[191].mxu1  ;;  %8281 = vmatmul.mubr.bf16.gmra.mrb[24].mxu0 %v12881_v46 }
 0x2dc   : > { %v2120_v61 = vrot.slane %v1826_v25, 1  ;;  %8284 = vmatprep.mubr.bf16.mxu0 %v12882_v18  ;;  %v12887_v25 = vld [vmem:[#allocation25_spill] sm:$0xff]  ;;  %v12888_v18 = vld [vmem:[#allocation87_spill] sm:$0xff] }
 0x2dd   : > { %v2125_v24 = vsel %vm2069_vm0, %v2122_v29, %v2124_v7  ;;  %v2275_v10 = vsel %vm2069_vm0, %v2124_v7, 0.0  ;;  %2744 = vmatmul.mubr.bf16.gmra.mrb[40].mxu1 %v9258_v27 }
 0x2de   : > { %v10239_v21 = vadd.f32 %v2125_v24, %v12883_v41  ;;  %v10242_v42 = vadd.f32 %v2275_v10, %v12885_v26  ;;  %v2121_v50 = vsel %vm2069_vm0, %v2119_v6, %v2120_v61  ;;  %v2123_v22 = vsel %vm2069_vm0, %v2120_v61, %v2122_v29  ;;  %v8162_v58 = vpop.f32.mrb[176].mxu0  ;;  %2751 = vmatprep.mubr.bf16.mxu1 %v9278_v37 }
 0x2df   : > { %v10248_v13 = vadd.f32 %v2121_v50, %v12887_v25  ;;  %v10251_v7 = vadd.f32 %v2123_v22, %v12888_v18  ;;  %v1847_v27 = vadd.f32 %v8162_v58, %v9950_v15  ;;  %v1838_v24 = vpop.f32.mrb[177].mxu0  ;;  %v12889_v18 = vld [vmem:[#allocation36_spill] sm:$0xff] }
 0x2e0   : > { %12884 = vst [vmem:[#allocation57_spill] sm:$0xff] %v10239_v21  ;;  %12886 = vst [vmem:[#allocation102_spill] sm:$0xff] %v10242_v42  ;;  %v1839_v41 = vadd.f32 %v1838_v24, %v9934_v45  ;;  %v8163_v10 = vpop.f32.mrb[178].mxu0  ;;  %v10255_v26 = vpop.f32.mrb[192].mxu1 }
 0x2e1   : > { %v1850_v6 = vadd.f32 %v8163_v10, %v9955_v2  ;;  %v1841_v29 = vpop.f32.mrb[179].mxu0  ;;  %v1631_v61 = vpop.f32.mrb[193].mxu1  ;;  %v2129_v50 = vrot.slane %v1847_v27, 1  ;;  %v12890_v2 = vld [vmem:[#allocation48_spill] sm:$0xff] }
 0x2e2   : > { %v1842_v42 = vadd.f32 %v1841_v29, %v9940_v39  ;;  %v10259_v21 = vpop.f32.mrb[194].mxu1  ;;  %v2126_v15 = vrot.slane %v1839_v41, 1  ;;  %v12892_v61 = vld [vmem:[#allocation50_spill] sm:$0xff] }
 0x2e3   : > { %v2131_v25 = vrot.slane %v1850_v6, 1  ;;  %v1634_v22 = vpop.f32.mrb[195].mxu1  ;;  %8285 = vmatmul.mubr.bf16.gmra.mrb[28].mxu0 %v12889_v18 }
 0x2e4   : > { %v2127_v58 = vrot.slane %v1842_v42, 1  ;;  %v12894_v42 = vld [vmem:[#allocation46_spill] sm:$0xff] }
 0x2e5   : > { %v2132_v45 = vsel %vm2069_vm0, %v2129_v50, %v2131_v25  ;;  %v2276_v24 = vsel %vm2069_vm0, %v2131_v25, 0.0  ;;  %2752 = vmatmul.mubr.bf16.gmra.mrb[44].mxu1 %v9267_v31  ;;  %v12896_v22 = vld [vmem:[#allocation90_spill] sm:$0xff] }
 0x2e6   : > { %v10266_v10 = vadd.f32 %v2132_v45, %v12890_v2  ;;  %v10269_v39 = vadd.f32 %v2276_v24, %v12892_v61  ;;  %v2128_v27 = vsel %vm2069_vm0, %v2126_v15, %v2127_v58  ;;  %v2130_v6 = vsel %vm2069_vm0, %v2127_v58, %v2129_v50  ;;  %v8166_v29 = vpop.f32.mrb[180].mxu0  ;;  %2759 = vmatprep.mubr.bf16.mxu1 %v9281_v38 }
 0x2e7   : > { %v10275_v41 = vadd.f32 %v2128_v27, %v12894_v42  ;;  %v10278_v25 = vadd.f32 %v2130_v6, %v12896_v22  ;;  %v1863_v31 = vadd.f32 %v8166_v29, %v9979_v4  ;;  %v1854_v18 = vpop.f32.mrb[181].mxu0  ;;  %v12898_v29 = vld [vmem:[#allocation52_spill] sm:$0xff] }
 0x2e8   : > { %12891 = vst [vmem:[#allocation104_spill] sm:$0xff] %v10266_v10  ;;  %12893 = vst [vmem:[#allocation29_spill] sm:$0xff] %v10269_v39  ;;  %v1855_v45 = vadd.f32 %v1854_v18, %v9964_v12  ;;  %v8167_v24 = vpop.f32.mrb[182].mxu0  ;;  %v10282_v2 = vpop.f32.mrb[196].mxu1 }
 0x2e9   : > { %12895 = vst [vmem:[#allocation30_spill] sm:$0xff] %v10275_v41  ;;  %12897 = vst [vmem:[#allocation67_spill] sm:$0xff] %v10278_v25  ;;  %v1866_v15 = vadd.f32 %v8167_v24, %v9984_v30  ;;  %v1857_v50 = vpop.f32.mrb[183].mxu0  ;;  %v1639_v58 = vpop.f32.mrb[197].mxu1  ;;  %v2136_v27 = vrot.slane %v1863_v31, 1  ;;  %v12900_v30 = vld [vmem:[#allocation54_spill] sm:$0xff] }
 0x2ea   : > { %v1858_v61 = vadd.f32 %v1857_v50, %v9970_v33  ;;  %v10286_v39 = vpop.f32.mrb[198].mxu1  ;;  %v2133_v22 = vrot.slane %v1855_v45, 1  ;;  %v12902_v45 = vld [vmem:[#allocation93_spill] sm:$0xff]  ;;  %v12903_v58 = vld [vmem:[#allocation55_spill] sm:$0xff] }
 0x2eb   : > { %v2138_v42 = vrot.slane %v1866_v15, 1  ;;  %v1642_v6 = vpop.f32.mrb[199].mxu1 }
 0x2ec   : > { %v2134_v10 = vrot.slane %v1858_v61, 1 }
 0x2ed   : > { %v2139_v4 = vsel %vm2069_vm0, %v2136_v27, %v2138_v42  ;;  %v2277_v12 = vsel %vm2069_vm0, %v2138_v42, 0.0  ;;  %2760 = vmatmul.mubr.bf16.gmra.mrb[48].mxu1 %v9270_v34  ;;  %v12905_v34 = vld [vmem:[#allocation113_spill] sm:$0xff] }
 0x2ee   : > { %v10292_v18 = vadd.f32 %v2139_v4, %v12898_v29  ;;  %v10295_v24 = vadd.f32 %v2277_v12, %v12900_v30  ;;  %v2135_v33 = vsel %vm2069_vm0, %v2133_v22, %v2134_v10  ;;  %v2137_v31 = vsel %vm2069_vm0, %v2134_v10, %v2136_v27  ;;  %v8170_v15 = vpop.f32.mrb[184].mxu0  ;;  %2767 = vmatprep.mubr.bf16.mxu1 %v9288_v43  ;;  %v12906_v4 = vld [vmem:[#allocation111_spill] sm:$0xff]  ;;  %v12907_v22 = vld [vmem:[#allocation114_spill] sm:$0xff] }
 0x2ef   : > { %v10301_v50 = vadd.f32 %v2135_v33, %v12902_v45  ;;  %v10304_v61 = vadd.f32 %v2137_v31, %v12903_v58  ;;  %v1879_v42 = vadd.f32 %v8170_v15, %v12905_v34  ;;  %v1870_v6 = vpop.f32.mrb[185].mxu0 }
 0x2f0   : > { %12899 = vst [vmem:[#allocation69_spill] sm:$0xff] %v10292_v18  ;;  %12901 = vst [vmem:[#allocation63_spill] sm:$0xff] %v10295_v24  ;;  %v1871_v29 = vadd.f32 %v1870_v6, %v12906_v4  ;;  %v8171_v12 = vpop.f32.mrb[186].mxu0  ;;  %v10308_v30 = vpop.f32.mrb[200].mxu1  ;;  %v12908_v18 = vld [vmem:[#allocation112_spill] sm:$0xff] }
 0x2f1   : > { %12904 = vst [vmem:[#allocation65_spill] sm:$0xff] %v10304_v61  ;;  %v1882_v24 = vadd.f32 %v8171_v12, %v12907_v22  ;;  %v1873_v10 = vpop.f32.mrb[187].mxu0  ;;  %v1647_v27 = vpop.f32.mrb[201].mxu1  ;;  %v2143_v33 = vrot.slane %v1879_v42, 1  ;;  %v12909_v6 = vld [vmem:[#allocation100_spill] sm:$0xff]  ;;  %v12911_v12 = vld [vmem:[#allocation58_spill] sm:$0xff] }
 0x2f2   : > { %v1874_v25 = vadd.f32 %v1873_v10, %v12908_v18  ;;  %v10312_v41 = vpop.f32.mrb[202].mxu1  ;;  %v2140_v58 = vrot.slane %v1871_v29, 1  ;;  %v12914_v10 = vld [vmem:[#allocation98_spill] sm:$0xff] }
 0x2f3   : > { %v2145_v45 = vrot.slane %v1882_v24, 1  ;;  %v1650_v31 = vpop.f32.mrb[203].mxu1 }
 0x2f4   : > { %v2141_v61 = vrot.slane %v1874_v25, 1  ;;  %v12913_v25 = vld [vmem:[#allocation96_spill] sm:$0xff]  ;;  %v12916_v31 = vld [vmem:[#allocation86_spill] sm:$0xff] }
 0x2f5   : > { %v2146_v15 = vsel %vm2069_vm0, %v2143_v33, %v2145_v45  ;;  %v2278_v34 = vsel %vm2069_vm0, %v2145_v45, 0.0  ;;  %2768 = vmatmul.mubr.bf16.gmra.mrb[52].mxu1 %v9278_v37 }
 0x2f6   : > { %v10318_v4 = vadd.f32 %v2146_v15, %v12909_v6  ;;  %v10321_v22 = vadd.f32 %v2278_v34, %v12911_v12  ;;  %v2142_v18 = vsel %vm2069_vm0, %v2140_v58, %v2141_v61  ;;  %v2144_v42 = vsel %vm2069_vm0, %v2141_v61, %v2143_v33  ;;  %v8174_v24 = vpop.f32.mrb[188].mxu0  ;;  %2775 = vmatprep.mubr.bf16.mxu1 %v9291_v44  ;;  %v12917_v12 = vld [vmem:[#allocation88_spill] sm:$0xff] }
 0x2f7   : > { %v10327_v29 = vadd.f32 %v2142_v18, %v12913_v25  ;;  %v10330_v27 = vadd.f32 %v2144_v42, %v12914_v10  ;;  %v1895_v37 = vadd.f32 %v8174_v24, %v10052_v32  ;;  %v1886_v45 = vpop.f32.mrb[189].mxu0 }
 0x2f8   : > { %12910 = vst [vmem:[#allocation31_spill] sm:$0xff] %v10318_v4  ;;  %12912 = vst [vmem:[#allocation75_spill] sm:$0xff] %v10321_v22  ;;  %v1887_v15 = vadd.f32 %v1886_v45, %v12916_v31  ;;  %v8175_v34 = vpop.f32.mrb[190].mxu0  ;;  %v10334_v6 = vpop.f32.mrb[204].mxu1  ;;  %v12918_v45 = vld [vmem:[#allocation20_spill] sm:$0xff] }
 0x2f9   : > { %12915 = vst [vmem:[#allocation77_spill] sm:$0xff] %v10330_v27  ;;  %v1898_v58 = vadd.f32 %v8175_v34, %v10056_v23  ;;  %v1889_v61 = vpop.f32.mrb[191].mxu0  ;;  %v1655_v33 = vpop.f32.mrb[205].mxu1  ;;  %v2150_v18 = vrot.slane %v1895_v37, 1  ;;  %v12919_v23 = vld [vmem:[#allocation60_spill] sm:$0xff] }
 0x2fa   : > { %v1890_v22 = vadd.f32 %v1889_v61, %v12917_v12  ;;  %v10338_v4 = vpop.f32.mrb[206].mxu1  ;;  %v2147_v10 = vrot.slane %v1887_v15, 1  ;;  %v12922_v33 = vld [vmem:[#allocation103_spill] sm:$0xff] }
 0x2fb   : > { %v2152_v25 = vrot.slane %v1898_v58, 1  ;;  %v1658_v42 = vpop.f32.mrb[207].mxu1 }
 0x2fc   : > { %v2148_v27 = vrot.slane %v1890_v22, 1  ;;  %v12921_v22 = vld [vmem:[#allocation101_spill] sm:$0xff] }
 0x2fd   : > { %v2153_v32 = vsel %vm2069_vm0, %v2150_v18, %v2152_v25  ;;  %v2279_v24 = vsel %vm2069_vm0, %v2152_v25, 0.0  ;;  %2776 = vmatmul.mubr.bf16.gmra.mrb[56].mxu1 %v9281_v38 }
 0x2fe   : > { %v10344_v31 = vadd.f32 %v2153_v32, %v12918_v45  ;;  %v10347_v34 = vadd.f32 %v2279_v24, %v12919_v23  ;;  %v2149_v61 = vsel %vm2069_vm0, %v2147_v10, %v2148_v27  ;;  %v2151_v37 = vsel %vm2069_vm0, %v2148_v27, %v2150_v18  ;;  %v8178_v58 = vpop.f32.mrb[192].mxu0  ;;  %2783 = vmatprep.mubr.bf16.mxu1 %v9298_v49 }
 0x2ff   : > { %v10353_v15 = vadd.f32 %v2149_v61, %v12921_v22  ;;  %v10356_v12 = vadd.f32 %v2151_v37, %v12922_v33  ;;  %v1911_v38 = vadd.f32 %v8178_v58, %v10110_v53  ;;  %v1902_v25 = vpop.f32.mrb[193].mxu0  ;;  %v12923_v58 = vld [vmem:[#allocation23_spill] sm:$0xff] }
 0x300   : > { %12920 = vst [vmem:[#allocation71_spill] sm:$0xff] %v10347_v34  ;;  %v1903_v42 = vadd.f32 %v1902_v25, %v10081_v11  ;;  %v8179_v32 = vpop.f32.mrb[194].mxu0  ;;  %v10360_v24 = vpop.f32.mrb[208].mxu1 }
 0x301   : > { %v1914_v10 = vadd.f32 %v8179_v32, %v10114_v9  ;;  %v1905_v27 = vpop.f32.mrb[195].mxu0  ;;  %v1663_v18 = vpop.f32.mrb[209].mxu1  ;;  %v2157_v61 = vrot.slane %v1911_v38, 1  ;;  %v12924_v9 = vld [vmem:[#allocation26_spill] sm:$0xff] }
 0x302   : > { %v1906_v45 = vadd.f32 %v1905_v27, %v10085_v36  ;;  %v10364_v23 = vpop.f32.mrb[210].mxu1  ;;  %v2154_v33 = vrot.slane %v1903_v42, 1  ;;  %v12926_v42 = vld [vmem:[#allocation62_spill] sm:$0xff] }
 0x303   : > { %v2159_v22 = vrot.slane %v1914_v10, 1  ;;  %v1666_v37 = vpop.f32.mrb[211].mxu1  ;;  %v12927_v18 = vld [vmem:[#allocation22_spill] sm:$0xff] }
 0x304   : > { %v2155_v34 = vrot.slane %v1906_v45, 1 }
 0x305   : > { %v2160_v53 = vsel %vm2069_vm0, %v2157_v61, %v2159_v22  ;;  %v2280_v11 = vsel %vm2069_vm0, %v2159_v22, 0.0  ;;  %2784 = vmatmul.mubr.bf16.gmra.mrb[60].mxu1 %v9288_v43 }
 0x306   : > { %v10370_v25 = vadd.f32 %v2160_v53, %v12923_v58  ;;  %v10373_v32 = vadd.f32 %v2280_v11, %v12924_v9  ;;  %v2156_v36 = vsel %vm2069_vm0, %v2154_v33, %v2155_v34  ;;  %v2158_v38 = vsel %vm2069_vm0, %v2155_v34, %v2157_v61  ;;  %v8182_v10 = vpop.f32.mrb[196].mxu0  ;;  %2791 = vmatprep.mubr.bf16.mxu1 %v12712_v1 }
 0x307   : > { %v10379_v27 = vadd.f32 %v2156_v36, %v12926_v42  ;;  %v10382_v45 = vadd.f32 %v2158_v38, %v12927_v18  ;;  %v1927_v43 = vadd.f32 %v8182_v10, %v10167_v56  ;;  %v1918_v22 = vpop.f32.mrb[197].mxu0  ;;  %v12928_v10 = vld [vmem:[#allocation66_spill] sm:$0xff] }
 0x308   : > { %12925 = vst [vmem:[#allocation73_spill] sm:$0xff] %v10373_v32  ;;  %v1919_v37 = vadd.f32 %v1918_v22, %v10138_v20  ;;  %v8183_v53 = vpop.f32.mrb[198].mxu0  ;;  %v10386_v11 = vpop.f32.mrb[212].mxu1 }
 0x309   : > { %v1930_v33 = vadd.f32 %v8183_v53, %v10171_v19  ;;  %v1921_v34 = vpop.f32.mrb[199].mxu0  ;;  %v1671_v61 = vpop.f32.mrb[213].mxu1  ;;  %v2164_v36 = vrot.slane %v1927_v43, 1  ;;  %v12929_v19 = vld [vmem:[#allocation21_spill] sm:$0xff] }
 0x30a   : > { %v1922_v58 = vadd.f32 %v1921_v34, %v10143_v28  ;;  %v10390_v9 = vpop.f32.mrb[214].mxu1  ;;  %v2161_v18 = vrot.slane %v1919_v37, 1  ;;  %v12931_v37 = vld [vmem:[#allocation19_spill] sm:$0xff]  ;;  %v12932_v61 = vld [vmem:[#allocation64_spill] sm:$0xff] }
 0x30b   : > { %v2166_v42 = vrot.slane %v1930_v33, 1  ;;  %v1674_v38 = vpop.f32.mrb[215].mxu1 }
 0x30c   : > { %v2162_v32 = vrot.slane %v1922_v58, 1 }
 0x30d   : > { %v2167_v56 = vsel %vm2069_vm0, %v2164_v36, %v2166_v42  ;;  %v2281_v20 = vsel %vm2069_vm0, %v2166_v42, 0.0  ;;  %2792 = vmatmul.mubr.bf16.gmra.mrb[64].mxu1 %v9291_v44 }
 0x30e   : > { %v10396_v22 = vadd.f32 %v2167_v56, %v12928_v10  ;;  %v10399_v53 = vadd.f32 %v2281_v20, %v12929_v19  ;;  %v2163_v28 = vsel %vm2069_vm0, %v2161_v18, %v2162_v32  ;;  %v2165_v43 = vsel %vm2069_vm0, %v2162_v32, %v2164_v36  ;;  %v8186_v33 = vpop.f32.mrb[200].mxu0  ;;  %2799 = vmatprep.mubr.bf16.mxu1 %v9308_v54 }
 0x30f   : > { %v10405_v34 = vadd.f32 %v2163_v28, %v12931_v37  ;;  %v10408_v58 = vadd.f32 %v2165_v43, %v12932_v61  ;;  %v1943_v44 = vadd.f32 %v8186_v33, %v10226_v59  ;;  %v1934_v42 = vpop.f32.mrb[201].mxu0  ;;  %v12933_v33 = vld [vmem:[#allocation72_spill] sm:$0xff] }
 0x310   : > { %12930 = vst [vmem:[#allocation32_spill] sm:$0xff] %v10399_v53  ;;  %v1935_v38 = vadd.f32 %v1934_v42, %v10198_v16  ;;  %v8187_v56 = vpop.f32.mrb[202].mxu0  ;;  %v10412_v20 = vpop.f32.mrb[216].mxu1 }
 0x311   : > { %v1946_v18 = vadd.f32 %v8187_v56, %v10230_v52  ;;  %v1937_v32 = vpop.f32.mrb[203].mxu0  ;;  %v2587_v36 = vpop.f32.mrb[217].mxu1  ;;  %v2171_v28 = vrot.slane %v1943_v44, 1  ;;  %v12934_v52 = vld [vmem:[#allocation74_spill] sm:$0xff] }
 0x312   : > { %v1938_v10 = vadd.f32 %v1937_v32, %v10202_v14  ;;  %v10416_v19 = vpop.f32.mrb[218].mxu1  ;;  %v2168_v61 = vrot.slane %v1935_v38, 1  ;;  %v12936_v38 = vld [vmem:[#allocation68_spill] sm:$0xff]  ;;  %v12937_v36 = vld [vmem:[#allocation70_spill] sm:$0xff] }
 0x313   : > { %v2173_v37 = vrot.slane %v1946_v18, 1  ;;  %v2590_v43 = vpop.f32.mrb[219].mxu1 }
 0x314   : > { %v2169_v53 = vrot.slane %v1938_v10, 1 }
 0x315   : > { %v2174_v59 = vsel %vm2069_vm0, %v2171_v28, %v2173_v37  ;;  %v2282_v16 = vsel %vm2069_vm0, %v2173_v37, 0.0  ;;  %2800 = vmatmul.mubr.bf16.gmra.mrb[68].mxu1 %v9298_v49 }
 0x316   : > { %v10422_v42 = vadd.f32 %v2174_v59, %v12933_v33  ;;  %v10425_v56 = vadd.f32 %v2282_v16, %v12934_v52  ;;  %v2170_v14 = vsel %vm2069_vm0, %v2168_v61, %v2169_v53  ;;  %v2172_v44 = vsel %vm2069_vm0, %v2169_v53, %v2171_v28  ;;  %v8190_v18 = vpop.f32.mrb[204].mxu0  ;;  %2807 = vmatprep.mubr.bf16.mxu1 %v9311_v55 }
 0x317   : > { %v10431_v32 = vadd.f32 %v2170_v14, %v12936_v38  ;;  %v10434_v10 = vadd.f32 %v2172_v44, %v12937_v36  ;;  %v1959_v49 = vadd.f32 %v8190_v18, %v10282_v2  ;;  %v1950_v37 = vpop.f32.mrb[205].mxu0  ;;  %v12938_v18 = vld [vmem:[#allocation76_spill] sm:$0xff] }
 0x318   : > { %12935 = vst [vmem:[#allocation33_spill] sm:$0xff] %v10425_v56  ;;  %v1951_v43 = vadd.f32 %v1950_v37, %v10255_v26  ;;  %v8191_v59 = vpop.f32.mrb[206].mxu0  ;;  %v10438_v16 = vpop.f32.mrb[220].mxu1 }
 0x319   : > { %v1962_v61 = vadd.f32 %v8191_v59, %v10286_v39  ;;  %v1953_v53 = vpop.f32.mrb[207].mxu0  ;;  %v2595_v28 = vpop.f32.mrb[221].mxu1  ;;  %v2178_v14 = vrot.slane %v1959_v49, 1  ;;  %v12940_v39 = vld [vmem:[#allocation78_spill] sm:$0xff] }
 0x31a   : > { %v1954_v33 = vadd.f32 %v1953_v53, %v10259_v21  ;;  %v10442_v52 = vpop.f32.mrb[222].mxu1  ;;  %v2175_v36 = vrot.slane %v1951_v43, 1  ;;  %v12942_v43 = vld [vmem:[#allocation106_spill] sm:$0xff]  ;;  %v12943_v28 = vld [vmem:[#allocation107_spill] sm:$0xff] }
 0x31b   : > { %v2180_v38 = vrot.slane %v1962_v61, 1  ;;  %v2598_v44 = vpop.f32.mrb[223].mxu1 }
 0x31c   : > { %v2176_v56 = vrot.slane %v1954_v33, 1 }
 0x31d   : > { %v2181_v2 = vsel %vm2069_vm0, %v2178_v14, %v2180_v38  ;;  %v2283_v26 = vsel %vm2069_vm0, %v2180_v38, 0.0  ;;  %2808 = vmatmul.mubr.bf16.gmra.mrb[72].mxu1 %v12712_v1 }
 0x31e   : > { %v10448_v37 = vadd.f32 %v2181_v2, %v12938_v18  ;;  %v10451_v59 = vadd.f32 %v2283_v26, %v12940_v39  ;;  %v2177_v21 = vsel %vm2069_vm0, %v2175_v36, %v2176_v56  ;;  %v2179_v49 = vsel %vm2069_vm0, %v2176_v56, %v2178_v14  ;;  %v8194_v61 = vpop.f32.mrb[208].mxu0  ;;  %2815 = vmatprep.mubr.bf16.mxu1 %v12855_v60 }
 0x31f   : > { %v10457_v53 = vadd.f32 %v2177_v21, %v12942_v43  ;;  %v10460_v33 = vadd.f32 %v2179_v49, %v12943_v28  ;;  %v1975_v1 = vadd.f32 %v8194_v61, %v10334_v6  ;;  %v1966_v38 = vpop.f32.mrb[209].mxu0  ;;  %v12945_v61 = vld [vmem:[#allocation80_spill] sm:$0xff] }
 0x320   : > { %12939 = vst [vmem:[#allocation28_spill] sm:$0xff] %v10448_v37  ;;  %12941 = vst [vmem:[#allocation84_spill] sm:$0xff] %v10451_v59  ;;  %v1967_v44 = vadd.f32 %v1966_v38, %v10308_v30  ;;  %v8195_v2 = vpop.f32.mrb[210].mxu0  ;;  %v10464_v26 = vpop.f32.mrb[224].mxu1 }
 0x321   : > { %12944 = vst [vmem:[#allocation79_spill] sm:$0xff] %v10460_v33  ;;  %v1978_v36 = vadd.f32 %v8195_v2, %v10338_v4  ;;  %v1969_v56 = vpop.f32.mrb[211].mxu0  ;;  %v2603_v14 = vpop.f32.mrb[225].mxu1  ;;  %v2185_v21 = vrot.slane %v1975_v1, 1  ;;  %v12947_v4 = vld [vmem:[#allocation82_spill] sm:$0xff] }
 0x322   : > { %v1970_v18 = vadd.f32 %v1969_v56, %v10312_v41  ;;  %v10468_v39 = vpop.f32.mrb[226].mxu1  ;;  %v2182_v28 = vrot.slane %v1967_v44, 1  ;;  %v12949_v44 = vld [vmem:[#allocation108_spill] sm:$0xff]  ;;  %v12951_v14 = vld [vmem:[#allocation109_spill] sm:$0xff] }
 0x323   : > { %v2187_v43 = vrot.slane %v1978_v36, 1  ;;  %v2606_v49 = vpop.f32.mrb[227].mxu1 }
 0x324   : > { %v2183_v59 = vrot.slane %v1970_v18, 1  ;;  %v3759_v49 = vlaneseq }
 0x325   : > { %v2188_v6 = vsel %vm2069_vm0, %v2185_v21, %v2187_v43  ;;  %v2284_v30 = vsel %vm2069_vm0, %v2187_v43, 0.0  ;;  %2816 = vmatmul.mubr.bf16.gmra.mrb[76].mxu1 %v9308_v54 }
 0x326   : > { %v10474_v38 = vadd.f32 %v2188_v6, %v12945_v61  ;;  %v10477_v2 = vadd.f32 %v2284_v30, %v12947_v4  ;;  %v2184_v41 = vsel %vm2069_vm0, %v2182_v28, %v2183_v59  ;;  %v2186_v1 = vsel %vm2069_vm0, %v2183_v59, %v2185_v21  ;;  %v8198_v36 = vpop.f32.mrb[212].mxu0  ;;  %2823 = vmatprep.mubr.bf16.mxu1 %v12856_v57 }
 0x327   : > { %v10483_v56 = vadd.f32 %v2184_v41, %v12949_v44  ;;  %v10486_v18 = vadd.f32 %v2186_v1, %v12951_v14  ;;  %v1991_v54 = vadd.f32 %v8198_v36, %v10386_v11  ;;  %v1982_v43 = vpop.f32.mrb[213].mxu0  ;;  %v3760_v14 = vshrl.u32 %v3759_v49, 7  ;;  %v12957_v49 = vld [vmem:[#allocation110_spill] sm:$0xff] }
 0x328   : > { %12946 = vst [vmem:[#allocation81_spill] sm:$0xff] %v10474_v38  ;;  %12948 = vst [vmem:[#allocation105_spill] sm:$0xff] %v10477_v2  ;;  %v1983_v6 = vadd.f32 %v1982_v43, %v10360_v24  ;;  %v8199_v30 = vpop.f32.mrb[214].mxu0  ;;  %v2609_v61 = vpop.f32.mrb[228].mxu1  ;;  %v12953_v43 = vld [vmem:[#allocation83_spill] sm:$0xff] }
 0x329   : > { %12950 = vst [vmem:[#allocation34_spill] sm:$0xff] %v10483_v56  ;;  %12952 = vst [vmem:[#allocation35_spill] sm:$0xff] %v10486_v18  ;;  %v1994_v28 = vadd.f32 %v8199_v30, %v10390_v9  ;;  %v1985_v59 = vpop.f32.mrb[215].mxu0  ;;  %v2611_v21 = vpop.f32.mrb[229].mxu1  ;;  %v2192_v41 = vrot.slane %v1991_v54, 1  ;;  %v12955_v30 = vld [vmem:[#allocation85_spill] sm:$0xff] }
 0x32a   : > { %v1986_v4 = vadd.f32 %v1985_v59, %v10364_v23  ;;  %v10492_v2 = vpop.f32.mrb[230].mxu1  ;;  %v2189_v38 = vrot.slane %v1983_v6, 1  ;;  %v12959_v59 = vld [vmem:[#allocation24_spill] sm:$0xff]  ;;  %vm3818_vm1 = vcmp.ge.s32.totalorder %v3760_v14, 1 }
 0x32b   : > { %v2194_v44 = vrot.slane %v1994_v28, 1  ;;  %v2614_v1 = vpop.f32.mrb[231].mxu1  ;;  %vm3974_vm5 = vmpackc.low %vm3818_vm1, %vm3818_vm1 }
 0x32c   : > { %v2190_v11 = vrot.slane %v1986_v4, 1 }
 0x32d   : > { %v2195_v36 = vsel %vm2069_vm0, %v2192_v41, %v2194_v44  ;;  %v2285_v24 = vsel %vm2069_vm0, %v2194_v44, 0.0  ;;  %2824 = vmatmul.mubr.bf16.gmra.mrb[80].mxu1 %v9311_v55 }
 0x32e   : > { %v10498_v9 = vadd.f32 %v2195_v36, %v12953_v43  ;;  %v10501_v21 = vadd.f32 %v2285_v24, %v12955_v30  ;;  %v2191_v23 = vsel %vm2069_vm0, %v2189_v38, %v2190_v11  ;;  %v2193_v54 = vsel %vm2069_vm0, %v2190_v11, %v2192_v41  ;;  %v8218_v28 = vpop.f32.mrb[216].mxu0  ;;  %2831 = vmatprep.mubr.bf16.mxu1 %v9328_v3 }
 0x32f   : > { %v10507_v6 = vadd.f32 %v2191_v23, %v12957_v49  ;;  %v10510_v4 = vadd.f32 %v2193_v54, %v12959_v59  ;;  %v2915_v55 = vadd.f32 %v8218_v28, %v10438_v16  ;;  %v2906_v44 = vpop.f32.mrb[217].mxu0  ;;  %v3762_v28 = vadd.s32 16, %v3760_v14 }
 0x330   : > { %12954 = vst [vmem:[#allocation27_spill] sm:$0xff] %v10498_v9  ;;  %12956 = vst [vmem:[#allocation44_spill] sm:$0xff] %v10501_v21  ;;  %v2907_v1 = vadd.f32 %v2906_v44, %v10412_v20  ;;  %v8219_v36 = vpop.f32.mrb[218].mxu0  ;;  %v10514_v24 = vpop.f32.mrb[232].mxu1  ;;  %v10538_v14 = vsel %vm10517_vm3, 65537, %v12670_v47  ;;  %v12966_v21 = vld [vmem:[#allocation38_spill] sm:$0xff] }
 0x331   : > { %12958 = vst [vmem:[#allocation25_spill] sm:$0xff] %v10507_v6  ;;  %12960 = vst [vmem:[#allocation87_spill] sm:$0xff] %v10510_v4  ;;  %v2918_v38 = vadd.f32 %v8219_v36, %v10442_v52  ;;  %v2909_v41 = vpop.f32.mrb[219].mxu0  ;;  %v2619_v11 = vpop.f32.mrb[233].mxu1  ;;  %v3269_v23 = vrot.slane %v2915_v55, 2  ;;  %v12963_v55 = vld [vmem:[#allocation39_spill] sm:$0xff] }
 0x332   : > { %v2910_v30 = vadd.f32 %v2909_v41, %v10416_v19  ;;  %v10522_v16 = vpop.f32.mrb[234].mxu1  ;;  %v3266_v49 = vrot.slane %v2907_v1, 2  ;;  %v10527_v52 = vld [vmem:[%s12559_s2] ss:$0 sm:$0xff]  ;;  %v10533_v19 = vsel %vm3974_vm5, 65537, %v12670_v47  ;;  %vm3896_vm6 = vcmp.le.s32.totalorder %v3762_v28, 16 }
 0x333   : > { %v3271_v20 = vrot.slane %v2918_v38, 2  ;;  %v2622_v54 = vpop.f32.mrb[235].mxu1  ;;  %v12964_v38 = vld [vmem:[#allocation40_spill] sm:$0xff]  ;;  %vm3976_vm9 = vmpackc.low %vm3896_vm6, %vm3896_vm6 }
 0x334   : > { %v3267_v59 = vrot.slane %v2910_v30, 2  ;;  %v4048_v28 = vsel %vm3976_vm9, 65537, %v12670_v47 }
 0x335   : > { %v3272_v44 = vsel %vm3265_vm4, %v3269_v23, %v3271_v20  ;;  %v3464_v36 = vsel %vm3265_vm4, %v3271_v20, 0.0  ;;  %2832 = vmatmul.mubr.bf16.gmra.mrb[84].mxu1 %v12855_v60  ;;  %v12965_v60 = vld [vmem:[#allocation37_spill] sm:$0xff] }
 0x336   : > { %v3484_v1 = vadd.f32 %v3272_v44, %v12963_v55  ;;  %v3485_v41 = vadd.f32 %v3464_v36, %v12964_v38  ;;  %v3268_v11 = vsel %vm3265_vm4, %v3266_v49, %v3267_v59  ;;  %v3270_v30 = vsel %vm3265_vm4, %v3267_v59, %v3269_v23  ;;  %v8222_v54 = vpop.f32.mrb[220].mxu0  ;;  %2839 = vmatprep.mubr.bf16.mxu1 %v12863_v35 }
 0x337   : > { %v3482_v20 = vadd.f32 %v3268_v11, %v12965_v60  ;;  %v3483_v9 = vadd.f32 %v3270_v30, %v12966_v21  ;;  %v2931_v4 = vadd.f32 %v8222_v54, %v2609_v61  ;;  %v2922_v6 = vpop.f32.mrb[221].mxu0 }
 0x338   : > { %v3562_v43 = vadd.f32 %v10527_v52, %v3484_v1  ;;  %v3563_v44 = vadd.f32 %v10527_v52, %v3485_v41  ;;  %v2923_v36 = vadd.f32 %v2922_v6, %v10464_v26  ;;  %v8223_v55 = vpop.f32.mrb[222].mxu0  ;;  %v2625_v49 = vpop.f32.mrb[236].mxu1  ;;  %v7369_v26 = vcombine.low %v10533_v19, %v10538_v14  ;;  %v12969_v14 = vld [vmem:[#allocation89_spill] sm:$0xff] }
 0x339   : > { %v3560_v23 = vadd.f32 %v10527_v52, %v3482_v20  ;;  %v3561_v59 = vadd.f32 %v10527_v52, %v3483_v9  ;;  %v2934_v38 = vadd.f32 %v8223_v55, %v10492_v2  ;;  %v2925_v11 = vpop.f32.mrb[223].mxu0  ;;  %v2627_v60 = vpop.f32.mrb[237].mxu1  ;;  %v3276_v9 = vrot.slane %v2931_v4, 2 }
 0x33a   : > { %v3634_v61 = vmax.f32 %v3562_v43, 0.0  ;;  %v3635_v21 = vmax.f32 %v3563_v44, 0.0  ;;  %v2926_v1 = vadd.f32 %v2925_v11, %v10468_v39  ;;  %v2628_v30 = vpop.f32.mrb[238].mxu1  ;;  %v3273_v55 = vrot.slane %v2923_v36, 2 }
 0x33b   : > { %v3632_v6 = vmax.f32 %v3560_v23, 0.0  ;;  %v3633_v41 = vmax.f32 %v3561_v59, 0.0  ;;  %v3278_v54 = vrot.slane %v2934_v38, 2  ;;  %v2630_v2 = vpop.f32.mrb[239].mxu1  ;;  %v4042_v43 = vsel %vm3970_vm8, 65537, %v12670_v47  ;;  %v12970_v23 = vld [vmem:[#allocation92_spill] sm:$0xff] }
 0x33c   : > { %v10558_v20 = vpack.c.bf16 %v3635_v21, %v3634_v61  ;;  %v3274_v60 = vrot.slane %v2926_v1, 2  ;;  %v12971_v21 = vld [vmem:[#allocation91_spill] sm:$0xff]  ;;  %vm10580_vm10 = vcmp.ne.s16.totalorder %v7369_v26, 0 }
 0x33d   : > { %v10561_v44 = vpack.c.bf16 %v3633_v41, %v3632_v6  ;;  %v3279_v39 = vsel %vm3265_vm4, %v3276_v9, %v3278_v54  ;;  %v3465_v19 = vsel %vm3265_vm4, %v3278_v54, 0.0  ;;  %2840 = vmatmul.mubr.bf16.gmra.mrb[88].mxu1 %v12856_v57 }
 0x33e   : > { %12967 = vst [vmem:[#allocation36_spill] sm:$0xff] %v10558_v20  ;;  %v3488_v4 = vadd.f32 %v3279_v39, %v12969_v14  ;;  %v3489_v59 = vadd.f32 %v3465_v19, %v12970_v23  ;;  %v3275_v38 = vsel %vm3265_vm4, %v3273_v55, %v3274_v60  ;;  %v3277_v36 = vsel %vm3265_vm4, %v3274_v60, %v3276_v9  ;;  %v8226_v11 = vpop.f32.mrb[224].mxu0 }
 0x33f   : > { %12968 = vst [vmem:[#allocation48_spill] sm:$0xff] %v10561_v44  ;;  %2847 = vmatprep.mubr.bf16.mxu1 %v12872_v51  ;;  %v3486_v61 = vadd.f32 %v3275_v38, %v10074_v8  ;;  %v3487_v1 = vadd.f32 %v3277_v36, %v12971_v21  ;;  %v2947_v6 = vadd.f32 %v8226_v11, %v2625_v49  ;;  %v2938_v41 = vpop.f32.mrb[225].mxu0 }
 0x340   : > { %v3566_v57 = vadd.f32 %v10527_v52, %v3488_v4  ;;  %v3567_v54 = vadd.f32 %v10527_v52, %v3489_v59  ;;  %v2939_v2 = vadd.f32 %v2938_v41, %v10514_v24  ;;  %v8227_v39 = vpop.f32.mrb[226].mxu0  ;;  %v2633_v19 = vpop.f32.mrb[240].mxu1  ;;  %v7367_v55 = vcombine.low %v4042_v43, %v4042_v43 }
 0x341   : > { %v3564_v9 = vadd.f32 %v10527_v52, %v3486_v61  ;;  %v3565_v60 = vadd.f32 %v10527_v52, %v3487_v1  ;;  %v2950_v14 = vadd.f32 %v8227_v39, %v2628_v30  ;;  %v2941_v23 = vpop.f32.mrb[227].mxu0  ;;  %v2635_v8 = vpop.f32.mrb[241].mxu1  ;;  %v7370_v38 = vcombine.low %v4048_v28, %v4042_v43 }
 0x342   : > { %v3638_v36 = vmax.f32 %v3566_v57, 0.0  ;;  %v3639_v49 = vmax.f32 %v3567_v54, 0.0  ;;  %v2942_v11 = vadd.f32 %v2941_v23, %v10522_v16  ;;  %v2636_v4 = vpop.f32.mrb[242].mxu1  ;;  %v3283_v41 = vrot.slane %v2947_v6, 2  ;;  %v12981_v57 = vld [vmem:[#allocation43_spill] sm:$0xff]  ;;  %v12983_v23 = vld [vmem:[#allocation41_spill] sm:$0xff] }
 0x343   : > { %v3636_v24 = vmax.f32 %v3564_v9, 0.0  ;;  %v3637_v21 = vmax.f32 %v3565_v60, 0.0  ;;  %v3285_v18 = vrot.slane %v2950_v14, 2  ;;  %v2638_v61 = vpop.f32.mrb[243].mxu1  ;;  %v3280_v30 = vrot.slane %v2939_v2, 2  ;;  %v12982_v2 = vld [vmem:[#allocation45_spill] sm:$0xff] }
 0x344   : > { %v10584_v56 = vpack.c.bf16 %v3639_v49, %v3638_v36  ;;  %v3281_v1 = vrot.slane %v2942_v11, 2  ;;  %vm10586_vm11 = vcmp.ne.s16.totalorder %v7367_v55, 0  ;;  %v12975_v43 = vmov 0  ;;  %v8709_v14 = vld [vmem:[#allocation7 + $0x148] sm:$0xff]  }
 0x345   : > { %v12976_v43 = vsel %vm10586_vm11, 4294967295, %v12975_v43  ;;  %v10590_v28 = vpack.c.bf16 %v3637_v21, %v3636_v24  ;;  %v3286_v16 = vsel %vm3265_vm4, %v3283_v41, %v3285_v18  ;;  %v3466_v26 = vsel %vm3265_vm4, %v3285_v18, 0.0  ;;  %2848 = vmatmul.mubr.bf16.gmra.mrb[92].mxu1 %v9328_v3 }
 0x346   : > { %12974 = vst [vmem:[#allocation50_spill] sm:$0xff] %v10584_v56  ;;  %12977 = vst [vmem:[#allocation46_spill] sm:$0xff] %v12976_v43  ;;  %vm10595_vm12 = vcmp.ne.s16.totalorder %v7370_v38, 0  ;;  %v3492_v54 = vadd.f32 %v3286_v16, %v12981_v57  ;;  %v3493_v39 = vadd.f32 %v3466_v26, %v12982_v2  ;;  %v3282_v55 = vsel %vm3265_vm4, %v3280_v30, %v3281_v1  ;;  %v8230_v60 = vpop.f32.mrb[228].mxu0  ;;  %v8710_v26 = vld [vmem:[#allocation7 + $0x150] sm:$0xff]  }
 0x347   : > { %12978 = vst [vmem:[#allocation90_spill] sm:$0xff] %v10590_v28  ;;  %v3284_v9 = vsel %vm3265_vm4, %v3281_v1, %v3283_v41  ;;  %2855 = vmatprep.mubr.bf16.mxu1 %v12873_v17  ;;  %v3490_v18 = vadd.f32 %v3282_v55, %v10103_v48  ;;  %v2954_v8 = vpop.f32.mrb[229].mxu0  ;;  %7427 = vmatprep.mubr.msk.bf16.mxu0 %vm10580_vm10, %v10590_v28 }
 0x348   : > { %v3491_v3 = vadd.f32 %v3284_v9, %v12983_v23  ;;  %v3570_v38 = vadd.f32 %v10527_v52, %v3492_v54  ;;  %v3571_v36 = vadd.f32 %v10527_v52, %v3493_v39  ;;  %v2641_v49 = vpop.f32.mrb[244].mxu1  ;;  %v2955_v11 = vadd.f32 %v2954_v8, %v2633_v19  ;;  %v8231_v24 = vpop.f32.mrb[230].mxu0  ;;  %7428 = vmatmul.mubr.msk.bf16.vlgmr.msra.gmra.mrb[32].mxu0 %vm10586_vm11, %v10561_v44 }
 0x349   : > { %v3568_v48 = vadd.f32 %v10527_v52, %v3490_v18  ;;  %v2963_v21 = vadd.f32 %v8230_v60, %v2641_v49  ;;  %v2643_v41 = vpop.f32.mrb[245].mxu1  ;;  %v2957_v61 = vpop.f32.mrb[231].mxu0  ;;  %7429 = vmatprep.mubr.msk.bf16.mxu0 %vm10595_vm12, %v10584_v56  ;;  %8369 = vmatpush3.bf16.msra.mxu0 %v10178_v62 }
 0x34a   : > { %v3569_v17 = vadd.f32 %v10527_v52, %v3491_v3  ;;  %v3642_v30 = vmax.f32 %v3570_v38, 0.0  ;;  %v3643_v19 = vmax.f32 %v3571_v36, 0.0  ;;  %v2644_v1 = vpop.f32.mrb[246].mxu1  ;;  %v2958_v16 = vadd.f32 %v2957_v61, %v2636_v4  ;;  %8370 = vmatprep.subr.bf16.mxu0 %v8709_v14  ;;  %v8711_v38 = vld [vmem:[#allocation7 + $0x158] sm:$0xff]  }
 0x34b   : > { %v3640_v57 = vmax.f32 %v3568_v48, 0.0  ;;  %v3290_v2 = vrot.slane %v2963_v21, 2  ;;  %v2966_v39 = vadd.f32 %v8231_v24, %v2644_v1  ;;  %v2646_v55 = vpop.f32.mrb[247].mxu1  ;;  %v3287_v60 = vrot.slane %v2955_v11, 2  ;;  %v12986_v11 = vld [vmem:[#allocation95_spill] sm:$0xff]  ;;  %v12989_v41 = vld [vmem:[#allocation94_spill] sm:$0xff] }
 0x34c   : > { %v3641_v54 = vmax.f32 %v3569_v17, 0.0  ;;  %v10620_v9 = vpack.c.bf16 %v3643_v19, %v3642_v30  ;;  %v3288_v18 = vrot.slane %v2958_v16, 2  ;;  %v12987_v48 = vld [vmem:[#allocation51_spill] sm:$0xff] }
 0x34d   : > { %v3292_v3 = vrot.slane %v2966_v39, 2  ;;  %2856 = vmatmul.mubr.bf16.gmra.mrb[96].mxu1 %v12863_v35  ;;  %8371 = vmatpush3.bf16.msra.mxu0 %v8709_v14  ;;  %v12988_v35 = vld [vmem:[#allocation42_spill] sm:$0xff] }
 0x34e   : > { %12984 = vst [vmem:[#allocation52_spill] sm:$0xff] %v10620_v9  ;;  %v10622_v23 = vpack.c.bf16 %v3641_v54, %v3640_v57  ;;  %v3289_v62 = vsel %vm3265_vm4, %v3287_v60, %v3288_v18  ;;  %v3291_v4 = vsel %vm3265_vm4, %v3288_v18, %v3290_v2  ;;  %v8234_v8 = vpop.f32.mrb[232].mxu0  ;;  %2863 = vmatprep.mubr.bf16.mxu1 %v12881_v46 }
 0x34f   : > { %8372 = vmatprep.subr.bf16.mxu0 %v8710_v26  ;;  %v3293_v36 = vsel %vm3265_vm4, %v3290_v2, %v3292_v3  ;;  %v3467_v49 = vsel %vm3265_vm4, %v3292_v3, 0.0  ;;  %v3494_v24 = vadd.f32 %v3289_v62, %v12986_v11  ;;  %v3495_v17 = vadd.f32 %v3291_v4, %v12987_v48  ;;  %v2970_v21 = vpop.f32.mrb[233].mxu0  ;;  %v8713_v11 = vld [vmem:[#allocation7 + $0x160] sm:$0xff]  }
 0x350   : > { %12985 = vst [vmem:[#allocation54_spill] sm:$0xff] %v10622_v23  ;;  %v3496_v14 = vadd.f32 %v3293_v36, %v12988_v35  ;;  %v3497_v61 = vadd.f32 %v3467_v49, %v12989_v41  ;;  %v2649_v30 = vpop.f32.mrb[248].mxu1  ;;  %v8235_v19 = vpop.f32.mrb[234].mxu0  ;;  %7430 = vmatmul.mubr.msk.bf16.gmra.mrb[36].mxu0 %vm10586_vm11, %v10558_v20 }
 0x351   : > { %v3572_v46 = vadd.f32 %v10527_v52, %v3494_v24  ;;  %v3573_v1 = vadd.f32 %v10527_v52, %v3495_v17  ;;  %v2971_v16 = vadd.f32 %v2970_v21, %v2649_v30  ;;  %v2651_v57 = vpop.f32.mrb[249].mxu1  ;;  %v2973_v54 = vpop.f32.mrb[235].mxu0  ;;  %7431 = vmatprep.mubr.msk.bf16.mxu0 %vm10580_vm10, %v10622_v23  ;;  %8373 = vmatpush3.bf16.msra.mxu0 %v8710_v26 }
 0x352   : > { %v3574_v2 = vadd.f32 %v10527_v52, %v3496_v14  ;;  %v3575_v39 = vadd.f32 %v10527_v52, %v3497_v61  ;;  %v2652_v55 = vpop.f32.mrb[250].mxu1  ;;  %8374 = vmatprep.subr.bf16.mxu0 %v8711_v38 }
 0x353   : > { %v3644_v60 = vmax.f32 %v3572_v46, 0.0  ;;  %v3645_v18 = vmax.f32 %v3573_v1, 0.0  ;;  %v3294_v3 = vrot.slane %v2971_v16, 2  ;;  %v2974_v62 = vadd.f32 %v2973_v54, %v2652_v55  ;;  %v2654_v4 = vpop.f32.mrb[251].mxu1  ;;  %v8712_v1 = vld [vmem:[#allocation7 + $0xc0] sm:$0xff]  }
 0x354   : > { %v3646_v36 = vmax.f32 %v3574_v2, 0.0  ;;  %v3647_v49 = vmax.f32 %v3575_v39, 0.0  ;;  %v12992_v4 = vld [vmem:[#allocation53_spill] sm:$0xff] }
 0x355   : > { %v10644_v24 = vpack.c.bf16 %v3645_v18, %v3644_v60  ;;  %v3295_v48 = vrot.slane %v2974_v62, 2  ;;  %2864 = vmatmul.mubr.bf16.gmra.mrb[100].mxu1 %v12872_v51  ;;  %8375 = vmatpush3.bf16.msra.mxu0 %v8711_v38 }
 0x356   : > { %v10647_v26 = vpack.c.bf16 %v3647_v49, %v3646_v36  ;;  %8304 = vmatprep.mubr.msk.bf16.mxu1 %vm10580_vm10, %v10622_v23  ;;  %v10652_v17 = vpop.f32.mrb[236].mxu0  ;;  %8376 = vmatprep.subr.bf16.mxu0 %v8713_v11  ;;  %v12993_v36 = vld [vmem:[#allocation47_spill] sm:$0xff] }
 0x357   : > { %12990 = vst [vmem:[#allocation93_spill] sm:$0xff] %v10644_v24  ;;  %v3296_v21 = vsel %vm3265_vm4, %v3294_v3, %v3295_v48  ;;  %v2986_v35 = vpop.f32.mrb[237].mxu0 }
 0x358   : > { %12991 = vst [vmem:[#allocation55_spill] sm:$0xff] %v10647_v26  ;;  %v3498_v14 = vadd.f32 %v3296_v21, %v10160_v40  ;;  %v2657_v41 = vpop.f32.mrb[252].mxu1  ;;  %7432 = vmatmul.mubr.msk.bf16.gmra.mrb[40].mxu0 %vm10580_vm10, %v10590_v28  ;;  %v10659_v51 = vpop.f32.mrb[238].mxu0 }
 0x359   : > { %v2979_v38 = vadd.f32 %v8234_v8, %v2657_v41  ;;  %v2659_v61 = vpop.f32.mrb[253].mxu1  ;;  %7433 = vmatprep.mubr.msk.bf16.mxu0 %vm10595_vm12, %v10620_v9  ;;  %v2989_v30 = vpop.f32.mrb[239].mxu0  ;;  %8377 = vmatpush3.bf16.msra.mxu0 %v8713_v11 }
 0x35a   : > { %v2660_v46 = vpop.f32.mrb[254].mxu1  ;;  %v3576_v8 = vadd.f32 %v10527_v52, %v3498_v14 }
 0x35b   : > { %v3297_v16 = vrot.slane %v2979_v38, 2  ;;  %v2982_v57 = vadd.f32 %v8235_v19, %v2660_v46  ;;  %v2662_v40 = vpop.f32.mrb[255].mxu1  ;;  %v8714_v19 = vld [vmem:[#allocation7 + $0xc8] sm:$0xff]  }
 0x35c   : > { %v3648_v38 = vmax.f32 %v3576_v8, 0.0 }
 0x35d   : > { %v3298_v54 = vsel %vm3265_vm4, %v3295_v48, %v3297_v16  ;;  %v3299_v2 = vrot.slane %v2982_v57, 2  ;;  %8305 = vmatmul.mubr.msk.bf16.vlgmr.msra.gmra.mrb[104].mxu1 %vm10595_vm12, %v10620_v9  ;;  %v8715_v57 = vld [vmem:[#allocation7 + $0xd0] sm:$0xff]  }
 0x35e   : > { %v3499_v39 = vadd.f32 %v3298_v54, %v10163_v0  ;;  %8308 = vmatprep.mubr.msk.bf16.mxu1 %vm10580_vm10, %v10644_v24  ;;  %v10673_v55 = vpop.f32.mrb[240].mxu0  ;;  %5195 = vmatpush1.bf16.msra.mxu1 %v8712_v1 }
 0x35f   : > { %v3300_v60 = vsel %vm3265_vm4, %v3297_v16, %v3299_v2  ;;  %v3468_v18 = vsel %vm3265_vm4, %v3299_v2, 0.0  ;;  %v10677_v3 = vpop.f32.mrb[241].mxu0  ;;  %5196 = vmatprep.subr.bf16.mxu1 %v12670_v47 }
 0x360   : > { %v3577_v62 = vadd.f32 %v10527_v52, %v3499_v39  ;;  %v3500_v0 = vadd.f32 %v3300_v60, %v12992_v4  ;;  %v3501_v49 = vadd.f32 %v3468_v18, %v12993_v36  ;;  %v2665_v11 = vpop.f32.mrb[0].mxu1  ;;  %7434 = vmatmul.mubr.msk.bf16.gmra.mrb[44].mxu0 %vm10595_vm12, %v10584_v56  ;;  %v10686_v48 = vpop.f32.mrb[242].mxu0 }
 0x361   : > { %v2987_v21 = vadd.f32 %v2986_v35, %v2665_v11  ;;  %v2667_v14 = vpop.f32.mrb[1].mxu1  ;;  %7435 = vmatprep.mubr.msk.bf16.mxu0 %vm10580_vm10, %v10644_v24  ;;  %v10691_v41 = vpop.f32.mrb[243].mxu0 }
 0x362   : > { %v3649_v61 = vmax.f32 %v3577_v62, 0.0  ;;  %v3578_v46 = vadd.f32 %v10527_v52, %v3500_v0  ;;  %v3579_v1 = vadd.f32 %v10527_v52, %v3501_v49  ;;  %v2668_v16 = vpop.f32.mrb[2].mxu1  ;;  %5197 = vmatpush1.bf16.msra.mxu1 %v8714_v19  ;;  %v12996_v0 = vld [vmem:[#allocation99_spill] sm:$0xff] }
 0x363   : > { %v3301_v40 = vrot.slane %v2987_v21, 2  ;;  %v2990_v54 = vadd.f32 %v2989_v30, %v2668_v16  ;;  %v2670_v2 = vpop.f32.mrb[3].mxu1  ;;  %5198 = vmatprep.subr.bf16.mxu1 %v12670_v47  ;;  %v8716_v30 = vld [vmem:[#allocation7 + $0xd8] sm:$0xff]  }
 0x364   : > { %v10696_v35 = vpack.c.bf16 %v3649_v61, %v3648_v38  ;;  %v3650_v39 = vmax.f32 %v3578_v46, 0.0  ;;  %v3651_v60 = vmax.f32 %v3579_v1, 0.0  ;;  %v12997_v2 = vld [vmem:[#allocation59_spill] sm:$0xff] }
 0x365   : > { %v3302_v18 = vrot.slane %v2990_v54, 2  ;;  %8309 = vmatmul.mubr.msk.bf16.gmra.mrb[108].mxu1 %vm10595_vm12, %v10647_v26 }
 0x366   : > { %12994 = vst [vmem:[#allocation113_spill] sm:$0xff] %v10696_v35  ;;  %v10701_v8 = vpack.c.bf16 %v3651_v60, %v3650_v39  ;;  %8312 = vmatprep.mubr.msk.bf16.mxu1 %vm10580_vm10, %v10696_v35  ;;  %v10706_v19 = vpop.f32.mrb[244].mxu0  ;;  %5199 = vmatpush1.bf16.msra.mxu1 %v8715_v57  ;;  %v8717_v57 = vld [vmem:[#allocation7 + $0xe0] sm:$0xff]  }
 0x367   : > { %v3303_v62 = vsel %vm3265_vm4, %v3301_v40, %v3302_v18  ;;  %v10709_v4 = vpop.f32.mrb[245].mxu0  ;;  %5200 = vmatprep.subr.bf16.mxu1 %v12670_v47 }
 0x368   : > { %12995 = vst [vmem:[#allocation111_spill] sm:$0xff] %v10701_v8  ;;  %v3502_v36 = vadd.f32 %v3303_v62, %v12996_v0  ;;  %v2673_v49 = vpop.f32.mrb[4].mxu1  ;;  %7436 = vmatmul.mubr.msk.bf16.gmra.mrb[48].mxu0 %vm10580_vm10, %v10622_v23  ;;  %v10716_v11 = vpop.f32.mrb[246].mxu0  ;;  %v12998_v0 = vld [vmem:[#allocation49_spill] sm:$0xff] }
 0x369   : > { %v2995_v21 = vadd.f32 %v10652_v17, %v2673_v49  ;;  %v2675_v14 = vpop.f32.mrb[5].mxu1  ;;  %7437 = vmatprep.mubr.msk.bf16.mxu0 %vm10595_vm12, %v10647_v26  ;;  %v10722_v38 = vpop.f32.mrb[247].mxu0 }
 0x36a   : > { %v2676_v61 = vpop.f32.mrb[6].mxu1  ;;  %5201 = vmatpush1.bf16.msra.mxu1 %v8716_v30  ;;  %v3580_v17 = vadd.f32 %v10527_v52, %v3502_v36 }
 0x36b   : > { %v3304_v46 = vrot.slane %v2995_v21, 2  ;;  %v2998_v1 = vadd.f32 %v10659_v51, %v2676_v61  ;;  %v2678_v16 = vpop.f32.mrb[7].mxu1  ;;  %5202 = vmatprep.subr.bf16.mxu1 %v12670_v47  ;;  %v12999_v21 = vld [vmem:[#allocation97_spill] sm:$0xff] }
 0x36d   : > { %v3305_v40 = vsel %vm3265_vm4, %v3302_v18, %v3304_v46  ;;  %v3306_v54 = vrot.slane %v2998_v1, 2  ;;  %8313 = vmatmul.mubr.msk.bf16.gmra.mrb[112].mxu1 %vm10595_vm12, %v10701_v8 }
 0x36e   : > { %v3503_v39 = vadd.f32 %v3305_v40, %v12997_v2  ;;  %v10732_v60 = vpop.f32.mrb[248].mxu0  ;;  %5203 = vmatpush1.bf16.msra.mxu1 %v8717_v57  ;;  %v3652_v57 = vmax.f32 %v3580_v17, 0.0 }
 0x36f   : > { %v3307_v51 = vsel %vm3265_vm4, %v3304_v46, %v3306_v54  ;;  %v3469_v30 = vsel %vm3265_vm4, %v3306_v54, 0.0  ;;  %v10736_v62 = vpop.f32.mrb[249].mxu0  ;;  %5204 = vmatprep.subr.bf16.mxu1 %v12670_v47 }
 0x370   : > { %v3581_v18 = vadd.f32 %v10527_v52, %v3503_v39  ;;  %v3504_v49 = vadd.f32 %v3307_v51, %v12998_v0  ;;  %v3505_v14 = vadd.f32 %v3469_v30, %v12999_v21  ;;  %v2681_v36 = vpop.f32.mrb[8].mxu1  ;;  %7438 = vmatmul.mubr.msk.bf16.gmra.mrb[52].mxu0 %vm10595_vm12, %v10620_v9  ;;  %v10745_v61 = vpop.f32.mrb[250].mxu0 }
 0x371   : > { %v3003_v46 = vadd.f32 %v10677_v3, %v2681_v36  ;;  %v2683_v1 = vpop.f32.mrb[9].mxu1  ;;  %7439 = vmatprep.mubr.msk.bf16.mxu0 %vm10580_vm10, %v10696_v35  ;;  %v10751_v16 = vpop.f32.mrb[251].mxu0 }
 0x372   : > { %v3653_v40 = vmax.f32 %v3581_v18, 0.0  ;;  %v3582_v54 = vadd.f32 %v10527_v52, %v3504_v49  ;;  %v3583_v2 = vadd.f32 %v10527_v52, %v3505_v14  ;;  %v2684_v39 = vpop.f32.mrb[10].mxu1  ;;  %v8718_v1 = vld [vmem:[#allocation7 + $0x168] sm:$0xff]  }
 0x373   : > { %v3308_v51 = vrot.slane %v3003_v46, 2  ;;  %v3006_v30 = vadd.f32 %v10691_v41, %v2684_v39  ;;  %v2686_v0 = vpop.f32.mrb[11].mxu1  ;;  %8378 = vmatprep.subr.bf16.mxu0 %v8718_v1  ;;  %v8719_v18 = vld [vmem:[#allocation7 + $0xe8] sm:$0xff]  }
 0x374   : > { %v10756_v21 = vpack.c.bf16 %v3653_v40, %v3652_v57  ;;  %v3654_v3 = vmax.f32 %v3582_v54, 0.0  ;;  %v3655_v36 = vmax.f32 %v3583_v2, 0.0  ;;  %8379 = vmatpush3.bf16.msra.mxu0 %v8718_v1  ;;  %5205 = vmatpush1.bf16.msra.mxu1 %v8719_v18  ;;  %v8720_v0 = vld [vmem:[#allocation7 + $0xf0] sm:$0xff]  }
 0x375   : > { %v3309_v9 = vrot.slane %v3006_v30, 2  ;;  %5206 = vmatprep.subr.bf16.mxu1 %v12670_v47 }
 0x376   : > { %13000 = vst [vmem:[#allocation114_spill] sm:$0xff] %v10756_v21  ;;  %v10758_v20 = vpack.c.bf16 %v3655_v36, %v3654_v3  ;;  %8316 = vmatprep.mubr.msk.bf16.mxu1 %vm10580_vm10, %v10756_v21  ;;  %v10763_v17 = vpop.f32.mrb[252].mxu0 }
 0x377   : > { %v3310_v49 = vsel %vm3265_vm4, %v3308_v51, %v3309_v9  ;;  %v10766_v41 = vpop.f32.mrb[253].mxu0 }
 0x378   : > { %13001 = vst [vmem:[#allocation112_spill] sm:$0xff] %v10758_v20  ;;  %v3506_v14 = vadd.f32 %v3310_v49, %v10219_v63  ;;  %v2689_v46 = vpop.f32.mrb[12].mxu1  ;;  %8317 = vmatmul.mubr.msk.bf16.gmra.mrb[116].mxu1 %vm10595_vm12, %v10758_v20  ;;  %7440 = vmatmul.mubr.msk.bf16.gmra.mrb[56].mxu0 %vm10580_vm10, %v10644_v24  ;;  %v10775_v57 = vpop.f32.mrb[254].mxu0 }
 0x379   : > { %v3011_v40 = vadd.f32 %v10673_v55, %v2689_v46  ;;  %v2691_v54 = vpop.f32.mrb[13].mxu1  ;;  %7441 = vmatprep.mubr.msk.bf16.mxu0 %vm10595_vm12, %v10701_v8  ;;  %v10781_v2 = vpop.f32.mrb[255].mxu0  ;;  %5207 = vmatpush1.bf16.msra.mxu1 %v8720_v0 }
 0x37a   : > { %v2692_v63 = vpop.f32.mrb[14].mxu1  ;;  %v3584_v55 = vadd.f32 %v10527_v52, %v3506_v14  ;;  %5208 = vmatprep.subr.bf16.mxu1 %v12670_v47 }
 0x37b   : > { %v3311_v39 = vrot.slane %v3011_v40, 2  ;;  %v3014_v51 = vadd.f32 %v10686_v48, %v2692_v63  ;;  %v2694_v30 = vpop.f32.mrb[15].mxu1  ;;  %v13002_v40 = vld [vmem:[#allocation61_spill] sm:$0xff]  ;;  %v13003_v63 = vld [vmem:[#allocation56_spill] sm:$0xff] }
 0x37d   : > { %v3312_v3 = vsel %vm3265_vm4, %v3309_v9, %v3311_v39  ;;  %v3313_v36 = vrot.slane %v3014_v51, 2 }
 0x37e   : > { %v3507_v1 = vadd.f32 %v3312_v3, %v10222_v5  ;;  %v10788_v49 = vpop.f32.mrb[0].mxu0  ;;  %v3656_v3 = vmax.f32 %v3584_v55, 0.0 }
 0x37f   : > { %v3314_v18 = vsel %vm3265_vm4, %v3311_v39, %v3313_v36  ;;  %v3470_v46 = vsel %vm3265_vm4, %v3313_v36, 0.0  ;;  %v10792_v54 = vpop.f32.mrb[1].mxu0 }
 0x380   : > { %v3585_v48 = vadd.f32 %v10527_v52, %v3507_v1  ;;  %v3508_v9 = vadd.f32 %v3314_v18, %v13002_v40  ;;  %v3509_v51 = vadd.f32 %v3470_v46, %v13003_v63  ;;  %v2697_v14 = vpop.f32.mrb[16].mxu1  ;;  %7442 = vmatmul.mubr.msk.bf16.gmra.mrb[60].mxu0 %vm10595_vm12, %v10647_v26  ;;  %v10801_v5 = vpop.f32.mrb[2].mxu0 }
 0x381   : > { %v3019_v39 = vadd.f32 %v10709_v4, %v2697_v14  ;;  %v2699_v30 = vpop.f32.mrb[17].mxu1  ;;  %7443 = vmatprep.mubr.msk.bf16.mxu0 %vm10580_vm10, %v10756_v21  ;;  %v10807_v0 = vpop.f32.mrb[3].mxu0 }
 0x382   : > { %v3657_v36 = vmax.f32 %v3585_v48, 0.0  ;;  %v3586_v1 = vadd.f32 %v10527_v52, %v3508_v9  ;;  %v3587_v18 = vadd.f32 %v10527_v52, %v3509_v51  ;;  %v2700_v46 = vpop.f32.mrb[18].mxu1  ;;  %v8721_v48 = vld [vmem:[#allocation7 + $0xf8] sm:$0xff]  }
 0x383   : > { %v3315_v40 = vrot.slane %v3019_v39, 2  ;;  %v3022_v63 = vadd.f32 %v10722_v38, %v2700_v46  ;;  %v2702_v26 = vpop.f32.mrb[19].mxu1  ;;  %5209 = vmatpush1.bf16.msra.mxu1 %v8721_v48 }
 0x384   : > { %v10812_v24 = vpack.c.bf16 %v3657_v36, %v3656_v3  ;;  %v3658_v4 = vmax.f32 %v3586_v1, 0.0  ;;  %v3659_v14 = vmax.f32 %v3587_v18, 0.0  ;;  %5210 = vmatprep.subr.bf16.mxu1 %v12670_v47 }
 0x385   : > { %v3316_v30 = vrot.slane %v3022_v63, 2  ;;  %v8722_v63 = vld [vmem:[#allocation7 + $0x100] sm:$0xff]  }
 0x386   : > { %13004 = vst [vmem:[#allocation100_spill] sm:$0xff] %v10812_v24  ;;  %v10814_v23 = vpack.c.bf16 %v3659_v14, %v3658_v4  ;;  %8320 = vmatprep.mubr.msk.bf16.mxu1 %vm10580_vm10, %v10812_v24  ;;  %v10819_v55 = vpop.f32.mrb[4].mxu0 }
 0x387   : > { %v3317_v9 = vsel %vm3265_vm4, %v3315_v40, %v3316_v30  ;;  %v10822_v51 = vpop.f32.mrb[5].mxu0  ;;  %5211 = vmatpush1.bf16.msra.mxu1 %v8722_v63 }
 0x388   : > { %13005 = vst [vmem:[#allocation58_spill] sm:$0xff] %v10814_v23  ;;  %v3510_v26 = vadd.f32 %v3317_v9, %v10248_v13  ;;  %v2705_v38 = vpop.f32.mrb[20].mxu1  ;;  %8321 = vmatmul.mubr.msk.bf16.gmra.mrb[120].mxu1 %vm10595_vm12, %v10814_v23  ;;  %7444 = vmatmul.mubr.msk.bf16.gmra.mrb[64].mxu0 %vm10580_vm10, %v10696_v35  ;;  %v10831_v39 = vpop.f32.mrb[6].mxu0 }
 0x389   : > { %v3027_v3 = vadd.f32 %v10706_v19, %v2705_v38  ;;  %v2707_v36 = vpop.f32.mrb[21].mxu1  ;;  %7445 = vmatprep.mubr.msk.bf16.mxu0 %vm10595_vm12, %v10758_v20  ;;  %v10837_v1 = vpop.f32.mrb[7].mxu0  ;;  %5212 = vmatprep.subr.bf16.mxu1 %v12670_v47 }
 0x38a   : > { %v2708_v13 = vpop.f32.mrb[22].mxu1  ;;  %v3588_v19 = vadd.f32 %v10527_v52, %v3510_v26 }
 0x38b   : > { %v3318_v18 = vrot.slane %v3027_v3, 2  ;;  %v3030_v46 = vadd.f32 %v10716_v11, %v2708_v13  ;;  %v2710_v40 = vpop.f32.mrb[23].mxu1  ;;  %v13006_v3 = vld [vmem:[#allocation57_spill] sm:$0xff]  ;;  %v13007_v13 = vld [vmem:[#allocation102_spill] sm:$0xff] }
 0x38d   : > { %v3319_v4 = vsel %vm3265_vm4, %v3316_v30, %v3318_v18  ;;  %v3320_v14 = vrot.slane %v3030_v46, 2 }
 0x38e   : > { %v3511_v9 = vadd.f32 %v3319_v4, %v10251_v7  ;;  %v10844_v38 = vpop.f32.mrb[8].mxu0  ;;  %v3660_v4 = vmax.f32 %v3588_v19, 0.0 }
 0x38f   : > { %v3321_v48 = vsel %vm3265_vm4, %v3318_v18, %v3320_v14  ;;  %v3471_v36 = vsel %vm3265_vm4, %v3320_v14, 0.0  ;;  %v10848_v35 = vpop.f32.mrb[9].mxu0 }
 0x390   : > { %v3589_v11 = vadd.f32 %v10527_v52, %v3511_v9  ;;  %v3512_v30 = vadd.f32 %v3321_v48, %v13006_v3  ;;  %v3513_v46 = vadd.f32 %v3471_v36, %v13007_v13  ;;  %v2713_v26 = vpop.f32.mrb[24].mxu1  ;;  %7446 = vmatmul.mubr.msk.bf16.gmra.mrb[68].mxu0 %vm10595_vm12, %v10701_v8  ;;  %v10857_v7 = vpop.f32.mrb[10].mxu0 }
 0x391   : > { %v3035_v18 = vadd.f32 %v10736_v62, %v2713_v26  ;;  %v2715_v40 = vpop.f32.mrb[25].mxu1  ;;  %7447 = vmatprep.mubr.msk.bf16.mxu0 %vm10580_vm10, %v10812_v24  ;;  %v10863_v63 = vpop.f32.mrb[11].mxu0 }
 0x392   : > { %v3661_v14 = vmax.f32 %v3589_v11, 0.0  ;;  %v3590_v9 = vadd.f32 %v10527_v52, %v3512_v30  ;;  %v3591_v48 = vadd.f32 %v10527_v52, %v3513_v46  ;;  %v2716_v36 = vpop.f32.mrb[26].mxu1  ;;  %v8723_v40 = vld [vmem:[#allocation7 + $0x170] sm:$0xff]   ;;  %v8724_v11 = vld [vmem:[#allocation7 + $0x108] sm:$0xff]  }
 0x393   : > { %v3322_v3 = vrot.slane %v3035_v18, 2  ;;  %v3038_v13 = vadd.f32 %v10751_v16, %v2716_v36  ;;  %v2718_v8 = vpop.f32.mrb[27].mxu1  ;;  %8380 = vmatprep.subr.bf16.mxu0 %v8723_v40  ;;  %5213 = vmatpush1.bf16.msra.mxu1 %v8724_v11 }
 0x394   : > { %v10868_v56 = vpack.c.bf16 %v3661_v14, %v3660_v4  ;;  %v3662_v62 = vmax.f32 %v3590_v9, 0.0  ;;  %v3663_v26 = vmax.f32 %v3591_v48, 0.0  ;;  %8381 = vmatpush3.bf16.msra.mxu0 %v8723_v40  ;;  %v13009_v8 = vld [vmem:[#allocation30_spill] sm:$0xff]  ;;  %5214 = vmatprep.subr.bf16.mxu1 %v12670_v47 }
 0x395   : > { %v3323_v44 = vrot.slane %v3038_v13, 2 }
 0x396   : > { %v10870_v28 = vpack.c.bf16 %v3663_v26, %v3662_v62  ;;  %8324 = vmatprep.mubr.msk.bf16.mxu1 %vm10580_vm10, %v10868_v56  ;;  %v10875_v19 = vpop.f32.mrb[12].mxu0  ;;  %v8725_v26 = vld [vmem:[#allocation7 + $0x110] sm:$0xff]  }
 0x397   : > { %v3324_v30 = vsel %vm3265_vm4, %v3322_v3, %v3323_v44  ;;  %v10878_v16 = vpop.f32.mrb[13].mxu0  ;;  %5215 = vmatpush1.bf16.msra.mxu1 %v8725_v26 }
 0x398   : > { %13008 = vst [vmem:[#allocation96_spill] sm:$0xff] %v10870_v28  ;;  %v3514_v46 = vadd.f32 %v3324_v30, %v13009_v8  ;;  %v2721_v18 = vpop.f32.mrb[28].mxu1  ;;  %8325 = vmatmul.mubr.msk.bf16.gmra.mrb[124].mxu1 %vm10595_vm12, %v10870_v28  ;;  %7448 = vmatmul.mubr.msk.bf16.gmra.mrb[72].mxu0 %vm10580_vm10, %v10756_v21  ;;  %v10887_v4 = vpop.f32.mrb[14].mxu0  ;;  %v13010_v8 = vld [vmem:[#allocation67_spill] sm:$0xff] }
 0x399   : > { %v3043_v14 = vadd.f32 %v10732_v60, %v2721_v18  ;;  %v2723_v9 = vpop.f32.mrb[29].mxu1  ;;  %7449 = vmatprep.mubr.msk.bf16.mxu0 %vm10595_vm12, %v10814_v23  ;;  %v10893_v48 = vpop.f32.mrb[15].mxu0  ;;  %5216 = vmatprep.subr.bf16.mxu1 %v12670_v47 }
 0x39a   : > { %v2724_v36 = vpop.f32.mrb[30].mxu1  ;;  %v3592_v60 = vadd.f32 %v10527_v52, %v3514_v46 }
 0x39b   : > { %v3325_v3 = vrot.slane %v3043_v14, 2  ;;  %v3046_v13 = vadd.f32 %v10745_v61, %v2724_v36  ;;  %v2726_v62 = vpop.f32.mrb[31].mxu1  ;;  %v13011_v14 = vld [vmem:[#allocation104_spill] sm:$0xff]  ;;  %v13012_v36 = vld [vmem:[#allocation29_spill] sm:$0xff] }
 0x39d   : > { %v3326_v40 = vsel %vm3265_vm4, %v3323_v44, %v3325_v3  ;;  %v3327_v30 = vrot.slane %v3046_v13, 2 }
 0x39e   : > { %v3515_v18 = vadd.f32 %v3326_v40, %v13010_v8  ;;  %v10900_v9 = vpop.f32.mrb[16].mxu0 }
 0x39f   : > { %v3328_v11 = vsel %vm3265_vm4, %v3325_v3, %v3327_v30  ;;  %v3472_v21 = vsel %vm3265_vm4, %v3327_v30, 0.0  ;;  %v10904_v43 = vpop.f32.mrb[17].mxu0  ;;  %v3664_v30 = vmax.f32 %v3592_v60, 0.0 }
 0x3a0   : > { %v3593_v61 = vadd.f32 %v10527_v52, %v3515_v18  ;;  %v3516_v44 = vadd.f32 %v3328_v11, %v13011_v14  ;;  %v3517_v13 = vadd.f32 %v3472_v21, %v13012_v36  ;;  %v2729_v46 = vpop.f32.mrb[32].mxu1  ;;  %7450 = vmatmul.mubr.msk.bf16.gmra.mrb[76].mxu0 %vm10595_vm12, %v10758_v20  ;;  %v10913_v62 = vpop.f32.mrb[18].mxu0 }
 0x3a1   : > { %v3051_v3 = vadd.f32 %v10766_v41, %v2729_v46  ;;  %v2731_v26 = vpop.f32.mrb[33].mxu1  ;;  %7451 = vmatprep.mubr.msk.bf16.mxu0 %vm10580_vm10, %v10868_v56  ;;  %v10919_v40 = vpop.f32.mrb[19].mxu0 }
 0x3a2   : > { %v3665_v8 = vmax.f32 %v3593_v61, 0.0  ;;  %v3594_v21 = vadd.f32 %v10527_v52, %v3516_v44  ;;  %v3595_v18 = vadd.f32 %v10527_v52, %v3517_v13  ;;  %v2732_v11 = vpop.f32.mrb[34].mxu1  ;;  %v8726_v61 = vld [vmem:[#allocation7 + $0x118] sm:$0xff]  }
 0x3a3   : > { %v3329_v14 = vrot.slane %v3051_v3, 2  ;;  %v3054_v36 = vadd.f32 %v10781_v2, %v2732_v11  ;;  %v2734_v20 = vpop.f32.mrb[35].mxu1  ;;  %5217 = vmatpush1.bf16.msra.mxu1 %v8726_v61 }
 0x3a4   : > { %v10924_v37 = vpack.c.bf16 %v3665_v8, %v3664_v30  ;;  %v3666_v41 = vmax.f32 %v3594_v21, 0.0  ;;  %v3667_v46 = vmax.f32 %v3595_v18, 0.0  ;;  %5218 = vmatprep.subr.bf16.mxu1 %v12670_v47 }
 0x3a5   : > { %v3330_v26 = vrot.slane %v3054_v36, 2 }
 0x3a6   : > { %v10926_v33 = vpack.c.bf16 %v3667_v46, %v3666_v41  ;;  %8328 = vmatprep.mubr.msk.bf16.mxu1 %vm10580_vm10, %v10924_v37  ;;  %v10931_v60 = vpop.f32.mrb[20].mxu0 }
 0x3a7   : > { %v3331_v44 = vsel %vm3265_vm4, %v3329_v14, %v3330_v26  ;;  %v10934_v13 = vpop.f32.mrb[21].mxu0 }
 0x3a8   : > { %v3518_v20 = vadd.f32 %v3331_v44, %v10301_v50  ;;  %v2737_v2 = vpop.f32.mrb[36].mxu1  ;;  %8329 = vmatmul.mubr.msk.bf16.gmra.mrb[128].mxu1 %vm10595_vm12, %v10926_v33  ;;  %7452 = vmatmul.mubr.msk.bf16.gmra.mrb[80].mxu0 %vm10580_vm10, %v10812_v24  ;;  %v10943_v3 = vpop.f32.mrb[22].mxu0  ;;  %v8727_v50 = vld [vmem:[#allocation7 + $0x120] sm:$0xff]   ;;  %v13014_v44 = vld [vmem:[#allocation65_spill] sm:$0xff]  ;;  %v8728_v24 = vld [vmem:[#allocation7 + $0x178] sm:$0xff]  }
 0x3a9   : > { %13013 = vst [vmem:[#allocation98_spill] sm:$0xff] %v10943_v3  ;;  %v3059_v30 = vadd.f32 %v10763_v17, %v2737_v2  ;;  %v2739_v8 = vpop.f32.mrb[37].mxu1  ;;  %7453 = vmatprep.mubr.msk.bf16.mxu0 %vm10595_vm12, %v10870_v28  ;;  %v10949_v21 = vpop.f32.mrb[23].mxu0  ;;  %5219 = vmatpush1.bf16.msra.mxu1 %v8727_v50  ;;  %v13017_v50 = vld [vmem:[#allocation63_spill] sm:$0xff] }
 0x3aa   : > { %v2740_v18 = vpop.f32.mrb[38].mxu1  ;;  %v3596_v17 = vadd.f32 %v10527_v52, %v3518_v20  ;;  %5220 = vmatprep.subr.bf16.mxu1 %v12670_v47  ;;  %8382 = vmatprep.subr.bf16.mxu0 %v8728_v24 }
 0x3ab   : > { %v3332_v11 = vrot.slane %v3059_v30, 2  ;;  %v3062_v14 = vadd.f32 %v10775_v57, %v2740_v18  ;;  %v2742_v36 = vpop.f32.mrb[39].mxu1  ;;  %8383 = vmatpush3.bf16.msra.mxu0 %v8728_v24 }
 0x3ac   : > { %6125 = vmatprep.subr.bf16.mxu0 %v12670_v47 }
 0x3ad   : > { %v3333_v41 = vsel %vm3265_vm4, %v3330_v26, %v3332_v11  ;;  %v3334_v46 = vrot.slane %v3062_v14, 2  ;;  %v13016_v26 = vld [vmem:[#allocation69_spill] sm:$0xff] }
 0x3ae   : > { %v3519_v2 = vadd.f32 %v3333_v41, %v13014_v44  ;;  %v10956_v8 = vpop.f32.mrb[24].mxu0  ;;  %v3668_v44 = vmax.f32 %v3596_v17, 0.0  ;;  %v8730_v17 = vld [vmem:[#allocation7 + $0x130] sm:$0xff]  }
 0x3af   : > { %13015 = vst [vmem:[#allocation86_spill] sm:$0xff] %v10956_v8  ;;  %v3335_v61 = vsel %vm3265_vm4, %v3332_v11, %v3334_v46  ;;  %v3473_v30 = vsel %vm3265_vm4, %v3334_v46, 0.0  ;;  %v10961_v3 = vpop.f32.mrb[25].mxu0 }
 0x3b0   : > { %v3597_v57 = vadd.f32 %v10527_v52, %v3519_v2  ;;  %v3520_v18 = vadd.f32 %v3335_v61, %v13016_v26  ;;  %v3521_v14 = vadd.f32 %v3473_v30, %v13017_v50  ;;  %v2745_v20 = vpop.f32.mrb[40].mxu1  ;;  %7454 = vmatmul.mubr.msk.bf16.gmra.mrb[84].mxu0 %vm10595_vm12, %v10814_v23  ;;  %v10969_v36 = vpop.f32.mrb[26].mxu0 }
 0x3b1   : > { %13018 = vst [vmem:[#allocation88_spill] sm:$0xff] %v10969_v36  ;;  %v3067_v11 = vadd.f32 %v10792_v54, %v2745_v20  ;;  %v2747_v41 = vpop.f32.mrb[41].mxu1  ;;  %7455 = vmatprep.mubr.msk.bf16.mxu0 %vm10580_vm10, %v10924_v37  ;;  %v10975_v46 = vpop.f32.mrb[27].mxu0 }
 0x3b2   : > { %13019 = vst [vmem:[#allocation20_spill] sm:$0xff] %v10975_v46  ;;  %v3669_v2 = vmax.f32 %v3597_v57, 0.0  ;;  %v3598_v61 = vadd.f32 %v10527_v52, %v3520_v18  ;;  %v3599_v30 = vadd.f32 %v10527_v52, %v3521_v14  ;;  %v2748_v26 = vpop.f32.mrb[42].mxu1  ;;  %v8729_v41 = vld [vmem:[#allocation7 + $0x128] sm:$0xff]  }
 0x3b3   : > { %v3336_v50 = vrot.slane %v3067_v11, 2  ;;  %v3070_v54 = vadd.f32 %v10807_v0, %v2748_v26  ;;  %v2750_v20 = vpop.f32.mrb[43].mxu1  ;;  %5221 = vmatpush1.bf16.msra.mxu1 %v8729_v41  ;;  %v8731_v26 = vld [vmem:[#allocation7 + $0x138] sm:$0xff]   ;;  %v13020_v41 = vld [vmem:[#allocation77_spill] sm:$0xff] }
 0x3b4   : > { %v10981_v23 = vpack.c.bf16 %v3669_v2, %v3668_v44  ;;  %v3670_v36 = vmax.f32 %v3598_v61, 0.0  ;;  %v3671_v8 = vmax.f32 %v3599_v30, 0.0  ;;  %5222 = vmatprep.subr.bf16.mxu1 %v12670_v47 }
 0x3b5   : > { %v3337_v46 = vrot.slane %v3070_v54, 2 }
 0x3b6   : > { %v10983_v24 = vpack.c.bf16 %v3671_v8, %v3670_v36  ;;  %8332 = vmatprep.mubr.msk.bf16.mxu1 %vm10580_vm10, %v10981_v23  ;;  %v10988_v52 = vpop.f32.mrb[28].mxu0 }
 0x3b7   : > { %v3338_v0 = vsel %vm3265_vm4, %v3336_v50, %v3337_v46  ;;  %v10992_v57 = vpop.f32.mrb[29].mxu0  ;;  %5223 = vmatpush1.bf16.msra.mxu1 %v8730_v17 }
 0x3b8   : > { %v3522_v18 = vadd.f32 %v3338_v0, %v10327_v29  ;;  %v2753_v14 = vpop.f32.mrb[44].mxu1  ;;  %8333 = vmatmul.mubr.msk.bf16.gmra.mrb[132].mxu1 %vm10595_vm12, %v10983_v24  ;;  %7456 = vmatmul.mubr.msk.bf16.gmra.mrb[88].mxu0 %vm10580_vm10, %v10868_v56  ;;  %v11001_v8 = vpop.f32.mrb[30].mxu0 }
 0x3b9   : > { %v3075_v36 = vadd.f32 %v10788_v49, %v2753_v14  ;;  %v2755_v11 = vpop.f32.mrb[45].mxu1  ;;  %7457 = vmatprep.mubr.msk.bf16.mxu0 %vm10595_vm12, %v10926_v33  ;;  %v11007_v44 = vpop.f32.mrb[31].mxu0  ;;  %5224 = vmatprep.subr.bf16.mxu1 %v12670_v47  ;;  %v11015_v49 = vld [vmem:[%s12559_s2] ss:$0 sm:$0xff] }
 0x3ba   : > { %v2756_v29 = vpop.f32.mrb[46].mxu1  ;;  %v3600_v20 = vadd.f32 %v11015_v49, %v3522_v18 }
 0x3bb   : > { %v3339_v2 = vrot.slane %v3075_v36, 2  ;;  %v3078_v61 = vadd.f32 %v10801_v5, %v2756_v29  ;;  %v2758_v30 = vpop.f32.mrb[47].mxu1  ;;  %5225 = vmatpush1.bf16.msra.mxu1 %v8731_v26  ;;  %v13021_v36 = vld [vmem:[#allocation31_spill] sm:$0xff] }
 0x3bd   : > { %v3340_v50 = vsel %vm3265_vm4, %v3337_v46, %v3339_v2  ;;  %v3341_v54 = vrot.slane %v3078_v61, 2  ;;  %v13022_v46 = vld [vmem:[#allocation75_spill] sm:$0xff] }
 0x3be   : > { %v3523_v17 = vadd.f32 %v3340_v50, %v13020_v41 }
 0x3bf   : > { %v3342_v0 = vsel %vm3265_vm4, %v3339_v2, %v3341_v54  ;;  %v3474_v14 = vsel %vm3265_vm4, %v3341_v54, 0.0  ;;  %v3672_v2 = vmax.f32 %v3600_v20, 0.0 }
 0x3c0   : > { %v3601_v5 = vadd.f32 %v11015_v49, %v3523_v17  ;;  %v3524_v11 = vadd.f32 %v3342_v0, %v13021_v36  ;;  %v3525_v29 = vadd.f32 %v3474_v14, %v13022_v46  ;;  %v2761_v61 = vpop.f32.mrb[48].mxu1  ;;  %7458 = vmatmul.mubr.msk.bf16.gmra.mrb[92].mxu0 %vm10595_vm12, %v10870_v28 }
 0x3c1   : > { %v3083_v30 = vadd.f32 %v10822_v51, %v2761_v61  ;;  %v2763_v18 = vpop.f32.mrb[49].mxu1  ;;  %7459 = vmatprep.mubr.msk.bf16.mxu0 %vm10580_vm10, %v10981_v23 }
 0x3c2   : > { %v3673_v26 = vmax.f32 %v3601_v5, 0.0  ;;  %v3602_v50 = vadd.f32 %v11015_v49, %v3524_v11  ;;  %v3603_v54 = vadd.f32 %v11015_v49, %v3525_v29  ;;  %v2764_v41 = vpop.f32.mrb[50].mxu1  ;;  %v11036_v18 = vld [vmem:[#allocation7 + $0x200] sm:$0xff]  }
 0x3c3   : > { %v3343_v17 = vrot.slane %v3083_v30, 2  ;;  %v3086_v0 = vadd.f32 %v10837_v1, %v2764_v41  ;;  %v2766_v14 = vpop.f32.mrb[51].mxu1  ;;  %8448 = vmatprep.subr.bf16.mxu1 %v11036_v18 }
 0x3c4   : > { %v11034_v36 = vpack.c.bf16 %v3673_v26, %v3672_v2  ;;  %v3674_v46 = vmax.f32 %v3602_v50, 0.0  ;;  %v3675_v51 = vmax.f32 %v3603_v54, 0.0 }
 0x3c5   : > { %v3344_v61 = vrot.slane %v3086_v0, 2 }
 0x3c6   : > { %v11038_v28 = vpack.c.bf16 %v3675_v51, %v3674_v46  ;;  %8336 = vmatprep.mubr.msk.bf16.mxu1 %vm10580_vm10, %v11034_v36  ;;  %v13023_v51 = vld [vmem:[#allocation71_spill] sm:$0xff] }
 0x3c7   : > { %v3345_v20 = vsel %vm3265_vm4, %v3343_v17, %v3344_v61 }
 0x3c8   : > { %v3526_v1 = vadd.f32 %v3345_v20, %v10353_v15  ;;  %v2769_v5 = vpop.f32.mrb[52].mxu1  ;;  %8337 = vmatmul.mubr.msk.bf16.gmra.mrb[136].mxu1 %vm10595_vm12, %v11038_v28  ;;  %7460 = vmatmul.mubr.msk.bf16.gmra.mrb[96].mxu0 %vm10580_vm10, %v10924_v37 }
 0x3c9   : > { %v3091_v11 = vadd.f32 %v10819_v55, %v2769_v5  ;;  %v2771_v29 = vpop.f32.mrb[53].mxu1  ;;  %7461 = vmatprep.mubr.msk.bf16.mxu0 %vm10595_vm12, %v10983_v24 }
 0x3ca   : > { %v2772_v30 = vpop.f32.mrb[54].mxu1  ;;  %v3604_v41 = vadd.f32 %v11015_v49, %v3526_v1 }
 0x3cb   : > { %v3346_v2 = vrot.slane %v3091_v11, 2  ;;  %v3094_v15 = vadd.f32 %v10831_v39, %v2772_v30  ;;  %v2774_v26 = vpop.f32.mrb[55].mxu1 }
 0x3cd   : > { %v3347_v50 = vsel %vm3265_vm4, %v3344_v61, %v3346_v2  ;;  %v3348_v54 = vrot.slane %v3094_v15, 2 }
 0x3ce   : > { %v3527_v17 = vadd.f32 %v3347_v50, %v10356_v12  ;;  %v3676_v12 = vmax.f32 %v3604_v41, 0.0 }
 0x3cf   : > { %v3349_v0 = vsel %vm3265_vm4, %v3346_v2, %v3348_v54  ;;  %v3475_v55 = vsel %vm3265_vm4, %v3348_v54, 0.0 }
 0x3d0   : > { %v3605_v14 = vadd.f32 %v11015_v49, %v3527_v17  ;;  %v3528_v46 = vadd.f32 %v3349_v0, %v10344_v31  ;;  %v3529_v20 = vadd.f32 %v3475_v55, %v13023_v51  ;;  %v2777_v5 = vpop.f32.mrb[56].mxu1  ;;  %7462 = vmatmul.mubr.msk.bf16.gmra.mrb[100].mxu0 %vm10595_vm12, %v10926_v33 }
 0x3d1   : > { %v3099_v39 = vadd.f32 %v10848_v35, %v2777_v5  ;;  %v2779_v61 = vpop.f32.mrb[57].mxu1  ;;  %7463 = vmatprep.mubr.msk.bf16.mxu0 %vm10580_vm10, %v11034_v36 }
 0x3d2   : > { %v3677_v1 = vmax.f32 %v3605_v14, 0.0  ;;  %v3606_v11 = vadd.f32 %v11015_v49, %v3528_v46  ;;  %v3607_v31 = vadd.f32 %v11015_v49, %v3529_v20  ;;  %v2780_v29 = vpop.f32.mrb[58].mxu1 }
 0x3d3   : > { %v3350_v30 = vrot.slane %v3099_v39, 2  ;;  %v3102_v2 = vadd.f32 %v10863_v63, %v2780_v29  ;;  %v2782_v15 = vpop.f32.mrb[59].mxu1  ;;  %v13024_v29 = vld [vmem:[#allocation73_spill] sm:$0xff] }
 0x3d4   : > { %v11075_v26 = vpack.c.bf16 %v3677_v1, %v3676_v12  ;;  %v3678_v50 = vmax.f32 %v3606_v11, 0.0  ;;  %v3679_v35 = vmax.f32 %v3607_v31, 0.0 }
 0x3d5   : > { %v3351_v54 = vrot.slane %v3102_v2, 2 }
 0x3d6   : > { %v11077_v17 = vpack.c.bf16 %v3679_v35, %v3678_v50  ;;  %8340 = vmatprep.mubr.msk.bf16.mxu1 %vm10580_vm10, %v11075_v26 }
 0x3d7   : > { %v3352_v41 = vsel %vm3265_vm4, %v3350_v30, %v3351_v54 }
 0x3d8   : > { %v3530_v0 = vadd.f32 %v3352_v41, %v10379_v27  ;;  %v2785_v55 = vpop.f32.mrb[60].mxu1  ;;  %8341 = vmatmul.mubr.msk.bf16.gmra.mrb[140].mxu1 %vm10595_vm12, %v11077_v17  ;;  %7464 = vmatmul.mubr.msk.bf16.gmra.mrb[104].mxu0 %vm10580_vm10, %v10981_v23 }
 0x3d9   : > { %v3107_v63 = vadd.f32 %v10844_v38, %v2785_v55  ;;  %v2787_v14 = vpop.f32.mrb[61].mxu1  ;;  %7465 = vmatprep.mubr.msk.bf16.mxu0 %vm10595_vm12, %v11038_v28 }
 0x3da   : > { %v2788_v46 = vpop.f32.mrb[62].mxu1  ;;  %v3608_v61 = vadd.f32 %v11015_v49, %v3530_v0 }
 0x3db   : > { %v3353_v51 = vrot.slane %v3107_v63, 2  ;;  %v3110_v27 = vadd.f32 %v10857_v7, %v2788_v46  ;;  %v2790_v20 = vpop.f32.mrb[63].mxu1 }
 0x3dd   : > { %v3354_v5 = vsel %vm3265_vm4, %v3351_v54, %v3353_v51  ;;  %v3355_v39 = vrot.slane %v3110_v27, 2 }
 0x3de   : > { %v3531_v12 = vadd.f32 %v3354_v5, %v10382_v45  ;;  %v3680_v45 = vmax.f32 %v3608_v61, 0.0 }
 0x3df   : > { %v3356_v1 = vsel %vm3265_vm4, %v3353_v51, %v3355_v39  ;;  %v3476_v38 = vsel %vm3265_vm4, %v3355_v39, 0.0 }
 0x3e0   : > { %v3609_v11 = vadd.f32 %v11015_v49, %v3531_v12  ;;  %v3532_v31 = vadd.f32 %v3356_v1, %v10370_v25  ;;  %v3533_v30 = vadd.f32 %v3476_v38, %v13024_v29  ;;  %v2793_v2 = vpop.f32.mrb[64].mxu1  ;;  %7466 = vmatmul.mubr.msk.bf16.gmra.mrb[108].mxu0 %vm10595_vm12, %v10983_v24 }
 0x3e1   : > { %v3115_v7 = vadd.f32 %v10878_v16, %v2793_v2  ;;  %v2795_v15 = vpop.f32.mrb[65].mxu1  ;;  %7467 = vmatprep.mubr.msk.bf16.mxu0 %vm10580_vm10, %v11075_v26 }
 0x3e2   : > { %v3681_v50 = vmax.f32 %v3609_v11, 0.0  ;;  %v3610_v35 = vadd.f32 %v11015_v49, %v3532_v31  ;;  %v3611_v25 = vadd.f32 %v11015_v49, %v3533_v30  ;;  %v2796_v54 = vpop.f32.mrb[66].mxu1  ;;  %v13025_v15 = vld [vmem:[#allocation32_spill] sm:$0xff] }
 0x3e3   : > { %v3357_v41 = vrot.slane %v3115_v7, 2  ;;  %v3118_v0 = vadd.f32 %v10893_v48, %v2796_v54  ;;  %v2798_v55 = vpop.f32.mrb[67].mxu1 }
 0x3e4   : > { %v11113_v63 = vpack.c.bf16 %v3681_v50, %v3680_v45  ;;  %v3682_v14 = vmax.f32 %v3610_v35, 0.0  ;;  %v3683_v16 = vmax.f32 %v3611_v25, 0.0 }
 0x3e5   : > { %v3358_v46 = vrot.slane %v3118_v0, 2 }
 0x3e6   : > { %v11115_v51 = vpack.c.bf16 %v3683_v16, %v3682_v14  ;;  %8344 = vmatprep.mubr.msk.bf16.mxu1 %vm10580_vm10, %v11113_v63 }
 0x3e7   : > { %v3359_v27 = vsel %vm3265_vm4, %v3357_v41, %v3358_v46 }
 0x3e8   : > { %v3534_v20 = vadd.f32 %v3359_v27, %v10405_v34  ;;  %v2801_v5 = vpop.f32.mrb[68].mxu1  ;;  %8345 = vmatmul.mubr.msk.bf16.gmra.mrb[144].mxu1 %vm10595_vm12, %v11115_v51  ;;  %7468 = vmatmul.mubr.msk.bf16.gmra.mrb[112].mxu0 %vm10580_vm10, %v11034_v36 }
 0x3e9   : > { %v3123_v48 = vadd.f32 %v10875_v19, %v2801_v5  ;;  %v2803_v39 = vpop.f32.mrb[69].mxu1  ;;  %7469 = vmatprep.mubr.msk.bf16.mxu0 %vm10595_vm12, %v11077_v17 }
 0x3ea   : > { %v2804_v61 = vpop.f32.mrb[70].mxu1  ;;  %v3612_v31 = vadd.f32 %v11015_v49, %v3534_v20 }
 0x3eb   : > { %v3360_v12 = vrot.slane %v3123_v48, 2  ;;  %v3126_v34 = vadd.f32 %v10887_v4, %v2804_v61  ;;  %v2806_v1 = vpop.f32.mrb[71].mxu1 }
 0x3ed   : > { %v3361_v38 = vsel %vm3265_vm4, %v3358_v46, %v3360_v12  ;;  %v3362_v11 = vrot.slane %v3126_v34, 2 }
 0x3ee   : > { %v3535_v29 = vadd.f32 %v3361_v38, %v10408_v58  ;;  %v3684_v58 = vmax.f32 %v3612_v31, 0.0 }
 0x3ef   : > { %v3363_v30 = vsel %vm3265_vm4, %v3360_v12, %v3362_v11  ;;  %v3477_v19 = vsel %vm3265_vm4, %v3362_v11, 0.0 }
 0x3f0   : > { %v3613_v2 = vadd.f32 %v11015_v49, %v3535_v29  ;;  %v3536_v7 = vadd.f32 %v3363_v30, %v10396_v22  ;;  %v3537_v45 = vadd.f32 %v3477_v19, %v13025_v15  ;;  %v2809_v50 = vpop.f32.mrb[72].mxu1  ;;  %7470 = vmatmul.mubr.msk.bf16.gmra.mrb[116].mxu0 %vm10595_vm12, %v11038_v28 }
 0x3f1   : > { %v3131_v4 = vadd.f32 %v10904_v43, %v2809_v50  ;;  %v2811_v35 = vpop.f32.mrb[73].mxu1  ;;  %7471 = vmatprep.mubr.msk.bf16.mxu0 %vm10580_vm10, %v11113_v63 }
 0x3f2   : > { %v3685_v25 = vmax.f32 %v3613_v2, 0.0  ;;  %v3614_v54 = vadd.f32 %v11015_v49, %v3536_v7  ;;  %v3615_v22 = vadd.f32 %v11015_v49, %v3537_v45  ;;  %v2812_v41 = vpop.f32.mrb[74].mxu1  ;;  %v13026_v7 = vld [vmem:[#allocation33_spill] sm:$0xff] }
 0x3f3   : > { %v3364_v0 = vrot.slane %v3131_v4, 2  ;;  %v3134_v55 = vadd.f32 %v10919_v40, %v2812_v41  ;;  %v2814_v14 = vpop.f32.mrb[75].mxu1 }
 0x3f4   : > { %v11151_v16 = vpack.c.bf16 %v3685_v25, %v3684_v58  ;;  %v3686_v46 = vmax.f32 %v3614_v54, 0.0  ;;  %v3687_v43 = vmax.f32 %v3615_v22, 0.0 }
 0x3f5   : > { %v3365_v27 = vrot.slane %v3134_v55, 2 }
 0x3f6   : > { %v11153_v20 = vpack.c.bf16 %v3687_v43, %v3686_v46  ;;  %8348 = vmatprep.mubr.msk.bf16.mxu1 %vm10580_vm10, %v11151_v16 }
 0x3f7   : > { %v3366_v5 = vsel %vm3265_vm4, %v3364_v0, %v3365_v27 }
 0x3f8   : > { %v3538_v48 = vadd.f32 %v3366_v5, %v10431_v32  ;;  %v2817_v39 = vpop.f32.mrb[76].mxu1  ;;  %8349 = vmatmul.mubr.msk.bf16.gmra.mrb[148].mxu1 %vm10595_vm12, %v11153_v20  ;;  %7472 = vmatmul.mubr.msk.bf16.gmra.mrb[120].mxu0 %vm10580_vm10, %v11075_v26 }
 0x3f9   : > { %v3139_v40 = vadd.f32 %v10900_v9, %v2817_v39  ;;  %v2819_v61 = vpop.f32.mrb[77].mxu1  ;;  %7473 = vmatprep.mubr.msk.bf16.mxu0 %vm10595_vm12, %v11115_v51 }
 0x3fa   : > { %v2820_v12 = vpop.f32.mrb[78].mxu1  ;;  %v3616_v31 = vadd.f32 %v11015_v49, %v3538_v48 }
 0x3fb   : > { %v3367_v34 = vrot.slane %v3139_v40, 2  ;;  %v3142_v32 = vadd.f32 %v10913_v62, %v2820_v12  ;;  %v2822_v1 = vpop.f32.mrb[79].mxu1  ;;  %v13027_v40 = vld [vmem:[#allocation98_spill] sm:$0xff] }
 0x3fc   : > { %v13028_v1 = vld [vmem:[#allocation79_spill] sm:$0xff] }
 0x3fd   : > { %v3368_v38 = vsel %vm3265_vm4, %v3365_v27, %v3367_v34  ;;  %v3369_v11 = vrot.slane %v3142_v32, 2 }
 0x3fe   : > { %v3539_v29 = vadd.f32 %v3368_v38, %v10434_v10  ;;  %v3688_v10 = vmax.f32 %v3616_v31, 0.0 }
 0x3ff   : > { %v3370_v30 = vsel %vm3265_vm4, %v3367_v34, %v3369_v11  ;;  %v3478_v9 = vsel %vm3265_vm4, %v3369_v11, 0.0 }
 0x400   : > { %v3617_v19 = vadd.f32 %v11015_v49, %v3539_v29  ;;  %v3540_v2 = vadd.f32 %v3370_v30, %v10422_v42  ;;  %v3541_v15 = vadd.f32 %v3478_v9, %v13026_v7  ;;  %v2825_v45 = vpop.f32.mrb[80].mxu1  ;;  %7474 = vmatmul.mubr.msk.bf16.gmra.mrb[124].mxu0 %vm10595_vm12, %v11077_v17  ;;  %v13029_v29 = vld [vmem:[#allocation28_spill] sm:$0xff] }
 0x401   : > { %v3147_v62 = vadd.f32 %v10934_v13, %v2825_v45  ;;  %v2827_v50 = vpop.f32.mrb[81].mxu1  ;;  %7475 = vmatprep.mubr.msk.bf16.mxu0 %vm10580_vm10, %v11151_v16  ;;  %v13030_v9 = vld [vmem:[#allocation84_spill] sm:$0xff] }
 0x402   : > { %v3689_v4 = vmax.f32 %v3617_v19, 0.0  ;;  %v3618_v35 = vadd.f32 %v11015_v49, %v3540_v2  ;;  %v3619_v42 = vadd.f32 %v11015_v49, %v3541_v15  ;;  %v2828_v58 = vpop.f32.mrb[82].mxu1 }
 0x403   : > { %v3371_v25 = vrot.slane %v3147_v62, 2  ;;  %v3150_v54 = vadd.f32 %v10949_v21, %v2828_v58  ;;  %v2830_v22 = vpop.f32.mrb[83].mxu1 }
 0x404   : > { %v11189_v41 = vpack.c.bf16 %v3689_v4, %v3688_v10  ;;  %v3690_v0 = vmax.f32 %v3618_v35, 0.0  ;;  %v3691_v13 = vmax.f32 %v3619_v42, 0.0  ;;  %v13031_v35 = vld [vmem:[#allocation20_spill] sm:$0xff] }
 0x405   : > { %v3372_v55 = vrot.slane %v3150_v54, 2 }
 0x406   : > { %v11191_v14 = vpack.c.bf16 %v3691_v13, %v3690_v0  ;;  %8352 = vmatprep.mubr.msk.bf16.mxu1 %vm10580_vm10, %v11189_v41 }
 0x407   : > { %v3373_v46 = vsel %vm3265_vm4, %v3371_v25, %v3372_v55 }
 0x408   : > { %v3542_v43 = vadd.f32 %v3373_v46, %v10457_v53  ;;  %v2833_v27 = vpop.f32.mrb[84].mxu1  ;;  %8353 = vmatmul.mubr.msk.bf16.gmra.mrb[152].mxu1 %vm10595_vm12, %v11191_v14  ;;  %7476 = vmatmul.mubr.msk.bf16.gmra.mrb[128].mxu0 %vm10580_vm10, %v11113_v63  ;;  %v13032_v46 = vld [vmem:[#allocation34_spill] sm:$0xff] }
 0x409   : > { %v3155_v21 = vadd.f32 %v10931_v60, %v2833_v27  ;;  %v2835_v5 = vpop.f32.mrb[85].mxu1  ;;  %7477 = vmatprep.mubr.msk.bf16.mxu0 %vm10595_vm12, %v11153_v20 }
 0x40a   : > { %v2836_v48 = vpop.f32.mrb[86].mxu1  ;;  %v3620_v32 = vadd.f32 %v11015_v49, %v3542_v43 }
 0x40b   : > { %v3374_v39 = vrot.slane %v3155_v21, 2  ;;  %v3158_v53 = vadd.f32 %v13027_v40, %v2836_v48  ;;  %v2838_v61 = vpop.f32.mrb[87].mxu1  ;;  %v13033_v21 = vld [vmem:[#allocation86_spill] sm:$0xff] }
 0x40c   : > { %v3692_v45 = vmax.f32 %v3620_v32, 0.0 }
 0x40d   : > { %v3375_v12 = vsel %vm3265_vm4, %v3372_v55, %v3374_v39  ;;  %v3376_v34 = vrot.slane %v3158_v53, 2  ;;  %v13034_v53 = vld [vmem:[#allocation88_spill] sm:$0xff] }
 0x40e   : > { %v3543_v38 = vadd.f32 %v3375_v12, %v13028_v1 }
 0x40f   : > { %v3377_v11 = vsel %vm3265_vm4, %v3374_v39, %v3376_v34  ;;  %v3479_v60 = vsel %vm3265_vm4, %v3376_v34, 0.0 }
 0x410   : > { %v3621_v31 = vadd.f32 %v11015_v49, %v3543_v38  ;;  %v3544_v30 = vadd.f32 %v3377_v11, %v13029_v29  ;;  %v3545_v19 = vadd.f32 %v3479_v60, %v13030_v9  ;;  %v2841_v2 = vpop.f32.mrb[88].mxu1  ;;  %7478 = vmatmul.mubr.msk.bf16.gmra.mrb[132].mxu0 %vm10595_vm12, %v11115_v51 }
 0x411   : > { %v3163_v7 = vadd.f32 %v10961_v3, %v2841_v2  ;;  %v2843_v15 = vpop.f32.mrb[89].mxu1  ;;  %7479 = vmatprep.mubr.msk.bf16.mxu0 %vm10580_vm10, %v11189_v41 }
 0x412   : > { %v3693_v62 = vmax.f32 %v3621_v31, 0.0  ;;  %v3622_v50 = vadd.f32 %v11015_v49, %v3544_v30  ;;  %v3623_v10 = vadd.f32 %v11015_v49, %v3545_v19  ;;  %v2844_v4 = vpop.f32.mrb[90].mxu1  ;;  %v13035_v31 = vld [vmem:[#allocation35_spill] sm:$0xff] }
 0x413   : > { %v3166_v42 = vadd.f32 %v13031_v35, %v2844_v4  ;;  %v2846_v58 = vpop.f32.mrb[91].mxu1  ;;  %v3378_v3 = vrot.slane %v3163_v7, 2  ;;  %v13036_v7 = vld [vmem:[#allocation81_spill] sm:$0xff] }
 0x414   : > { %v11227_v25 = vpack.c.bf16 %v3693_v62, %v3692_v45  ;;  %v3694_v54 = vmax.f32 %v3622_v50, 0.0  ;;  %v3695_v22 = vmax.f32 %v3623_v10, 0.0  ;;  %v13037_v45 = vld [vmem:[#allocation105_spill] sm:$0xff] }
 0x415   : > { %v3379_v0 = vrot.slane %v3166_v42, 2 }
 0x416   : > { %v11229_v13 = vpack.c.bf16 %v3695_v22, %v3694_v54  ;;  %8356 = vmatprep.mubr.msk.bf16.mxu1 %vm10580_vm10, %v11227_v25 }
 0x417   : > { %v3380_v55 = vsel %vm3265_vm4, %v3378_v3, %v3379_v0 }
 0x418   : > { %v3546_v43 = vadd.f32 %v3380_v55, %v13032_v46  ;;  %v2849_v27 = vpop.f32.mrb[92].mxu1  ;;  %8357 = vmatmul.mubr.msk.bf16.gmra.mrb[156].mxu1 %vm10595_vm12, %v11229_v13  ;;  %7480 = vmatmul.mubr.msk.bf16.gmra.mrb[136].mxu0 %vm10580_vm10, %v11151_v16 }
 0x419   : > { %v3171_v5 = vadd.f32 %v13033_v21, %v2849_v27  ;;  %v2851_v48 = vpop.f32.mrb[93].mxu1  ;;  %7481 = vmatprep.mubr.msk.bf16.mxu0 %vm10595_vm12, %v11191_v14 }
 0x41a   : > { %v2852_v39 = vpop.f32.mrb[94].mxu1  ;;  %v3624_v60 = vadd.f32 %v11015_v49, %v3546_v43 }
 0x41b   : > { %v3381_v40 = vrot.slane %v3171_v5, 2  ;;  %v3174_v61 = vadd.f32 %v13034_v53, %v2852_v39  ;;  %v11247_v12 = vpop.f32.mrb[32].mxu0  ;;  %v2854_v34 = vpop.f32.mrb[95].mxu1 }
 0x41c   : > { %v4523_v32 = vpop.f32.mrb[33].mxu0  ;;  %v3696_v35 = vmax.f32 %v3624_v60, 0.0 }
 0x41d   : > { %v3382_v1 = vsel %vm3265_vm4, %v3379_v0, %v3381_v40  ;;  %v3383_v38 = vrot.slane %v3174_v61, 2  ;;  %v11250_v11 = vpop.f32.mrb[34].mxu0 }
 0x41e   : > { %v3547_v29 = vadd.f32 %v3382_v1, %v13035_v31  ;;  %v4526_v30 = vpop.f32.mrb[35].mxu0 }
 0x41f   : > { %v3384_v9 = vsel %vm3265_vm4, %v3381_v40, %v3383_v38  ;;  %v3480_v19 = vsel %vm3265_vm4, %v3383_v38, 0.0 }
 0x420   : > { %v3625_v2 = vadd.f32 %v11015_v49, %v3547_v29  ;;  %v3548_v15 = vadd.f32 %v3384_v9, %v13036_v7  ;;  %v3549_v62 = vadd.f32 %v3480_v19, %v13037_v45  ;;  %v2857_v50 = vpop.f32.mrb[96].mxu1  ;;  %7482 = vmatmul.mubr.msk.bf16.gmra.mrb[140].mxu0 %vm10595_vm12, %v11153_v20  ;;  %v13039_v45 = vld [vmem:[#allocation87_spill] sm:$0xff] }
 0x421   : > { %v3179_v10 = vadd.f32 %v10992_v57, %v2857_v50  ;;  %v2859_v4 = vpop.f32.mrb[97].mxu1  ;;  %7483 = vmatprep.mubr.msk.bf16.mxu0 %vm10580_vm10, %v11227_v25 }
 0x422   : > { %v3697_v42 = vmax.f32 %v3625_v2, 0.0  ;;  %v3626_v58 = vadd.f32 %v11015_v49, %v3548_v15  ;;  %v3627_v54 = vadd.f32 %v11015_v49, %v3549_v62  ;;  %v2860_v22 = vpop.f32.mrb[98].mxu1  ;;  %v13040_v4 = vld [vmem:[#allocation27_spill] sm:$0xff] }
 0x423   : > { %v3182_v3 = vadd.f32 %v11007_v44, %v2860_v22  ;;  %v4529_v0 = vpop.f32.mrb[36].mxu0  ;;  %v2862_v55 = vpop.f32.mrb[99].mxu1  ;;  %v3385_v21 = vrot.slane %v3179_v10, 2  ;;  %v13038_v44 = vld [vmem:[#allocation25_spill] sm:$0xff] }
 0x424   : > { %v11269_v46 = vpack.c.bf16 %v3697_v42, %v3696_v35  ;;  %v3698_v43 = vmax.f32 %v3626_v58, 0.0  ;;  %v3699_v57 = vmax.f32 %v3627_v54, 0.0  ;;  %v4530_v27 = vpop.f32.mrb[37].mxu0  ;;  %v13041_v42 = vld [vmem:[#allocation44_spill] sm:$0xff] }
 0x425   : > { %v3386_v5 = vrot.slane %v3182_v3, 2  ;;  %v4531_v48 = vpop.f32.mrb[38].mxu0 }
 0x426   : > { %v11271_v39 = vpack.c.bf16 %v3699_v57, %v3698_v43  ;;  %8360 = vmatprep.mubr.msk.bf16.mxu1 %vm10580_vm10, %v11269_v46  ;;  %v4532_v40 = vpop.f32.mrb[39].mxu0 }
 0x427   : > { %v3387_v53 = vsel %vm3265_vm4, %v3385_v21, %v3386_v5 }
 0x428   : > { %v3550_v61 = vadd.f32 %v3387_v53, %v13038_v44  ;;  %v2865_v34 = vpop.f32.mrb[100].mxu1  ;;  %8361 = vmatmul.mubr.msk.bf16.gmra.mrb[160].mxu1 %vm10595_vm12, %v11271_v39  ;;  %7484 = vmatmul.mubr.msk.bf16.gmra.mrb[144].mxu0 %vm10580_vm10, %v11189_v41 }
 0x429   : > { %v3187_v32 = vadd.f32 %v10988_v52, %v2865_v34  ;;  %v2867_v1 = vpop.f32.mrb[101].mxu1  ;;  %7485 = vmatprep.mubr.msk.bf16.mxu0 %vm10595_vm12, %v11229_v13 }
 0x42a   : > { %v2868_v38 = vpop.f32.mrb[102].mxu1  ;;  %v3628_v15 = vadd.f32 %v11015_v49, %v3550_v61 }
 0x42b   : > { %v3388_v60 = vrot.slane %v3187_v32, 2  ;;  %v3190_v31 = vadd.f32 %v11001_v8, %v2868_v38  ;;  %v4535_v29 = vpop.f32.mrb[40].mxu0  ;;  %v2870_v30 = vpop.f32.mrb[103].mxu1  ;;  %v13045_v38 = vld [vmem:[#allocation90_spill] sm:$0xff] }
 0x42c   : > { %v4537_v9 = vpop.f32.mrb[41].mxu0  ;;  %v3700_v3 = vmax.f32 %v3628_v15, 0.0 }
 0x42d   : > { %v3389_v19 = vsel %vm3265_vm4, %v3386_v5, %v3388_v60  ;;  %v3390_v2 = vrot.slane %v3190_v31, 2  ;;  %v4538_v7 = vpop.f32.mrb[42].mxu0 }
 0x42e   : > { %v3551_v52 = vadd.f32 %v3389_v19, %v13039_v45  ;;  %v4540_v62 = vpop.f32.mrb[43].mxu0 }
 0x42f   : > { %v3391_v50 = vsel %vm3265_vm4, %v3388_v60, %v3390_v2  ;;  %v3481_v10 = vsel %vm3265_vm4, %v3390_v2, 0.0 }
 0x430   : > { %v3552_v35 = vadd.f32 %v3391_v50, %v13040_v4  ;;  %v3553_v8 = vadd.f32 %v3481_v10, %v13041_v42  ;;  %v8306_v58 = vpop.f32.mrb[104].mxu1  ;;  %7486 = vmatmul.mubr.msk.bf16.gmra.mrb[148].mxu0 %vm10595_vm12, %v11191_v14  ;;  %v3629_v54 = vadd.f32 %v11015_v49, %v3551_v52  ;;  %v8737_v52 = vld [vmem:[#allocation7 + $0x208] sm:$0xff]   ;;  %v13047_v10 = vld [vmem:[#allocation50_spill] sm:$0xff] }
 0x431   : > { %v4778_v22 = vpop.f32.mrb[105].mxu1  ;;  %7487 = vmatprep.mubr.msk.bf16.mxu0 %vm10580_vm10, %v11269_v46  ;;  %v13046_v50 = vld [vmem:[#allocation48_spill] sm:$0xff]  ;;  %v8742_v58 = vld [vmem:[#allocation7 + $0x210] sm:$0xff]  }
 0x432   : > { %v3630_v0 = vadd.f32 %v11015_v49, %v3552_v35  ;;  %v3631_v55 = vadd.f32 %v11015_v49, %v3553_v8  ;;  %v11306_v43 = vadd.f32 %v4778_v22, %v11247_v12  ;;  %v8307_v57 = vpop.f32.mrb[106].mxu1  ;;  %v3701_v27 = vmax.f32 %v3629_v54, 0.0 }
 0x433   : > { %v4781_v21 = vpop.f32.mrb[107].mxu1  ;;  %v4543_v5 = vpop.f32.mrb[44].mxu0  ;;  %v8747_v57 = vld [vmem:[#allocation7 + $0x218] sm:$0xff]  }
 0x434   : > { %v3702_v48 = vmax.f32 %v3630_v0, 0.0  ;;  %v3703_v40 = vmax.f32 %v3631_v55, 0.0  ;;  %v11309_v53 = vadd.f32 %v4781_v21, %v11250_v11  ;;  %v4544_v44 = vpop.f32.mrb[45].mxu0  ;;  %v11311_v61 = vpack.c.bf16 %v3701_v27, %v3700_v3  ;;  %v8733_v55 = vld [vmem:[#allocation7 + $0x180] sm:$0xff]   ;;  %v13049_v27 = vld [vmem:[#allocation36_spill] sm:$0xff] }
 0x435   : > { %v4545_v34 = vpop.f32.mrb[46].mxu0  ;;  %v13050_v21 = vld [vmem:[#allocation52_spill] sm:$0xff]  ;;  %v8752_v44 = vld [vmem:[#allocation7 + $0x220] sm:$0xff]  }
 0x436   : > { %13042 = vst [vmem:[#allocation60_spill] sm:$0xff] %v11311_v61  ;;  %v11313_v32 = vpack.c.bf16 %v3703_v40, %v3702_v48  ;;  %8364 = vmatprep.mubr.msk.bf16.mxu1 %vm10586_vm11, %v11311_v61  ;;  %v4546_v12 = vpop.f32.mrb[47].mxu0  ;;  %v8734_v5 = vld [vmem:[#allocation7 + $0x188] sm:$0xff]  }
 0x438   : > { %13043 = vst [vmem:[#allocation101_spill] sm:$0xff] %v11313_v32  ;;  %v8310_v1 = vpop.f32.mrb[108].mxu1  ;;  %8365 = vmatmul.mubr.msk.bf16.gmra.mrb[164].mxu1 %vm10586_vm11, %v11313_v32  ;;  %7488 = vmatmul.mubr.msk.bf16.gmra.mrb[152].mxu0 %vm10580_vm10, %v11227_v25 }
 0x439   : > { %v4792_v11 = vpop.f32.mrb[109].mxu1  ;;  %7547 = vmatprep.mubr.msk.bf16.mxu1 %vm10580_vm10, %v13045_v38  ;;  %7489 = vmatprep.mubr.msk.bf16.mxu0 %vm10595_vm12, %v11271_v39 }
 0x43a   : > { %v11330_v60 = vadd.f32 %v4792_v11, %v4535_v29  ;;  %v8311_v31 = vpop.f32.mrb[110].mxu1 }
 0x43b   : > { %v4795_v30 = vpop.f32.mrb[111].mxu1  ;;  %v4549_v9 = vpop.f32.mrb[48].mxu0 }
 0x43c   : > { %v11332_v19 = vadd.f32 %v4795_v30, %v4538_v7  ;;  %v4551_v2 = vpop.f32.mrb[49].mxu0  ;;  %v13048_v7 = vld [vmem:[#allocation54_spill] sm:$0xff] }
 0x43d   : > { %v4552_v15 = vpop.f32.mrb[50].mxu0  ;;  %v8735_v2 = vld [vmem:[#allocation7 + $0x190] sm:$0xff]  }
 0x43e   : > { %v4554_v45 = vpop.f32.mrb[51].mxu0 }
 0x43f   : > { %v13052_v45 = vld [vmem:[#allocation55_spill] sm:$0xff] }
 0x440   : > { %v8314_v62 = vpop.f32.mrb[112].mxu1  ;;  %7548 = vmatmul.mubr.msk.bf16.vlgmr.msra.gmra.mrb[168].mxu1 %vm10586_vm11, %v13046_v50  ;;  %7490 = vmatmul.mubr.msk.bf16.gmra.mrb[156].mxu0 %vm10595_vm12, %v11229_v13 }
 0x441   : > { %v4806_v29 = vpop.f32.mrb[113].mxu1  ;;  %7549 = vmatprep.mubr.msk.bf16.mxu1 %vm10595_vm12, %v13047_v10  ;;  %8384 = vmatprep.mubr.msk.bf16.mxu0 %vm10580_vm10, %v13048_v7  ;;  %v8736_v62 = vld [vmem:[#allocation7 + $0x198] sm:$0xff]  }
 0x442   : > { %v11346_v4 = vadd.f32 %v4806_v29, %v4549_v9  ;;  %v8315_v35 = vpop.f32.mrb[114].mxu1  ;;  %8449 = vmatpush3.bf16.msra.mxu1 %v11036_v18  ;;  %v13051_v18 = vld [vmem:[#allocation93_spill] sm:$0xff] }
 0x443   : > { %v4809_v42 = vpop.f32.mrb[115].mxu1  ;;  %v4557_v8 = vpop.f32.mrb[52].mxu0  ;;  %8450 = vmatprep.subr.bf16.mxu1 %v8737_v52 }
 0x444   : > { %v11349_v54 = vadd.f32 %v4809_v42, %v4552_v15  ;;  %v4558_v22 = vpop.f32.mrb[53].mxu0 }
 0x445   : > { %v4559_v3 = vpop.f32.mrb[54].mxu0  ;;  %v13054_v22 = vld [vmem:[#allocation111_spill] sm:$0xff] }
 0x446   : > { %v4560_v0 = vpop.f32.mrb[55].mxu0  ;;  %8451 = vmatpush3.bf16.msra.mxu1 %v8737_v52  ;;  %v13053_v52 = vld [vmem:[#allocation113_spill] sm:$0xff]  ;;  %v13055_v3 = vld [vmem:[#allocation114_spill] sm:$0xff] }
 0x447   : > { %8452 = vmatprep.subr.bf16.mxu1 %v8742_v58  ;;  %v8739_v0 = vld [vmem:[#allocation7 + $0x1a8] sm:$0xff]  }
 0x448   : > { %7550 = vmatmul.mubr.msk.bf16.gmra.mrb[172].mxu1 %vm10586_vm11, %v13049_v27  ;;  %8385 = vmatmul.mubr.msk.bf16.vlgmr.msra.gmra.mrb[160].mxu0 %vm10595_vm12, %v13050_v21 }
 0x449   : > { %7551 = vmatprep.mubr.msk.bf16.mxu1 %vm10580_vm10, %v13048_v7  ;;  %8388 = vmatprep.mubr.msk.bf16.mxu0 %vm10580_vm10, %v13051_v18 }
 0x44a   : > { %6126 = vmatpush1.bf16.msra.mxu0 %v8733_v55  ;;  %8453 = vmatpush3.bf16.msra.mxu1 %v8742_v58  ;;  %v8738_v58 = vld [vmem:[#allocation7 + $0x1a0] sm:$0xff]  }
 0x44b   : > { %v8318_v48 = vpop.f32.mrb[116].mxu1  ;;  %v4563_v40 = vpop.f32.mrb[56].mxu0  ;;  %6127 = vmatprep.subr.bf16.mxu0 %v12670_v47  ;;  %8454 = vmatprep.subr.bf16.mxu1 %v8747_v57 }
 0x44c   : > { %v4820_v34 = vpop.f32.mrb[117].mxu1  ;;  %v4565_v12 = vpop.f32.mrb[57].mxu0 }
 0x44d   : > { %v11364_v1 = vadd.f32 %v4820_v34, %v4563_v40  ;;  %v8319_v11 = vpop.f32.mrb[118].mxu1  ;;  %v4566_v31 = vpop.f32.mrb[58].mxu0 }
 0x44e   : > { %v4823_v30 = vpop.f32.mrb[119].mxu1  ;;  %v4568_v9 = vpop.f32.mrb[59].mxu0  ;;  %6128 = vmatpush1.bf16.msra.mxu0 %v8734_v5  ;;  %8455 = vmatpush3.bf16.msra.mxu1 %v8747_v57 }
 0x44f   : > { %v11366_v15 = vadd.f32 %v4823_v30, %v4566_v31  ;;  %6129 = vmatprep.subr.bf16.mxu0 %v12670_v47  ;;  %8456 = vmatprep.subr.bf16.mxu1 %v8752_v44  ;;  %v8740_v31 = vld [vmem:[#allocation7 + $0x1b0] sm:$0xff]   ;;  %v13056_v9 = vld [vmem:[#allocation112_spill] sm:$0xff] }
 0x450   : > { %7552 = vmatmul.mubr.msk.bf16.gmra.mrb[176].mxu1 %vm10580_vm10, %v13045_v38  ;;  %8389 = vmatmul.mubr.msk.bf16.gmra.mrb[164].mxu0 %vm10595_vm12, %v13052_v45 }
 0x451   : > { %7553 = vmatprep.mubr.msk.bf16.mxu1 %vm10595_vm12, %v13050_v21  ;;  %8392 = vmatprep.mubr.msk.bf16.mxu0 %vm10580_vm10, %v13053_v52 }
 0x452   : > { %6130 = vmatpush1.bf16.msra.mxu0 %v8735_v2  ;;  %8457 = vmatpush3.bf16.msra.mxu1 %v8752_v44  ;;  %v13057_v2 = vld [vmem:[#allocation100_spill] sm:$0xff] }
 0x453   : > { %v4571_v29 = vpop.f32.mrb[60].mxu0  ;;  %6131 = vmatprep.subr.bf16.mxu0 %v12670_v47 }
 0x454   : > { %v4572_v35 = vpop.f32.mrb[61].mxu0 }
 0x455   : > { %v4573_v42 = vpop.f32.mrb[62].mxu0 }
 0x456   : > { %v4574_v8 = vpop.f32.mrb[63].mxu0  ;;  %6132 = vmatpush1.bf16.msra.mxu0 %v8736_v62  ;;  %v8741_v62 = vld [vmem:[#allocation7 + $0x1b8] sm:$0xff]  }
 0x457   : > { %6133 = vmatprep.subr.bf16.mxu0 %v12670_v47  ;;  %v8753_v8 = vld [vmem:[#allocation7 + $0x228] sm:$0xff]  }
 0x458   : > { %7554 = vmatmul.mubr.msk.bf16.gmra.mrb[180].mxu1 %vm10595_vm12, %v13047_v10  ;;  %8393 = vmatmul.mubr.msk.bf16.gmra.mrb[168].mxu0 %vm10595_vm12, %v13054_v22 }
 0x459   : > { %7555 = vmatprep.mubr.msk.bf16.mxu1 %vm10580_vm10, %v13051_v18  ;;  %8396 = vmatprep.mubr.msk.bf16.mxu0 %vm10580_vm10, %v13055_v3 }
 0x45a   : > { %6134 = vmatpush1.bf16.msra.mxu0 %v8738_v58  ;;  %8458 = vmatprep.subr.bf16.mxu1 %v8753_v8 }
 0x45b   : > { %v8322_v55 = vpop.f32.mrb[120].mxu1  ;;  %v4577_v57 = vpop.f32.mrb[64].mxu0  ;;  %6135 = vmatprep.subr.bf16.mxu0 %v12670_v47  ;;  %8459 = vmatpush3.bf16.msra.mxu1 %v8753_v8  ;;  %v13060_v8 = vld [vmem:[#allocation96_spill] sm:$0xff] }
 0x45c   : > { %v4834_v5 = vpop.f32.mrb[121].mxu1  ;;  %v4579_v48 = vpop.f32.mrb[65].mxu0  ;;  %v13058_v55 = vld [vmem:[#allocation58_spill] sm:$0xff] }
 0x45d   : > { %v11396_v40 = vadd.f32 %v4834_v5, %v4577_v57  ;;  %v8323_v44 = vpop.f32.mrb[122].mxu1  ;;  %v4580_v34 = vpop.f32.mrb[66].mxu0  ;;  %v8744_v57 = vld [vmem:[#allocation7 + $0x1c8] sm:$0xff]  }
 0x45e   : > { %v4837_v12 = vpop.f32.mrb[123].mxu1  ;;  %v4582_v11 = vpop.f32.mrb[67].mxu0  ;;  %6136 = vmatpush1.bf16.msra.mxu0 %v8739_v0  ;;  %v8743_v0 = vld [vmem:[#allocation7 + $0x1c0] sm:$0xff]  }
 0x45f   : > { %v11398_v30 = vadd.f32 %v4837_v12, %v4580_v34  ;;  %6137 = vmatprep.subr.bf16.mxu0 %v12670_v47 }
 0x460   : > { %7556 = vmatmul.mubr.msk.bf16.gmra.mrb[184].mxu1 %vm10580_vm10, %v13048_v7  ;;  %8397 = vmatmul.mubr.msk.bf16.gmra.mrb[172].mxu0 %vm10595_vm12, %v13056_v9 }
 0x461   : > { %7557 = vmatprep.mubr.msk.bf16.mxu1 %vm10595_vm12, %v13052_v45  ;;  %8400 = vmatprep.mubr.msk.bf16.mxu0 %vm10580_vm10, %v13057_v2 }
 0x462   : > { %6138 = vmatpush1.bf16.msra.mxu0 %v8740_v31 }
 0x463   : > { %v4585_v29 = vpop.f32.mrb[68].mxu0  ;;  %6139 = vmatprep.subr.bf16.mxu0 %v12670_v47 }
 0x464   : > { %v4586_v35 = vpop.f32.mrb[69].mxu0 }
 0x465   : > { %v4587_v42 = vpop.f32.mrb[70].mxu0  ;;  %v8745_v35 = vld [vmem:[#allocation7 + $0x1d0] sm:$0xff]  }
 0x466   : > { %v4588_v58 = vpop.f32.mrb[71].mxu0  ;;  %6140 = vmatpush1.bf16.msra.mxu0 %v8741_v62 }
 0x467   : > { %6141 = vmatprep.subr.bf16.mxu0 %v12670_v47  ;;  %v8746_v58 = vld [vmem:[#allocation7 + $0x1d8] sm:$0xff]  }
 0x468   : > { %7558 = vmatmul.mubr.msk.bf16.gmra.mrb[188].mxu1 %vm10595_vm12, %v13050_v21  ;;  %8401 = vmatmul.mubr.msk.bf16.gmra.mrb[176].mxu0 %vm10595_vm12, %v13058_v55 }
 0x469   : > { %7559 = vmatprep.mubr.msk.bf16.mxu1 %vm10580_vm10, %v13053_v52  ;;  %8404 = vmatprep.mubr.msk.bf16.mxu0 %vm10580_vm10, %v10868_v56 }
 0x46a   : > { %6142 = vmatpush1.bf16.msra.mxu0 %v8743_v0 }
 0x46b   : > { %v8326_v5 = vpop.f32.mrb[124].mxu1  ;;  %v4591_v48 = vpop.f32.mrb[72].mxu0  ;;  %6143 = vmatprep.subr.bf16.mxu0 %v12670_v47 }
 0x46c   : > { %v4848_v44 = vpop.f32.mrb[125].mxu1  ;;  %v4593_v34 = vpop.f32.mrb[73].mxu0 }
 0x46d   : > { %v11428_v12 = vadd.f32 %v4848_v44, %v4591_v48  ;;  %v8327_v11 = vpop.f32.mrb[126].mxu1  ;;  %v4594_v31 = vpop.f32.mrb[74].mxu0  ;;  %v8748_v44 = vld [vmem:[#allocation7 + $0x1e0] sm:$0xff]   ;;  %v8749_v34 = vld [vmem:[#allocation7 + $0x1e8] sm:$0xff]  }
 0x46e   : > { %v4851_v62 = vpop.f32.mrb[127].mxu1  ;;  %v4596_v29 = vpop.f32.mrb[75].mxu0  ;;  %6144 = vmatpush1.bf16.msra.mxu0 %v8744_v57 }
 0x46f   : > { %v11430_v42 = vadd.f32 %v4851_v62, %v4594_v31  ;;  %6145 = vmatprep.subr.bf16.mxu0 %v12670_v47 }
 0x470   : > { %7560 = vmatmul.mubr.msk.bf16.gmra.mrb[192].mxu1 %vm10580_vm10, %v13051_v18  ;;  %8405 = vmatmul.mubr.msk.bf16.gmra.mrb[180].mxu0 %vm10595_vm12, %v13060_v8 }
 0x471   : > { %13059 = vst [vmem:[#allocation103_spill] sm:$0xff] %v11430_v42  ;;  %7561 = vmatprep.mubr.msk.bf16.mxu1 %vm10595_vm12, %v13054_v22  ;;  %8408 = vmatprep.mubr.msk.bf16.mxu0 %vm10580_vm10, %v10924_v37 }
 0x472   : > { %6146 = vmatpush1.bf16.msra.mxu0 %v8745_v35 }
 0x473   : > { %v4599_v0 = vpop.f32.mrb[76].mxu0  ;;  %6147 = vmatprep.subr.bf16.mxu0 %v12670_v47 }
 0x474   : > { %v4600_v57 = vpop.f32.mrb[77].mxu0 }
 0x475   : > { %v4601_v5 = vpop.f32.mrb[78].mxu0 }
 0x476   : > { %v4602_v48 = vpop.f32.mrb[79].mxu0  ;;  %6148 = vmatpush1.bf16.msra.mxu0 %v8746_v58 }
 0x477   : > { %6149 = vmatprep.subr.bf16.mxu0 %v12670_v47  ;;  %v8750_v48 = vld [vmem:[#allocation7 + $0x1f0] sm:$0xff]  }
 0x478   : > { %7562 = vmatmul.mubr.msk.bf16.gmra.mrb[196].mxu1 %vm10595_vm12, %v13052_v45  ;;  %8409 = vmatmul.mubr.msk.bf16.gmra.mrb[184].mxu0 %vm10595_vm12, %v10926_v33 }
 0x479   : > { %7563 = vmatprep.mubr.msk.bf16.mxu1 %vm10580_vm10, %v13055_v3  ;;  %8412 = vmatprep.mubr.msk.bf16.mxu0 %vm10580_vm10, %v10981_v23 }
 0x47a   : > { %6150 = vmatpush1.bf16.msra.mxu0 %v8748_v44  ;;  %v8751_v44 = vld [vmem:[#allocation7 + $0x1f8] sm:$0xff]  }
 0x47b   : > { %v8330_v11 = vpop.f32.mrb[128].mxu1  ;;  %v4605_v31 = vpop.f32.mrb[80].mxu0  ;;  %6151 = vmatprep.subr.bf16.mxu0 %v12670_v47 }
 0x47c   : > { %v4862_v62 = vpop.f32.mrb[129].mxu1  ;;  %v4607_v29 = vpop.f32.mrb[81].mxu0 }
 0x47d   : > { %v11460_v35 = vadd.f32 %v4862_v62, %v4605_v31  ;;  %v8331_v58 = vpop.f32.mrb[130].mxu1  ;;  %v4608_v0 = vpop.f32.mrb[82].mxu0  ;;  %v8754_v62 = vld [vmem:[#allocation7 + $0x230] sm:$0xff]  }
 0x47e   : > { %v4865_v57 = vpop.f32.mrb[131].mxu1  ;;  %v4610_v5 = vpop.f32.mrb[83].mxu0  ;;  %6152 = vmatpush1.bf16.msra.mxu0 %v8749_v34  ;;  %8460 = vmatprep.subr.bf16.mxu1 %v8754_v62 }
 0x47f   : > { %v11462_v42 = vadd.f32 %v4865_v57, %v4608_v0  ;;  %6153 = vmatprep.subr.bf16.mxu0 %v12670_v47  ;;  %8461 = vmatpush3.bf16.msra.mxu1 %v8754_v62 }
 0x480   : > { %7564 = vmatmul.mubr.msk.bf16.gmra.mrb[200].mxu1 %vm10580_vm10, %v13053_v52  ;;  %8413 = vmatmul.mubr.msk.bf16.gmra.mrb[188].mxu0 %vm10595_vm12, %v10983_v24 }
 0x481   : > { %7565 = vmatprep.mubr.msk.bf16.mxu1 %vm10595_vm12, %v13056_v9  ;;  %8416 = vmatprep.mubr.msk.bf16.mxu0 %vm10580_vm10, %v11034_v36 }
 0x482   : > { %6154 = vmatpush1.bf16.msra.mxu0 %v8750_v48 }
 0x483   : > { %v4613_v34 = vpop.f32.mrb[84].mxu0  ;;  %6155 = vmatprep.subr.bf16.mxu0 %v12670_v47 }
 0x484   : > { %v4614_v11 = vpop.f32.mrb[85].mxu0 }
 0x485   : > { %v4615_v31 = vpop.f32.mrb[86].mxu0 }
 0x486   : > { %v4616_v29 = vpop.f32.mrb[87].mxu0  ;;  %6156 = vmatpush1.bf16.msra.mxu0 %v8751_v44 }
 0x488   : > { %7566 = vmatmul.mubr.msk.bf16.gmra.mrb[204].mxu1 %vm10595_vm12, %v13054_v22  ;;  %8417 = vmatmul.mubr.msk.bf16.gmra.mrb[192].mxu0 %vm10595_vm12, %v11038_v28 }
 0x489   : > { %7567 = vmatprep.mubr.msk.bf16.mxu1 %vm10580_vm10, %v13057_v2  ;;  %8420 = vmatprep.mubr.msk.bf16.mxu0 %vm10580_vm10, %v11075_v26 }
 0x48b   : > { %v8334_v47 = vpop.f32.mrb[132].mxu1  ;;  %v4619_v58 = vpop.f32.mrb[88].mxu0 }
 0x48c   : > { %v4876_v0 = vpop.f32.mrb[133].mxu1  ;;  %v4621_v57 = vpop.f32.mrb[89].mxu0 }
 0x48d   : > { %v11490_v5 = vadd.f32 %v4876_v0, %v4619_v58  ;;  %v8335_v48 = vpop.f32.mrb[134].mxu1  ;;  %v4622_v44 = vpop.f32.mrb[90].mxu0 }
 0x48e   : > { %v4879_v34 = vpop.f32.mrb[135].mxu1  ;;  %v4624_v11 = vpop.f32.mrb[91].mxu0 }
 0x48f   : > { %v11492_v31 = vadd.f32 %v4879_v34, %v4622_v44 }
 0x490   : > { %7568 = vmatmul.mubr.msk.bf16.gmra.mrb[208].mxu1 %vm10580_vm10, %v13055_v3  ;;  %8421 = vmatmul.mubr.msk.bf16.gmra.mrb[196].mxu0 %vm10595_vm12, %v11077_v17 }
 0x491   : > { %13061 = vst [vmem:[#allocation23_spill] sm:$0xff] %v11492_v31  ;;  %7569 = vmatprep.mubr.msk.bf16.mxu1 %vm10595_vm12, %v13058_v55  ;;  %8424 = vmatprep.mubr.msk.bf16.mxu0 %vm10580_vm10, %v11113_v63 }
 0x493   : > { %v4627_v62 = vpop.f32.mrb[92].mxu0 }
 0x494   : > { %v4628_v29 = vpop.f32.mrb[93].mxu0 }
 0x495   : > { %v4629_v47 = vpop.f32.mrb[94].mxu0 }
 0x496   : > { %v4630_v58 = vpop.f32.mrb[95].mxu0 }
 0x498   : > { %7570 = vmatmul.mubr.msk.bf16.gmra.mrb[212].mxu1 %vm10595_vm12, %v13056_v9  ;;  %8425 = vmatmul.mubr.msk.bf16.gmra.mrb[200].mxu0 %vm10595_vm12, %v11115_v51 }
 0x499   : > { %7571 = vmatprep.mubr.msk.bf16.mxu1 %vm10580_vm10, %v10868_v56  ;;  %8428 = vmatprep.mubr.msk.bf16.mxu0 %vm10580_vm10, %v11151_v16 }
 0x49b   : > { %v8338_v0 = vpop.f32.mrb[136].mxu1  ;;  %v4633_v57 = vpop.f32.mrb[96].mxu0 }
 0x49c   : > { %v4890_v48 = vpop.f32.mrb[137].mxu1  ;;  %v4635_v44 = vpop.f32.mrb[97].mxu0 }
 0x49d   : > { %v11518_v34 = vadd.f32 %v4890_v48, %v4633_v57  ;;  %v8339_v11 = vpop.f32.mrb[138].mxu1  ;;  %v4636_v62 = vpop.f32.mrb[98].mxu0 }
 0x49e   : > { %v4893_v29 = vpop.f32.mrb[139].mxu1  ;;  %v4638_v47 = vpop.f32.mrb[99].mxu0  ;;  %v8755_v11 = vld [vmem:[#allocation7 + $0x238] sm:$0xff]  }
 0x49f   : > { %13062 = vst [vmem:[#allocation26_spill] sm:$0xff] %v11518_v34  ;;  %v11520_v58 = vadd.f32 %v4893_v29, %v4636_v62  ;;  %8462 = vmatprep.subr.bf16.mxu1 %v8755_v11 }
 0x4a0   : > { %7572 = vmatmul.mubr.msk.bf16.gmra.mrb[216].mxu1 %vm10580_vm10, %v13057_v2  ;;  %8429 = vmatmul.mubr.msk.bf16.gmra.mrb[204].mxu0 %vm10595_vm12, %v11153_v20 }
 0x4a1   : > { %13063 = vst [vmem:[#allocation62_spill] sm:$0xff] %v11520_v58  ;;  %7573 = vmatprep.mubr.msk.bf16.mxu1 %vm10595_vm12, %v13060_v8  ;;  %8432 = vmatprep.mubr.msk.bf16.mxu0 %vm10580_vm10, %v11189_v41 }
 0x4a2   : > { %8463 = vmatpush3.bf16.msra.mxu1 %v8755_v11 }
 0x4a3   : > { %v4641_v0 = vpop.f32.mrb[100].mxu0 }
 0x4a4   : > { %v4642_v57 = vpop.f32.mrb[101].mxu0 }
 0x4a5   : > { %v4643_v48 = vpop.f32.mrb[102].mxu0 }
 0x4a6   : > { %v4644_v44 = vpop.f32.mrb[103].mxu0 }
 0x4a8   : > { %7574 = vmatmul.mubr.msk.bf16.gmra.mrb[220].mxu1 %vm10595_vm12, %v13058_v55  ;;  %8433 = vmatmul.mubr.msk.bf16.gmra.mrb[208].mxu0 %vm10595_vm12, %v11191_v14 }
 0x4a9   : > { %7575 = vmatprep.mubr.msk.bf16.mxu1 %vm10580_vm10, %v10924_v37  ;;  %8436 = vmatprep.mubr.msk.bf16.mxu0 %vm10580_vm10, %v11227_v25 }
 0x4ab   : > { %v8342_v62 = vpop.f32.mrb[140].mxu1  ;;  %v4647_v29 = vpop.f32.mrb[104].mxu0 }
 0x4ac   : > { %v4904_v47 = vpop.f32.mrb[141].mxu1  ;;  %v4649_v0 = vpop.f32.mrb[105].mxu0 }
 0x4ad   : > { %v11546_v57 = vadd.f32 %v4904_v47, %v4647_v29  ;;  %v8343_v48 = vpop.f32.mrb[142].mxu1  ;;  %v4650_v44 = vpop.f32.mrb[106].mxu0 }
 0x4ae   : > { %v4907_v58 = vpop.f32.mrb[143].mxu1  ;;  %v4652_v34 = vpop.f32.mrb[107].mxu0 }
 0x4af   : > { %v11548_v31 = vadd.f32 %v4907_v58, %v4650_v44 }
 0x4b0   : > { %7576 = vmatmul.mubr.msk.bf16.gmra.mrb[224].mxu1 %vm10580_vm10, %v10868_v56  ;;  %8437 = vmatmul.mubr.msk.bf16.gmra.mrb[212].mxu0 %vm10595_vm12, %v11229_v13 }
 0x4b1   : > { %13064 = vst [vmem:[#allocation22_spill] sm:$0xff] %v11548_v31  ;;  %7577 = vmatprep.mubr.msk.bf16.mxu1 %vm10595_vm12, %v10926_v33  ;;  %8440 = vmatprep.mubr.msk.bf16.mxu0 %vm10580_vm10, %v11269_v46 }
 0x4b3   : > { %v4655_v11 = vpop.f32.mrb[108].mxu0 }
 0x4b4   : > { %v4656_v34 = vpop.f32.mrb[109].mxu0 }
 0x4b5   : > { %v4657_v58 = vpop.f32.mrb[110].mxu0 }
 0x4b6   : > { %v4658_v62 = vpop.f32.mrb[111].mxu0 }
 0x4b8   : > { %7578 = vmatmul.mubr.msk.bf16.gmra.mrb[228].mxu1 %vm10595_vm12, %v13060_v8  ;;  %8441 = vmatmul.mubr.msk.bf16.gmra.mrb[216].mxu0 %vm10595_vm12, %v11271_v39 }
 0x4b9   : > { %7579 = vmatprep.mubr.msk.bf16.mxu1 %vm10580_vm10, %v10981_v23  ;;  %8444 = vmatprep.mubr.msk.bf16.mxu0 %vm10586_vm11, %v11311_v61 }
 0x4bb   : > { %v8346_v29 = vpop.f32.mrb[144].mxu1  ;;  %v4661_v47 = vpop.f32.mrb[112].mxu0 }
 0x4bc   : > { %v4918_v0 = vpop.f32.mrb[145].mxu1  ;;  %v4663_v48 = vpop.f32.mrb[113].mxu0 }
 0x4bd   : > { %v11574_v44 = vadd.f32 %v4918_v0, %v4661_v47  ;;  %v8347_v11 = vpop.f32.mrb[146].mxu1  ;;  %v4664_v34 = vpop.f32.mrb[114].mxu0 }
 0x4be   : > { %v4921_v58 = vpop.f32.mrb[147].mxu1  ;;  %v4666_v62 = vpop.f32.mrb[115].mxu0 }
 0x4bf   : > { %13065 = vst [vmem:[#allocation66_spill] sm:$0xff] %v11574_v44  ;;  %v11576_v31 = vadd.f32 %v4921_v58, %v4664_v34 }
 0x4c0   : > { %7580 = vmatmul.mubr.msk.bf16.gmra.mrb[232].mxu1 %vm10580_vm10, %v10924_v37  ;;  %8445 = vmatmul.mubr.msk.bf16.gmra.mrb[220].mxu0 %vm10586_vm11, %v11313_v32 }
 0x4c1   : > { %13066 = vst [vmem:[#allocation21_spill] sm:$0xff] %v11576_v31  ;;  %7581 = vmatprep.mubr.msk.bf16.mxu1 %vm10595_vm12, %v10983_v24  ;;  %7667 = vmatprep.mubr.msk.bf16.mxu0 %vm10580_vm10, %v13045_v38 }
 0x4c3   : > { %v4669_v29 = vpop.f32.mrb[116].mxu0 }
 0x4c4   : > { %v4670_v47 = vpop.f32.mrb[117].mxu0 }
 0x4c5   : > { %v4671_v0 = vpop.f32.mrb[118].mxu0 }
 0x4c6   : > { %v4672_v48 = vpop.f32.mrb[119].mxu0 }
 0x4c8   : > { %7582 = vmatmul.mubr.msk.bf16.gmra.mrb[236].mxu1 %vm10595_vm12, %v10926_v33  ;;  %7668 = vmatmul.mubr.msk.bf16.vlgmr.msra.gmra.mrb[224].mxu0 %vm10586_vm11, %v13046_v50 }
 0x4c9   : > { %7583 = vmatprep.mubr.msk.bf16.mxu1 %vm10580_vm10, %v11034_v36  ;;  %7669 = vmatprep.mubr.msk.bf16.mxu0 %vm10595_vm12, %v13047_v10 }
 0x4cb   : > { %v8350_v11 = vpop.f32.mrb[148].mxu1  ;;  %v4675_v34 = vpop.f32.mrb[120].mxu0 }
 0x4cc   : > { %v4932_v58 = vpop.f32.mrb[149].mxu1  ;;  %v4677_v62 = vpop.f32.mrb[121].mxu0 }
 0x4cd   : > { %v11602_v29 = vadd.f32 %v4932_v58, %v4675_v34  ;;  %v8351_v47 = vpop.f32.mrb[150].mxu1  ;;  %v4678_v0 = vpop.f32.mrb[122].mxu0 }
 0x4ce   : > { %v4935_v48 = vpop.f32.mrb[151].mxu1  ;;  %v4680_v31 = vpop.f32.mrb[123].mxu0 }
 0x4cf   : > { %13067 = vst [vmem:[#allocation19_spill] sm:$0xff] %v11602_v29  ;;  %v11604_v44 = vadd.f32 %v4935_v48, %v4678_v0 }
 0x4d0   : > { %7584 = vmatmul.mubr.msk.bf16.gmra.mrb[240].mxu1 %vm10580_vm10, %v10981_v23  ;;  %7670 = vmatmul.mubr.msk.bf16.gmra.mrb[228].mxu0 %vm10586_vm11, %v13049_v27 }
 0x4d1   : > { %13068 = vst [vmem:[#allocation64_spill] sm:$0xff] %v11604_v44  ;;  %7585 = vmatprep.mubr.msk.bf16.mxu1 %vm10595_vm12, %v11038_v28  ;;  %7671 = vmatprep.mubr.msk.bf16.mxu0 %vm10580_vm10, %v13048_v7 }
 0x4d3   : > { %v4683_v50 = vpop.f32.mrb[124].mxu0 }
 0x4d4   : > { %v4684_v31 = vpop.f32.mrb[125].mxu0 }
 0x4d5   : > { %v4685_v11 = vpop.f32.mrb[126].mxu0 }
 0x4d6   : > { %v4686_v34 = vpop.f32.mrb[127].mxu0 }
 0x4d8   : > { %7586 = vmatmul.mubr.msk.bf16.gmra.mrb[244].mxu1 %vm10595_vm12, %v10983_v24  ;;  %7672 = vmatmul.mubr.msk.bf16.gmra.mrb[232].mxu0 %vm10580_vm10, %v13045_v38 }
 0x4d9   : > { %7587 = vmatprep.mubr.msk.bf16.mxu1 %vm10580_vm10, %v11075_v26  ;;  %7673 = vmatprep.mubr.msk.bf16.mxu0 %vm10595_vm12, %v13050_v21 }
 0x4db   : > { %v8354_v27 = vpop.f32.mrb[152].mxu1  ;;  %v4689_v58 = vpop.f32.mrb[128].mxu0 }
 0x4dc   : > { %v4946_v62 = vpop.f32.mrb[153].mxu1  ;;  %v4691_v47 = vpop.f32.mrb[129].mxu0 }
 0x4dd   : > { %v11630_v0 = vadd.f32 %v4946_v62, %v4689_v58  ;;  %v8355_v48 = vpop.f32.mrb[154].mxu1  ;;  %v4692_v50 = vpop.f32.mrb[130].mxu0 }
 0x4de   : > { %v4949_v31 = vpop.f32.mrb[155].mxu1  ;;  %v4694_v11 = vpop.f32.mrb[131].mxu0 }
 0x4df   : > { %13069 = vst [vmem:[#allocation72_spill] sm:$0xff] %v11630_v0  ;;  %v11632_v34 = vadd.f32 %v4949_v31, %v4692_v50 }
 0x4e0   : > { %7588 = vmatmul.mubr.msk.bf16.gmra.mrb[248].mxu1 %vm10580_vm10, %v11034_v36  ;;  %7674 = vmatmul.mubr.msk.bf16.gmra.mrb[236].mxu0 %vm10595_vm12, %v13047_v10 }
 0x4e1   : > { %13070 = vst [vmem:[#allocation74_spill] sm:$0xff] %v11632_v34  ;;  %7589 = vmatprep.mubr.msk.bf16.mxu1 %vm10595_vm12, %v11077_v17  ;;  %7675 = vmatprep.mubr.msk.bf16.mxu0 %vm10580_vm10, %v13051_v18 }
 0x4e3   : > { %v4697_v38 = vpop.f32.mrb[132].mxu0 }
 0x4e4   : > { %v4698_v27 = vpop.f32.mrb[133].mxu0 }
 0x4e5   : > { %v4699_v58 = vpop.f32.mrb[134].mxu0 }
 0x4e6   : > { %v4700_v62 = vpop.f32.mrb[135].mxu0 }
 0x4e8   : > { %7590 = vmatmul.mubr.msk.bf16.gmra.mrb[252].mxu1 %vm10595_vm12, %v11038_v28  ;;  %7676 = vmatmul.mubr.msk.bf16.gmra.mrb[240].mxu0 %vm10580_vm10, %v13048_v7 }
 0x4e9   : > { %7591 = vmatprep.mubr.msk.bf16.mxu1 %vm10580_vm10, %v11113_v63  ;;  %7677 = vmatprep.mubr.msk.bf16.mxu0 %vm10595_vm12, %v13052_v45 }
 0x4eb   : > { %v8358_v10 = vpop.f32.mrb[156].mxu1  ;;  %v4703_v47 = vpop.f32.mrb[136].mxu0 }
 0x4ec   : > { %v4960_v48 = vpop.f32.mrb[157].mxu1  ;;  %v4705_v50 = vpop.f32.mrb[137].mxu0 }
 0x4ed   : > { %v11658_v31 = vadd.f32 %v4960_v48, %v4703_v47  ;;  %v8359_v11 = vpop.f32.mrb[158].mxu1  ;;  %v4706_v38 = vpop.f32.mrb[138].mxu0 }
 0x4ee   : > { %v4963_v27 = vpop.f32.mrb[159].mxu1  ;;  %v4708_v58 = vpop.f32.mrb[139].mxu0 }
 0x4ef   : > { %13071 = vst [vmem:[#allocation68_spill] sm:$0xff] %v11658_v31  ;;  %v11660_v62 = vadd.f32 %v4963_v27, %v4706_v38 }
 0x4f0   : > { %7592 = vmatmul.mubr.msk.bf16.gmra.mrb[0].mxu1 %vm10580_vm10, %v11075_v26  ;;  %7678 = vmatmul.mubr.msk.bf16.gmra.mrb[244].mxu0 %vm10595_vm12, %v13050_v21 }
 0x4f1   : > { %13072 = vst [vmem:[#allocation70_spill] sm:$0xff] %v11660_v62  ;;  %7593 = vmatprep.mubr.msk.bf16.mxu1 %vm10595_vm12, %v11115_v51  ;;  %7679 = vmatprep.mubr.msk.bf16.mxu0 %vm10580_vm10, %v13053_v52 }
 0x4f3   : > { %v4711_v10 = vpop.f32.mrb[140].mxu0 }
 0x4f4   : > { %v4712_v47 = vpop.f32.mrb[141].mxu0 }
 0x4f5   : > { %v4713_v48 = vpop.f32.mrb[142].mxu0 }
 0x4f6   : > { %v4714_v50 = vpop.f32.mrb[143].mxu0 }
 0x4f8   : > { %7594 = vmatmul.mubr.msk.bf16.gmra.mrb[4].mxu1 %vm10595_vm12, %v11077_v17  ;;  %7680 = vmatmul.mubr.msk.bf16.gmra.mrb[248].mxu0 %vm10580_vm10, %v13051_v18 }
 0x4f9   : > { %7595 = vmatprep.mubr.msk.bf16.mxu1 %vm10580_vm10, %v11151_v16  ;;  %7681 = vmatprep.mubr.msk.bf16.mxu0 %vm10595_vm12, %v13054_v22 }
 0x4fb   : > { %v8362_v11 = vpop.f32.mrb[160].mxu1  ;;  %v4717_v38 = vpop.f32.mrb[144].mxu0 }
 0x4fc   : > { %v4974_v27 = vpop.f32.mrb[161].mxu1  ;;  %v4719_v58 = vpop.f32.mrb[145].mxu0 }
 0x4fd   : > { %v11686_v10 = vadd.f32 %v4974_v27, %v4717_v38  ;;  %v8363_v47 = vpop.f32.mrb[162].mxu1  ;;  %v4720_v48 = vpop.f32.mrb[146].mxu0 }
 0x4fe   : > { %v4977_v50 = vpop.f32.mrb[163].mxu1  ;;  %v4722_v62 = vpop.f32.mrb[147].mxu0 }
 0x4ff   : > { %13073 = vst [vmem:[#allocation76_spill] sm:$0xff] %v11686_v10  ;;  %v11688_v31 = vadd.f32 %v4977_v50, %v4720_v48 }
 0x500   : > { %7596 = vmatmul.mubr.msk.bf16.gmra.mrb[8].mxu1 %vm10580_vm10, %v11113_v63  ;;  %7682 = vmatmul.mubr.msk.bf16.gmra.mrb[252].mxu0 %vm10595_vm12, %v13052_v45 }
 0x501   : > { %13074 = vst [vmem:[#allocation78_spill] sm:$0xff] %v11688_v31  ;;  %7597 = vmatprep.mubr.msk.bf16.mxu1 %vm10595_vm12, %v11153_v20  ;;  %7683 = vmatprep.mubr.msk.bf16.mxu0 %vm10580_vm10, %v13055_v3 }
 0x503   : > { %v4725_v11 = vpop.f32.mrb[148].mxu0 }
 0x504   : > { %v4726_v62 = vpop.f32.mrb[149].mxu0 }
 0x505   : > { %v4727_v38 = vpop.f32.mrb[150].mxu0 }
 0x506   : > { %v4728_v27 = vpop.f32.mrb[151].mxu0 }
 0x508   : > { %7598 = vmatmul.mubr.msk.bf16.gmra.mrb[12].mxu1 %vm10595_vm12, %v11115_v51  ;;  %7684 = vmatmul.mubr.msk.bf16.gmra.mrb[0].mxu0 %vm10580_vm10, %v13053_v52 }
 0x509   : > { %7599 = vmatprep.mubr.msk.bf16.mxu1 %vm10580_vm10, %v11189_v41  ;;  %7685 = vmatprep.mubr.msk.bf16.mxu0 %vm10595_vm12, %v13056_v9 }
 0x50b   : > { %v8366_v58 = vpop.f32.mrb[164].mxu1  ;;  %v4731_v47 = vpop.f32.mrb[152].mxu0 }
 0x50c   : > { %v4988_v48 = vpop.f32.mrb[165].mxu1  ;;  %v4733_v50 = vpop.f32.mrb[153].mxu0 }
 0x50d   : > { %v11714_v11 = vadd.f32 %v4988_v48, %v4731_v47  ;;  %v8367_v62 = vpop.f32.mrb[166].mxu1  ;;  %v4734_v38 = vpop.f32.mrb[154].mxu0 }
 0x50e   : > { %v4991_v27 = vpop.f32.mrb[167].mxu1  ;;  %v4736_v31 = vpop.f32.mrb[155].mxu0 }
 0x50f   : > { %13075 = vst [vmem:[#allocation106_spill] sm:$0xff] %v11714_v11  ;;  %v11716_v10 = vadd.f32 %v4991_v27, %v4734_v38 }
 0x510   : > { %7600 = vmatmul.mubr.msk.bf16.gmra.mrb[16].mxu1 %vm10580_vm10, %v11151_v16  ;;  %7686 = vmatmul.mubr.msk.bf16.gmra.mrb[4].mxu0 %vm10595_vm12, %v13054_v22 }
 0x511   : > { %13076 = vst [vmem:[#allocation107_spill] sm:$0xff] %v11716_v10  ;;  %7601 = vmatprep.mubr.msk.bf16.mxu1 %vm10595_vm12, %v11191_v14  ;;  %7687 = vmatprep.mubr.msk.bf16.mxu0 %vm10580_vm10, %v13057_v2 }
 0x513   : > { %v5228_v58 = vpop.f32.mrb[168].mxu1  ;;  %v4739_v31 = vpop.f32.mrb[156].mxu0 }
 0x514   : > { %v5230_v47 = vpop.f32.mrb[169].mxu1  ;;  %v4740_v48 = vpop.f32.mrb[157].mxu0 }
 0x515   : > { %v5231_v50 = vpop.f32.mrb[170].mxu1  ;;  %v4741_v62 = vpop.f32.mrb[158].mxu0 }
 0x516   : > { %v5233_v38 = vpop.f32.mrb[171].mxu1  ;;  %v4742_v27 = vpop.f32.mrb[159].mxu0 }
 0x518   : > { %7602 = vmatmul.mubr.msk.bf16.gmra.mrb[20].mxu1 %vm10595_vm12, %v11153_v20  ;;  %7688 = vmatmul.mubr.msk.bf16.gmra.mrb[8].mxu0 %vm10580_vm10, %v13055_v3 }
 0x519   : > { %7603 = vmatprep.mubr.msk.bf16.mxu1 %vm10580_vm10, %v11227_v25  ;;  %7689 = vmatprep.mubr.msk.bf16.mxu0 %vm10595_vm12, %v13058_v55 }
 0x51b   : > { %v5236_v31 = vpop.f32.mrb[172].mxu1  ;;  %v8386_v47 = vpop.f32.mrb[160].mxu0 }
 0x51c   : > { %v5238_v48 = vpop.f32.mrb[173].mxu1  ;;  %v5510_v62 = vadd.f32 %v8386_v47, %v5236_v31  ;;  %v5501_v38 = vpop.f32.mrb[161].mxu0 }
 0x51d   : > { %v5239_v27 = vpop.f32.mrb[174].mxu1  ;;  %v5502_v10 = vadd.f32 %v5501_v38, %v5228_v58  ;;  %v8387_v11 = vpop.f32.mrb[162].mxu0 }
 0x51e   : > { %v5240_v34 = vpop.f32.mrb[175].mxu1  ;;  %v5504_v0 = vpop.f32.mrb[163].mxu0  ;;  %v5791_v29 = vrot.slane %v5510_v62, 1 }
 0x51f   : > { %v5505_v44 = vadd.f32 %v5504_v0, %v5231_v50  ;;  %v5788_v32 = vrot.slane %v5502_v10, 1 }
 0x520   : > { %7604 = vmatmul.mubr.msk.bf16.gmra.mrb[24].mxu1 %vm10580_vm10, %v11189_v41  ;;  %7690 = vmatmul.mubr.msk.bf16.gmra.mrb[12].mxu0 %vm10595_vm12, %v13056_v9 }
 0x521   : > { %v5789_v49 = vrot.slane %v5505_v44, 1  ;;  %7605 = vmatprep.mubr.msk.bf16.mxu1 %vm10595_vm12, %v11229_v13  ;;  %7691 = vmatprep.mubr.msk.bf16.mxu0 %vm10580_vm10, %v10868_v56 }
 0x523   : > { %v5790_v0 = vsel %vm2069_vm0, %v5788_v32, %v5789_v49  ;;  %v5792_v34 = vsel %vm2069_vm0, %v5789_v49, %v5791_v29  ;;  %v5243_v11 = vpop.f32.mrb[176].mxu1  ;;  %v8390_v58 = vpop.f32.mrb[164].mxu0 }
 0x524   : > { %v11757_v50 = vadd.f32 %v5790_v0, %v11306_v43  ;;  %v11760_v10 = vadd.f32 %v5792_v34, %v11309_v53  ;;  %v5245_v44 = vpop.f32.mrb[177].mxu1  ;;  %v5516_v31 = vpop.f32.mrb[165].mxu0 }
 0x525   : > { %v5246_v47 = vpop.f32.mrb[178].mxu1  ;;  %v5517_v48 = vadd.f32 %v5516_v31, %v5243_v11  ;;  %v8391_v62 = vpop.f32.mrb[166].mxu0 }
 0x526   : > { %v5248_v38 = vpop.f32.mrb[179].mxu1  ;;  %v5519_v27 = vpop.f32.mrb[167].mxu0 }
 0x527   : > { %v5520_v61 = vadd.f32 %v5519_v27, %v5246_v47  ;;  %v5793_v43 = vrot.slane %v5517_v48, 1 }
 0x528   : > { %7606 = vmatmul.mubr.msk.bf16.gmra.mrb[28].mxu1 %vm10595_vm12, %v11191_v14  ;;  %7692 = vmatmul.mubr.msk.bf16.gmra.mrb[16].mxu0 %vm10580_vm10, %v13057_v2 }
 0x529   : > { %v5794_v32 = vrot.slane %v5520_v61, 1  ;;  %7607 = vmatprep.mubr.msk.bf16.mxu1 %vm10580_vm10, %v11269_v46  ;;  %7693 = vmatprep.mubr.msk.bf16.mxu0 %vm10595_vm12, %v13060_v8 }
 0x52b   : > { %v5795_v53 = vsel %vm2069_vm0, %v5793_v43, %v5794_v32  ;;  %v5251_v49 = vpop.f32.mrb[180].mxu1  ;;  %v8394_v29 = vpop.f32.mrb[168].mxu0 }
 0x52c   : > { %v11776_v0 = vadd.f32 %v5795_v53, %v11330_v60  ;;  %v5525_v34 = vadd.f32 %v8390_v58, %v5251_v49  ;;  %v5253_v11 = vpop.f32.mrb[181].mxu1  ;;  %v5531_v44 = vpop.f32.mrb[169].mxu0 }
 0x52d   : > { %v5254_v31 = vpop.f32.mrb[182].mxu1  ;;  %v8395_v61 = vpop.f32.mrb[170].mxu0 }
 0x52e   : > { %v5796_v47 = vrot.slane %v5525_v34, 1  ;;  %v5255_v48 = vpop.f32.mrb[183].mxu1  ;;  %v5534_v62 = vpop.f32.mrb[171].mxu0 }
 0x530   : > { %v5797_v38 = vsel %vm2069_vm0, %v5794_v32, %v5796_v47  ;;  %7608 = vmatmul.mubr.msk.bf16.gmra.mrb[32].mxu1 %vm10580_vm10, %v11227_v25  ;;  %7694 = vmatmul.mubr.msk.bf16.gmra.mrb[20].mxu0 %vm10595_vm12, %v13058_v55 }
 0x531   : > { %v11786_v60 = vadd.f32 %v5797_v38, %v11332_v19  ;;  %7609 = vmatprep.mubr.msk.bf16.mxu1 %vm10595_vm12, %v11271_v39  ;;  %7695 = vmatprep.mubr.msk.bf16.mxu0 %vm10580_vm10, %v10924_v37 }
 0x533   : > { %13077 = vst [vmem:[#allocation80_spill] sm:$0xff] %v11786_v60  ;;  %v5258_v58 = vpop.f32.mrb[184].mxu1  ;;  %v8398_v27 = vpop.f32.mrb[172].mxu0 }
 0x534   : > { %v5532_v43 = vadd.f32 %v5531_v44, %v5258_v58  ;;  %v5260_v32 = vpop.f32.mrb[185].mxu1  ;;  %v5546_v53 = vpop.f32.mrb[173].mxu0 }
 0x535   : > { %v5261_v49 = vpop.f32.mrb[186].mxu1  ;;  %v8399_v34 = vpop.f32.mrb[174].mxu0 }
 0x536   : > { %v5535_v11 = vadd.f32 %v5534_v62, %v5261_v49  ;;  %v5263_v31 = vpop.f32.mrb[187].mxu1  ;;  %v5549_v61 = vpop.f32.mrb[175].mxu0  ;;  %v5798_v19 = vrot.slane %v5532_v43, 1 }
 0x538   : > { %v5799_v47 = vrot.slane %v5535_v11, 1  ;;  %7610 = vmatmul.mubr.msk.bf16.gmra.mrb[36].mxu1 %vm10595_vm12, %v11229_v13  ;;  %7696 = vmatmul.mubr.msk.bf16.gmra.mrb[24].mxu0 %vm10580_vm10, %v10868_v56 }
 0x539   : > { %8464 = vmatprep.mubr.msk.bf16.mxu1 %vm10580_vm10, %v13048_v7  ;;  %7697 = vmatprep.mubr.msk.bf16.mxu0 %vm10595_vm12, %v10926_v33 }
 0x53a   : > { %v5800_v44 = vsel %vm2069_vm0, %v5798_v19, %v5799_v47 }
 0x53b   : > { %v11808_v48 = vadd.f32 %v5800_v44, %v11346_v4  ;;  %v5266_v62 = vpop.f32.mrb[188].mxu1  ;;  %v11810_v38 = vpop.f32.mrb[176].mxu0 }
 0x53c   : > { %v5540_v58 = vadd.f32 %v8394_v29, %v5266_v62  ;;  %v5268_v43 = vpop.f32.mrb[189].mxu1  ;;  %v5561_v32 = vpop.f32.mrb[177].mxu0 }
 0x53d   : > { %v5269_v49 = vpop.f32.mrb[190].mxu1  ;;  %v8403_v34 = vpop.f32.mrb[178].mxu0 }
 0x53e   : > { %v5801_v11 = vrot.slane %v5540_v58, 1  ;;  %v5270_v31 = vpop.f32.mrb[191].mxu1  ;;  %v5564_v7 = vpop.f32.mrb[179].mxu0 }
 0x540   : > { %v5802_v60 = vsel %vm2069_vm0, %v5799_v47, %v5801_v11  ;;  %8465 = vmatmul.mubr.msk.bf16.vlgmr.msra.gmra.mrb[40].mxu1 %vm10595_vm12, %v13050_v21  ;;  %7698 = vmatmul.mubr.msk.bf16.gmra.mrb[28].mxu0 %vm10595_vm12, %v13060_v8 }
 0x541   : > { %v11820_v4 = vadd.f32 %v5802_v60, %v11349_v54  ;;  %8468 = vmatprep.mubr.msk.bf16.mxu1 %vm10580_vm10, %v13051_v18  ;;  %7699 = vmatprep.mubr.msk.bf16.mxu0 %vm10580_vm10, %v10981_v23 }
 0x543   : > { %v5273_v29 = vpop.f32.mrb[192].mxu1  ;;  %v11828_v19 = vpop.f32.mrb[180].mxu0 }
 0x544   : > { %v5547_v47 = vadd.f32 %v5546_v53, %v5273_v29  ;;  %v5275_v21 = vpop.f32.mrb[193].mxu1  ;;  %v11830_v44 = vpop.f32.mrb[181].mxu0 }
 0x545   : > { %v5276_v62 = vpop.f32.mrb[194].mxu1  ;;  %v8407_v58 = vpop.f32.mrb[182].mxu0 }
 0x546   : > { %v5550_v43 = vadd.f32 %v5549_v61, %v5276_v62  ;;  %v5278_v54 = vpop.f32.mrb[195].mxu1  ;;  %v11832_v60 = vpop.f32.mrb[183].mxu0  ;;  %v5803_v49 = vrot.slane %v5547_v47, 1 }
 0x548   : > { %v5804_v34 = vrot.slane %v5550_v43, 1  ;;  %8469 = vmatmul.mubr.msk.bf16.gmra.mrb[44].mxu1 %vm10595_vm12, %v13052_v45  ;;  %7700 = vmatmul.mubr.msk.bf16.gmra.mrb[32].mxu0 %vm10580_vm10, %v10924_v37 }
 0x549   : > { %8472 = vmatprep.mubr.msk.bf16.mxu1 %vm10580_vm10, %v13053_v52  ;;  %7701 = vmatprep.mubr.msk.bf16.mxu0 %vm10595_vm12, %v10983_v24 }
 0x54a   : > { %v5805_v18 = vsel %vm2069_vm0, %v5803_v49, %v5804_v34 }
 0x54b   : > { %v11848_v53 = vadd.f32 %v5805_v18, %v11364_v1  ;;  %v5281_v61 = vpop.f32.mrb[196].mxu1  ;;  %v11850_v11 = vpop.f32.mrb[184].mxu0 }
 0x54c   : > { %v5555_v45 = vadd.f32 %v8398_v27, %v5281_v61  ;;  %v5283_v31 = vpop.f32.mrb[197].mxu1  ;;  %v11852_v29 = vpop.f32.mrb[185].mxu0 }
 0x54d   : > { %v5284_v47 = vpop.f32.mrb[198].mxu1  ;;  %v8411_v21 = vpop.f32.mrb[186].mxu0 }
 0x54e   : > { %v5806_v62 = vrot.slane %v5555_v45, 1  ;;  %v5285_v52 = vpop.f32.mrb[199].mxu1  ;;  %v11854_v58 = vpop.f32.mrb[187].mxu0 }
 0x550   : > { %v5807_v43 = vsel %vm2069_vm0, %v5804_v34, %v5806_v62  ;;  %8473 = vmatmul.mubr.msk.bf16.gmra.mrb[48].mxu1 %vm10595_vm12, %v13054_v22  ;;  %7702 = vmatmul.mubr.msk.bf16.gmra.mrb[36].mxu0 %vm10595_vm12, %v10926_v33 }
 0x551   : > { %v11864_v1 = vadd.f32 %v5807_v43, %v11366_v15  ;;  %8476 = vmatprep.mubr.msk.bf16.mxu1 %vm10580_vm10, %v13055_v3  ;;  %7703 = vmatprep.mubr.msk.bf16.mxu0 %vm10580_vm10, %v11034_v36 }
 0x553   : > { %v5288_v27 = vpop.f32.mrb[200].mxu1  ;;  %v11872_v54 = vpop.f32.mrb[188].mxu0 }
 0x554   : > { %v5562_v49 = vadd.f32 %v5561_v32, %v5288_v27  ;;  %v5290_v22 = vpop.f32.mrb[201].mxu1  ;;  %v11874_v34 = vpop.f32.mrb[189].mxu0 }
 0x555   : > { %v5291_v18 = vpop.f32.mrb[202].mxu1  ;;  %v8415_v61 = vpop.f32.mrb[190].mxu0 }
 0x556   : > { %v5565_v45 = vadd.f32 %v5564_v7, %v5291_v18  ;;  %v5293_v15 = vpop.f32.mrb[203].mxu1  ;;  %v11876_v31 = vpop.f32.mrb[191].mxu0  ;;  %v5808_v47 = vrot.slane %v5562_v49, 1 }
 0x558   : > { %v5809_v21 = vrot.slane %v5565_v45, 1  ;;  %8477 = vmatmul.mubr.msk.bf16.gmra.mrb[52].mxu1 %vm10595_vm12, %v13056_v9  ;;  %7704 = vmatmul.mubr.msk.bf16.gmra.mrb[40].mxu0 %vm10580_vm10, %v10981_v23 }
 0x559   : > { %8480 = vmatprep.mubr.msk.bf16.mxu1 %vm10580_vm10, %v13057_v2  ;;  %7705 = vmatprep.mubr.msk.bf16.mxu0 %vm10595_vm12, %v11038_v28 }
 0x55a   : > { %v5810_v3 = vsel %vm2069_vm0, %v5808_v47, %v5809_v21 }
 0x55b   : > { %v11892_v32 = vadd.f32 %v5810_v3, %v11396_v40  ;;  %v5296_v7 = vpop.f32.mrb[204].mxu1  ;;  %v11894_v62 = vpop.f32.mrb[192].mxu0 }
 0x55c   : > { %v5570_v9 = vadd.f32 %v11810_v38, %v5296_v7  ;;  %v5298_v52 = vpop.f32.mrb[205].mxu1  ;;  %v11897_v43 = vpop.f32.mrb[193].mxu0 }
 0x55d   : > { %v5299_v27 = vpop.f32.mrb[206].mxu1  ;;  %v8419_v49 = vpop.f32.mrb[194].mxu0 }
 0x55e   : > { %v5811_v2 = vrot.slane %v5570_v9, 1  ;;  %v5300_v22 = vpop.f32.mrb[207].mxu1  ;;  %v11899_v18 = vpop.f32.mrb[195].mxu0 }
 0x560   : > { %v5812_v61 = vsel %vm2069_vm0, %v5809_v21, %v5811_v2  ;;  %8481 = vmatmul.mubr.msk.bf16.gmra.mrb[56].mxu1 %vm10595_vm12, %v13058_v55  ;;  %7706 = vmatmul.mubr.msk.bf16.gmra.mrb[44].mxu0 %vm10595_vm12, %v10983_v24 }
 0x561   : > { %v11909_v40 = vadd.f32 %v5812_v61, %v11398_v30  ;;  %8484 = vmatprep.mubr.msk.bf16.mxu1 %vm10580_vm10, %v10868_v56  ;;  %7707 = vmatprep.mubr.msk.bf16.mxu0 %vm10580_vm10, %v11075_v26 }
 0x563   : > { %v5303_v38 = vpop.f32.mrb[208].mxu1  ;;  %v11917_v45 = vpop.f32.mrb[196].mxu0 }
 0x564   : > { %v5577_v55 = vadd.f32 %v11830_v44, %v5303_v38  ;;  %v5305_v15 = vpop.f32.mrb[209].mxu1  ;;  %v11920_v47 = vpop.f32.mrb[197].mxu0 }
 0x565   : > { %v5306_v21 = vpop.f32.mrb[210].mxu1  ;;  %v8423_v3 = vpop.f32.mrb[198].mxu0 }
 0x566   : > { %v5580_v30 = vadd.f32 %v11832_v60, %v5306_v21  ;;  %v5308_v7 = vpop.f32.mrb[211].mxu1  ;;  %v11923_v9 = vpop.f32.mrb[199].mxu0  ;;  %v5813_v56 = vrot.slane %v5577_v55, 1 }
 0x568   : > { %v5814_v52 = vrot.slane %v5580_v30, 1  ;;  %8485 = vmatmul.mubr.msk.bf16.gmra.mrb[60].mxu1 %vm10595_vm12, %v13060_v8  ;;  %7708 = vmatmul.mubr.msk.bf16.gmra.mrb[48].mxu0 %vm10580_vm10, %v11034_v36 }
 0x569   : > { %8488 = vmatprep.mubr.msk.bf16.mxu1 %vm10580_vm10, %v10924_v37  ;;  %7709 = vmatprep.mubr.msk.bf16.mxu0 %vm10595_vm12, %v11077_v17 }
 0x56a   : > { %v5815_v44 = vsel %vm2069_vm0, %v5813_v56, %v5814_v52 }
 0x56b   : > { %v11939_v60 = vadd.f32 %v5815_v44, %v11428_v12  ;;  %v5311_v27 = vpop.f32.mrb[212].mxu1  ;;  %v11941_v49 = vpop.f32.mrb[200].mxu0  ;;  %v13078_v12 = vld [vmem:[#allocation103_spill] sm:$0xff] }
 0x56c   : > { %v5585_v8 = vadd.f32 %v11828_v19, %v5311_v27  ;;  %v5313_v2 = vpop.f32.mrb[213].mxu1  ;;  %v11944_v22 = vpop.f32.mrb[201].mxu0 }
 0x56d   : > { %v5314_v61 = vpop.f32.mrb[214].mxu1  ;;  %v8427_v38 = vpop.f32.mrb[202].mxu0 }
 0x56e   : > { %v5816_v37 = vrot.slane %v5585_v8, 1  ;;  %v5315_v55 = vpop.f32.mrb[215].mxu1  ;;  %v11946_v15 = vpop.f32.mrb[203].mxu0 }
 0x570   : > { %v5817_v21 = vsel %vm2069_vm0, %v5814_v52, %v5816_v37  ;;  %8489 = vmatmul.mubr.msk.bf16.gmra.mrb[64].mxu1 %vm10595_vm12, %v10926_v33  ;;  %7710 = vmatmul.mubr.msk.bf16.gmra.mrb[52].mxu0 %vm10595_vm12, %v11038_v28 }
 0x571   : > { %v11956_v19 = vadd.f32 %v5817_v21, %v13078_v12  ;;  %8492 = vmatprep.mubr.msk.bf16.mxu1 %vm10580_vm10, %v10981_v23  ;;  %7711 = vmatprep.mubr.msk.bf16.mxu0 %vm10580_vm10, %v11113_v63 }
 0x573   : > { %v5318_v3 = vpop.f32.mrb[216].mxu1  ;;  %v11964_v30 = vpop.f32.mrb[204].mxu0 }
 0x574   : > { %v5592_v33 = vadd.f32 %v11852_v29, %v5318_v3  ;;  %v5320_v7 = vpop.f32.mrb[217].mxu1  ;;  %v11967_v56 = vpop.f32.mrb[205].mxu0 }
 0x575   : > { %v5321_v52 = vpop.f32.mrb[218].mxu1  ;;  %v8431_v44 = vpop.f32.mrb[206].mxu0 }
 0x576   : > { %v5595_v27 = vadd.f32 %v11854_v58, %v5321_v52  ;;  %v5323_v8 = vpop.f32.mrb[219].mxu1  ;;  %v11970_v2 = vpop.f32.mrb[207].mxu0  ;;  %v5818_v23 = vrot.slane %v5592_v33, 1 }
 0x578   : > { %v5819_v61 = vrot.slane %v5595_v27, 1  ;;  %8493 = vmatmul.mubr.msk.bf16.gmra.mrb[68].mxu1 %vm10595_vm12, %v10983_v24  ;;  %7712 = vmatmul.mubr.msk.bf16.gmra.mrb[56].mxu0 %vm10580_vm10, %v11075_v26 }
 0x579   : > { %8496 = vmatprep.mubr.msk.bf16.mxu1 %vm10580_vm10, %v11034_v36  ;;  %7713 = vmatprep.mubr.msk.bf16.mxu0 %vm10595_vm12, %v11115_v51 }
 0x57a   : > { %v5820_v29 = vsel %vm2069_vm0, %v5818_v23, %v5819_v61 }
 0x57b   : > { %v11986_v58 = vadd.f32 %v5820_v29, %v11460_v35  ;;  %v5326_v38 = vpop.f32.mrb[220].mxu1  ;;  %v11988_v37 = vpop.f32.mrb[208].mxu0 }
 0x57c   : > { %v5600_v24 = vadd.f32 %v11850_v11, %v5326_v38  ;;  %v5328_v55 = vpop.f32.mrb[221].mxu1  ;;  %v11991_v21 = vpop.f32.mrb[209].mxu0 }
 0x57d   : > { %v5329_v12 = vpop.f32.mrb[222].mxu1  ;;  %v8435_v3 = vpop.f32.mrb[210].mxu0 }
 0x57e   : > { %v5821_v36 = vrot.slane %v5600_v24, 1  ;;  %v5330_v33 = vpop.f32.mrb[223].mxu1  ;;  %v11993_v7 = vpop.f32.mrb[211].mxu0 }
 0x580   : > { %v5822_v52 = vsel %vm2069_vm0, %v5819_v61, %v5821_v36  ;;  %8497 = vmatmul.mubr.msk.bf16.gmra.mrb[72].mxu1 %vm10595_vm12, %v11038_v28  ;;  %7714 = vmatmul.mubr.msk.bf16.gmra.mrb[60].mxu0 %vm10595_vm12, %v11077_v17 }
 0x581   : > { %v12003_v35 = vadd.f32 %v5822_v52, %v11462_v42  ;;  %8500 = vmatprep.mubr.msk.bf16.mxu1 %vm10580_vm10, %v11075_v26  ;;  %7715 = vmatprep.mubr.msk.bf16.mxu0 %vm10580_vm10, %v11151_v16 }
 0x583   : > { %v5333_v11 = vpop.f32.mrb[224].mxu1  ;;  %v12011_v44 = vpop.f32.mrb[212].mxu0 }
 0x584   : > { %v5607_v28 = vadd.f32 %v11874_v34, %v5333_v11  ;;  %v5335_v27 = vpop.f32.mrb[225].mxu1  ;;  %v12014_v8 = vpop.f32.mrb[213].mxu0 }
 0x585   : > { %v5336_v23 = vpop.f32.mrb[226].mxu1  ;;  %v8439_v61 = vpop.f32.mrb[214].mxu0 }
 0x586   : > { %v5610_v42 = vadd.f32 %v11876_v31, %v5336_v23  ;;  %v5338_v29 = vpop.f32.mrb[227].mxu1  ;;  %v12017_v38 = vpop.f32.mrb[215].mxu0  ;;  %v5823_v26 = vrot.slane %v5607_v28, 1 }
 0x588   : > { %v5824_v24 = vrot.slane %v5610_v42, 1  ;;  %8501 = vmatmul.mubr.msk.bf16.gmra.mrb[76].mxu1 %vm10595_vm12, %v11077_v17  ;;  %7716 = vmatmul.mubr.msk.bf16.gmra.mrb[64].mxu0 %vm10580_vm10, %v11113_v63 }
 0x589   : > { %8504 = vmatprep.mubr.msk.bf16.mxu1 %vm10580_vm10, %v11113_v63  ;;  %7717 = vmatprep.mubr.msk.bf16.mxu0 %vm10595_vm12, %v11153_v20 }
 0x58a   : > { %v5825_v34 = vsel %vm2069_vm0, %v5823_v26, %v5824_v24 }
 0x58b   : > { %v12033_v31 = vadd.f32 %v5825_v34, %v11490_v5  ;;  %v5341_v55 = vpop.f32.mrb[228].mxu1  ;;  %v12035_v12 = vpop.f32.mrb[216].mxu0  ;;  %v13079_v5 = vld [vmem:[#allocation23_spill] sm:$0xff] }
 0x58c   : > { %v5615_v17 = vadd.f32 %v11872_v54, %v5341_v55  ;;  %v5343_v3 = vpop.f32.mrb[229].mxu1  ;;  %v12038_v36 = vpop.f32.mrb[217].mxu0 }
 0x58d   : > { %v5344_v33 = vpop.f32.mrb[230].mxu1  ;;  %v8443_v52 = vpop.f32.mrb[218].mxu0 }
 0x58e   : > { %v5826_v63 = vrot.slane %v5615_v17, 1  ;;  %v5345_v11 = vpop.f32.mrb[231].mxu1  ;;  %v12040_v28 = vpop.f32.mrb[219].mxu0 }
 0x590   : > { %v5827_v27 = vsel %vm2069_vm0, %v5824_v24, %v5826_v63  ;;  %8505 = vmatmul.mubr.msk.bf16.gmra.mrb[80].mxu1 %vm10595_vm12, %v11115_v51  ;;  %7718 = vmatmul.mubr.msk.bf16.gmra.mrb[68].mxu0 %vm10595_vm12, %v11115_v51 }
 0x591   : > { %v12050_v54 = vadd.f32 %v5827_v27, %v13079_v5  ;;  %8508 = vmatprep.mubr.msk.bf16.mxu1 %vm10580_vm10, %v11151_v16  ;;  %7719 = vmatprep.mubr.msk.bf16.mxu0 %vm10580_vm10, %v11189_v41 }
 0x593   : > { %v5348_v23 = vpop.f32.mrb[232].mxu1  ;;  %v12058_v61 = vpop.f32.mrb[220].mxu0 }
 0x594   : > { %v5622_v42 = vadd.f32 %v11897_v43, %v5348_v23  ;;  %v5350_v29 = vpop.f32.mrb[233].mxu1  ;;  %v12061_v26 = vpop.f32.mrb[221].mxu0 }
 0x595   : > { %v5351_v51 = vpop.f32.mrb[234].mxu1  ;;  %v8447_v24 = vpop.f32.mrb[222].mxu0 }
 0x596   : > { %v5625_v34 = vadd.f32 %v11899_v18, %v5351_v51  ;;  %v5353_v55 = vpop.f32.mrb[235].mxu1  ;;  %v12064_v17 = vpop.f32.mrb[223].mxu0  ;;  %v5828_v3 = vrot.slane %v5622_v42, 1  ;;  %v13080_v18 = vld [vmem:[#allocation26_spill] sm:$0xff] }
 0x597   : > { %v13081_v55 = vld [vmem:[#allocation62_spill] sm:$0xff] }
 0x598   : > { %v5829_v33 = vrot.slane %v5625_v34, 1  ;;  %8509 = vmatmul.mubr.msk.bf16.gmra.mrb[84].mxu1 %vm10595_vm12, %v11153_v20  ;;  %7720 = vmatmul.mubr.msk.bf16.gmra.mrb[72].mxu0 %vm10580_vm10, %v11151_v16 }
 0x599   : > { %8512 = vmatprep.mubr.msk.bf16.mxu1 %vm10580_vm10, %v11189_v41  ;;  %7721 = vmatprep.mubr.msk.bf16.mxu0 %vm10595_vm12, %v11191_v14 }
 0x59a   : > { %v5830_v43 = vsel %vm2069_vm0, %v5828_v3, %v5829_v33 }
 0x59b   : > { %v12080_v52 = vadd.f32 %v5830_v43, %v13080_v18  ;;  %v5356_v63 = vpop.f32.mrb[236].mxu1  ;;  %v12082_v11 = vpop.f32.mrb[224].mxu0 }
 0x59c   : > { %v5630_v27 = vadd.f32 %v11894_v62, %v5356_v63  ;;  %v5358_v5 = vpop.f32.mrb[237].mxu1  ;;  %v6161_v16 = vpop.f32.mrb[225].mxu0 }
 0x59d   : > { %v5359_v23 = vpop.f32.mrb[238].mxu1  ;;  %v12085_v42 = vpop.f32.mrb[226].mxu0 }
 0x59e   : > { %v5831_v29 = vrot.slane %v5630_v27, 1  ;;  %v5360_v51 = vpop.f32.mrb[239].mxu1  ;;  %v6164_v24 = vpop.f32.mrb[227].mxu0 }
 0x5a0   : > { %v5832_v34 = vsel %vm2069_vm0, %v5829_v33, %v5831_v29  ;;  %8513 = vmatmul.mubr.msk.bf16.gmra.mrb[88].mxu1 %vm10595_vm12, %v11191_v14  ;;  %7722 = vmatmul.mubr.msk.bf16.gmra.mrb[76].mxu0 %vm10595_vm12, %v11153_v20 }
 0x5a1   : > { %v12095_v62 = vadd.f32 %v5832_v34, %v13081_v55  ;;  %8516 = vmatprep.mubr.msk.bf16.mxu1 %vm10580_vm10, %v11227_v25  ;;  %7723 = vmatprep.mubr.msk.bf16.mxu0 %vm10580_vm10, %v11227_v25 }
 0x5a3   : > { %v5363_v3 = vpop.f32.mrb[240].mxu1  ;;  %v12103_v33 = vpop.f32.mrb[228].mxu0 }
 0x5a4   : > { %v5637_v43 = vadd.f32 %v11920_v47, %v5363_v3  ;;  %v5365_v18 = vpop.f32.mrb[241].mxu1  ;;  %v6169_v63 = vpop.f32.mrb[229].mxu0 }
 0x5a5   : > { %v5366_v27 = vpop.f32.mrb[242].mxu1  ;;  %v6170_v20 = vpop.f32.mrb[230].mxu0 }
 0x5a6   : > { %v5640_v5 = vadd.f32 %v11923_v9, %v5366_v27  ;;  %v5368_v16 = vpop.f32.mrb[243].mxu1  ;;  %v6171_v23 = vpop.f32.mrb[231].mxu0  ;;  %v5833_v29 = vrot.slane %v5637_v43, 1 }
 0x5a7   : > { %v13083_v16 = vld [vmem:[#allocation60_spill] sm:$0xff] }
 0x5a8   : > { %v5834_v51 = vrot.slane %v5640_v5, 1  ;;  %8517 = vmatmul.mubr.msk.bf16.gmra.mrb[92].mxu1 %vm10595_vm12, %v11229_v13  ;;  %7724 = vmatmul.mubr.msk.bf16.gmra.mrb[80].mxu0 %vm10580_vm10, %v11189_v41 }
 0x5a9   : > { %8520 = vmatprep.mubr.msk.bf16.mxu1 %vm10580_vm10, %v11269_v46  ;;  %7725 = vmatprep.mubr.msk.bf16.mxu0 %vm10595_vm12, %v11229_v13 }
 0x5aa   : > { %v5835_v47 = vsel %vm2069_vm0, %v5833_v29, %v5834_v51 }
 0x5ab   : > { %v12121_v9 = vadd.f32 %v5835_v47, %v11546_v57  ;;  %v5371_v24 = vpop.f32.mrb[244].mxu1  ;;  %v12123_v34 = vpop.f32.mrb[232].mxu0  ;;  %v13082_v57 = vld [vmem:[#allocation22_spill] sm:$0xff] }
 0x5ac   : > { %v5645_v55 = vadd.f32 %v11917_v45, %v5371_v24  ;;  %v5373_v3 = vpop.f32.mrb[245].mxu1  ;;  %v6176_v41 = vpop.f32.mrb[233].mxu0 }
 0x5ad   : > { %v5374_v43 = vpop.f32.mrb[246].mxu1  ;;  %v12126_v18 = vpop.f32.mrb[234].mxu0 }
 0x5ae   : > { %v5836_v63 = vrot.slane %v5645_v55, 1  ;;  %v5375_v27 = vpop.f32.mrb[247].mxu1  ;;  %v6179_v20 = vpop.f32.mrb[235].mxu0 }
 0x5b0   : > { %v5837_v5 = vsel %vm2069_vm0, %v5834_v51, %v5836_v63  ;;  %8521 = vmatmul.mubr.msk.bf16.gmra.mrb[96].mxu1 %vm10595_vm12, %v11271_v39  ;;  %7726 = vmatmul.mubr.msk.bf16.gmra.mrb[84].mxu0 %vm10595_vm12, %v11191_v14 }
 0x5b1   : > { %v12136_v45 = vadd.f32 %v5837_v5, %v13082_v57  ;;  %8524 = vmatprep.mubr.msk.bf16.mxu1 %vm10586_vm11, %v13083_v16  ;;  %7727 = vmatprep.mubr.msk.bf16.mxu0 %vm10580_vm10, %v11269_v46  ;;  %v13085_v5 = vld [vmem:[#allocation101_spill] sm:$0xff] }
 0x5b3   : > { %v5378_v29 = vpop.f32.mrb[248].mxu1  ;;  %v12144_v51 = vpop.f32.mrb[236].mxu0 }
 0x5b4   : > { %v5652_v47 = vadd.f32 %v11944_v22, %v5378_v29  ;;  %v5380_v24 = vpop.f32.mrb[249].mxu1  ;;  %v6184_v55 = vpop.f32.mrb[237].mxu0  ;;  %v13086_v22 = vld [vmem:[#allocation66_spill] sm:$0xff] }
 0x5b5   : > { %v5381_v3 = vpop.f32.mrb[250].mxu1  ;;  %v6185_v14 = vpop.f32.mrb[238].mxu0 }
 0x5b6   : > { %v5655_v41 = vadd.f32 %v11946_v15, %v5381_v3  ;;  %v5383_v43 = vpop.f32.mrb[251].mxu1  ;;  %v6186_v63 = vpop.f32.mrb[239].mxu0  ;;  %v5838_v27 = vrot.slane %v5652_v47, 1  ;;  %v13088_v14 = vld [vmem:[#allocation21_spill] sm:$0xff] }
 0x5b8   : > { %v5839_v20 = vrot.slane %v5655_v41, 1  ;;  %8525 = vmatmul.mubr.msk.bf16.gmra.mrb[100].mxu1 %vm10586_vm11, %v13085_v5  ;;  %7728 = vmatmul.mubr.msk.bf16.gmra.mrb[88].mxu0 %vm10580_vm10, %v11227_v25 }
 0x5b9   : > { %7729 = vmatprep.mubr.msk.bf16.mxu0 %vm10595_vm12, %v11271_v39 }
 0x5ba   : > { %v5840_v46 = vsel %vm2069_vm0, %v5838_v27, %v5839_v20 }
 0x5bb   : > { %v12159_v15 = vadd.f32 %v5840_v46, %v13086_v22  ;;  %v5386_v57 = vpop.f32.mrb[252].mxu1  ;;  %v12161_v16 = vpop.f32.mrb[240].mxu0 }
 0x5bc   : > { %v5660_v29 = vadd.f32 %v11941_v49, %v5386_v57  ;;  %v5388_v23 = vpop.f32.mrb[253].mxu1  ;;  %v6191_v47 = vpop.f32.mrb[241].mxu0 }
 0x5bd   : > { %13087 = vst [vmem:[#allocation82_spill] sm:$0xff] %v12159_v15  ;;  %v5389_v24 = vpop.f32.mrb[254].mxu1  ;;  %v12164_v55 = vpop.f32.mrb[242].mxu0 }
 0x5be   : > { %v5841_v59 = vrot.slane %v5660_v29, 1  ;;  %v5390_v25 = vpop.f32.mrb[255].mxu1  ;;  %v6194_v3 = vpop.f32.mrb[243].mxu0 }
 0x5c0   : > { %v5842_v39 = vsel %vm2069_vm0, %v5839_v20, %v5841_v59  ;;  %7730 = vmatmul.mubr.msk.bf16.gmra.mrb[92].mxu0 %vm10595_vm12, %v11229_v13  ;;  %v13090_v13 = vld [vmem:[#allocation19_spill] sm:$0xff] }
 0x5c1   : > { %v12171_v41 = vadd.f32 %v5842_v39, %v13088_v14 }
 0x5c3   : > { %13089 = vst [vmem:[#allocation108_spill] sm:$0xff] %v12171_v41  ;;  %v5393_v43 = vpop.f32.mrb[0].mxu1  ;;  %v12173_v63 = vpop.f32.mrb[244].mxu0 }
 0x5c4   : > { %v5667_v49 = vadd.f32 %v11967_v56, %v5393_v43  ;;  %v5395_v27 = vpop.f32.mrb[1].mxu1  ;;  %v6199_v5 = vpop.f32.mrb[245].mxu0 }
 0x5c5   : > { %v5396_v46 = vpop.f32.mrb[2].mxu1  ;;  %v6200_v22 = vpop.f32.mrb[246].mxu0 }
 0x5c6   : > { %v5670_v57 = vadd.f32 %v11970_v2, %v5396_v46  ;;  %v5398_v29 = vpop.f32.mrb[3].mxu1  ;;  %v6201_v20 = vpop.f32.mrb[247].mxu0  ;;  %v5843_v23 = vrot.slane %v5667_v49, 1  ;;  %v13092_v46 = vld [vmem:[#allocation64_spill] sm:$0xff] }
 0x5c8   : > { %v5844_v47 = vrot.slane %v5670_v57, 1 }
 0x5ca   : > { %v5845_v6 = vsel %vm2069_vm0, %v5843_v23, %v5844_v47 }
 0x5cb   : > { %v12179_v24 = vadd.f32 %v5845_v6, %v13090_v13  ;;  %v5401_v59 = vpop.f32.mrb[4].mxu1  ;;  %v12181_v25 = vpop.f32.mrb[248].mxu0 }
 0x5cc   : > { %v5675_v56 = vadd.f32 %v11964_v30, %v5401_v59  ;;  %v5403_v3 = vpop.f32.mrb[5].mxu1  ;;  %v6206_v39 = vpop.f32.mrb[249].mxu0 }
 0x5cd   : > { %13091 = vst [vmem:[#allocation109_spill] sm:$0xff] %v12179_v24  ;;  %v5404_v14 = vpop.f32.mrb[6].mxu1  ;;  %v12184_v43 = vpop.f32.mrb[250].mxu0 }
 0x5ce   : > { %v5846_v2 = vrot.slane %v5675_v56, 1  ;;  %v5405_v27 = vpop.f32.mrb[7].mxu1  ;;  %v6209_v5 = vpop.f32.mrb[251].mxu0 }
 0x5d0   : > { %v5847_v49 = vsel %vm2069_vm0, %v5844_v47, %v5846_v2  ;;  %v13094_v2 = vld [vmem:[#allocation72_spill] sm:$0xff] }
 0x5d1   : > { %v12188_v22 = vadd.f32 %v5847_v49, %v13092_v46 }
 0x5d3   : > { %13093 = vst [vmem:[#allocation83_spill] sm:$0xff] %v12188_v22  ;;  %v5408_v57 = vpop.f32.mrb[8].mxu1  ;;  %v12190_v29 = vpop.f32.mrb[252].mxu0 }
 0x5d4   : > { %v5682_v20 = vadd.f32 %v11991_v21, %v5408_v57  ;;  %v5410_v23 = vpop.f32.mrb[9].mxu1  ;;  %v6214_v30 = vpop.f32.mrb[253].mxu0 }
 0x5d5   : > { %v5411_v6 = vpop.f32.mrb[10].mxu1  ;;  %v6215_v13 = vpop.f32.mrb[254].mxu0 }
 0x5d6   : > { %v5685_v59 = vadd.f32 %v11993_v7, %v5411_v6  ;;  %v5413_v3 = vpop.f32.mrb[11].mxu1  ;;  %v6216_v56 = vpop.f32.mrb[255].mxu0  ;;  %v5848_v39 = vrot.slane %v5682_v20, 1 }
 0x5d8   : > { %v5849_v14 = vrot.slane %v5685_v59, 1  ;;  %v13096_v59 = vld [vmem:[#allocation74_spill] sm:$0xff] }
 0x5da   : > { %v5850_v47 = vsel %vm2069_vm0, %v5848_v39, %v5849_v14 }
 0x5db   : > { %v12196_v27 = vadd.f32 %v5850_v47, %v13094_v2  ;;  %v5416_v5 = vpop.f32.mrb[12].mxu1  ;;  %v12198_v49 = vpop.f32.mrb[0].mxu0 }
 0x5dc   : > { %v5690_v21 = vadd.f32 %v11988_v37, %v5416_v5  ;;  %v5418_v46 = vpop.f32.mrb[13].mxu1  ;;  %v6221_v57 = vpop.f32.mrb[1].mxu0 }
 0x5dd   : > { %13095 = vst [vmem:[#allocation85_spill] sm:$0xff] %v12196_v27  ;;  %v5419_v23 = vpop.f32.mrb[14].mxu1  ;;  %v12201_v30 = vpop.f32.mrb[2].mxu0 }
 0x5de   : > { %v5851_v7 = vrot.slane %v5690_v21, 1  ;;  %v5420_v6 = vpop.f32.mrb[15].mxu1  ;;  %v6224_v13 = vpop.f32.mrb[3].mxu0 }
 0x5e0   : > { %v5852_v20 = vsel %vm2069_vm0, %v5849_v14, %v5851_v7  ;;  %v13098_v7 = vld [vmem:[#allocation68_spill] sm:$0xff] }
 0x5e1   : > { %v12205_v3 = vadd.f32 %v5852_v20, %v13096_v59 }
 0x5e3   : > { %13097 = vst [vmem:[#allocation110_spill] sm:$0xff] %v12205_v3  ;;  %v5423_v56 = vpop.f32.mrb[16].mxu1  ;;  %v12207_v39 = vpop.f32.mrb[4].mxu0 }
 0x5e4   : > { %v5697_v47 = vadd.f32 %v12014_v8, %v5423_v56  ;;  %v5425_v2 = vpop.f32.mrb[17].mxu1  ;;  %v6229_v37 = vpop.f32.mrb[5].mxu0 }
 0x5e5   : > { %v5426_v5 = vpop.f32.mrb[18].mxu1  ;;  %v6230_v46 = vpop.f32.mrb[6].mxu0 }
 0x5e6   : > { %v5700_v57 = vadd.f32 %v12017_v38, %v5426_v5  ;;  %v5428_v23 = vpop.f32.mrb[19].mxu1  ;;  %v6231_v21 = vpop.f32.mrb[7].mxu0  ;;  %v5853_v6 = vrot.slane %v5697_v47, 1 }
 0x5e8   : > { %v5854_v13 = vrot.slane %v5700_v57, 1  ;;  %v13100_v57 = vld [vmem:[#allocation70_spill] sm:$0xff] }
 0x5ea   : > { %v5855_v14 = vsel %vm2069_vm0, %v5853_v6, %v5854_v13 }
 0x5eb   : > { %v12213_v20 = vadd.f32 %v5855_v14, %v13098_v7  ;;  %v5431_v59 = vpop.f32.mrb[20].mxu1  ;;  %v12215_v3 = vpop.f32.mrb[8].mxu0 }
 0x5ec   : > { %v5705_v8 = vadd.f32 %v12011_v44, %v5431_v59  ;;  %v5433_v56 = vpop.f32.mrb[21].mxu1  ;;  %v6236_v2 = vpop.f32.mrb[9].mxu0 }
 0x5ed   : > { %13099 = vst [vmem:[#allocation24_spill] sm:$0xff] %v12213_v20  ;;  %v5434_v37 = vpop.f32.mrb[22].mxu1  ;;  %v12218_v46 = vpop.f32.mrb[10].mxu0 }
 0x5ee   : > { %v5856_v38 = vrot.slane %v5705_v8, 1  ;;  %v5435_v5 = vpop.f32.mrb[23].mxu1  ;;  %v6239_v23 = vpop.f32.mrb[11].mxu0 }
 0x5f0   : > { %v5857_v47 = vsel %vm2069_vm0, %v5854_v13, %v5856_v38  ;;  %v13102_v38 = vld [vmem:[#allocation76_spill] sm:$0xff] }
 0x5f1   : > { %v12222_v21 = vadd.f32 %v5857_v47, %v13100_v57 }
 0x5f3   : > { %13101 = vst [vmem:[#allocation39_spill] sm:$0xff] %v12222_v21  ;;  %v5438_v6 = vpop.f32.mrb[24].mxu1  ;;  %v12224_v14 = vpop.f32.mrb[12].mxu0 }
 0x5f4   : > { %v5712_v7 = vadd.f32 %v12038_v36, %v5438_v6  ;;  %v5440_v20 = vpop.f32.mrb[25].mxu1  ;;  %v6244_v44 = vpop.f32.mrb[13].mxu0 }
 0x5f5   : > { %v5441_v59 = vpop.f32.mrb[26].mxu1  ;;  %v6245_v56 = vpop.f32.mrb[14].mxu0 }
 0x5f6   : > { %v5715_v2 = vadd.f32 %v12040_v28, %v5441_v59  ;;  %v5443_v37 = vpop.f32.mrb[27].mxu1  ;;  %v6246_v8 = vpop.f32.mrb[15].mxu0  ;;  %v5858_v5 = vrot.slane %v5712_v7, 1 }
 0x5f8   : > { %v5859_v23 = vrot.slane %v5715_v2, 1  ;;  %v13104_v2 = vld [vmem:[#allocation78_spill] sm:$0xff] }
 0x5fa   : > { %v5860_v13 = vsel %vm2069_vm0, %v5858_v5, %v5859_v23 }
 0x5fb   : > { %v12230_v47 = vadd.f32 %v5860_v13, %v13102_v38  ;;  %v5446_v57 = vpop.f32.mrb[28].mxu1  ;;  %v12232_v21 = vpop.f32.mrb[16].mxu0 }
 0x5fc   : > { %v5720_v36 = vadd.f32 %v12035_v12, %v5446_v57  ;;  %v5448_v20 = vpop.f32.mrb[29].mxu1  ;;  %v6251_v6 = vpop.f32.mrb[17].mxu0 }
 0x5fd   : > { %13103 = vst [vmem:[#allocation40_spill] sm:$0xff] %v12230_v47  ;;  %v5449_v44 = vpop.f32.mrb[30].mxu1  ;;  %v12235_v56 = vpop.f32.mrb[18].mxu0 }
 0x5fe   : > { %v5861_v28 = vrot.slane %v5720_v36, 1  ;;  %v5450_v59 = vpop.f32.mrb[31].mxu1  ;;  %v6254_v37 = vpop.f32.mrb[19].mxu0 }
 0x600   : > { %v5862_v7 = vsel %vm2069_vm0, %v5859_v23, %v5861_v28  ;;  %v13106_v28 = vld [vmem:[#allocation106_spill] sm:$0xff] }
 0x601   : > { %v12239_v8 = vadd.f32 %v5862_v7, %v13104_v2 }
 0x603   : > { %13105 = vst [vmem:[#allocation37_spill] sm:$0xff] %v12239_v8  ;;  %v5453_v5 = vpop.f32.mrb[32].mxu1  ;;  %v12241_v13 = vpop.f32.mrb[20].mxu0 }
 0x604   : > { %v5727_v38 = vadd.f32 %v12061_v26, %v5453_v5  ;;  %v5455_v47 = vpop.f32.mrb[33].mxu1  ;;  %v6259_v12 = vpop.f32.mrb[21].mxu0 }
 0x605   : > { %v5456_v57 = vpop.f32.mrb[34].mxu1  ;;  %v6260_v20 = vpop.f32.mrb[22].mxu0 }
 0x606   : > { %v5730_v6 = vadd.f32 %v12064_v17, %v5456_v57  ;;  %v5458_v44 = vpop.f32.mrb[35].mxu1  ;;  %v6261_v36 = vpop.f32.mrb[23].mxu0  ;;  %v5863_v59 = vrot.slane %v5727_v38, 1 }
 0x608   : > { %v5864_v37 = vrot.slane %v5730_v6, 1  ;;  %v13108_v6 = vld [vmem:[#allocation107_spill] sm:$0xff] }
 0x60a   : > { %v5865_v23 = vsel %vm2069_vm0, %v5863_v59, %v5864_v37 }
 0x60b   : > { %v12247_v7 = vadd.f32 %v5865_v23, %v13106_v28  ;;  %v5461_v2 = vpop.f32.mrb[36].mxu1  ;;  %v12249_v8 = vpop.f32.mrb[24].mxu0 }
 0x60c   : > { %v5735_v26 = vadd.f32 %v12058_v61, %v5461_v2  ;;  %v5463_v47 = vpop.f32.mrb[37].mxu1  ;;  %v6266_v5 = vpop.f32.mrb[25].mxu0  ;;  %v8757_v2 = vld [vmem:[#allocation2 + $0x20] sm:$0xff] }
 0x60d   : > { %13107 = vst [vmem:[#allocation38_spill] sm:$0xff] %v12247_v7  ;;  %v5464_v12 = vpop.f32.mrb[38].mxu1  ;;  %v12252_v20 = vpop.f32.mrb[26].mxu0  ;;  %v6901_v47 = vunpack.c.l.bf16 %v8757_v2  ;;  %v6902_v5 = vunpack.c.h.bf16 %v8757_v2 }
 0x60e   : > { %v5866_v17 = vrot.slane %v5735_v26, 1  ;;  %v5465_v57 = vpop.f32.mrb[39].mxu1  ;;  %v6269_v44 = vpop.f32.mrb[27].mxu0 }
 0x60f   : > { %v8758_v44 = vld [vmem:[#allocation2 + $0x28] sm:$0xff] }
 0x610   : > { %v5867_v38 = vsel %vm2069_vm0, %v5864_v37, %v5866_v17  ;;  %v6903_v27 = vunpack.c.l.bf16 %v8758_v44 }
 0x611   : > { %v12256_v36 = vadd.f32 %v5867_v38, %v13108_v6  ;;  %v6997_v6 = vrot.slane %v6901_v47, 2 }
 0x613   : > { %13109 = vst [vmem:[#allocation89_spill] sm:$0xff] %v12256_v36  ;;  %v8466_v59 = vpop.f32.mrb[40].mxu1  ;;  %v12258_v23 = vpop.f32.mrb[28].mxu0  ;;  %v6998_v36 = vrot.slane %v6902_v5, 2 }
 0x614   : > { %v6441_v28 = vadd.f32 %v8466_v59, %v12103_v33  ;;  %v6432_v7 = vpop.f32.mrb[41].mxu1  ;;  %v6274_v61 = vpop.f32.mrb[29].mxu0  ;;  %v7000_v59 = vrot.slane %v6903_v27, 2 }
 0x615   : > { %v6433_v12 = vadd.f32 %v6432_v7, %v12082_v11  ;;  %v8467_v26 = vpop.f32.mrb[42].mxu1  ;;  %v6275_v57 = vpop.f32.mrb[30].mxu0  ;;  %v12266_v61 = vld [vmem:[%s12561_s4] ss:$0 sm:$0xff] }
 0x616   : > { %v6435_v37 = vpop.f32.mrb[43].mxu1  ;;  %v6276_v17 = vpop.f32.mrb[31].mxu0  ;;  %v6722_v22 = vrot.slane %v6441_v28, 2  ;;  %v8759_v57 = vld [vmem:[#allocation2 + $0x30] sm:$0xff] }
 0x617   : > { %v6436_v38 = vadd.f32 %v6435_v37, %v12085_v42  ;;  %v6719_v24 = vrot.slane %v6433_v12, 2  ;;  %v6904_v42 = vunpack.c.l.bf16 %v8759_v57  ;;  %v6905_v44 = vunpack.c.h.bf16 %v8759_v57 }
 0x618   : > { %v6999_v37 = vsel %vm3265_vm4, %v6997_v6, %v6998_v36 }
 0x619   : > { %v6720_v33 = vrot.slane %v6436_v38, 2 }
 0x61b   : > { %v6721_v11 = vsel %vm3265_vm4, %v6719_v24, %v6720_v33  ;;  %v6723_v7 = vsel %vm3265_vm4, %v6720_v33, %v6722_v22  ;;  %v8470_v2 = vpop.f32.mrb[44].mxu1  ;;  %v12270_v26 = vpop.f32.mrb[32].mxu0  ;;  %v7001_v24 = vsel %vm3265_vm4, %v6998_v36, %v7000_v59  ;;  %v8760_v33 = vld [vmem:[#allocation2 + $0x38] sm:$0xff]  ;;  %v7002_v36 = vrot.slane %v6904_v42, 2 }
 0x61c   : > { %v6831_v47 = vadd.f32 %v6721_v11, %v11757_v50  ;;  %v6832_v28 = vadd.f32 %v6723_v7, %v11760_v10  ;;  %v6456_v27 = vadd.f32 %v8470_v2, %v12144_v51  ;;  %v6447_v5 = vpop.f32.mrb[45].mxu1  ;;  %v6281_v12 = vpop.f32.mrb[33].mxu0  ;;  %v6906_v50 = vunpack.c.l.bf16 %v8760_v33 }
 0x61d   : > { %v6448_v22 = vadd.f32 %v6447_v5, %v12123_v34  ;;  %v8471_v17 = vpop.f32.mrb[46].mxu1  ;;  %v12278_v38 = vpop.f32.mrb[34].mxu0  ;;  %v7003_v59 = vrot.slane %v6905_v44, 2 }
 0x61e   : > { %v6869_v10 = vadd.f32 %v12266_v61, %v6831_v47  ;;  %v6870_v51 = vadd.f32 %v12266_v61, %v6832_v28  ;;  %v6450_v11 = vpop.f32.mrb[47].mxu1  ;;  %v6284_v7 = vpop.f32.mrb[35].mxu0  ;;  %v6727_v34 = vrot.slane %v6456_v27, 2  ;;  %v7005_v17 = vrot.slane %v6906_v50, 2 }
 0x61f   : > { %v6451_v2 = vadd.f32 %v6450_v11, %v12126_v18  ;;  %v6724_v5 = vrot.slane %v6448_v22, 2  ;;  %v8761_v7 = vld [vmem:[#allocation2 + $0x40] sm:$0xff]  ;;  %v7004_v50 = vsel %vm3265_vm4, %v7002_v36, %v7003_v59 }
 0x620   : > { %v7109_v6 = vadd.f32 %v6999_v37, %v6869_v10  ;;  %v7110_v57 = vadd.f32 %v7001_v24, %v6870_v51  ;;  %v6907_v15 = vunpack.c.l.bf16 %v8761_v7  ;;  %v13110_v37 = vld [vmem:[#allocation80_spill] sm:$0xff]  ;;  %v6908_v22 = vunpack.c.h.bf16 %v8761_v7 }
 0x621   : > { %v6725_v12 = vrot.slane %v6451_v2, 2  ;;  %v7006_v10 = vsel %vm3265_vm4, %v7003_v59, %v7005_v17 }
 0x622   : > { %7141 = vst [vmem:[%s9143_s14] sm:$0xff] %v7109_v6  ;;  %7142 = vst [vmem:[%s9143_s14 + $0x8] sm:$0xff] %v7110_v57  ;;  %v8762_v6 = vld [vmem:[#allocation2 + $0x48] sm:$0xff]  ;;  %v7008_v59 = vrot.slane %v6908_v22, 2 }
 0x623   : > { %v6726_v33 = vsel %vm3265_vm4, %v6724_v5, %v6725_v12  ;;  %v6728_v47 = vsel %vm3265_vm4, %v6725_v12, %v6727_v34  ;;  %v8474_v41 = vpop.f32.mrb[48].mxu1  ;;  %v12287_v28 = vpop.f32.mrb[36].mxu0  ;;  %v6909_v57 = vunpack.c.l.bf16 %v8762_v6 }
 0x624   : > { %v6833_v18 = vadd.f32 %v6726_v33, %v11776_v0  ;;  %v6834_v42 = vadd.f32 %v6728_v47, %v13110_v37  ;;  %v6471_v27 = vadd.f32 %v8474_v41, %v12173_v63  ;;  %v6462_v44 = vpop.f32.mrb[49].mxu1  ;;  %v6289_v24 = vpop.f32.mrb[37].mxu0  ;;  %v7007_v33 = vrot.slane %v6907_v15, 2 }
 0x625   : > { %v6463_v51 = vadd.f32 %v6462_v44, %v12161_v16  ;;  %v8475_v11 = vpop.f32.mrb[50].mxu1  ;;  %v6290_v2 = vpop.f32.mrb[38].mxu0  ;;  %v7010_v7 = vrot.slane %v6909_v57, 2  ;;  %v8763_v24 = vld [vmem:[#allocation2 + $0x50] sm:$0xff] }
 0x626   : > { %v6871_v0 = vadd.f32 %v12266_v61, %v6833_v18  ;;  %v6872_v34 = vadd.f32 %v12266_v61, %v6834_v42  ;;  %v6465_v41 = vpop.f32.mrb[51].mxu1  ;;  %v6291_v63 = vpop.f32.mrb[39].mxu0  ;;  %v6732_v17 = vrot.slane %v6471_v27, 2  ;;  %v6910_v11 = vunpack.c.l.bf16 %v8763_v24 }
 0x627   : > { %v6466_v5 = vadd.f32 %v6465_v41, %v12164_v55  ;;  %v6729_v16 = vrot.slane %v6463_v51, 2  ;;  %v7009_v51 = vsel %vm3265_vm4, %v7007_v33, %v7008_v59  ;;  %v7011_v2 = vsel %vm3265_vm4, %v7008_v59, %v7010_v7 }
 0x628   : > { %v7111_v12 = vadd.f32 %v7004_v50, %v6871_v0  ;;  %v7112_v36 = vadd.f32 %v7006_v10, %v6872_v34  ;;  %v6911_v10 = vunpack.c.h.bf16 %v8763_v24  ;;  %v8764_v34 = vld [vmem:[#allocation2 + $0x58] sm:$0xff]  ;;  %v7012_v33 = vrot.slane %v6910_v11, 2  ;;  %v8765_v24 = vld [vmem:[#allocation2 + $0x60] sm:$0xff] }
 0x629   : > { %v6730_v47 = vrot.slane %v6466_v5, 2 }
 0x62a   : > { %7143 = vst [vmem:[%s9143_s14 + $0x10] sm:$0xff] %v7111_v12  ;;  %7144 = vst [vmem:[%s9143_s14 + $0x18] sm:$0xff] %v7112_v36  ;;  %v7013_v59 = vrot.slane %v6911_v10, 2 }
 0x62b   : > { %v6731_v37 = vsel %vm3265_vm4, %v6729_v16, %v6730_v47  ;;  %v6733_v18 = vsel %vm3265_vm4, %v6730_v47, %v6732_v17  ;;  %v8478_v44 = vpop.f32.mrb[52].mxu1  ;;  %v12302_v42 = vpop.f32.mrb[40].mxu0 }
 0x62c   : > { %v6835_v55 = vadd.f32 %v6731_v37, %v11808_v48  ;;  %v6836_v15 = vadd.f32 %v6733_v18, %v11820_v4  ;;  %v6486_v27 = vadd.f32 %v8478_v44, %v12190_v29  ;;  %v6477_v22 = vpop.f32.mrb[53].mxu1  ;;  %v6296_v50 = vpop.f32.mrb[41].mxu0  ;;  %v6912_v48 = vunpack.c.l.bf16 %v8764_v34  ;;  %v8766_v34 = vld [vmem:[#allocation2 + $0x68] sm:$0xff] }
 0x62d   : > { %v6478_v6 = vadd.f32 %v6477_v22, %v12181_v25  ;;  %v8479_v57 = vpop.f32.mrb[54].mxu1  ;;  %v12310_v0 = vpop.f32.mrb[42].mxu0  ;;  %v6914_v50 = vunpack.c.h.bf16 %v8765_v24  ;;  %v7014_v10 = vsel %vm3265_vm4, %v7012_v33, %v7013_v59 }
 0x62e   : > { %v6873_v4 = vadd.f32 %v12266_v61, %v6835_v55  ;;  %v6874_v29 = vadd.f32 %v12266_v61, %v6836_v15  ;;  %v6480_v41 = vpop.f32.mrb[55].mxu1  ;;  %v6299_v63 = vpop.f32.mrb[43].mxu0  ;;  %v6737_v25 = vrot.slane %v6486_v27, 2  ;;  %v7015_v47 = vrot.slane %v6912_v48, 2 }
 0x62f   : > { %v6481_v5 = vadd.f32 %v6480_v41, %v12184_v43  ;;  %v6734_v17 = vrot.slane %v6478_v6, 2  ;;  %v6913_v55 = vunpack.c.l.bf16 %v8765_v24  ;;  %v6915_v48 = vunpack.c.l.bf16 %v8766_v34 }
 0x630   : > { %v7113_v12 = vadd.f32 %v7009_v51, %v6873_v4  ;;  %v7114_v36 = vadd.f32 %v7011_v2, %v6874_v29  ;;  %v7016_v51 = vsel %vm3265_vm4, %v7013_v59, %v7015_v47 }
 0x631   : > { %v6735_v16 = vrot.slane %v6481_v5, 2  ;;  %v7017_v5 = vrot.slane %v6913_v55, 2  ;;  %v7020_v59 = vrot.slane %v6915_v48, 2 }
 0x632   : > { %7145 = vst [vmem:[%s9143_s14 + $0x20] sm:$0xff] %v7113_v12  ;;  %7146 = vst [vmem:[%s9143_s14 + $0x28] sm:$0xff] %v7114_v36  ;;  %v7018_v12 = vrot.slane %v6914_v50, 2 }
 0x633   : > { %v6736_v7 = vsel %vm3265_vm4, %v6734_v17, %v6735_v16  ;;  %v6738_v37 = vsel %vm3265_vm4, %v6735_v16, %v6737_v25  ;;  %v8482_v18 = vpop.f32.mrb[56].mxu1  ;;  %v12319_v44 = vpop.f32.mrb[44].mxu0 }
 0x634   : > { %v6837_v43 = vadd.f32 %v6736_v7, %v11848_v53  ;;  %v6838_v11 = vadd.f32 %v6738_v37, %v11864_v1  ;;  %v6501_v15 = vadd.f32 %v8482_v18, %v12207_v39  ;;  %v6492_v27 = vpop.f32.mrb[57].mxu1  ;;  %v6304_v22 = vpop.f32.mrb[45].mxu0  ;;  %v8767_v7 = vld [vmem:[#allocation2 + $0x70] sm:$0xff] }
 0x635   : > { %v6493_v2 = vadd.f32 %v6492_v27, %v12198_v49  ;;  %v8483_v6 = vpop.f32.mrb[58].mxu1  ;;  %v6305_v57 = vpop.f32.mrb[46].mxu0  ;;  %v6916_v37 = vunpack.c.l.bf16 %v8767_v7  ;;  %v7021_v27 = vsel %vm3265_vm4, %v7018_v12, %v7020_v59 }
 0x636   : > { %v6875_v53 = vadd.f32 %v12266_v61, %v6837_v43  ;;  %v6876_v1 = vadd.f32 %v12266_v61, %v6838_v11  ;;  %v6495_v39 = vpop.f32.mrb[59].mxu1  ;;  %v6306_v4 = vpop.f32.mrb[47].mxu0  ;;  %v6742_v36 = vrot.slane %v6501_v15, 2  ;;  %v6917_v11 = vunpack.c.h.bf16 %v8767_v7 }
 0x637   : > { %v6496_v29 = vadd.f32 %v6495_v39, %v12201_v30  ;;  %v6739_v49 = vrot.slane %v6493_v2, 2  ;;  %v7019_v15 = vsel %vm3265_vm4, %v7017_v5, %v7018_v12 }
 0x638   : > { %v7115_v41 = vadd.f32 %v7014_v10, %v6875_v53  ;;  %v7116_v63 = vadd.f32 %v7016_v51, %v6876_v1  ;;  %v8768_v51 = vld [vmem:[#allocation2 + $0x78] sm:$0xff]  ;;  %v7022_v53 = vrot.slane %v6916_v37, 2  ;;  %v7023_v1 = vrot.slane %v6917_v11, 2 }
 0x639   : > { %v6740_v33 = vrot.slane %v6496_v29, 2 }
 0x63a   : > { %7147 = vst [vmem:[%s9143_s14 + $0x30] sm:$0xff] %v7115_v41  ;;  %7148 = vst [vmem:[%s9143_s14 + $0x38] sm:$0xff] %v7116_v63  ;;  %v7024_v7 = vsel %vm3265_vm4, %v7022_v53, %v7023_v1 }
 0x63b   : > { %v6741_v25 = vsel %vm3265_vm4, %v6739_v49, %v6740_v33  ;;  %v6743_v17 = vsel %vm3265_vm4, %v6740_v33, %v6742_v36  ;;  %v8486_v16 = vpop.f32.mrb[60].mxu1  ;;  %v12334_v47 = vpop.f32.mrb[48].mxu0  ;;  %v8769_v36 = vld [vmem:[#allocation2 + $0x80] sm:$0xff] }
 0x63c   : > { %v6839_v30 = vadd.f32 %v6741_v25, %v11892_v32  ;;  %v6840_v18 = vadd.f32 %v6743_v17, %v11909_v40  ;;  %v6516_v24 = vadd.f32 %v8486_v16, %v12224_v14  ;;  %v6507_v55 = vpop.f32.mrb[61].mxu1  ;;  %v6311_v43 = vpop.f32.mrb[49].mxu0  ;;  %v6918_v32 = vunpack.c.l.bf16 %v8768_v51 }
 0x63d   : > { %v6508_v22 = vadd.f32 %v6507_v55, %v12215_v3  ;;  %v8487_v50 = vpop.f32.mrb[62].mxu1  ;;  %v12342_v10 = vpop.f32.mrb[50].mxu0  ;;  %v6919_v49 = vunpack.c.l.bf16 %v8769_v36  ;;  %v6920_v16 = vunpack.c.h.bf16 %v8769_v36  ;;  %v8770_v55 = vld [vmem:[#allocation2 + $0x88] sm:$0xff] }
 0x63e   : > { %v6877_v40 = vadd.f32 %v12266_v61, %v6839_v30  ;;  %v6878_v14 = vadd.f32 %v12266_v61, %v6840_v18  ;;  %v6510_v2 = vpop.f32.mrb[63].mxu1  ;;  %v6314_v6 = vpop.f32.mrb[51].mxu0  ;;  %v6747_v3 = vrot.slane %v6516_v24, 2  ;;  %v7025_v29 = vrot.slane %v6918_v32, 2 }
 0x63f   : > { %v6511_v57 = vadd.f32 %v6510_v2, %v12218_v46  ;;  %v6744_v39 = vrot.slane %v6508_v22, 2  ;;  %v6921_v43 = vunpack.c.l.bf16 %v8770_v55  ;;  %v7027_v50 = vrot.slane %v6919_v49, 2 }
 0x640   : > { %v7117_v34 = vadd.f32 %v7019_v15, %v6877_v40  ;;  %v7118_v48 = vadd.f32 %v7021_v27, %v6878_v14  ;;  %v7026_v37 = vsel %vm3265_vm4, %v7023_v1, %v7025_v29  ;;  %v7028_v51 = vrot.slane %v6920_v16, 2 }
 0x641   : > { %v6745_v4 = vrot.slane %v6511_v57, 2  ;;  %v7030_v14 = vrot.slane %v6921_v43, 2 }
 0x642   : > { %7149 = vst [vmem:[%s9143_s14 + $0x40] sm:$0xff] %v7117_v34  ;;  %7150 = vst [vmem:[%s9143_s14 + $0x48] sm:$0xff] %v7118_v48  ;;  %v8771_v48 = vld [vmem:[#allocation2 + $0x90] sm:$0xff] }
 0x643   : > { %v6746_v41 = vsel %vm3265_vm4, %v6744_v39, %v6745_v4  ;;  %v6748_v63 = vsel %vm3265_vm4, %v6745_v4, %v6747_v3  ;;  %v8490_v5 = vpop.f32.mrb[64].mxu1  ;;  %v12351_v12 = vpop.f32.mrb[52].mxu0  ;;  %v6922_v53 = vunpack.c.l.bf16 %v8771_v48  ;;  %v6923_v29 = vunpack.c.h.bf16 %v8771_v48 }
 0x644   : > { %v6841_v46 = vadd.f32 %v6746_v41, %v11939_v60  ;;  %v6842_v33 = vadd.f32 %v6748_v63, %v11956_v19  ;;  %v6531_v59 = vadd.f32 %v8490_v5, %v12241_v13  ;;  %v6522_v25 = vpop.f32.mrb[65].mxu1  ;;  %v6319_v17 = vpop.f32.mrb[53].mxu0  ;;  %v7029_v41 = vsel %vm3265_vm4, %v7027_v50, %v7028_v51 }
 0x645   : > { %v6523_v30 = vadd.f32 %v6522_v25, %v12232_v21  ;;  %v8491_v18 = vpop.f32.mrb[66].mxu1  ;;  %v6320_v24 = vpop.f32.mrb[54].mxu0  ;;  %v7031_v63 = vsel %vm3265_vm4, %v7028_v51, %v7030_v14 }
 0x646   : > { %v6879_v60 = vadd.f32 %v12266_v61, %v6841_v46  ;;  %v6880_v19 = vadd.f32 %v12266_v61, %v6842_v33  ;;  %v6525_v13 = vpop.f32.mrb[67].mxu1  ;;  %v6321_v11 = vpop.f32.mrb[55].mxu0  ;;  %v6752_v32 = vrot.slane %v6531_v59, 2  ;;  %v8772_v46 = vld [vmem:[#allocation2 + $0x98] sm:$0xff] }
 0x647   : > { %v6526_v15 = vadd.f32 %v6525_v13, %v12235_v56  ;;  %v6749_v21 = vrot.slane %v6523_v30, 2  ;;  %v8773_v13 = vld [vmem:[#allocation2 + $0xa0] sm:$0xff] }
 0x648   : > { %v7119_v27 = vadd.f32 %v7024_v7, %v6879_v60  ;;  %v7120_v22 = vadd.f32 %v7026_v37, %v6880_v19  ;;  %v7032_v7 = vrot.slane %v6922_v53, 2  ;;  %v7033_v37 = vrot.slane %v6923_v29, 2 }
 0x649   : > { %v6750_v40 = vrot.slane %v6526_v15, 2  ;;  %v6925_v11 = vunpack.c.l.bf16 %v8773_v13  ;;  %v6926_v51 = vunpack.c.h.bf16 %v8773_v13 }
 0x64a   : > { %7151 = vst [vmem:[%s9143_s14 + $0x50] sm:$0xff] %v7119_v27  ;;  %7152 = vst [vmem:[%s9143_s14 + $0x58] sm:$0xff] %v7120_v22 }
 0x64b   : > { %v6751_v2 = vsel %vm3265_vm4, %v6749_v21, %v6750_v40  ;;  %v6753_v6 = vsel %vm3265_vm4, %v6750_v40, %v6752_v32  ;;  %v8494_v57 = vpop.f32.mrb[68].mxu1  ;;  %v12366_v34 = vpop.f32.mrb[56].mxu0  ;;  %v7034_v32 = vsel %vm3265_vm4, %v7032_v7, %v7033_v37 }
 0x64c   : > { %v6843_v56 = vadd.f32 %v6751_v2, %v11986_v58  ;;  %v6844_v1 = vadd.f32 %v6753_v6, %v12003_v35  ;;  %v6546_v3 = vadd.f32 %v8494_v57, %v12258_v23  ;;  %v6537_v39 = vpop.f32.mrb[69].mxu1  ;;  %v6326_v4 = vpop.f32.mrb[57].mxu0  ;;  %v6924_v58 = vunpack.c.l.bf16 %v8772_v46  ;;  %v8774_v6 = vld [vmem:[#allocation2 + $0xa8] sm:$0xff] }
 0x64d   : > { %v6538_v5 = vadd.f32 %v6537_v39, %v12249_v8  ;;  %v8495_v36 = vpop.f32.mrb[70].mxu1  ;;  %v12374_v49 = vpop.f32.mrb[58].mxu0  ;;  %v6927_v57 = vunpack.c.l.bf16 %v8774_v6  ;;  %v7038_v39 = vrot.slane %v6926_v51, 2 }
 0x64e   : > { %v6881_v35 = vadd.f32 %v12266_v61, %v6843_v56  ;;  %v6882_v23 = vadd.f32 %v12266_v61, %v6844_v1  ;;  %v6540_v33 = vpop.f32.mrb[71].mxu1  ;;  %v6329_v59 = vpop.f32.mrb[59].mxu0  ;;  %v6757_v8 = vrot.slane %v6546_v3, 2  ;;  %v7035_v24 = vrot.slane %v6924_v58, 2  ;;  %v8775_v58 = vld [vmem:[#allocation2 + $0xb0] sm:$0xff] }
 0x64f   : > { %v6541_v25 = vadd.f32 %v6540_v33, %v12252_v20  ;;  %v6754_v30 = vrot.slane %v6538_v5, 2  ;;  %v7037_v3 = vrot.slane %v6925_v11, 2 }
 0x650   : > { %v7121_v17 = vadd.f32 %v7029_v41, %v6881_v35  ;;  %v7122_v16 = vadd.f32 %v7031_v63, %v6882_v23  ;;  %v7036_v21 = vsel %vm3265_vm4, %v7033_v37, %v7035_v24  ;;  %v7040_v41 = vrot.slane %v6927_v57, 2 }
 0x651   : > { %v6755_v18 = vrot.slane %v6541_v25, 2  ;;  %v6928_v35 = vunpack.c.l.bf16 %v8775_v58 }
 0x652   : > { %7153 = vst [vmem:[%s9143_s14 + $0x60] sm:$0xff] %v7121_v17  ;;  %7154 = vst [vmem:[%s9143_s14 + $0x68] sm:$0xff] %v7122_v16  ;;  %v6929_v17 = vunpack.c.h.bf16 %v8775_v58  ;;  %v7039_v16 = vsel %vm3265_vm4, %v7037_v3, %v7038_v39  ;;  %v7041_v7 = vsel %vm3265_vm4, %v7038_v39, %v7040_v41  ;;  %v8778_v3 = vld [vmem:[#allocation2 + $0xc8] sm:$0xff] }
 0x653   : > { %v6756_v55 = vsel %vm3265_vm4, %v6754_v30, %v6755_v18  ;;  %v6758_v43 = vsel %vm3265_vm4, %v6755_v18, %v6757_v8  ;;  %v8498_v60 = vpop.f32.mrb[72].mxu1  ;;  %v12383_v19 = vpop.f32.mrb[60].mxu0  ;;  %v8776_v18 = vld [vmem:[#allocation2 + $0xb8] sm:$0xff]  ;;  %v7042_v11 = vrot.slane %v6928_v35, 2  ;;  %v6933_v39 = vunpack.c.l.bf16 %v8778_v3 }
 0x654   : > { %v6845_v20 = vadd.f32 %v6756_v55, %v12033_v31  ;;  %v6846_v15 = vadd.f32 %v6758_v43, %v12050_v54  ;;  %v6561_v27 = vadd.f32 %v8498_v60, %v12287_v28  ;;  %v6552_v22 = vpop.f32.mrb[73].mxu1  ;;  %v6334_v50 = vpop.f32.mrb[61].mxu0 }
 0x655   : > { %v6553_v40 = vadd.f32 %v6552_v22, %v12270_v26  ;;  %v8499_v14 = vpop.f32.mrb[74].mxu1  ;;  %v6335_v2 = vpop.f32.mrb[62].mxu0  ;;  %v7050_v35 = vrot.slane %v6933_v39, 2 }
 0x656   : > { %v6883_v31 = vadd.f32 %v12266_v61, %v6845_v20  ;;  %v6884_v54 = vadd.f32 %v12266_v61, %v6846_v15  ;;  %v6555_v28 = vpop.f32.mrb[75].mxu1  ;;  %v6336_v48 = vpop.f32.mrb[63].mxu0  ;;  %v6762_v4 = vrot.slane %v6561_v27, 2  ;;  %v7043_v20 = vrot.slane %v6929_v17, 2 }
 0x657   : > { %v6556_v53 = vadd.f32 %v6555_v28, %v12278_v38  ;;  %v6759_v26 = vrot.slane %v6553_v40, 2  ;;  %v8777_v40 = vld [vmem:[#allocation2 + $0xc0] sm:$0xff] }
 0x658   : > { %v7123_v56 = vadd.f32 %v7034_v32, %v6883_v31  ;;  %v7124_v1 = vadd.f32 %v7036_v21, %v6884_v54  ;;  %v6931_v14 = vunpack.c.l.bf16 %v8777_v40  ;;  %v6932_v54 = vunpack.c.h.bf16 %v8777_v40 }
 0x659   : > { %v6760_v29 = vrot.slane %v6556_v53, 2  ;;  %v7044_v28 = vsel %vm3265_vm4, %v7042_v11, %v7043_v20 }
 0x65a   : > { %7155 = vst [vmem:[%s9143_s14 + $0x70] sm:$0xff] %v7123_v56  ;;  %7156 = vst [vmem:[%s9143_s14 + $0x78] sm:$0xff] %v7124_v1 }
 0x65b   : > { %v6761_v63 = vsel %vm3265_vm4, %v6759_v26, %v6760_v29  ;;  %v6763_v5 = vsel %vm3265_vm4, %v6760_v29, %v6762_v4  ;;  %v8502_v36 = vpop.f32.mrb[76].mxu1  ;;  %v12398_v46 = vpop.f32.mrb[64].mxu0 }
 0x65c   : > { %v6847_v38 = vadd.f32 %v6761_v63, %v12080_v52  ;;  %v6848_v23 = vadd.f32 %v6763_v5, %v12095_v62  ;;  %v6576_v33 = vadd.f32 %v8502_v36, %v12319_v44  ;;  %v6567_v59 = vpop.f32.mrb[77].mxu1  ;;  %v6341_v25 = vpop.f32.mrb[65].mxu0  ;;  %v6930_v52 = vunpack.c.l.bf16 %v8776_v18 }
 0x65d   : > { %v6568_v37 = vadd.f32 %v6567_v59, %v12302_v42  ;;  %v8503_v8 = vpop.f32.mrb[78].mxu1  ;;  %v12406_v30 = vpop.f32.mrb[66].mxu0  ;;  %v7047_v63 = vrot.slane %v6931_v14, 2  ;;  %v7048_v5 = vrot.slane %v6932_v54, 2  ;;  %v8779_v25 = vld [vmem:[#allocation2 + $0xd0] sm:$0xff]  ;;  %v8781_v54 = vld [vmem:[#allocation2 + $0xe0] sm:$0xff] }
 0x65e   : > { %v6885_v62 = vadd.f32 %v12266_v61, %v6847_v38  ;;  %v6886_v44 = vadd.f32 %v12266_v61, %v6848_v23  ;;  %v6570_v24 = vpop.f32.mrb[79].mxu1  ;;  %v6344_v55 = vpop.f32.mrb[67].mxu0  ;;  %v6767_v42 = vrot.slane %v6576_v33, 2  ;;  %v7045_v22 = vrot.slane %v6930_v52, 2 }
 0x65f   : > { %v6571_v43 = vadd.f32 %v6570_v24, %v12310_v0  ;;  %v6764_v15 = vrot.slane %v6568_v37, 2  ;;  %v6934_v17 = vunpack.c.l.bf16 %v8779_v25  ;;  %v7051_v24 = vsel %vm3265_vm4, %v7048_v5, %v7050_v35 }
 0x660   : > { %v7125_v60 = vadd.f32 %v7039_v16, %v6885_v62  ;;  %v7126_v13 = vadd.f32 %v7041_v7, %v6886_v44  ;;  %v7046_v48 = vsel %vm3265_vm4, %v7043_v20, %v7045_v22  ;;  %v13112_v7 = vld [vmem:[#allocation108_spill] sm:$0xff]  ;;  %v6935_v62 = vunpack.c.h.bf16 %v8779_v25 }
 0x661   : > { %v6765_v27 = vrot.slane %v6571_v43, 2  ;;  %v7049_v44 = vsel %vm3265_vm4, %v7047_v63, %v7048_v5 }
 0x662   : > { %7157 = vst [vmem:[%s9143_s14 + $0x80] sm:$0xff] %v7125_v60  ;;  %7158 = vst [vmem:[%s9143_s14 + $0x88] sm:$0xff] %v7126_v13  ;;  %v8780_v13 = vld [vmem:[#allocation2 + $0xd8] sm:$0xff] }
 0x663   : > { %v6766_v50 = vsel %vm3265_vm4, %v6764_v15, %v6765_v27  ;;  %v6768_v51 = vsel %vm3265_vm4, %v6765_v27, %v6767_v42  ;;  %v8506_v32 = vpop.f32.mrb[80].mxu1  ;;  %v12415_v21 = vpop.f32.mrb[68].mxu0  ;;  %v6936_v11 = vunpack.c.l.bf16 %v8780_v13 }
 0x664   : > { %v6849_v0 = vadd.f32 %v6766_v50, %v12121_v9  ;;  %v6850_v2 = vadd.f32 %v6768_v51, %v12136_v45  ;;  %v6591_v6 = vadd.f32 %v8506_v32, %v12351_v12  ;;  %v6582_v57 = vpop.f32.mrb[81].mxu1  ;;  %v6349_v31 = vpop.f32.mrb[69].mxu0  ;;  %v7052_v51 = vrot.slane %v6934_v17, 2 }
 0x665   : > { %v6583_v53 = vadd.f32 %v6582_v57, %v12334_v47  ;;  %v8507_v56 = vpop.f32.mrb[82].mxu1  ;;  %v6350_v1 = vpop.f32.mrb[70].mxu0  ;;  %v7053_v32 = vrot.slane %v6935_v62, 2  ;;  %v13115_v62 = vld [vmem:[#allocation85_spill] sm:$0xff] }
 0x666   : > { %v6887_v9 = vadd.f32 %v12266_v61, %v6849_v0  ;;  %v6888_v45 = vadd.f32 %v12266_v61, %v6850_v2  ;;  %v6585_v12 = vpop.f32.mrb[83].mxu1  ;;  %v6351_v4 = vpop.f32.mrb[71].mxu0  ;;  %v6772_v36 = vrot.slane %v6591_v6, 2  ;;  %v7055_v0 = vrot.slane %v6936_v11, 2 }
 0x667   : > { %v6586_v26 = vadd.f32 %v6585_v12, %v12342_v10  ;;  %v6769_v47 = vrot.slane %v6583_v53, 2  ;;  %v13111_v10 = vld [vmem:[#allocation82_spill] sm:$0xff]  ;;  %v13114_v53 = vld [vmem:[#allocation83_spill] sm:$0xff] }
 0x668   : > { %v7127_v29 = vadd.f32 %v7044_v28, %v6887_v9  ;;  %v7128_v41 = vadd.f32 %v7046_v48, %v6888_v45  ;;  %v6937_v28 = vunpack.c.l.bf16 %v8781_v54  ;;  %v13113_v48 = vld [vmem:[#allocation109_spill] sm:$0xff]  ;;  %v6938_v9 = vunpack.c.h.bf16 %v8781_v54 }
 0x669   : > { %v6770_v58 = vrot.slane %v6586_v26, 2  ;;  %v7054_v45 = vsel %vm3265_vm4, %v7052_v51, %v7053_v32  ;;  %v7056_v12 = vsel %vm3265_vm4, %v7053_v32, %v7055_v0 }
 0x66a   : > { %7159 = vst [vmem:[%s9143_s14 + $0x90] sm:$0xff] %v7127_v29  ;;  %7160 = vst [vmem:[%s9143_s14 + $0x98] sm:$0xff] %v7128_v41  ;;  %v8782_v41 = vld [vmem:[#allocation2 + $0xe8] sm:$0xff] }
 0x66b   : > { %v6771_v38 = vsel %vm3265_vm4, %v6769_v47, %v6770_v58  ;;  %v6773_v23 = vsel %vm3265_vm4, %v6770_v58, %v6772_v36  ;;  %v8510_v33 = vpop.f32.mrb[84].mxu1  ;;  %v12430_v59 = vpop.f32.mrb[72].mxu0  ;;  %v6939_v63 = vunpack.c.l.bf16 %v8782_v41 }
 0x66c   : > { %v6851_v16 = vadd.f32 %v6771_v38, %v13111_v10  ;;  %v6852_v37 = vadd.f32 %v6773_v23, %v13112_v7  ;;  %v6606_v8 = vadd.f32 %v8510_v33, %v12383_v19  ;;  %v6597_v18 = vpop.f32.mrb[85].mxu1  ;;  %v6356_v52 = vpop.f32.mrb[73].mxu0  ;;  %v7057_v23 = vrot.slane %v6937_v28, 2 }
 0x66d   : > { %v6598_v55 = vadd.f32 %v6597_v18, %v12366_v34  ;;  %v8511_v43 = vpop.f32.mrb[86].mxu1  ;;  %v12438_v60 = vpop.f32.mrb[74].mxu0  ;;  %v7058_v33 = vrot.slane %v6938_v9, 2  ;;  %v7060_v10 = vrot.slane %v6939_v63, 2  ;;  %v8783_v18 = vld [vmem:[#allocation2 + $0xf0] sm:$0xff]  ;;  %v13118_v9 = vld [vmem:[#allocation39_spill] sm:$0xff] }
 0x66e   : > { %v6889_v20 = vadd.f32 %v12266_v61, %v6851_v16  ;;  %v6890_v19 = vadd.f32 %v12266_v61, %v6852_v37  ;;  %v6600_v42 = vpop.f32.mrb[87].mxu1  ;;  %v6359_v15 = vpop.f32.mrb[75].mxu0  ;;  %v6777_v34 = vrot.slane %v6606_v8, 2  ;;  %v6940_v52 = vunpack.c.l.bf16 %v8783_v18 }
 0x66f   : > { %v6601_v27 = vadd.f32 %v6600_v42, %v12374_v49  ;;  %v6774_v40 = vrot.slane %v6598_v55, 2  ;;  %v6941_v11 = vunpack.c.h.bf16 %v8783_v18 }
 0x670   : > { %v7129_v22 = vadd.f32 %v7049_v44, %v6889_v20  ;;  %v7130_v50 = vadd.f32 %v7051_v24, %v6890_v19  ;;  %v13116_v44 = vld [vmem:[#allocation110_spill] sm:$0xff]  ;;  %v7059_v20 = vsel %vm3265_vm4, %v7057_v23, %v7058_v33  ;;  %v7061_v19 = vsel %vm3265_vm4, %v7058_v33, %v7060_v10 }
 0x671   : > { %v6775_v14 = vrot.slane %v6601_v27, 2 }
 0x672   : > { %7161 = vst [vmem:[%s9143_s14 + $0xa0] sm:$0xff] %v7129_v22  ;;  %7162 = vst [vmem:[%s9143_s14 + $0xa8] sm:$0xff] %v7130_v50  ;;  %v8784_v22 = vld [vmem:[#allocation2 + $0xf8] sm:$0xff] }
 0x673   : > { %v6776_v2 = vsel %vm3265_vm4, %v6774_v40, %v6775_v14  ;;  %v6778_v6 = vsel %vm3265_vm4, %v6775_v14, %v6777_v34  ;;  %v8514_v57 = vpop.f32.mrb[88].mxu1  ;;  %v6362_v31 = vpop.f32.mrb[76].mxu0  ;;  %v6942_v50 = vunpack.c.l.bf16 %v8784_v22 }
 0x674   : > { %v6853_v49 = vadd.f32 %v6776_v2, %v13113_v48  ;;  %v6854_v56 = vadd.f32 %v6778_v6, %v13114_v53  ;;  %v6621_v1 = vadd.f32 %v8514_v57, %v12415_v21  ;;  %v6612_v3 = vpop.f32.mrb[89].mxu1  ;;  %v6364_v39 = vpop.f32.mrb[77].mxu0  ;;  %v7062_v6 = vrot.slane %v6940_v52, 2 }
 0x675   : > { %v6613_v4 = vadd.f32 %v6612_v3, %v12398_v46  ;;  %v8515_v26 = vpop.f32.mrb[90].mxu1  ;;  %v6365_v29 = vpop.f32.mrb[78].mxu0  ;;  %v7063_v57 = vrot.slane %v6941_v11, 2  ;;  %v7065_v28 = vrot.slane %v6942_v50, 2  ;;  %v13117_v39 = vld [vmem:[#allocation24_spill] sm:$0xff]  ;;  %v8787_v50 = vld [vmem:[#allocation2 + $0x110] sm:$0xff] }
 0x676   : > { %v6891_v5 = vadd.f32 %v12266_v61, %v6853_v49  ;;  %v6892_v36 = vadd.f32 %v12266_v61, %v6854_v56  ;;  %v6615_v21 = vpop.f32.mrb[91].mxu1  ;;  %v6366_v47 = vpop.f32.mrb[79].mxu0  ;;  %v6782_v25 = vrot.slane %v6621_v1, 2  ;;  %v8785_v1 = vld [vmem:[#allocation2 + $0x100] sm:$0xff] }
 0x677   : > { %v6616_v58 = vadd.f32 %v6615_v21, %v12406_v30  ;;  %v6779_v46 = vrot.slane %v6613_v4, 2  ;;  %v6943_v3 = vunpack.c.l.bf16 %v8785_v1  ;;  %v6944_v29 = vunpack.c.h.bf16 %v8785_v1  ;;  %v8786_v47 = vld [vmem:[#allocation2 + $0x108] sm:$0xff]  ;;  %v13121_v1 = vld [vmem:[#allocation38_spill] sm:$0xff] }
 0x678   : > { %v7131_v35 = vadd.f32 %v7054_v45, %v6891_v5  ;;  %v7132_v38 = vadd.f32 %v7056_v12, %v6892_v36  ;;  %v7064_v41 = vsel %vm3265_vm4, %v7062_v6, %v7063_v57  ;;  %v7066_v63 = vsel %vm3265_vm4, %v7063_v57, %v7065_v28 }
 0x679   : > { %v6780_v17 = vrot.slane %v6616_v58, 2  ;;  %v6945_v58 = vunpack.c.l.bf16 %v8786_v47  ;;  %v7067_v10 = vrot.slane %v6943_v3, 2 }
 0x67a   : > { %7163 = vst [vmem:[%s9143_s14 + $0xb0] sm:$0xff] %v7131_v35  ;;  %7164 = vst [vmem:[%s9143_s14 + $0xb8] sm:$0xff] %v7132_v38 }
 0x67b   : > { %v6781_v16 = vsel %vm3265_vm4, %v6779_v46, %v6780_v17  ;;  %v6783_v7 = vsel %vm3265_vm4, %v6780_v17, %v6782_v25  ;;  %v8518_v37 = vpop.f32.mrb[92].mxu1  ;;  %v6369_v8 = vpop.f32.mrb[80].mxu0  ;;  %v7070_v18 = vrot.slane %v6945_v58, 2 }
 0x67c   : > { %v6855_v30 = vadd.f32 %v6781_v16, %v13115_v62  ;;  %v6856_v24 = vadd.f32 %v6783_v7, %v13116_v44  ;;  %v6636_v55 = vadd.f32 %v8518_v37, %v6362_v31  ;;  %v6627_v43 = vpop.f32.mrb[93].mxu1  ;;  %v6371_v13 = vpop.f32.mrb[81].mxu0  ;;  %v7068_v16 = vrot.slane %v6944_v29, 2 }
 0x67d   : > { %v6628_v42 = vadd.f32 %v6627_v43, %v12430_v59  ;;  %v8519_v15 = vpop.f32.mrb[94].mxu1  ;;  %v6372_v27 = vpop.f32.mrb[82].mxu0  ;;  %v13120_v43 = vld [vmem:[#allocation37_spill] sm:$0xff] }
 0x67e   : > { %v6893_v51 = vadd.f32 %v12266_v61, %v6855_v30  ;;  %v6894_v32 = vadd.f32 %v12266_v61, %v6856_v24  ;;  %v6630_v34 = vpop.f32.mrb[95].mxu1  ;;  %v6374_v40 = vpop.f32.mrb[83].mxu0  ;;  %v6787_v31 = vrot.slane %v6636_v55, 2  ;;  %v13119_v24 = vld [vmem:[#allocation40_spill] sm:$0xff]  ;;  %v7069_v11 = vsel %vm3265_vm4, %v7067_v10, %v7068_v16 }
 0x67f   : > { %v6631_v14 = vadd.f32 %v6630_v34, %v12438_v60  ;;  %v6784_v59 = vrot.slane %v6628_v42, 2  ;;  %v7071_v42 = vsel %vm3265_vm4, %v7068_v16, %v7070_v18 }
 0x680   : > { %v7133_v0 = vadd.f32 %v7059_v20, %v6893_v51  ;;  %v7134_v2 = vadd.f32 %v7061_v19, %v6894_v32  ;;  %v6946_v51 = vunpack.c.l.bf16 %v8787_v50  ;;  %v6947_v32 = vunpack.c.h.bf16 %v8787_v50 }
 0x681   : > { %v6785_v54 = vrot.slane %v6631_v14, 2 }
 0x682   : > { %7165 = vst [vmem:[%s9143_s14 + $0xc0] sm:$0xff] %v7133_v0  ;;  %7166 = vst [vmem:[%s9143_s14 + $0xc8] sm:$0xff] %v7134_v2  ;;  %v7073_v28 = vrot.slane %v6947_v32, 2 }
 0x683   : > { %v6786_v48 = vsel %vm3265_vm4, %v6784_v59, %v6785_v54  ;;  %v6788_v49 = vsel %vm3265_vm4, %v6785_v54, %v6787_v31  ;;  %v8522_v53 = vpop.f32.mrb[96].mxu1  ;;  %v6377_v56 = vpop.f32.mrb[84].mxu0  ;;  %v7072_v54 = vrot.slane %v6946_v51, 2 }
 0x684   : > { %v6857_v60 = vadd.f32 %v6786_v48, %v13117_v39  ;;  %v6858_v45 = vadd.f32 %v6788_v49, %v13118_v9  ;;  %v6651_v12 = vadd.f32 %v8522_v53, %v6377_v56  ;;  %v6642_v4 = vpop.f32.mrb[97].mxu1  ;;  %v6379_v26 = vpop.f32.mrb[85].mxu0  ;;  %v8788_v48 = vld [vmem:[#allocation2 + $0x118] sm:$0xff] }
 0x685   : > { %v6643_v5 = vadd.f32 %v6642_v4, %v6369_v8  ;;  %v8523_v36 = vpop.f32.mrb[98].mxu1  ;;  %v6380_v21 = vpop.f32.mrb[86].mxu0  ;;  %v6948_v49 = vunpack.c.l.bf16 %v8788_v48  ;;  %v7074_v9 = vsel %vm3265_vm4, %v7072_v54, %v7073_v28 }
 0x686   : > { %v6895_v35 = vadd.f32 %v12266_v61, %v6857_v60  ;;  %v6896_v38 = vadd.f32 %v12266_v61, %v6858_v45  ;;  %v6645_v23 = vpop.f32.mrb[99].mxu1  ;;  %v6381_v33 = vpop.f32.mrb[87].mxu0  ;;  %v6792_v7 = vrot.slane %v6651_v12, 2 }
 0x687   : > { %v6646_v25 = vadd.f32 %v6645_v23, %v6372_v27  ;;  %v6789_v37 = vrot.slane %v6643_v5, 2  ;;  %v7075_v26 = vrot.slane %v6948_v49, 2  ;;  %v13122_v5 = vld [vmem:[#allocation89_spill] sm:$0xff] }
 0x688   : > { %v7135_v46 = vadd.f32 %v7064_v41, %v6895_v35  ;;  %v7136_v17 = vadd.f32 %v7066_v63, %v6896_v38 }
 0x689   : > { %v6790_v8 = vrot.slane %v6646_v25, 2  ;;  %v7076_v21 = vsel %vm3265_vm4, %v7073_v28, %v7075_v26 }
 0x68a   : > { %7167 = vst [vmem:[%s9143_s14 + $0xd0] sm:$0xff] %v7135_v46  ;;  %7168 = vst [vmem:[%s9143_s14 + $0xd8] sm:$0xff] %v7136_v17 }
 0x68b   : > { %v6791_v52 = vsel %vm3265_vm4, %v6789_v37, %v6790_v8  ;;  %v6793_v62 = vsel %vm3265_vm4, %v6790_v8, %v6792_v7  ;;  %v8526_v30 = vpop.f32.mrb[100].mxu1  ;;  %v6384_v44 = vpop.f32.mrb[88].mxu0 }
 0x68c   : > { %v6859_v55 = vadd.f32 %v6791_v52, %v13119_v24  ;;  %v6860_v13 = vadd.f32 %v6793_v62, %v13120_v43  ;;  %v6657_v20 = vpop.f32.mrb[101].mxu1  ;;  %v6386_v19 = vpop.f32.mrb[89].mxu0 }
 0x68d   : > { %v6658_v15 = vadd.f32 %v6657_v20, %v6384_v44  ;;  %v8527_v27 = vpop.f32.mrb[102].mxu1  ;;  %v6387_v22 = vpop.f32.mrb[90].mxu0 }
 0x68e   : > { %v6897_v34 = vadd.f32 %v12266_v61, %v6859_v55  ;;  %v6898_v40 = vadd.f32 %v12266_v61, %v6860_v13  ;;  %v6660_v14 = vpop.f32.mrb[103].mxu1  ;;  %v6389_v0 = vpop.f32.mrb[91].mxu0 }
 0x68f   : > { %v6661_v2 = vadd.f32 %v6660_v14, %v6387_v22  ;;  %v6794_v31 = vrot.slane %v6658_v15, 2 }
 0x690   : > { %v7137_v6 = vadd.f32 %v7069_v11, %v6897_v34  ;;  %v7138_v57 = vadd.f32 %v7071_v42, %v6898_v40 }
 0x691   : > { %v6795_v59 = vrot.slane %v6661_v2, 2 }
 0x692   : > { %7169 = vst [vmem:[%s9143_s14 + $0xe0] sm:$0xff] %v7137_v6  ;;  %7170 = vst [vmem:[%s9143_s14 + $0xe8] sm:$0xff] %v7138_v57 }
 0x693   : > { %v6796_v53 = vsel %vm3265_vm4, %v6794_v31, %v6795_v59  ;;  %v6392_v56 = vpop.f32.mrb[92].mxu0 }
 0x694   : > { %v6861_v3 = vadd.f32 %v6796_v53, %v13121_v1  ;;  %v6666_v39 = vadd.f32 %v8526_v30, %v6392_v56  ;;  %v6394_v60 = vpop.f32.mrb[93].mxu0 }
 0x695   : > { %v6395_v45 = vpop.f32.mrb[94].mxu0 }
 0x696   : > { %v6899_v12 = vadd.f32 %v12266_v61, %v6861_v3  ;;  %v6797_v4 = vrot.slane %v6666_v39, 2  ;;  %v6396_v29 = vpop.f32.mrb[95].mxu0 }
 0x698   : > { %v7139_v41 = vadd.f32 %v7074_v9, %v6899_v12  ;;  %v6798_v63 = vsel %vm3265_vm4, %v6795_v59, %v6797_v4 }
 0x699   : > { %v6862_v36 = vadd.f32 %v6798_v63, %v13122_v5 }
 0x69a   : > { %7171 = vst [vmem:[%s9143_s14 + $0xf0] sm:$0xff] %v7139_v41 }
 0x69b   : > { %v6900_v47 = vadd.f32 %v12266_v61, %v6862_v36 }
 0x69d   : > { %v7140_v58 = vadd.f32 %v7076_v21, %v6900_v47 }
 0x69f   : > { %7172 = vst [vmem:[%s9143_s14 + $0xf8] sm:$0xff] %v7140_v58 }
 0x6a0   : > { %8882 = shalt.err (!%p8879_p2)
}
 0x6a1   : > { %s8883_s11 = scalar_lea.hbm %s12504_s8, 4096  ;;  %s8887_s9 = scalar_lea.hbm %s12562_s5, 8192 }
 0x6a2   : > { %p8884_p3 = scmp.ne.s32.totalorder %s12504_s8, %s8883_s11  ;;  %p8888_p7 = scmp.lt.u32.totalorder %s12504_s8, %s12562_s5 }
 0x6a3   : > { %p8889_p9 = scmp.lt.u32.totalorder %s8887_s9, %s8883_s11  ;;  %p8891_p0 = scmp.lt.u32.totalorder %s8883_s11, %s12504_s8 }
 0x6a4   : > { %p8885_p5 = pnand %p8884_p3, %p13123_p4 }
 0x6a5   : > { %p8890_p12 = por %p8889_p9, %p8888_p7 }
 0x6a6   : > { %p8886_p6 = pneg %p8885_p5 }
 0x6a7   : > { %p8892_p13 = por %p8891_p0, %p8890_p12 }
 0x6a9   : > { %p8893_p1 = pnand %p8892_p13, %p8886_p6 }
 0x6ab   : > { %8896 = shalt.err (!%p8893_p1)
}
 0x6ac   : > { %s8968_s16 = smov 128   ;;  %s8969_s17 = smov 8  }
 0x6ad   : > { %8536 = dma.vmem_to_hbm [thread:$0]  (%p13123_p4), %s12506_s24, 4096, %s12504_s8, %s12511_s21, %s8968_s16, %s8968_s16, %s8969_s17  }
 0x6ae PF: > { %p8553_p8 = scmp.ge.s32.totalorder %s8957_s23, 2  ;;  %s7205_s25 = sand.u32 1, %s8937_s18  }
 0x6af   : > { %p13124_p10 = scmp.ne.s32.totalorder %s12641_s30, 0  ;;  %s7206_s27 = scalar_lea.sflag [#allocation6], %s7205_s25 }
 0x6b1   : > { %p8546_p11 = pnand %p8553_p8, %p13124_p10 }
 0x6b3   : > { %8932 = dma.done.wait (!%p8546_p11), %s7206_s27, 4096  }
 0x6b4   : > { %8934 = vsyncadd (!%p8546_p11), %s7206_s27, 4294963200  ;;  %s20_s23 = sadd.s32 1, %s8957_s23   ;;  %s13125_s28 = sld [smem:[#allocation18_spill]] }
 0x6b5   : > { %p17_p2 = scmp.ge.s32.totalorder %s20_s23, 4   ;;  %s13126_s18 = smov %s8941_s19 }
 0x6b6   : > { %s13127_s19 = smov %s8945_s20  ;;  %s13128_s20 = smov %s9053_s6 }
 0x6b7   : > { %s13129_s21 = smov %s8953_s22  ;;  %19 = sbr.rel (!%p17_p2) target bundleno = 6 (0x6), region = 86 }
 0x6ba   : > { %s13130_s22 = smov %s13125_s28 }
 0x6be   :  { %7211 = vsyncpa [#allocation5], 1 }
 0x6bf   :  { %7213 = vsyncpa [#allocation5 + $0x1], 1 }
 0x6c0   :  { %7214 = vsyncpa [#allocation8], 1 }
 0x6c1   :  { %7215 = vsyncpa [#allocation6], 1 }
 0x6c2   :  { %7217 = vsyncpa [#allocation6 + $0x1], 1 }
 0x6c3   :  { %7218 = vsyncmov [#allocation3] }
 0x6c6   :  { %s7219_s30 = vpop.sfrf %7218 }
 0x6c7   :  { %p7769_p4 = scmp.ne.s32.totalorder %s7219_s30, 0 }
 0x6c9   :  { %7223 = shalt.err (%p7769_p4)  }

</bundles_post_ra>
